<compile_context>
chip_gen: v7x
topology: tpu7x:2x2x1
jax: 0.10.0
libtpu: 0.0.40
codegen_flags: <defaults>
</compile_context>

<pallas_src>
import functools

import jax
import jax.numpy as jnp
from jax.experimental import pallas as pl
from jax.experimental.pallas import tpu as pltpu

EPS = 1e-3

_CPARAMS = pltpu.CompilerParams(
    dimension_semantics=("parallel",),
    vmem_limit_bytes=32 * 1024 * 1024,
)


def _pick_tile_m(m, target=1024):
    """Largest multiple-of-8 divisor of m with tile <= target and m // tile >= 2.

    Guarantees at least 2 grid steps so both v7x TensorCores get work; falls back
    to a single full-M tile only when m cannot be split into multiple-of-8 tiles.
    """
    cap = min(target, m // 2)
    hi = (cap // 8) * 8
    for cand in range(hi, 7, -8):
        if m % cand == 0:
            return cand
    return m


# --------------------------------------------------------------------------- #
# In-kernel helpers
# --------------------------------------------------------------------------- #
def _fold_bn_stats(stats, gamma, beta, m):
    """(nt, 2, C) partial [sum, sumsq] -> per-channel (scale, shift), f32.

    Single-pass variance; eps=1e-3 covers tiny negative round-off. Runs on the
    EUP/VALU, which sit idle under the MXU in passes B/C.
    """
    s = jnp.sum(stats, axis=0)                   # (2, C)
    mu = s[0:1, :] * (1.0 / m)
    var = s[1:2, :] * (1.0 / m) - mu * mu        # biased (training-mode) variance
    scale = gamma * jax.lax.rsqrt(var + EPS)
    shift = beta - mu * scale
    return scale, shift


# --------------------------------------------------------------------------- #
# Kernels
# --------------------------------------------------------------------------- #
def _fc1_kernel(x_ref, w1_ref, h1_ref, stats_ref):
    """Pass A: h1_raw = x @ W1 (bf16 MXU, f32 acc) + BN1 per-tile partial stats."""
    y = jnp.dot(x_ref[...], w1_ref[...], preferred_element_type=jnp.float32)
    # fc1 bias omitted: a per-channel constant is exactly cancelled by training BN1.
    stats_ref[0, 0:1, :] = jnp.sum(y, axis=0, keepdims=True)
    stats_ref[0, 1:2, :] = jnp.sum(y * y, axis=0, keepdims=True)
    h1_ref[...] = y.astype(h1_ref.dtype)         # bf16 stream; stats taken from f32


def _bn1_fc2_kernel(h1raw_ref, stats1_ref, g1_ref, be1_ref, w2_ref,
                    h2_ref, stats2_ref, *, m):
    """Pass B: BN1 (folded from stats) + ReLU + fc2, plus BN2 partial stats."""
    scale, shift = _fold_bn_stats(stats1_ref[...], g1_ref[...], be1_ref[...], m)
    h1 = jnp.maximum(h1raw_ref[...].astype(jnp.float32) * scale + shift, 0.0)
    # fc2 bias omitted: exactly cancelled by training-mode BN2.
    h2 = jnp.dot(h1.astype(jnp.bfloat16), w2_ref[...],
                 preferred_element_type=jnp.float32)
    stats2_ref[0, 0:1, :] = jnp.sum(h2, axis=0, keepdims=True)
    stats2_ref[0, 1:2, :] = jnp.sum(h2 * h2, axis=0, keepdims=True)
    h2_ref[...] = h2.astype(h2_ref.dtype)


def _bn2_proj_residual_kernel(h2raw_ref, x_ref, wp_ref, bp_ref, stats2_ref,
                              g2_ref, be2_ref, o_ref, *, m):
    """Pass C: BN2 (folded) + projection matmul + residual add + ReLU."""
    scale, shift = _fold_bn_stats(stats2_ref[...], g2_ref[...], be2_ref[...], m)
    xp = jnp.dot(x_ref[...], wp_ref[...],
                 preferred_element_type=jnp.float32) + bp_ref[...]
    h2 = h2raw_ref[...].astype(jnp.float32) * scale + shift
    o_ref[...] = jnp.maximum(h2 + xp, 0.0).astype(o_ref.dtype)


# --------------------------------------------------------------------------- #
# Wrapper
# --------------------------------------------------------------------------- #
@jax.jit
def residual_block(x, params):
    """x: (B, N, in_dim) float32 -> (B, N, out_dim) float32."""
    B, N, Cin = x.shape
    Cout = params["w1"].shape[1]
    M = B * N
    TM = _pick_tile_m(M)
    nt = M // TM

    # bf16 MXU operands; f32 accumulation and f32 BN math inside the kernels.
    x2d = x.reshape(M, Cin).astype(jnp.bfloat16)
    w1 = params["w1"].astype(jnp.bfloat16)
    w2 = params["w2"].astype(jnp.bfloat16)
    wp = params["wp"].astype(jnp.bfloat16)

    def full(shape):
        return pl.BlockSpec(shape, lambda i: (0,) * len(shape))

    def row_tile(c):
        return pl.BlockSpec((TM, c), lambda i: (i, 0))

    stats_out_spec = pl.BlockSpec((1, 2, Cout), lambda i: (i, 0, 0))
    stats_in_spec = full((nt, 2, Cout))

    # ---- pass A: h1_raw = x @ W1; per-tile BN1 partial stats -----------------
    h1_raw, stats1 = pl.pallas_call(
        _fc1_kernel,
        grid=(nt,),
        in_specs=[row_tile(Cin), full((Cin, Cout))],
        out_specs=(row_tile(Cout), stats_out_spec),
        out_shape=(jax.ShapeDtypeStruct((M, Cout), jnp.bfloat16),
                   jax.ShapeDtypeStruct((nt, 2, Cout), jnp.float32)),
        compiler_params=_CPARAMS,
    )(x2d, w1)

    # ---- pass B: BN1 + ReLU + fc2; per-tile BN2 partial stats ----------------
    h2_raw, stats2 = pl.pallas_call(
        functools.partial(_bn1_fc2_kernel, m=M),
        grid=(nt,),
        in_specs=[row_tile(Cout), stats_in_spec, full((1, Cout)), full((1, Cout)),
                  full((Cout, Cout))],
        out_specs=(row_tile(Cout), stats_out_spec),
        out_shape=(jax.ShapeDtypeStruct((M, Cout), jnp.bfloat16),
                   jax.ShapeDtypeStruct((nt, 2, Cout), jnp.float32)),
        compiler_params=_CPARAMS,
    )(h1_raw, stats1, params["g1"], params["be1"], w2)

    # ---- pass C: BN2 + projection matmul + residual add + ReLU ---------------
    out2d = pl.pallas_call(
        functools.partial(_bn2_proj_residual_kernel, m=M),
        grid=(nt,),
        in_specs=[row_tile(Cout), row_tile(Cin), full((Cin, Cout)), full((1, Cout)),
                  stats_in_spec, full((1, Cout)), full((1, Cout))],
        out_specs=row_tile(Cout),
        out_shape=jax.ShapeDtypeStruct((M, Cout), jnp.float32),
        compiler_params=_CPARAMS,
    )(h2_raw, x2d, wp, params["bp"], stats2, params["g2"], params["be2"])

    return out2d.reshape(B, N, Cout)


# --------------------------------------------------------------------------- #
# Parameters / reference
# --------------------------------------------------------------------------- #
def init_params(key, in_dim, out_dim):
    """Deterministic synthetic parameters (PyTorch-Linear-like uniform init)."""
    k1, k2, k3, k4, k5, k6 = jax.random.split(key, 6)
    s1 = 1.0 / jnp.sqrt(in_dim)
    s2 = 1.0 / jnp.sqrt(out_dim)
    return {
        # fc1: Linear(in_dim, out_dim), stored as (in_dim, out_dim) = W^T
        "w1": jax.random.uniform(k1, (in_dim, out_dim), jnp.float32, -s1, s1),
        "b1": jax.random.uniform(k2, (1, out_dim), jnp.float32, -s1, s1),
        # bn1: default PyTorch init (gamma=1, beta=0)
        "g1": jnp.ones((1, out_dim), jnp.float32),
        "be1": jnp.zeros((1, out_dim), jnp.float32),
        # fc2: Linear(out_dim, out_dim)
        "w2": jax.random.uniform(k3, (out_dim, out_dim), jnp.float32, -s2, s2),
        "b2": jax.random.uniform(k4, (1, out_dim), jnp.float32, -s2, s2),
        "g2": jnp.ones((1, out_dim), jnp.float32),
        "be2": jnp.zeros((1, out_dim), jnp.float32),
        # projection: Linear(in_dim, out_dim) (present because in_dim != out_dim)
        "wp": jax.random.uniform(k5, (in_dim, out_dim), jnp.float32, -s1, s1),
        "bp": jax.random.uniform(k6, (1, out_dim), jnp.float32, -s1, s1),
    }


def _reference(x, p):
    """Pure-JAX f32 reference of the PyTorch forward (training-mode BN, with biases)."""
    B, N, Cin = x.shape
    x2d = x.reshape(B * N, Cin)

    def bn(h, g, b):
        mu = jnp.mean(h, axis=0, keepdims=True)
        var = jnp.mean((h - mu) ** 2, axis=0, keepdims=True)
        return (h - mu) / jnp.sqrt(var + EPS) * g + b

    h1 = jax.nn.relu(bn(x2d @ p["w1"] + p["b1"], p["g1"], p["be1"]))
    h2 = bn(h1 @ p["w2"] + p["b2"], p["g2"], p["be2"])
    xp = x2d @ p["wp"] + p["bp"]
    return jax.nn.relu(h2 + xp).reshape(B, N, -1)


if __name__ == "__main__":
    # Lane-dense small shapes (channels multiples of 128; in_dim != out_dim so the
    # projection path is exercised). M = B*N = 2048 -> TM = 1024, 2 grid tiles.
    B, N, in_dim, out_dim = 2, 1024, 128, 256
    key = jax.random.PRNGKey(0)
    kx, kp = jax.random.split(key)
    x = jax.random.normal(kx, (B, N, in_dim), dtype=jnp.float32)
    params = init_params(kp, in_dim, out_dim)

    out = residual_block(x, params)
    out = jax.block_until_ready(out)

    ref = _reference(x, params)
    assert out.shape == (B, N, out_dim)
    err = float(jnp.max(jnp.abs(out - ref)))
    # bf16 MXU operands + bf16 inter-pass streams vs. an f32 reference:
    # expected max-abs deviation is ~1e-2; 5e-2 gives comfortable margin.
    assert jnp.allclose(out, ref, atol=5e-2, rtol=5e-2), f"max abs err = {err}"

    print("KERNEL_OK")
</pallas_src>

<mosaic_0001>
module attributes {stable_mosaic.version = 11 : i64} {
  func.func @_fc1_kernel(%arg0: i32, %arg1: memref<1024x128xbf16, #tpu.memory_space<vmem>>, %arg2: memref<128x256xbf16, #tpu.memory_space<vmem>>, %arg3: memref<1024x256xbf16, #tpu.memory_space<vmem>>, %arg4: memref<1x2x256xf32, #tpu.memory_space<vmem>>) attributes {dimension_semantics = [#tpu.dimension_semantics<parallel>], iteration_bounds = array<i64: 2>, scalar_prefetch = 0 : i64, scratch_operands = 0 : i64, tpu.core_type = #tpu.core_type<tc>, window_params = [{transform_indices = @transform_0, window_bounds = array<i64: 1024, 128>}, {pipeline_mode = #tpu.pipeline_mode<synchronous>, transform_indices = @transform_1, window_bounds = array<i64: 128, 256>}, {transform_indices = @transform_2, window_bounds = array<i64: 1024, 256>}, {transform_indices = @transform_3, window_bounds = array<i64: 1, 2, 256>}]} {
    %c0 = arith.constant 0 : index
    %c0_0 = arith.constant 0 : index
    %0 = vector.load %arg1[%c0, %c0_0] : memref<1024x128xbf16, #tpu.memory_space<vmem>>, vector<1024x128xbf16>
    %c0_1 = arith.constant 0 : index
    %c0_2 = arith.constant 0 : index
    %1 = vector.load %arg2[%c0_1, %c0_2] : memref<128x256xbf16, #tpu.memory_space<vmem>>, vector<128x256xbf16>
    %cst = arith.constant dense<0.000000e+00> : vector<1024x256xf32>
    %2 = tpu.matmul %0, %1, %cst {dimension_numbers = #tpu.dot_dimension_numbers<[1], [0], [0], [1], [0, 0, 1, 1], [], []>} : vector<1024x128xbf16>, vector<128x256xbf16>, vector<1024x256xf32> -> vector<1024x256xf32>
    %cst_3 = arith.constant dense<0.000000e+00> : vector<256xf32>
    %3 = vector.multi_reduction <add>, %2, %cst_3 [0] : vector<1024x256xf32> to vector<256xf32>
    %4 = vector.shape_cast %3 : vector<256xf32> to vector<1x256xf32>
    %c0_4 = arith.constant 0 : index
    %c0_5 = arith.constant 0 : index
    %c0_6 = arith.constant 0 : index
    %5 = vector.load %arg4[%c0_4, %c0_5, %c0_6] : memref<1x2x256xf32, #tpu.memory_space<vmem>>, vector<1x1x256xf32>
    %6 = vector.shape_cast %5 : vector<1x1x256xf32> to vector<1x256xf32>
    %7 = vector.shape_cast %4 : vector<1x256xf32> to vector<1x1x256xf32>
    tpu.vector_store %arg4[%c0_4, %c0_5, %c0_6], %7 {strides = array<i32>} : memref<1x2x256xf32, #tpu.memory_space<vmem>>, vector<1x1x256xf32>,
    %8 = arith.mulf %2, %2 : vector<1024x256xf32>
    %cst_7 = arith.constant dense<0.000000e+00> : vector<256xf32>
    %9 = vector.multi_reduction <add>, %8, %cst_7 [0] : vector<1024x256xf32> to vector<256xf32>
    %10 = vector.shape_cast %9 : vector<256xf32> to vector<1x256xf32>
    %c0_8 = arith.constant 0 : index
    %c1 = arith.constant 1 : index
    %c0_9 = arith.constant 0 : index
    %11 = vector.load %arg4[%c0_8, %c1, %c0_9] : memref<1x2x256xf32, #tpu.memory_space<vmem>>, vector<1x1x256xf32>
    %12 = vector.shape_cast %11 : vector<1x1x256xf32> to vector<1x256xf32>
    %13 = vector.shape_cast %10 : vector<1x256xf32> to vector<1x1x256xf32>
    tpu.vector_store %arg4[%c0_8, %c1, %c0_9], %13 {strides = array<i32>} : memref<1x2x256xf32, #tpu.memory_space<vmem>>, vector<1x1x256xf32>,
    %14 = arith.truncf %2 : vector<1024x256xf32> to vector<1024x256xbf16>
    %c0_10 = arith.constant 0 : index
    %c0_11 = arith.constant 0 : index
    %15 = vector.load %arg3[%c0_10, %c0_11] : memref<1024x256xbf16, #tpu.memory_space<vmem>>, vector<1024x256xbf16>
    tpu.vector_store %arg3[%c0_10, %c0_11], %14 {strides = array<i32>} : memref<1024x256xbf16, #tpu.memory_space<vmem>>, vector<1024x256xbf16>,
    return
  }
  func.func @transform_0(%arg0: i32) -> (i32, i32) {
    %c0_i32 = arith.constant 0 : i32
    %c0_i32_0 = arith.constant 0 : i32
    return %arg0, %c0_i32 : i32, i32
  }
  func.func @transform_1(%arg0: i32) -> (i32, i32) {
    %c0_i32 = arith.constant 0 : i32
    %c0_i32_0 = arith.constant 0 : i32
    %c0_i32_1 = arith.constant 0 : i32
    return %c0_i32, %c0_i32_0 : i32, i32
  }
  func.func @transform_2(%arg0: i32) -> (i32, i32) {
    %c0_i32 = arith.constant 0 : i32
    %c0_i32_0 = arith.constant 0 : i32
    return %arg0, %c0_i32 : i32, i32
  }
  func.func @transform_3(%arg0: i32) -> (i32, i32, i32) {
    %c0_i32 = arith.constant 0 : i32
    %c0_i32_0 = arith.constant 0 : i32
    %c0_i32_1 = arith.constant 0 : i32
    return %arg0, %c0_i32, %c0_i32_0 : i32, i32, i32
  }
}

module attributes {stable_mosaic.version = 11 : i64} {
  func.func @_bn1_fc2_kernel(%arg0: i32, %arg1: memref<1024x256xbf16, #tpu.memory_space<vmem>>, %arg2: memref<2x2x256xf32, #tpu.memory_space<vmem>>, %arg3: memref<1x256xf32, #tpu.memory_space<vmem>>, %arg4: memref<1x256xf32, #tpu.memory_space<vmem>>, %arg5: memref<256x256xbf16, #tpu.memory_space<vmem>>, %arg6: memref<1024x256xbf16, #tpu.memory_space<vmem>>, %arg7: memref<1x2x256xf32, #tpu.memory_space<vmem>>) attributes {dimension_semantics = [#tpu.dimension_semantics<parallel>], iteration_bounds = array<i64: 2>, scalar_prefetch = 0 : i64, scratch_operands = 0 : i64, tpu.core_type = #tpu.core_type<tc>, window_params = [{transform_indices = @transform_0, window_bounds = array<i64: 1024, 256>}, {pipeline_mode = #tpu.pipeline_mode<synchronous>, transform_indices = @transform_1, window_bounds = array<i64: 2, 2, 256>}, {pipeline_mode = #tpu.pipeline_mode<synchronous>, transform_indices = @transform_2, window_bounds = array<i64: 1, 256>}, {pipeline_mode = #tpu.pipeline_mode<synchronous>, transform_indices = @transform_3, window_bounds = array<i64: 1, 256>}, {pipeline_mode = #tpu.pipeline_mode<synchronous>, transform_indices = @transform_4, window_bounds = array<i64: 256, 256>}, {transform_indices = @transform_5, window_bounds = array<i64: 1024, 256>}, {transform_indices = @transform_6, window_bounds = array<i64: 1, 2, 256>}]} {
    %c0 = arith.constant 0 : index
    %c0_0 = arith.constant 0 : index
    %c0_1 = arith.constant 0 : index
    %0 = vector.load %arg2[%c0, %c0_0, %c0_1] : memref<2x2x256xf32, #tpu.memory_space<vmem>>, vector<2x2x256xf32>
    %c0_2 = arith.constant 0 : index
    %c0_3 = arith.constant 0 : index
    %1 = vector.load %arg3[%c0_2, %c0_3] : memref<1x256xf32, #tpu.memory_space<vmem>>, vector<1x256xf32>
    %c0_4 = arith.constant 0 : index
    %c0_5 = arith.constant 0 : index
    %2 = vector.load %arg4[%c0_4, %c0_5] : memref<1x256xf32, #tpu.memory_space<vmem>>, vector<1x256xf32>
    %cst = arith.constant dense<0.000000e+00> : vector<2x256xf32>
    %3 = vector.multi_reduction <add>, %0, %cst [0] : vector<2x2x256xf32> to vector<2x256xf32>
    %4 = vector.extract_strided_slice %3 {offsets = [0, 0], sizes = [1, 256], strides = [1, 1]} : vector<2x256xf32> to vector<1x256xf32>
    %cst_6 = arith.constant 4.8828125E-4 : f32
    %5 = vector.broadcast %cst_6 : f32 to vector<1x256xf32>
    %6 = arith.mulf %4, %5 : vector<1x256xf32>
    %7 = vector.extract_strided_slice %3 {offsets = [1, 0], sizes = [1, 256], strides = [1, 1]} : vector<2x256xf32> to vector<1x256xf32>
    %cst_7 = arith.constant 4.8828125E-4 : f32
    %8 = vector.broadcast %cst_7 : f32 to vector<1x256xf32>
    %9 = arith.mulf %7, %8 : vector<1x256xf32>
    %10 = arith.mulf %6, %6 : vector<1x256xf32>
    %11 = arith.subf %9, %10 : vector<1x256xf32>
    %cst_8 = arith.constant 1.000000e-03 : f32
    %12 = vector.broadcast %cst_8 : f32 to vector<1x256xf32>
    %13 = arith.addf %11, %12 : vector<1x256xf32>
    %14 = math.rsqrt %13 : vector<1x256xf32>
    %15 = arith.mulf %1, %14 : vector<1x256xf32>
    %16 = arith.mulf %6, %15 : vector<1x256xf32>
    %17 = arith.subf %2, %16 : vector<1x256xf32>
    %c0_9 = arith.constant 0 : index
    %c0_10 = arith.constant 0 : index
    %18 = vector.load %arg1[%c0_9, %c0_10] : memref<1024x256xbf16, #tpu.memory_space<vmem>>, vector<1024x256xbf16>
    %19 = arith.extf %18 : vector<1024x256xbf16> to vector<1024x256xf32>
    %20 = vector.broadcast %15 : vector<1x256xf32> to vector<1024x256xf32>
    %21 = arith.mulf %19, %20 : vector<1024x256xf32>
    %22 = vector.broadcast %17 : vector<1x256xf32> to vector<1024x256xf32>
    %23 = arith.addf %21, %22 : vector<1024x256xf32>
    %cst_11 = arith.constant 0.000000e+00 : f32
    %24 = vector.broadcast %cst_11 : f32 to vector<1024x256xf32>
    %25 = arith.maximumf %23, %24 : vector<1024x256xf32>
    %26 = arith.truncf %25 : vector<1024x256xf32> to vector<1024x256xbf16>
    %c0_12 = arith.constant 0 : index
    %c0_13 = arith.constant 0 : index
    %27 = vector.load %arg5[%c0_12, %c0_13] : memref<256x256xbf16, #tpu.memory_space<vmem>>, vector<256x256xbf16>
    %cst_14 = arith.constant dense<0.000000e+00> : vector<1024x256xf32>
    %28 = tpu.matmul %26, %27, %cst_14 {dimension_numbers = #tpu.dot_dimension_numbers<[1], [0], [0], [1], [0, 0, 1, 1], [], []>} : vector<1024x256xbf16>, vector<256x256xbf16>, vector<1024x256xf32> -> vector<1024x256xf32>
    %cst_15 = arith.constant dense<0.000000e+00> : vector<256xf32>
    %29 = vector.multi_reduction <add>, %28, %cst_15 [0] : vector<1024x256xf32> to vector<256xf32>
    %30 = vector.shape_cast %29 : vector<256xf32> to vector<1x256xf32>
    %c0_16 = arith.constant 0 : index
    %c0_17 = arith.constant 0 : index
    %c0_18 = arith.constant 0 : index
    %31 = vector.load %arg7[%c0_16, %c0_17, %c0_18] : memref<1x2x256xf32, #tpu.memory_space<vmem>>, vector<1x1x256xf32>
    %32 = vector.shape_cast %31 : vector<1x1x256xf32> to vector<1x256xf32>
    %33 = vector.shape_cast %30 : vector<1x256xf32> to vector<1x1x256xf32>
    tpu.vector_store %arg7[%c0_16, %c0_17, %c0_18], %33 {strides = array<i32>} : memref<1x2x256xf32, #tpu.memory_space<vmem>>, vector<1x1x256xf32>,
    %34 = arith.mulf %28, %28 : vector<1024x256xf32>
    %cst_19 = arith.constant dense<0.000000e+00> : vector<256xf32>
    %35 = vector.multi_reduction <add>, %34, %cst_19 [0] : vector<1024x256xf32> to vector<256xf32>
    %36 = vector.shape_cast %35 : vector<256xf32> to vector<1x256xf32>
    %c0_20 = arith.constant 0 : index
    %c1 = arith.constant 1 : index
    %c0_21 = arith.constant 0 : index
    %37 = vector.load %arg7[%c0_20, %c1, %c0_21] : memref<1x2x256xf32, #tpu.memory_space<vmem>>, vector<1x1x256xf32>
    %38 = vector.shape_cast %37 : vector<1x1x256xf32> to vector<1x256xf32>
    %39 = vector.shape_cast %36 : vector<1x256xf32> to vector<1x1x256xf32>
    tpu.vector_store %arg7[%c0_20, %c1, %c0_21], %39 {strides = array<i32>} : memref<1x2x256xf32, #tpu.memory_space<vmem>>, vector<1x1x256xf32>,
    %40 = arith.truncf %28 : vector<1024x256xf32> to vector<1024x256xbf16>
    %c0_22 = arith.constant 0 : index
    %c0_23 = arith.constant 0 : index
    %41 = vector.load %arg6[%c0_22, %c0_23] : memref<1024x256xbf16, #tpu.memory_space<vmem>>, vector<1024x256xbf16>
    tpu.vector_store %arg6[%c0_22, %c0_23], %40 {strides = array<i32>} : memref<1024x256xbf16, #tpu.memory_space<vmem>>, vector<1024x256xbf16>,
    return
  }
  func.func @transform_0(%arg0: i32) -> (i32, i32) {
    %c0_i32 = arith.constant 0 : i32
    %c0_i32_0 = arith.constant 0 : i32
    return %arg0, %c0_i32 : i32, i32
  }
  func.func @transform_1(%arg0: i32) -> (i32, i32, i32) {
    %c0_i32 = arith.constant 0 : i32
    %c0_i32_0 = arith.constant 0 : i32
    %c0_i32_1 = arith.constant 0 : i32
    %c0_i32_2 = arith.constant 0 : i32
    return %c0_i32, %c0_i32_0, %c0_i32_1 : i32, i32, i32
  }
  func.func @transform_2(%arg0: i32) -> (i32, i32) {
    %c0_i32 = arith.constant 0 : i32
    %c0_i32_0 = arith.constant 0 : i32
    %c0_i32_1 = arith.constant 0 : i32
    return %c0_i32, %c0_i32_0 : i32, i32
  }
  func.func @transform_3(%arg0: i32) -> (i32, i32) {
    %c0_i32 = arith.constant 0 : i32
    %c0_i32_0 = arith.constant 0 : i32
    %c0_i32_1 = arith.constant 0 : i32
    return %c0_i32, %c0_i32_0 : i32, i32
  }
  func.func @transform_4(%arg0: i32) -> (i32, i32) {
    %c0_i32 = arith.constant 0 : i32
    %c0_i32_0 = arith.constant 0 : i32
    %c0_i32_1 = arith.constant 0 : i32
    return %c0_i32, %c0_i32_0 : i32, i32
  }
  func.func @transform_5(%arg0: i32) -> (i32, i32) {
    %c0_i32 = arith.constant 0 : i32
    %c0_i32_0 = arith.constant 0 : i32
    return %arg0, %c0_i32 : i32, i32
  }
  func.func @transform_6(%arg0: i32) -> (i32, i32, i32) {
    %c0_i32 = arith.constant 0 : i32
    %c0_i32_0 = arith.constant 0 : i32
    %c0_i32_1 = arith.constant 0 : i32
    return %arg0, %c0_i32, %c0_i32_0 : i32, i32, i32
  }
}

module attributes {stable_mosaic.version = 11 : i64} {
  func.func @_bn2_proj_residual_kernel(%arg0: i32, %arg1: memref<1024x256xbf16, #tpu.memory_space<vmem>>, %arg2: memref<1024x128xbf16, #tpu.memory_space<vmem>>, %arg3: memref<128x256xbf16, #tpu.memory_space<vmem>>, %arg4: memref<1x256xf32, #tpu.memory_space<vmem>>, %arg5: memref<2x2x256xf32, #tpu.memory_space<vmem>>, %arg6: memref<1x256xf32, #tpu.memory_space<vmem>>, %arg7: memref<1x256xf32, #tpu.memory_space<vmem>>, %arg8: memref<1024x256xf32, #tpu.memory_space<vmem>>) attributes {dimension_semantics = [#tpu.dimension_semantics<parallel>], iteration_bounds = array<i64: 2>, scalar_prefetch = 0 : i64, scratch_operands = 0 : i64, tpu.core_type = #tpu.core_type<tc>, window_params = [{transform_indices = @transform_0, window_bounds = array<i64: 1024, 256>}, {transform_indices = @transform_1, window_bounds = array<i64: 1024, 128>}, {pipeline_mode = #tpu.pipeline_mode<synchronous>, transform_indices = @transform_2, window_bounds = array<i64: 128, 256>}, {pipeline_mode = #tpu.pipeline_mode<synchronous>, transform_indices = @transform_3, window_bounds = array<i64: 1, 256>}, {pipeline_mode = #tpu.pipeline_mode<synchronous>, transform_indices = @transform_4, window_bounds = array<i64: 2, 2, 256>}, {pipeline_mode = #tpu.pipeline_mode<synchronous>, transform_indices = @transform_5, window_bounds = array<i64: 1, 256>}, {pipeline_mode = #tpu.pipeline_mode<synchronous>, transform_indices = @transform_6, window_bounds = array<i64: 1, 256>}, {transform_indices = @transform_7, window_bounds = array<i64: 1024, 256>}]} {
    %c0 = arith.constant 0 : index
    %c0_0 = arith.constant 0 : index
    %c0_1 = arith.constant 0 : index
    %0 = vector.load %arg5[%c0, %c0_0, %c0_1] : memref<2x2x256xf32, #tpu.memory_space<vmem>>, vector<2x2x256xf32>
    %c0_2 = arith.constant 0 : index
    %c0_3 = arith.constant 0 : index
    %1 = vector.load %arg6[%c0_2, %c0_3] : memref<1x256xf32, #tpu.memory_space<vmem>>, vector<1x256xf32>
    %c0_4 = arith.constant 0 : index
    %c0_5 = arith.constant 0 : index
    %2 = vector.load %arg7[%c0_4, %c0_5] : memref<1x256xf32, #tpu.memory_space<vmem>>, vector<1x256xf32>
    %cst = arith.constant dense<0.000000e+00> : vector<2x256xf32>
    %3 = vector.multi_reduction <add>, %0, %cst [0] : vector<2x2x256xf32> to vector<2x256xf32>
    %4 = vector.extract_strided_slice %3 {offsets = [0, 0], sizes = [1, 256], strides = [1, 1]} : vector<2x256xf32> to vector<1x256xf32>
    %cst_6 = arith.constant 4.8828125E-4 : f32
    %5 = vector.broadcast %cst_6 : f32 to vector<1x256xf32>
    %6 = arith.mulf %4, %5 : vector<1x256xf32>
    %7 = vector.extract_strided_slice %3 {offsets = [1, 0], sizes = [1, 256], strides = [1, 1]} : vector<2x256xf32> to vector<1x256xf32>
    %cst_7 = arith.constant 4.8828125E-4 : f32
    %8 = vector.broadcast %cst_7 : f32 to vector<1x256xf32>
    %9 = arith.mulf %7, %8 : vector<1x256xf32>
    %10 = arith.mulf %6, %6 : vector<1x256xf32>
    %11 = arith.subf %9, %10 : vector<1x256xf32>
    %cst_8 = arith.constant 1.000000e-03 : f32
    %12 = vector.broadcast %cst_8 : f32 to vector<1x256xf32>
    %13 = arith.addf %11, %12 : vector<1x256xf32>
    %14 = math.rsqrt %13 : vector<1x256xf32>
    %15 = arith.mulf %1, %14 : vector<1x256xf32>
    %16 = arith.mulf %6, %15 : vector<1x256xf32>
    %17 = arith.subf %2, %16 : vector<1x256xf32>
    %c0_9 = arith.constant 0 : index
    %c0_10 = arith.constant 0 : index
    %18 = vector.load %arg2[%c0_9, %c0_10] : memref<1024x128xbf16, #tpu.memory_space<vmem>>, vector<1024x128xbf16>
    %c0_11 = arith.constant 0 : index
    %c0_12 = arith.constant 0 : index
    %19 = vector.load %arg3[%c0_11, %c0_12] : memref<128x256xbf16, #tpu.memory_space<vmem>>, vector<128x256xbf16>
    %cst_13 = arith.constant dense<0.000000e+00> : vector<1024x256xf32>
    %20 = tpu.matmul %18, %19, %cst_13 {dimension_numbers = #tpu.dot_dimension_numbers<[1], [0], [0], [1], [0, 0, 1, 1], [], []>} : vector<1024x128xbf16>, vector<128x256xbf16>, vector<1024x256xf32> -> vector<1024x256xf32>
    %c0_14 = arith.constant 0 : index
    %c0_15 = arith.constant 0 : index
    %21 = vector.load %arg4[%c0_14, %c0_15] : memref<1x256xf32, #tpu.memory_space<vmem>>, vector<1x256xf32>
    %22 = vector.broadcast %21 : vector<1x256xf32> to vector<1024x256xf32>
    %23 = arith.addf %20, %22 : vector<1024x256xf32>
    %c0_16 = arith.constant 0 : index
    %c0_17 = arith.constant 0 : index
    %24 = vector.load %arg1[%c0_16, %c0_17] : memref<1024x256xbf16, #tpu.memory_space<vmem>>, vector<1024x256xbf16>
    %25 = arith.extf %24 : vector<1024x256xbf16> to vector<1024x256xf32>
    %26 = vector.broadcast %15 : vector<1x256xf32> to vector<1024x256xf32>
    %27 = arith.mulf %25, %26 : vector<1024x256xf32>
    %28 = vector.broadcast %17 : vector<1x256xf32> to vector<1024x256xf32>
    %29 = arith.addf %27, %28 : vector<1024x256xf32>
    %30 = arith.addf %29, %23 : vector<1024x256xf32>
    %cst_18 = arith.constant 0.000000e+00 : f32
    %31 = vector.broadcast %cst_18 : f32 to vector<1024x256xf32>
    %32 = arith.maximumf %30, %31 : vector<1024x256xf32>
    %c0_19 = arith.constant 0 : index
    %c0_20 = arith.constant 0 : index
    %33 = vector.load %arg8[%c0_19, %c0_20] : memref<1024x256xf32, #tpu.memory_space<vmem>>, vector<1024x256xf32>
    tpu.vector_store %arg8[%c0_19, %c0_20], %32 {strides = array<i32>} : memref<1024x256xf32, #tpu.memory_space<vmem>>, vector<1024x256xf32>,
    return
  }
  func.func @transform_0(%arg0: i32) -> (i32, i32) {
    %c0_i32 = arith.constant 0 : i32
    %c0_i32_0 = arith.constant 0 : i32
    return %arg0, %c0_i32 : i32, i32
  }
  func.func @transform_1(%arg0: i32) -> (i32, i32) {
    %c0_i32 = arith.constant 0 : i32
    %c0_i32_0 = arith.constant 0 : i32
    return %arg0, %c0_i32 : i32, i32
  }
  func.func @transform_2(%arg0: i32) -> (i32, i32) {
    %c0_i32 = arith.constant 0 : i32
    %c0_i32_0 = arith.constant 0 : i32
    %c0_i32_1 = arith.constant 0 : i32
    return %c0_i32, %c0_i32_0 : i32, i32
  }
  func.func @transform_3(%arg0: i32) -> (i32, i32) {
    %c0_i32 = arith.constant 0 : i32
    %c0_i32_0 = arith.constant 0 : i32
    %c0_i32_1 = arith.constant 0 : i32
    return %c0_i32, %c0_i32_0 : i32, i32
  }
  func.func @transform_4(%arg0: i32) -> (i32, i32, i32) {
    %c0_i32 = arith.constant 0 : i32
    %c0_i32_0 = arith.constant 0 : i32
    %c0_i32_1 = arith.constant 0 : i32
    %c0_i32_2 = arith.constant 0 : i32
    return %c0_i32, %c0_i32_0, %c0_i32_1 : i32, i32, i32
  }
  func.func @transform_5(%arg0: i32) -> (i32, i32) {
    %c0_i32 = arith.constant 0 : i32
    %c0_i32_0 = arith.constant 0 : i32
    %c0_i32_1 = arith.constant 0 : i32
    return %c0_i32, %c0_i32_0 : i32, i32
  }
  func.func @transform_6(%arg0: i32) -> (i32, i32) {
    %c0_i32 = arith.constant 0 : i32
    %c0_i32_0 = arith.constant 0 : i32
    %c0_i32_1 = arith.constant 0 : i32
    return %c0_i32, %c0_i32_0 : i32, i32
  }
  func.func @transform_7(%arg0: i32) -> (i32, i32) {
    %c0_i32 = arith.constant 0 : i32
    %c0_i32_0 = arith.constant 0 : i32
    return %arg0, %c0_i32 : i32, i32
  }
}

</mosaic_0001>

<bundles_post_ra>
// kernel: residual_block.3
= control target key start
LH: loop header
LB: loop body
LE: loop exit
PB: predicated region body
PF: predicated region fallthrough
CT: control target
= control target key end

     0   :  { %s3786_s12 = smov 0   ;;  %s4891_s0 = inlined_call_operand.vmem [shape: bf16[2048,128], index: 0, kind: input, shape index: {}]   ;;  %s4892_s1 = inlined_call_operand.vmem [shape: bf16[128,256], index: 1, kind: input, shape index: {}]   ;;  %s4893_s2 = inlined_call_operand.vmem [shape: bf16[2048,256], index: 2, kind: output, shape index: {0}]   ;;  %s4894_s3 = inlined_call_operand.vmem [shape: f32[2,2,256], index: 3, kind: output, shape index: {1}]  }
   0x1 LB: > { %s3792_s13 = sadd.s32 4294967295, %s3762_s12   ;;  %p3293_p0 = scmp.ge.s32.totalorder %s3762_s12, 1  ;;  %s3762_s12 = sphi %s3786_s12, %s14_s12  }
   0x2   : > { %p141_p1 = scmp.lt.s32.totalorder %s3762_s12, 3 }
   0x4   : > { %p142_p2 = pnand %p3293_p0, %p141_p1 }
   0x6   : > { %145 = sbr.rel (%p142_p2) target bundleno = 661 (0x295), region = 28 }
   0xd   : > { %v3668_v0 = vld [vmem:[%s4892_s1 + $0x4] ss:$8 sps:$4 sm:$0xff]   ;;  %s3294_s16 = sshll.u32 %s3792_s13, 7  ;;  %v3670_v1 = vld [vmem:[%s4892_s1] ss:$8 sps:$4 sm:$0xff]   ;;  %v3764_v2 = vmov 0  }
   0xe   : > { %830 = vmatprep.mubr.bf16.mxu0 %v3764_v2  ;;  %p172_p3 = scmp.lt.s32.totalorder %s3294_s16, 255  ;;  %1150 = vmatprep.mubr.bf16.mxu1 %v3764_v2  ;;  %v3671_v3 = vld [vmem:[%s4892_s1 + $0x14] ss:$8 sps:$4 sm:$0xff]   ;;  %v3673_v4 = vld [vmem:[%s4892_s1 + $0x10] ss:$8 sps:$4 sm:$0xff]   ;;  %p184_p4 = scmp.lt.s32.totalorder %s3792_s13, 1 }
   0xf   : > { %798 = vmatprep.subr.bf16.mxu0 %v3668_v0  ;;  %3642 = vmatprep.subr.bf16.mxu1 %v3668_v0  ;;  %v3674_v5 = vld [vmem:[%s4892_s1 + $0x24] ss:$8 sps:$4 sm:$0xff]   ;;  %v3676_v6 = vld [vmem:[%s4892_s1 + $0x20] ss:$8 sps:$4 sm:$0xff]   ;;  %v3677_v7 = vld [vmem:[%s4892_s1 + $0x34] ss:$8 sps:$4 sm:$0xff]  }
  0x10   : > { %799 = vmatpush1.bf16.msra.mxu0 %v3670_v1  ;;  %s5228_s16 = smov (!%p172_p3, %s3294_s16), 255  ;;  %3650 = vmatpush1.bf16.msra.mxu1 %v3670_v1  ;;  %v3679_v8 = vld [vmem:[%s4892_s1 + $0x30] ss:$8 sps:$4 sm:$0xff]   ;;  %v3680_v9 = vld [vmem:[%s4892_s1 + $0x44] ss:$8 sps:$4 sm:$0xff]   ;;  %s5230_s13 = smov (!%p184_p4, %s3792_s13), 1 }
  0x11   : > { %800 = vmatprep.subr.bf16.mxu0 %v3671_v3  ;;  %3643 = vmatprep.subr.bf16.mxu1 %v3671_v3  ;;  %s3295_s25 = sshll.u32 %s5228_s16, 2  ;;  %v3682_v10 = vld [vmem:[%s4892_s1 + $0x40] ss:$8 sps:$4 sm:$0xff]   ;;  %v3683_v11 = vld [vmem:[%s4892_s1 + $0x54] ss:$8 sps:$4 sm:$0xff]   ;;  %s3512_s27 = sshll.u32 %s5228_s16, 3 }
  0x12   : > { %s3826_s5 = scalar_lea.vmem %s4891_s0, %s3295_s25  ;;  %v3685_v12 = vld [vmem:[%s4892_s1 + $0x50] ss:$8 sps:$4 sm:$0xff]   ;;  %v3686_v13 = vld [vmem:[%s4892_s1 + $0x64] ss:$8 sps:$4 sm:$0xff]   ;;  %v3688_v14 = vld [vmem:[%s4892_s1 + $0x60] ss:$8 sps:$4 sm:$0xff]   ;;  %s3969_s30 = scalar_lea.vmem %s4893_s2, %s3512_s27 }
  0x13   : > { %v3689_v15 = vld [vmem:[%s4892_s1 + $0x74] ss:$8 sps:$4 sm:$0xff]   ;;  %v3691_v16 = vld [vmem:[%s4892_s1 + $0x70] ss:$8 sps:$4 sm:$0xff]   ;;  %v3692_v17 = vld [vmem:[%s3826_s5] sm:$0xff]   ;;  %s3513_s16 = sshll.u32 %s5230_s13, 2 }
  0x14   : > { %801 = vmatpush1.bf16.msra.mxu0 %v3673_v4  ;;  %3651 = vmatpush1.bf16.msra.mxu1 %v3673_v4  ;;  %v3708_v18 = vld [vmem:[%s3826_s5 + $0x100] sm:$0xff]   ;;  %v3693_v19 = vld [vmem:[%s3826_s5 + $0x8] sm:$0xff]   ;;  %v3694_v21 = vld [vmem:[%s3826_s5 + $0x10] sm:$0xff]   ;;  %s188_s6 = scalar_lea.vmem %s4894_s3, %s3513_s16 }
  0x15   : > { %802 = vmatprep.subr.bf16.mxu0 %v3674_v5  ;;  %3644 = vmatprep.subr.bf16.mxu1 %v3674_v5  ;;  %v3710_v20 = vld [vmem:[%s3826_s5 + $0x108] sm:$0xff]   ;;  %v3712_v22 = vld [vmem:[%s3826_s5 + $0x110] sm:$0xff]   ;;  %v3695_v23 = vld [vmem:[%s3826_s5 + $0x18] sm:$0xff]  }
  0x16   : > { %v3714_v24 = vld [vmem:[%s3826_s5 + $0x118] sm:$0xff]   ;;  %v3696_v25 = vld [vmem:[%s3826_s5 + $0x20] sm:$0xff]   ;;  %v3697_v27 = vld [vmem:[%s3826_s5 + $0x28] sm:$0xff]  }
  0x17   : > { %v3716_v26 = vld [vmem:[%s3826_s5 + $0x120] sm:$0xff]   ;;  %v3718_v28 = vld [vmem:[%s3826_s5 + $0x128] sm:$0xff]   ;;  %v3698_v29 = vld [vmem:[%s3826_s5 + $0x30] sm:$0xff]  }
  0x18   : > { %803 = vmatpush1.bf16.msra.mxu0 %v3676_v6  ;;  %3652 = vmatpush1.bf16.msra.mxu1 %v3676_v6  ;;  %v3720_v30 = vld [vmem:[%s3826_s5 + $0x130] sm:$0xff]   ;;  %v3699_v31 = vld [vmem:[%s3826_s5 + $0x38] sm:$0xff]   ;;  %v3700_v33 = vld [vmem:[%s3826_s5 + $0x40] sm:$0xff]  }
  0x19   : > { %804 = vmatprep.subr.bf16.mxu0 %v3677_v7  ;;  %3645 = vmatprep.subr.bf16.mxu1 %v3677_v7  ;;  %v3722_v32 = vld [vmem:[%s3826_s5 + $0x138] sm:$0xff]   ;;  %v3724_v34 = vld [vmem:[%s3826_s5 + $0x140] sm:$0xff]   ;;  %v3701_v35 = vld [vmem:[%s3826_s5 + $0x48] sm:$0xff]  }
  0x1a   : > { %v3726_v36 = vld [vmem:[%s3826_s5 + $0x148] sm:$0xff]   ;;  %v3702_v37 = vld [vmem:[%s3826_s5 + $0x50] sm:$0xff]   ;;  %v3703_v39 = vld [vmem:[%s3826_s5 + $0x58] sm:$0xff]  }
  0x1b   : > { %v3728_v38 = vld [vmem:[%s3826_s5 + $0x150] sm:$0xff]   ;;  %v3730_v40 = vld [vmem:[%s3826_s5 + $0x158] sm:$0xff]   ;;  %v3704_v41 = vld [vmem:[%s3826_s5 + $0x60] sm:$0xff]  }
  0x1c   : > { %805 = vmatpush1.bf16.msra.mxu0 %v3679_v8  ;;  %3653 = vmatpush1.bf16.msra.mxu1 %v3679_v8  ;;  %v3732_v42 = vld [vmem:[%s3826_s5 + $0x160] sm:$0xff]   ;;  %v3705_v43 = vld [vmem:[%s3826_s5 + $0x68] sm:$0xff]   ;;  %v3706_v45 = vld [vmem:[%s3826_s5 + $0x70] sm:$0xff]  }
  0x1d   : > { %806 = vmatprep.subr.bf16.mxu0 %v3680_v9  ;;  %3646 = vmatprep.subr.bf16.mxu1 %v3680_v9  ;;  %v3734_v44 = vld [vmem:[%s3826_s5 + $0x168] sm:$0xff]   ;;  %v3736_v46 = vld [vmem:[%s3826_s5 + $0x170] sm:$0xff]   ;;  %v3707_v47 = vld [vmem:[%s3826_s5 + $0x78] sm:$0xff]  }
  0x1e   : > { %v3738_v48 = vld [vmem:[%s3826_s5 + $0x178] sm:$0xff]   ;;  %v3709_v49 = vld [vmem:[%s3826_s5 + $0x80] sm:$0xff]   ;;  %v3711_v51 = vld [vmem:[%s3826_s5 + $0x88] sm:$0xff]  }
  0x1f   : > { %v3740_v50 = vld [vmem:[%s3826_s5 + $0x180] sm:$0xff]   ;;  %v3741_v52 = vld [vmem:[%s3826_s5 + $0x188] sm:$0xff]   ;;  %v3713_v53 = vld [vmem:[%s3826_s5 + $0x90] sm:$0xff]  }
  0x20   : > { %807 = vmatpush1.bf16.msra.mxu0 %v3682_v10  ;;  %3654 = vmatpush1.bf16.msra.mxu1 %v3682_v10  ;;  %v3742_v54 = vld [vmem:[%s3826_s5 + $0x190] sm:$0xff]   ;;  %v3715_v55 = vld [vmem:[%s3826_s5 + $0x98] sm:$0xff]   ;;  %v3717_v57 = vld [vmem:[%s3826_s5 + $0xa0] sm:$0xff]  }
  0x21   : > { %808 = vmatprep.subr.bf16.mxu0 %v3683_v11  ;;  %3647 = vmatprep.subr.bf16.mxu1 %v3683_v11  ;;  %v3743_v56 = vld [vmem:[%s3826_s5 + $0x198] sm:$0xff]   ;;  %v3744_v58 = vld [vmem:[%s3826_s5 + $0x1a0] sm:$0xff]   ;;  %v3719_v59 = vld [vmem:[%s3826_s5 + $0xa8] sm:$0xff]  }
  0x22   : > { %v3745_v60 = vld [vmem:[%s3826_s5 + $0x1a8] sm:$0xff]   ;;  %v3721_v61 = vld [vmem:[%s3826_s5 + $0xb0] sm:$0xff]   ;;  %v3723_v63 = vld [vmem:[%s3826_s5 + $0xb8] sm:$0xff]  }
  0x23   : > { %v3746_v62 = vld [vmem:[%s3826_s5 + $0x1b0] sm:$0xff]   ;;  %v3747_v0 = vld [vmem:[%s3826_s5 + $0x1b8] sm:$0xff]   ;;  %v3725_v1 = vld [vmem:[%s3826_s5 + $0xc0] sm:$0xff]  }
  0x24   : > { %809 = vmatpush1.bf16.msra.mxu0 %v3685_v12  ;;  %3655 = vmatpush1.bf16.msra.mxu1 %v3685_v12  ;;  %v3748_v3 = vld [vmem:[%s3826_s5 + $0x1c0] sm:$0xff]   ;;  %v3727_v4 = vld [vmem:[%s3826_s5 + $0xc8] sm:$0xff]   ;;  %v3729_v6 = vld [vmem:[%s3826_s5 + $0xd0] sm:$0xff]  }
  0x25   : > { %810 = vmatprep.subr.bf16.mxu0 %v3686_v13  ;;  %3648 = vmatprep.subr.bf16.mxu1 %v3686_v13  ;;  %v3749_v5 = vld [vmem:[%s3826_s5 + $0x1c8] sm:$0xff]   ;;  %v3750_v7 = vld [vmem:[%s3826_s5 + $0x1d0] sm:$0xff]   ;;  %v3731_v11 = vld [vmem:[%s3826_s5 + $0xd8] sm:$0xff]  }
  0x26   : > { %v3751_v13 = vld [vmem:[%s3826_s5 + $0x1d8] sm:$0xff]  }
  0x28   : > { %811 = vmatpush1.bf16.msra.mxu0 %v3688_v14  ;;  %3656 = vmatpush1.bf16.msra.mxu1 %v3688_v14 }
  0x29   : > { %812 = vmatprep.subr.bf16.mxu0 %v3689_v15  ;;  %3649 = vmatprep.subr.bf16.mxu1 %v3689_v15 }
  0x2c   : > { %813 = vmatpush1.bf16.msra.mxu0 %v3691_v16  ;;  %3657 = vmatpush1.bf16.msra.mxu1 %v3691_v16 }
  0x2f   : > { %831 = vmatmul.mubr.bf16.vlgmr.msra.gmra.mrb[0].mxu0 %v3692_v17  ;;  %1151 = vmatmul.mubr.bf16.vlgmr.msra.gmra.mrb[0].mxu1 %v3708_v18 }
  0x30   : > { %840 = vmatprep.mubr.bf16.mxu0 %v3764_v2  ;;  %1160 = vmatprep.mubr.bf16.mxu1 %v3764_v2 }
  0x37   : > { %841 = vmatmul.mubr.bf16.gmra.mrb[4].mxu0 %v3693_v19  ;;  %1161 = vmatmul.mubr.bf16.gmra.mrb[4].mxu1 %v3710_v20 }
  0x38   : > { %850 = vmatprep.mubr.bf16.mxu0 %v3764_v2  ;;  %1170 = vmatprep.mubr.bf16.mxu1 %v3764_v2 }
  0x3f   : > { %851 = vmatmul.mubr.bf16.gmra.mrb[8].mxu0 %v3694_v21  ;;  %1171 = vmatmul.mubr.bf16.gmra.mrb[8].mxu1 %v3712_v22 }
  0x40   : > { %860 = vmatprep.mubr.bf16.mxu0 %v3764_v2  ;;  %1180 = vmatprep.mubr.bf16.mxu1 %v3764_v2 }
  0x47   : > { %861 = vmatmul.mubr.bf16.gmra.mrb[12].mxu0 %v3695_v23  ;;  %1181 = vmatmul.mubr.bf16.gmra.mrb[12].mxu1 %v3714_v24 }
  0x48   : > { %870 = vmatprep.mubr.bf16.mxu0 %v3764_v2  ;;  %1190 = vmatprep.mubr.bf16.mxu1 %v3764_v2 }
  0x4f   : > { %871 = vmatmul.mubr.bf16.gmra.mrb[16].mxu0 %v3696_v25  ;;  %1191 = vmatmul.mubr.bf16.gmra.mrb[16].mxu1 %v3716_v26 }
  0x50   : > { %880 = vmatprep.mubr.bf16.mxu0 %v3764_v2  ;;  %1200 = vmatprep.mubr.bf16.mxu1 %v3764_v2 }
  0x57   : > { %881 = vmatmul.mubr.bf16.gmra.mrb[20].mxu0 %v3697_v27  ;;  %1201 = vmatmul.mubr.bf16.gmra.mrb[20].mxu1 %v3718_v28 }
  0x58   : > { %890 = vmatprep.mubr.bf16.mxu0 %v3764_v2  ;;  %1210 = vmatprep.mubr.bf16.mxu1 %v3764_v2 }
  0x5f   : > { %891 = vmatmul.mubr.bf16.gmra.mrb[24].mxu0 %v3698_v29  ;;  %1211 = vmatmul.mubr.bf16.gmra.mrb[24].mxu1 %v3720_v30 }
  0x60   : > { %900 = vmatprep.mubr.bf16.mxu0 %v3764_v2  ;;  %1220 = vmatprep.mubr.bf16.mxu1 %v3764_v2 }
  0x67   : > { %901 = vmatmul.mubr.bf16.gmra.mrb[28].mxu0 %v3699_v31  ;;  %1221 = vmatmul.mubr.bf16.gmra.mrb[28].mxu1 %v3722_v32 }
  0x68   : > { %910 = vmatprep.mubr.bf16.mxu0 %v3764_v2  ;;  %1230 = vmatprep.mubr.bf16.mxu1 %v3764_v2 }
  0x6f   : > { %911 = vmatmul.mubr.bf16.gmra.mrb[32].mxu0 %v3700_v33  ;;  %1231 = vmatmul.mubr.bf16.gmra.mrb[32].mxu1 %v3724_v34 }
  0x70   : > { %920 = vmatprep.mubr.bf16.mxu0 %v3764_v2  ;;  %1240 = vmatprep.mubr.bf16.mxu1 %v3764_v2 }
  0x77   : > { %921 = vmatmul.mubr.bf16.gmra.mrb[36].mxu0 %v3701_v35  ;;  %1241 = vmatmul.mubr.bf16.gmra.mrb[36].mxu1 %v3726_v36  ;;  %v3733_v35 = vld [vmem:[%s3826_s5 + $0xe0] sm:$0xff]  }
  0x78   : > { %930 = vmatprep.mubr.bf16.mxu0 %v3764_v2  ;;  %1250 = vmatprep.mubr.bf16.mxu1 %v3764_v2 }
  0x7f   : > { %931 = vmatmul.mubr.bf16.gmra.mrb[40].mxu0 %v3702_v37  ;;  %1251 = vmatmul.mubr.bf16.gmra.mrb[40].mxu1 %v3728_v38 }
  0x80   : > { %940 = vmatprep.mubr.bf16.mxu0 %v3764_v2  ;;  %1260 = vmatprep.mubr.bf16.mxu1 %v3764_v2 }
  0x87   : > { %941 = vmatmul.mubr.bf16.gmra.mrb[44].mxu0 %v3703_v39  ;;  %1261 = vmatmul.mubr.bf16.gmra.mrb[44].mxu1 %v3730_v40 }
  0x88   : > { %950 = vmatprep.mubr.bf16.mxu0 %v3764_v2  ;;  %1270 = vmatprep.mubr.bf16.mxu1 %v3764_v2 }
  0x8f   : > { %951 = vmatmul.mubr.bf16.gmra.mrb[48].mxu0 %v3704_v41  ;;  %1271 = vmatmul.mubr.bf16.gmra.mrb[48].mxu1 %v3732_v42  ;;  %v3752_v42 = vld [vmem:[%s3826_s5 + $0x1e0] sm:$0xff]  }
  0x90   : > { %960 = vmatprep.mubr.bf16.mxu0 %v3764_v2  ;;  %1280 = vmatprep.mubr.bf16.mxu1 %v3764_v2 }
  0x97   : > { %961 = vmatmul.mubr.bf16.gmra.mrb[52].mxu0 %v3705_v43  ;;  %1281 = vmatmul.mubr.bf16.gmra.mrb[52].mxu1 %v3734_v44 }
  0x98   : > { %970 = vmatprep.mubr.bf16.mxu0 %v3764_v2  ;;  %1290 = vmatprep.mubr.bf16.mxu1 %v3764_v2 }
  0x9f   : > { %971 = vmatmul.mubr.bf16.gmra.mrb[56].mxu0 %v3706_v45  ;;  %1291 = vmatmul.mubr.bf16.gmra.mrb[56].mxu1 %v3736_v46 }
  0xa0   : > { %980 = vmatprep.mubr.bf16.mxu0 %v3764_v2  ;;  %1300 = vmatprep.mubr.bf16.mxu1 %v3764_v2 }
  0xa7   : > { %981 = vmatmul.mubr.bf16.gmra.mrb[60].mxu0 %v3707_v47  ;;  %1301 = vmatmul.mubr.bf16.gmra.mrb[60].mxu1 %v3738_v48 }
  0xa8   : > { %990 = vmatprep.mubr.bf16.mxu0 %v3764_v2  ;;  %1310 = vmatprep.mubr.bf16.mxu1 %v3764_v2 }
  0xaf   : > { %991 = vmatmul.mubr.bf16.gmra.mrb[64].mxu0 %v3709_v49  ;;  %1311 = vmatmul.mubr.bf16.gmra.mrb[64].mxu1 %v3740_v50 }
  0xb0   : > { %1000 = vmatprep.mubr.bf16.mxu0 %v3764_v2  ;;  %1320 = vmatprep.mubr.bf16.mxu1 %v3764_v2 }
  0xb7   : > { %1001 = vmatmul.mubr.bf16.gmra.mrb[68].mxu0 %v3711_v51  ;;  %1321 = vmatmul.mubr.bf16.gmra.mrb[68].mxu1 %v3741_v52 }
  0xb8   : > { %1010 = vmatprep.mubr.bf16.mxu0 %v3764_v2  ;;  %1330 = vmatprep.mubr.bf16.mxu1 %v3764_v2 }
  0xbf   : > { %1011 = vmatmul.mubr.bf16.gmra.mrb[72].mxu0 %v3713_v53  ;;  %1331 = vmatmul.mubr.bf16.gmra.mrb[72].mxu1 %v3742_v54 }
  0xc0   : > { %1020 = vmatprep.mubr.bf16.mxu0 %v3764_v2  ;;  %1340 = vmatprep.mubr.bf16.mxu1 %v3764_v2 }
  0xc7   : > { %1021 = vmatmul.mubr.bf16.gmra.mrb[76].mxu0 %v3715_v55  ;;  %1341 = vmatmul.mubr.bf16.gmra.mrb[76].mxu1 %v3743_v56 }
  0xc8   : > { %1030 = vmatprep.mubr.bf16.mxu0 %v3764_v2  ;;  %1350 = vmatprep.mubr.bf16.mxu1 %v3764_v2 }
  0xcf   : > { %1031 = vmatmul.mubr.bf16.gmra.mrb[80].mxu0 %v3717_v57  ;;  %1351 = vmatmul.mubr.bf16.gmra.mrb[80].mxu1 %v3744_v58 }
  0xd0   : > { %1040 = vmatprep.mubr.bf16.mxu0 %v3764_v2  ;;  %1360 = vmatprep.mubr.bf16.mxu1 %v3764_v2 }
  0xd7   : > { %1041 = vmatmul.mubr.bf16.gmra.mrb[84].mxu0 %v3719_v59  ;;  %1361 = vmatmul.mubr.bf16.gmra.mrb[84].mxu1 %v3745_v60 }
  0xd8   : > { %1050 = vmatprep.mubr.bf16.mxu0 %v3764_v2  ;;  %1370 = vmatprep.mubr.bf16.mxu1 %v3764_v2 }
  0xdf   : > { %1051 = vmatmul.mubr.bf16.gmra.mrb[88].mxu0 %v3721_v61  ;;  %1371 = vmatmul.mubr.bf16.gmra.mrb[88].mxu1 %v3746_v62  ;;  %v3735_v61 = vld [vmem:[%s3826_s5 + $0xe8] sm:$0xff]  }
  0xe0   : > { %1060 = vmatprep.mubr.bf16.mxu0 %v3764_v2  ;;  %1380 = vmatprep.mubr.bf16.mxu1 %v3764_v2 }
  0xe7   : > { %1061 = vmatmul.mubr.bf16.gmra.mrb[92].mxu0 %v3723_v63  ;;  %1381 = vmatmul.mubr.bf16.gmra.mrb[92].mxu1 %v3747_v0 }
  0xe8   : > { %1070 = vmatprep.mubr.bf16.mxu0 %v3764_v2  ;;  %1390 = vmatprep.mubr.bf16.mxu1 %v3764_v2 }
  0xef   : > { %1071 = vmatmul.mubr.bf16.gmra.mrb[96].mxu0 %v3725_v1  ;;  %1391 = vmatmul.mubr.bf16.gmra.mrb[96].mxu1 %v3748_v3 }
  0xf0   : > { %1080 = vmatprep.mubr.bf16.mxu0 %v3764_v2  ;;  %1400 = vmatprep.mubr.bf16.mxu1 %v3764_v2 }
  0xf7   : > { %1081 = vmatmul.mubr.bf16.gmra.mrb[100].mxu0 %v3727_v4  ;;  %1401 = vmatmul.mubr.bf16.gmra.mrb[100].mxu1 %v3749_v5  ;;  %v3753_v5 = vld [vmem:[%s3826_s5 + $0x1e8] sm:$0xff]  }
  0xf8   : > { %1090 = vmatprep.mubr.bf16.mxu0 %v3764_v2  ;;  %1410 = vmatprep.mubr.bf16.mxu1 %v3764_v2 }
  0xff   : > { %1091 = vmatmul.mubr.bf16.gmra.mrb[104].mxu0 %v3729_v6  ;;  %1411 = vmatmul.mubr.bf16.gmra.mrb[104].mxu1 %v3750_v7 }
 0x100   : > { %1100 = vmatprep.mubr.bf16.mxu0 %v3764_v2  ;;  %1420 = vmatprep.mubr.bf16.mxu1 %v3764_v2 }
 0x102   : > { %v832_v8 = vpop.f32.mrb[0].mxu0  ;;  %v3964_v9 = vpop.f32.mrb[0].mxu1 }
 0x103   : > { %v834_v10 = vpop.f32.mrb[1].mxu0  ;;  %v3972_v12 = vpop.f32.mrb[1].mxu1  ;;  %v1760_v18 = vmul.f32 %v832_v8, %v832_v8 }
 0x104   : > { %v3514_v14 = vpack.c.bf16 %v834_v10, %v832_v8  ;;  %v836_v15 = vpop.f32.mrb[2].mxu0  ;;  %v3578_v16 = vpack.c.bf16 %v3972_v12, %v3964_v9  ;;  %v3977_v17 = vpop.f32.mrb[2].mxu1  ;;  %v1761_v23 = vmul.f32 %v834_v10, %v834_v10 }
 0x105   : > { %v1471_v19 = vadd.f32 %v836_v15, %v832_v8  ;;  %v1762_v20 = vmul.f32 %v836_v15, %v836_v15  ;;  %v838_v21 = vpop.f32.mrb[3].mxu0  ;;  %v3979_v22 = vpop.f32.mrb[3].mxu1 }
 0x106   : > { %3070 = vst [vmem:[%s3969_s30] sm:$0xff] %v3514_v14  ;;  %v1604_v24 = vadd.f32 %v838_v21, %v834_v10  ;;  %v1763_v25 = vmul.f32 %v838_v21, %v838_v21  ;;  %v3515_v26 = vpack.c.bf16 %v838_v21, %v836_v15  ;;  %3134 = vst [vmem:[%s3969_s30 + $0x200] sm:$0xff] %v3578_v16 }
 0x107   : > { %v2016_v27 = vadd.f32 %v1762_v20, %v1760_v18  ;;  %1101 = vmatmul.mubr.bf16.gmra.mrb[108].mxu0 %v3731_v11  ;;  %v3579_v28 = vpack.c.bf16 %v3979_v22, %v3977_v17  ;;  %1421 = vmatmul.mubr.bf16.gmra.mrb[108].mxu1 %v3751_v13 }
 0x108   : > { %v2149_v29 = vadd.f32 %v1763_v25, %v1761_v23  ;;  %3071 = vst [vmem:[%s3969_s30 + $0x8] sm:$0xff] %v3515_v26  ;;  %1110 = vmatprep.mubr.bf16.mxu0 %v3764_v2  ;;  %1430 = vmatprep.mubr.bf16.mxu1 %v3764_v2 }
 0x109   : > { %3135 = vst [vmem:[%s3969_s30 + $0x208] sm:$0xff] %v3579_v28  ;;  %v3737_v28 = vld [vmem:[%s3826_s5 + $0xf0] sm:$0xff]  }
 0x10a   : > { %v842_v30 = vpop.f32.mrb[4].mxu0  ;;  %v3989_v31 = vpop.f32.mrb[4].mxu1 }
 0x10b   : > { %v1472_v32 = vadd.f32 %v1471_v19, %v842_v30  ;;  %v1764_v33 = vmul.f32 %v842_v30, %v842_v30  ;;  %v844_v34 = vpop.f32.mrb[5].mxu0  ;;  %v3992_v36 = vpop.f32.mrb[5].mxu1 }
 0x10c   : > { %v1605_v37 = vadd.f32 %v1604_v24, %v844_v34  ;;  %v1765_v38 = vmul.f32 %v844_v34, %v844_v34  ;;  %v3516_v39 = vpack.c.bf16 %v844_v34, %v842_v30  ;;  %v846_v40 = vpop.f32.mrb[6].mxu0  ;;  %v3994_v41 = vpop.f32.mrb[6].mxu1  ;;  %v3580_v47 = vpack.c.bf16 %v3992_v36, %v3989_v31 }
 0x10d   : > { %v2017_v43 = vadd.f32 %v2016_v27, %v1764_v33  ;;  %v1473_v44 = vadd.f32 %v1472_v32, %v846_v40  ;;  %v1766_v45 = vmul.f32 %v846_v40, %v846_v40  ;;  %v848_v46 = vpop.f32.mrb[7].mxu0  ;;  %v3999_v48 = vpop.f32.mrb[7].mxu1 }
 0x10e   : > { %v2150_v49 = vadd.f32 %v2149_v29, %v1765_v38  ;;  %3072 = vst [vmem:[%s3969_s30 + $0x10] sm:$0xff] %v3516_v39  ;;  %v1606_v50 = vadd.f32 %v1605_v37, %v848_v46  ;;  %v1767_v51 = vmul.f32 %v848_v46, %v848_v46  ;;  %v3517_v52 = vpack.c.bf16 %v848_v46, %v846_v40  ;;  %v3754_v37 = vld [vmem:[%s3826_s5 + $0x1f0] sm:$0xff]  }
 0x10f   : > { %v2018_v53 = vadd.f32 %v2017_v43, %v1766_v45  ;;  %1111 = vmatmul.mubr.bf16.gmra.mrb[112].mxu0 %v3733_v35  ;;  %3136 = vst [vmem:[%s3969_s30 + $0x210] sm:$0xff] %v3580_v47  ;;  %v3581_v54 = vpack.c.bf16 %v3999_v48, %v3994_v41  ;;  %1431 = vmatmul.mubr.bf16.gmra.mrb[112].mxu1 %v3752_v42 }
 0x110   : > { %v2151_v55 = vadd.f32 %v2150_v49, %v1767_v51  ;;  %3073 = vst [vmem:[%s3969_s30 + $0x18] sm:$0xff] %v3517_v52  ;;  %1120 = vmatprep.mubr.bf16.mxu0 %v3764_v2  ;;  %1440 = vmatprep.mubr.bf16.mxu1 %v3764_v2 }
 0x111   : > { %3137 = vst [vmem:[%s3969_s30 + $0x218] sm:$0xff] %v3581_v54 }
 0x112   : > { %v852_v56 = vpop.f32.mrb[8].mxu0  ;;  %v4009_v57 = vpop.f32.mrb[8].mxu1 }
 0x113   : > { %v1474_v58 = vadd.f32 %v1473_v44, %v852_v56  ;;  %v1768_v59 = vmul.f32 %v852_v56, %v852_v56  ;;  %v854_v60 = vpop.f32.mrb[9].mxu0  ;;  %v4012_v62 = vpop.f32.mrb[9].mxu1 }
 0x114   : > { %v1607_v63 = vadd.f32 %v1606_v50, %v854_v60  ;;  %v1769_v0 = vmul.f32 %v854_v60, %v854_v60  ;;  %v3518_v1 = vpack.c.bf16 %v854_v60, %v852_v56  ;;  %v856_v3 = vpop.f32.mrb[10].mxu0  ;;  %v4014_v4 = vpop.f32.mrb[10].mxu1  ;;  %v3582_v11 = vpack.c.bf16 %v4012_v62, %v4009_v57 }
 0x115   : > { %v2019_v6 = vadd.f32 %v2018_v53, %v1768_v59  ;;  %v1475_v7 = vadd.f32 %v1474_v58, %v856_v3  ;;  %v1770_v8 = vmul.f32 %v856_v3, %v856_v3  ;;  %v858_v10 = vpop.f32.mrb[11].mxu0  ;;  %v4019_v13 = vpop.f32.mrb[11].mxu1  ;;  %v3739_v59 = vld [vmem:[%s3826_s5 + $0xf8] sm:$0xff]  }
 0x116   : > { %v2152_v14 = vadd.f32 %v2151_v55, %v1769_v0  ;;  %3074 = vst [vmem:[%s3969_s30 + $0x20] sm:$0xff] %v3518_v1  ;;  %v1608_v15 = vadd.f32 %v1607_v63, %v858_v10  ;;  %v1771_v16 = vmul.f32 %v858_v10, %v858_v10  ;;  %v3519_v18 = vpack.c.bf16 %v858_v10, %v856_v3 }
 0x117   : > { %v2020_v19 = vadd.f32 %v2019_v6, %v1770_v8  ;;  %1121 = vmatmul.mubr.bf16.gmra.mrb[116].mxu0 %v3735_v61  ;;  %3138 = vst [vmem:[%s3969_s30 + $0x220] sm:$0xff] %v3582_v11  ;;  %v3583_v20 = vpack.c.bf16 %v4019_v13, %v4014_v4  ;;  %1441 = vmatmul.mubr.bf16.gmra.mrb[116].mxu1 %v3753_v5  ;;  %v3755_v5 = vld [vmem:[%s3826_s5 + $0x1f8] sm:$0xff]  }
 0x118   : > { %v2153_v21 = vadd.f32 %v2152_v14, %v1771_v16  ;;  %3075 = vst [vmem:[%s3969_s30 + $0x28] sm:$0xff] %v3519_v18  ;;  %1130 = vmatprep.mubr.bf16.mxu0 %v3764_v2  ;;  %1450 = vmatprep.mubr.bf16.mxu1 %v3764_v2 }
 0x119   : > { %3139 = vst [vmem:[%s3969_s30 + $0x228] sm:$0xff] %v3583_v20 }
 0x11a   : > { %v862_v23 = vpop.f32.mrb[12].mxu0  ;;  %v4029_v24 = vpop.f32.mrb[12].mxu1 }
 0x11b   : > { %v1476_v25 = vadd.f32 %v1475_v7, %v862_v23  ;;  %v1772_v26 = vmul.f32 %v862_v23, %v862_v23  ;;  %v864_v27 = vpop.f32.mrb[13].mxu0  ;;  %v4032_v29 = vpop.f32.mrb[13].mxu1 }
 0x11c   : > { %v1609_v30 = vadd.f32 %v1608_v15, %v864_v27  ;;  %v1773_v32 = vmul.f32 %v864_v27, %v864_v27  ;;  %v3520_v33 = vpack.c.bf16 %v864_v27, %v862_v23  ;;  %v866_v34 = vpop.f32.mrb[14].mxu0  ;;  %v4034_v35 = vpop.f32.mrb[14].mxu1  ;;  %v3584_v43 = vpack.c.bf16 %v4032_v29, %v4029_v24 }
 0x11d   : > { %v2021_v38 = vadd.f32 %v2020_v19, %v1772_v26  ;;  %v1477_v39 = vadd.f32 %v1476_v25, %v866_v34  ;;  %v1774_v40 = vmul.f32 %v866_v34, %v866_v34  ;;  %v868_v42 = vpop.f32.mrb[15].mxu0  ;;  %v4039_v44 = vpop.f32.mrb[15].mxu1 }
 0x11e   : > { %v2154_v45 = vadd.f32 %v2153_v21, %v1773_v32  ;;  %3076 = vst [vmem:[%s3969_s30 + $0x30] sm:$0xff] %v3520_v33  ;;  %v1610_v46 = vadd.f32 %v1609_v30, %v868_v42  ;;  %v1775_v47 = vmul.f32 %v868_v42, %v868_v42  ;;  %v3521_v49 = vpack.c.bf16 %v868_v42, %v866_v34 }
 0x11f   : > { %v2022_v50 = vadd.f32 %v2021_v38, %v1774_v40  ;;  %1131 = vmatmul.mubr.bf16.gmra.mrb[120].mxu0 %v3737_v28  ;;  %3140 = vst [vmem:[%s3969_s30 + $0x230] sm:$0xff] %v3584_v43  ;;  %v3585_v51 = vpack.c.bf16 %v4039_v44, %v4034_v35  ;;  %1451 = vmatmul.mubr.bf16.gmra.mrb[120].mxu1 %v3754_v37 }
 0x120   : > { %v2155_v52 = vadd.f32 %v2154_v45, %v1775_v47  ;;  %3077 = vst [vmem:[%s3969_s30 + $0x38] sm:$0xff] %v3521_v49  ;;  %1140 = vmatprep.mubr.bf16.mxu0 %v3764_v2  ;;  %1460 = vmatprep.mubr.bf16.mxu1 %v3764_v2 }
 0x121   : > { %3141 = vst [vmem:[%s3969_s30 + $0x238] sm:$0xff] %v3585_v51 }
 0x122   : > { %v872_v53 = vpop.f32.mrb[16].mxu0  ;;  %v4049_v54 = vpop.f32.mrb[16].mxu1 }
 0x123   : > { %v1478_v55 = vadd.f32 %v1477_v39, %v872_v53  ;;  %v1776_v56 = vmul.f32 %v872_v53, %v872_v53  ;;  %v874_v58 = vpop.f32.mrb[17].mxu0  ;;  %v4052_v60 = vpop.f32.mrb[17].mxu1 }
 0x124   : > { %v1611_v61 = vadd.f32 %v1610_v46, %v874_v58  ;;  %v1777_v63 = vmul.f32 %v874_v58, %v874_v58  ;;  %v3522_v0 = vpack.c.bf16 %v874_v58, %v872_v53  ;;  %v876_v1 = vpop.f32.mrb[18].mxu0  ;;  %v4054_v3 = vpop.f32.mrb[18].mxu1  ;;  %v3586_v10 = vpack.c.bf16 %v4052_v60, %v4049_v54 }
 0x125   : > { %v2023_v6 = vadd.f32 %v2022_v50, %v1776_v56  ;;  %v1479_v2 = vadd.f32 %v1478_v55, %v876_v1  ;;  %v1778_v7 = vmul.f32 %v876_v1, %v876_v1  ;;  %v878_v8 = vpop.f32.mrb[19].mxu0  ;;  %v4059_v11 = vpop.f32.mrb[19].mxu1 }
 0x126   : > { %v2156_v14 = vadd.f32 %v2155_v52, %v1777_v63  ;;  %3078 = vst [vmem:[%s3969_s30 + $0x40] sm:$0xff] %v3522_v0  ;;  %v1612_v15 = vadd.f32 %v1611_v61, %v878_v8  ;;  %v1779_v16 = vmul.f32 %v878_v8, %v878_v8  ;;  %v3523_v18 = vpack.c.bf16 %v878_v8, %v876_v1 }
 0x127   : > { %v2024_v19 = vadd.f32 %v2023_v6, %v1778_v7  ;;  %1141 = vmatmul.mubr.bf16.gmra.mrb[124].mxu0 %v3739_v59  ;;  %3142 = vst [vmem:[%s3969_s30 + $0x240] sm:$0xff] %v3586_v10  ;;  %v3587_v20 = vpack.c.bf16 %v4059_v11, %v4054_v3  ;;  %1461 = vmatmul.mubr.bf16.gmra.mrb[124].mxu1 %v3755_v5 }
 0x128   : > { %v2157_v21 = vadd.f32 %v2156_v14, %v1779_v16  ;;  %3079 = vst [vmem:[%s3969_s30 + $0x48] sm:$0xff] %v3523_v18 }
 0x129   : > { %3143 = vst [vmem:[%s3969_s30 + $0x248] sm:$0xff] %v3587_v20 }
 0x12a   : > { %v882_v23 = vpop.f32.mrb[20].mxu0  ;;  %v4067_v25 = vpop.f32.mrb[20].mxu1 }
 0x12b   : > { %v1480_v26 = vadd.f32 %v1479_v2, %v882_v23  ;;  %v1780_v27 = vmul.f32 %v882_v23, %v882_v23  ;;  %v884_v28 = vpop.f32.mrb[21].mxu0  ;;  %v4069_v30 = vpop.f32.mrb[21].mxu1 }
 0x12c   : > { %v1613_v32 = vadd.f32 %v1612_v15, %v884_v28  ;;  %v1781_v33 = vmul.f32 %v884_v28, %v884_v28  ;;  %v3524_v34 = vpack.c.bf16 %v884_v28, %v882_v23  ;;  %v886_v37 = vpop.f32.mrb[22].mxu0  ;;  %v4071_v38 = vpop.f32.mrb[22].mxu1  ;;  %v3588_v45 = vpack.c.bf16 %v4069_v30, %v4067_v25 }
 0x12d   : > { %v2025_v39 = vadd.f32 %v2024_v19, %v1780_v27  ;;  %v1481_v40 = vadd.f32 %v1480_v26, %v886_v37  ;;  %v1782_v42 = vmul.f32 %v886_v37, %v886_v37  ;;  %v888_v43 = vpop.f32.mrb[23].mxu0  ;;  %v4075_v46 = vpop.f32.mrb[23].mxu1 }
 0x12e   : > { %v2158_v47 = vadd.f32 %v2157_v21, %v1781_v33  ;;  %3080 = vst [vmem:[%s3969_s30 + $0x50] sm:$0xff] %v3524_v34  ;;  %v1614_v49 = vadd.f32 %v1613_v32, %v888_v43  ;;  %v1783_v50 = vmul.f32 %v888_v43, %v888_v43  ;;  %v3525_v51 = vpack.c.bf16 %v888_v43, %v886_v37 }
 0x12f   : > { %v2026_v52 = vadd.f32 %v2025_v39, %v1782_v42  ;;  %3144 = vst [vmem:[%s3969_s30 + $0x250] sm:$0xff] %v3588_v45  ;;  %v3589_v53 = vpack.c.bf16 %v4075_v46, %v4071_v38 }
 0x130   : > { %v2159_v55 = vadd.f32 %v2158_v47, %v1783_v50  ;;  %3081 = vst [vmem:[%s3969_s30 + $0x58] sm:$0xff] %v3525_v51 }
 0x131   : > { %3145 = vst [vmem:[%s3969_s30 + $0x258] sm:$0xff] %v3589_v53 }
 0x132   : > { %v892_v56 = vpop.f32.mrb[24].mxu0  ;;  %v4083_v58 = vpop.f32.mrb[24].mxu1 }
 0x133   : > { %v1482_v59 = vadd.f32 %v1481_v40, %v892_v56  ;;  %v1784_v61 = vmul.f32 %v892_v56, %v892_v56  ;;  %v894_v63 = vpop.f32.mrb[25].mxu0  ;;  %v4085_v0 = vpop.f32.mrb[25].mxu1 }
 0x134   : > { %v1615_v1 = vadd.f32 %v1614_v49, %v894_v63  ;;  %v1785_v5 = vmul.f32 %v894_v63, %v894_v63  ;;  %v3526_v6 = vpack.c.bf16 %v894_v63, %v892_v56  ;;  %v896_v2 = vpop.f32.mrb[26].mxu0  ;;  %v4087_v7 = vpop.f32.mrb[26].mxu1  ;;  %v3590_v16 = vpack.c.bf16 %v4085_v0, %v4083_v58 }
 0x135   : > { %v2027_v8 = vadd.f32 %v2026_v52, %v1784_v61  ;;  %v1483_v10 = vadd.f32 %v1482_v59, %v896_v2  ;;  %v1786_v14 = vmul.f32 %v896_v2, %v896_v2  ;;  %v898_v15 = vpop.f32.mrb[27].mxu0  ;;  %v4091_v18 = vpop.f32.mrb[27].mxu1 }
 0x136   : > { %v2160_v19 = vadd.f32 %v2159_v55, %v1785_v5  ;;  %3082 = vst [vmem:[%s3969_s30 + $0x60] sm:$0xff] %v3526_v6  ;;  %v1616_v20 = vadd.f32 %v1615_v1, %v898_v15  ;;  %v1787_v21 = vmul.f32 %v898_v15, %v898_v15  ;;  %v3527_v23 = vpack.c.bf16 %v898_v15, %v896_v2 }
 0x137   : > { %v2028_v26 = vadd.f32 %v2027_v8, %v1786_v14  ;;  %3146 = vst [vmem:[%s3969_s30 + $0x260] sm:$0xff] %v3590_v16  ;;  %v3591_v27 = vpack.c.bf16 %v4091_v18, %v4087_v7 }
 0x138   : > { %v2161_v28 = vadd.f32 %v2160_v19, %v1787_v21  ;;  %3083 = vst [vmem:[%s3969_s30 + $0x68] sm:$0xff] %v3527_v23 }
 0x139   : > { %3147 = vst [vmem:[%s3969_s30 + $0x268] sm:$0xff] %v3591_v27 }
 0x13a   : > { %v902_v32 = vpop.f32.mrb[28].mxu0  ;;  %v4099_v33 = vpop.f32.mrb[28].mxu1 }
 0x13b   : > { %v1484_v34 = vadd.f32 %v1483_v10, %v902_v32  ;;  %v1788_v37 = vmul.f32 %v902_v32, %v902_v32  ;;  %v904_v39 = vpop.f32.mrb[29].mxu0  ;;  %v4101_v40 = vpop.f32.mrb[29].mxu1 }
 0x13c   : > { %v1617_v42 = vadd.f32 %v1616_v20, %v904_v39  ;;  %v1789_v43 = vmul.f32 %v904_v39, %v904_v39  ;;  %v3528_v45 = vpack.c.bf16 %v904_v39, %v902_v32  ;;  %v906_v47 = vpop.f32.mrb[30].mxu0  ;;  %v4103_v49 = vpop.f32.mrb[30].mxu1  ;;  %v3592_v55 = vpack.c.bf16 %v4101_v40, %v4099_v33 }
 0x13d   : > { %v2029_v50 = vadd.f32 %v2028_v26, %v1788_v37  ;;  %v1485_v51 = vadd.f32 %v1484_v34, %v906_v47  ;;  %v1790_v52 = vmul.f32 %v906_v47, %v906_v47  ;;  %v908_v53 = vpop.f32.mrb[31].mxu0  ;;  %v4107_v56 = vpop.f32.mrb[31].mxu1 }
 0x13e   : > { %v2162_v59 = vadd.f32 %v2161_v28, %v1789_v43  ;;  %3084 = vst [vmem:[%s3969_s30 + $0x70] sm:$0xff] %v3528_v45  ;;  %v1618_v61 = vadd.f32 %v1617_v42, %v908_v53  ;;  %v1791_v63 = vmul.f32 %v908_v53, %v908_v53  ;;  %v3529_v1 = vpack.c.bf16 %v908_v53, %v906_v47 }
 0x13f   : > { %v2030_v5 = vadd.f32 %v2029_v50, %v1790_v52  ;;  %3148 = vst [vmem:[%s3969_s30 + $0x270] sm:$0xff] %v3592_v55  ;;  %v3593_v6 = vpack.c.bf16 %v4107_v56, %v4103_v49 }
 0x140   : > { %v2163_v2 = vadd.f32 %v2162_v59, %v1791_v63  ;;  %3085 = vst [vmem:[%s3969_s30 + $0x78] sm:$0xff] %v3529_v1 }
 0x141   : > { %3149 = vst [vmem:[%s3969_s30 + $0x278] sm:$0xff] %v3593_v6 }
 0x142   : > { %v912_v8 = vpop.f32.mrb[32].mxu0  ;;  %v4115_v10 = vpop.f32.mrb[32].mxu1 }
 0x143   : > { %v1486_v14 = vadd.f32 %v1485_v51, %v912_v8  ;;  %v1792_v15 = vmul.f32 %v912_v8, %v912_v8  ;;  %v914_v16 = vpop.f32.mrb[33].mxu0  ;;  %v4117_v19 = vpop.f32.mrb[33].mxu1 }
 0x144   : > { %v1619_v20 = vadd.f32 %v1618_v61, %v914_v16  ;;  %v1793_v21 = vmul.f32 %v914_v16, %v914_v16  ;;  %v3530_v23 = vpack.c.bf16 %v914_v16, %v912_v8  ;;  %v916_v26 = vpop.f32.mrb[34].mxu0  ;;  %v4119_v27 = vpop.f32.mrb[34].mxu1  ;;  %v3594_v39 = vpack.c.bf16 %v4117_v19, %v4115_v10 }
 0x145   : > { %v2031_v28 = vadd.f32 %v2030_v5, %v1792_v15  ;;  %v1487_v32 = vadd.f32 %v1486_v14, %v916_v26  ;;  %v1794_v34 = vmul.f32 %v916_v26, %v916_v26  ;;  %v918_v37 = vpop.f32.mrb[35].mxu0  ;;  %v4123_v42 = vpop.f32.mrb[35].mxu1 }
 0x146   : > { %v2164_v43 = vadd.f32 %v2163_v2, %v1793_v21  ;;  %3086 = vst [vmem:[%s3969_s30 + $0x80] sm:$0xff] %v3530_v23  ;;  %v1620_v45 = vadd.f32 %v1619_v20, %v918_v37  ;;  %v1795_v47 = vmul.f32 %v918_v37, %v918_v37  ;;  %v3531_v50 = vpack.c.bf16 %v918_v37, %v916_v26 }
 0x147   : > { %v2032_v51 = vadd.f32 %v2031_v28, %v1794_v34  ;;  %3150 = vst [vmem:[%s3969_s30 + $0x280] sm:$0xff] %v3594_v39  ;;  %v3595_v52 = vpack.c.bf16 %v4123_v42, %v4119_v27 }
 0x148   : > { %v2165_v53 = vadd.f32 %v2164_v43, %v1795_v47  ;;  %3087 = vst [vmem:[%s3969_s30 + $0x88] sm:$0xff] %v3531_v50 }
 0x149   : > { %3151 = vst [vmem:[%s3969_s30 + $0x288] sm:$0xff] %v3595_v52 }
 0x14a   : > { %v922_v55 = vpop.f32.mrb[36].mxu0  ;;  %v4131_v59 = vpop.f32.mrb[36].mxu1 }
 0x14b   : > { %v1488_v61 = vadd.f32 %v1487_v32, %v922_v55  ;;  %v1796_v63 = vmul.f32 %v922_v55, %v922_v55  ;;  %v924_v1 = vpop.f32.mrb[37].mxu0  ;;  %v4133_v5 = vpop.f32.mrb[37].mxu1 }
 0x14c   : > { %v1621_v6 = vadd.f32 %v1620_v45, %v924_v1  ;;  %v1797_v2 = vmul.f32 %v924_v1, %v924_v1  ;;  %v3532_v8 = vpack.c.bf16 %v924_v1, %v922_v55  ;;  %v926_v14 = vpop.f32.mrb[38].mxu0  ;;  %v4135_v15 = vpop.f32.mrb[38].mxu1  ;;  %v3596_v26 = vpack.c.bf16 %v4133_v5, %v4131_v59 }
 0x14d   : > { %v2033_v16 = vadd.f32 %v2032_v51, %v1796_v63  ;;  %v1489_v20 = vadd.f32 %v1488_v61, %v926_v14  ;;  %v1798_v21 = vmul.f32 %v926_v14, %v926_v14  ;;  %v928_v23 = vpop.f32.mrb[39].mxu0  ;;  %v4139_v28 = vpop.f32.mrb[39].mxu1 }
 0x14e   : > { %v2166_v32 = vadd.f32 %v2165_v53, %v1797_v2  ;;  %3088 = vst [vmem:[%s3969_s30 + $0x90] sm:$0xff] %v3532_v8  ;;  %v1622_v34 = vadd.f32 %v1621_v6, %v928_v23  ;;  %v1799_v37 = vmul.f32 %v928_v23, %v928_v23  ;;  %v3533_v39 = vpack.c.bf16 %v928_v23, %v926_v14 }
 0x14f   : > { %v2034_v43 = vadd.f32 %v2033_v16, %v1798_v21  ;;  %3152 = vst [vmem:[%s3969_s30 + $0x290] sm:$0xff] %v3596_v26  ;;  %v3597_v45 = vpack.c.bf16 %v4139_v28, %v4135_v15 }
 0x150   : > { %v2167_v47 = vadd.f32 %v2166_v32, %v1799_v37  ;;  %3089 = vst [vmem:[%s3969_s30 + $0x98] sm:$0xff] %v3533_v39 }
 0x151   : > { %3153 = vst [vmem:[%s3969_s30 + $0x298] sm:$0xff] %v3597_v45 }
 0x152   : > { %v932_v50 = vpop.f32.mrb[40].mxu0  ;;  %v4147_v51 = vpop.f32.mrb[40].mxu1 }
 0x153   : > { %5061 = vst [vmem:[#allocation2_spill] sm:$0xff] %v4147_v51  ;;  %v1490_v52 = vadd.f32 %v1489_v20, %v932_v50  ;;  %v1800_v55 = vmul.f32 %v932_v50, %v932_v50  ;;  %v934_v61 = vpop.f32.mrb[41].mxu0  ;;  %v4149_v53 = vpop.f32.mrb[41].mxu1 }
 0x154   : > { %5062 = vst [vmem:[#allocation3_spill] sm:$0xff] %v4149_v53  ;;  %v1623_v63 = vadd.f32 %v1622_v34, %v934_v61  ;;  %v1801_v1 = vmul.f32 %v934_v61, %v934_v61  ;;  %v3534_v6 = vpack.c.bf16 %v934_v61, %v932_v50  ;;  %v936_v2 = vpop.f32.mrb[42].mxu0  ;;  %v4151_v8 = vpop.f32.mrb[42].mxu1  ;;  %v3598_v20 = vpack.c.bf16 %v4149_v53, %v4147_v51 }
 0x155   : > { %5063 = vst [vmem:[#allocation4_spill] sm:$0xff] %v4151_v8  ;;  %v2035_v14 = vadd.f32 %v2034_v43, %v1800_v55  ;;  %v1491_v16 = vadd.f32 %v1490_v52, %v936_v2  ;;  %v1802_v21 = vmul.f32 %v936_v2, %v936_v2  ;;  %v938_v23 = vpop.f32.mrb[43].mxu0  ;;  %v4155_v26 = vpop.f32.mrb[43].mxu1 }
 0x156   : > { %5064 = vst [vmem:[#allocation5_spill] sm:$0xff] %v4155_v26  ;;  %v2168_v32 = vadd.f32 %v2167_v47, %v1801_v1  ;;  %3090 = vst [vmem:[%s3969_s30 + $0xa0] sm:$0xff] %v3534_v6  ;;  %v1624_v34 = vadd.f32 %v1623_v63, %v938_v23  ;;  %v1803_v37 = vmul.f32 %v938_v23, %v938_v23 }
 0x157   : > { %v3535_v39 = vpack.c.bf16 %v938_v23, %v936_v2  ;;  %v2036_v45 = vadd.f32 %v2035_v14, %v1802_v21  ;;  %3154 = vst [vmem:[%s3969_s30 + $0x2a0] sm:$0xff] %v3598_v20  ;;  %v3599_v50 = vpack.c.bf16 %v4155_v26, %v4151_v8 }
 0x158   : > { %v2169_v43 = vadd.f32 %v2168_v32, %v1803_v37 }
 0x159   : > { %3091 = vst [vmem:[%s3969_s30 + $0xa8] sm:$0xff] %v3535_v39  ;;  %3155 = vst [vmem:[%s3969_s30 + $0x2a8] sm:$0xff] %v3599_v50 }
 0x15a   : > { %v942_v52 = vpop.f32.mrb[44].mxu0  ;;  %v4163_v55 = vpop.f32.mrb[44].mxu1 }
 0x15b   : > { %5065 = vst [vmem:[#allocation6_spill] sm:$0xff] %v4163_v55  ;;  %v1492_v61 = vadd.f32 %v1491_v16, %v942_v52  ;;  %v1804_v53 = vmul.f32 %v942_v52, %v942_v52  ;;  %v944_v51 = vpop.f32.mrb[45].mxu0  ;;  %v4165_v47 = vpop.f32.mrb[45].mxu1 }
 0x15c   : > { %5066 = vst [vmem:[#allocation7_spill] sm:$0xff] %v4165_v47  ;;  %v1625_v63 = vadd.f32 %v1624_v34, %v944_v51  ;;  %v1805_v1 = vmul.f32 %v944_v51, %v944_v51  ;;  %v3536_v6 = vpack.c.bf16 %v944_v51, %v942_v52  ;;  %v946_v2 = vpop.f32.mrb[46].mxu0  ;;  %v4167_v14 = vpop.f32.mrb[46].mxu1  ;;  %v3600_v16 = vpack.c.bf16 %v4165_v47, %v4163_v55 }
 0x15d   : > { %5067 = vst [vmem:[#allocation8_spill] sm:$0xff] %v4167_v14  ;;  %v2037_v21 = vadd.f32 %v2036_v45, %v1804_v53  ;;  %v1493_v23 = vadd.f32 %v1492_v61, %v946_v2  ;;  %v1806_v20 = vmul.f32 %v946_v2, %v946_v2  ;;  %v948_v32 = vpop.f32.mrb[47].mxu0  ;;  %v4171_v37 = vpop.f32.mrb[47].mxu1 }
 0x15e   : > { %5068 = vst [vmem:[#allocation9_spill] sm:$0xff] %v4171_v37  ;;  %v2170_v39 = vadd.f32 %v2169_v43, %v1805_v1  ;;  %3092 = vst [vmem:[%s3969_s30 + $0xb0] sm:$0xff] %v3536_v6  ;;  %v1626_v34 = vadd.f32 %v1625_v63, %v948_v32  ;;  %v1807_v50 = vmul.f32 %v948_v32, %v948_v32 }
 0x15f   : > { %v3537_v26 = vpack.c.bf16 %v948_v32, %v946_v2  ;;  %v2038_v51 = vadd.f32 %v2037_v21, %v1806_v20  ;;  %3156 = vst [vmem:[%s3969_s30 + $0x2b0] sm:$0xff] %v3600_v16  ;;  %v3601_v52 = vpack.c.bf16 %v4171_v37, %v4167_v14 }
 0x160   : > { %v2171_v53 = vadd.f32 %v2170_v39, %v1807_v50 }
 0x161   : > { %3093 = vst [vmem:[%s3969_s30 + $0xb8] sm:$0xff] %v3537_v26  ;;  %3157 = vst [vmem:[%s3969_s30 + $0x2b8] sm:$0xff] %v3601_v52 }
 0x162   : > { %v952_v45 = vpop.f32.mrb[48].mxu0  ;;  %v4179_v61 = vpop.f32.mrb[48].mxu1 }
 0x163   : > { %5069 = vst [vmem:[#allocation10_spill] sm:$0xff] %v4179_v61  ;;  %v1494_v8 = vadd.f32 %v1493_v23, %v952_v45  ;;  %v1808_v47 = vmul.f32 %v952_v45, %v952_v45  ;;  %v954_v55 = vpop.f32.mrb[49].mxu0  ;;  %v4181_v43 = vpop.f32.mrb[49].mxu1 }
 0x164   : > { %5070 = vst [vmem:[#allocation11_spill] sm:$0xff] %v4181_v43  ;;  %v1627_v63 = vadd.f32 %v1626_v34, %v954_v55  ;;  %v1809_v1 = vmul.f32 %v954_v55, %v954_v55  ;;  %v3538_v6 = vpack.c.bf16 %v954_v55, %v952_v45  ;;  %v956_v2 = vpop.f32.mrb[50].mxu0  ;;  %v4183_v21 = vpop.f32.mrb[50].mxu1  ;;  %v3602_v23 = vpack.c.bf16 %v4181_v43, %v4179_v61 }
 0x165   : > { %5071 = vst [vmem:[#allocation12_spill] sm:$0xff] %v4183_v21  ;;  %v2039_v20 = vadd.f32 %v2038_v51, %v1808_v47  ;;  %v1495_v26 = vadd.f32 %v1494_v8, %v956_v2  ;;  %v1810_v32 = vmul.f32 %v956_v2, %v956_v2  ;;  %v958_v16 = vpop.f32.mrb[51].mxu0  ;;  %v4187_v39 = vpop.f32.mrb[51].mxu1 }
 0x166   : > { %5072 = vst [vmem:[#allocation13_spill] sm:$0xff] %v4187_v39  ;;  %v2172_v50 = vadd.f32 %v2171_v53, %v1809_v1  ;;  %3094 = vst [vmem:[%s3969_s30 + $0xc0] sm:$0xff] %v3538_v6  ;;  %v1628_v34 = vadd.f32 %v1627_v63, %v958_v16  ;;  %v1811_v52 = vmul.f32 %v958_v16, %v958_v16 }
 0x167   : > { %v3539_v37 = vpack.c.bf16 %v958_v16, %v956_v2  ;;  %v2040_v55 = vadd.f32 %v2039_v20, %v1810_v32  ;;  %3158 = vst [vmem:[%s3969_s30 + $0x2c0] sm:$0xff] %v3602_v23  ;;  %v3603_v45 = vpack.c.bf16 %v4187_v39, %v4183_v21 }
 0x168   : > { %v2173_v47 = vadd.f32 %v2172_v50, %v1811_v52 }
 0x169   : > { %3095 = vst [vmem:[%s3969_s30 + $0xc8] sm:$0xff] %v3539_v37  ;;  %3159 = vst [vmem:[%s3969_s30 + $0x2c8] sm:$0xff] %v3603_v45 }
 0x16a   : > { %v962_v8 = vpop.f32.mrb[52].mxu0  ;;  %v4195_v51 = vpop.f32.mrb[52].mxu1 }
 0x16b   : > { %5073 = vst [vmem:[#allocation14_spill] sm:$0xff] %v4195_v51  ;;  %v1496_v14 = vadd.f32 %v1495_v26, %v962_v8  ;;  %v1812_v43 = vmul.f32 %v962_v8, %v962_v8  ;;  %v964_v61 = vpop.f32.mrb[53].mxu0  ;;  %v4197_v53 = vpop.f32.mrb[53].mxu1 }
 0x16c   : > { %5074 = vst [vmem:[#allocation15_spill] sm:$0xff] %v4197_v53  ;;  %v1629_v63 = vadd.f32 %v1628_v34, %v964_v61  ;;  %v1813_v1 = vmul.f32 %v964_v61, %v964_v61  ;;  %v3540_v6 = vpack.c.bf16 %v964_v61, %v962_v8  ;;  %v966_v2 = vpop.f32.mrb[54].mxu0  ;;  %v4199_v20 = vpop.f32.mrb[54].mxu1  ;;  %v3604_v26 = vpack.c.bf16 %v4197_v53, %v4195_v51 }
 0x16d   : > { %5075 = vst [vmem:[#allocation16_spill] sm:$0xff] %v4199_v20  ;;  %v2041_v32 = vadd.f32 %v2040_v55, %v1812_v43  ;;  %v1497_v37 = vadd.f32 %v1496_v14, %v966_v2  ;;  %v1814_v16 = vmul.f32 %v966_v2, %v966_v2  ;;  %v968_v23 = vpop.f32.mrb[55].mxu0  ;;  %v4203_v50 = vpop.f32.mrb[55].mxu1 }
 0x16e   : > { %5076 = vst [vmem:[#allocation17_spill] sm:$0xff] %v4203_v50  ;;  %v2174_v52 = vadd.f32 %v2173_v47, %v1813_v1  ;;  %3096 = vst [vmem:[%s3969_s30 + $0xd0] sm:$0xff] %v3540_v6  ;;  %v1630_v34 = vadd.f32 %v1629_v63, %v968_v23  ;;  %v1815_v45 = vmul.f32 %v968_v23, %v968_v23 }
 0x16f   : > { %v3541_v39 = vpack.c.bf16 %v968_v23, %v966_v2  ;;  %v2042_v61 = vadd.f32 %v2041_v32, %v1814_v16  ;;  %3160 = vst [vmem:[%s3969_s30 + $0x2d0] sm:$0xff] %v3604_v26  ;;  %v3605_v8 = vpack.c.bf16 %v4203_v50, %v4199_v20 }
 0x170   : > { %v2175_v43 = vadd.f32 %v2174_v52, %v1815_v45 }
 0x171   : > { %3097 = vst [vmem:[%s3969_s30 + $0xd8] sm:$0xff] %v3541_v39  ;;  %3161 = vst [vmem:[%s3969_s30 + $0x2d8] sm:$0xff] %v3605_v8 }
 0x172   : > { %v972_v14 = vpop.f32.mrb[56].mxu0  ;;  %v4211_v55 = vpop.f32.mrb[56].mxu1 }
 0x173   : > { %5077 = vst [vmem:[#allocation18_spill] sm:$0xff] %v4211_v55  ;;  %v1498_v21 = vadd.f32 %v1497_v37, %v972_v14  ;;  %v1816_v53 = vmul.f32 %v972_v14, %v972_v14  ;;  %v974_v51 = vpop.f32.mrb[57].mxu0  ;;  %v4213_v47 = vpop.f32.mrb[57].mxu1 }
 0x174   : > { %5078 = vst [vmem:[#allocation19_spill] sm:$0xff] %v4213_v47  ;;  %v1631_v63 = vadd.f32 %v1630_v34, %v974_v51  ;;  %v1817_v1 = vmul.f32 %v974_v51, %v974_v51  ;;  %v3542_v6 = vpack.c.bf16 %v974_v51, %v972_v14  ;;  %v976_v2 = vpop.f32.mrb[58].mxu0  ;;  %v4215_v32 = vpop.f32.mrb[58].mxu1  ;;  %v3606_v37 = vpack.c.bf16 %v4213_v47, %v4211_v55 }
 0x175   : > { %5079 = vst [vmem:[#allocation20_spill] sm:$0xff] %v4215_v32  ;;  %v2043_v16 = vadd.f32 %v2042_v61, %v1816_v53  ;;  %v1499_v39 = vadd.f32 %v1498_v21, %v976_v2  ;;  %v1818_v23 = vmul.f32 %v976_v2, %v976_v2  ;;  %v978_v26 = vpop.f32.mrb[59].mxu0  ;;  %v4219_v52 = vpop.f32.mrb[59].mxu1 }
 0x176   : > { %5080 = vst [vmem:[#allocation21_spill] sm:$0xff] %v4219_v52  ;;  %v2176_v45 = vadd.f32 %v2175_v43, %v1817_v1  ;;  %3098 = vst [vmem:[%s3969_s30 + $0xe0] sm:$0xff] %v3542_v6  ;;  %v1632_v34 = vadd.f32 %v1631_v63, %v978_v26  ;;  %v1819_v8 = vmul.f32 %v978_v26, %v978_v26 }
 0x177   : > { %v3543_v50 = vpack.c.bf16 %v978_v26, %v976_v2  ;;  %v2044_v51 = vadd.f32 %v2043_v16, %v1818_v23  ;;  %3162 = vst [vmem:[%s3969_s30 + $0x2e0] sm:$0xff] %v3606_v37  ;;  %v3607_v14 = vpack.c.bf16 %v4219_v52, %v4215_v32 }
 0x178   : > { %v2177_v53 = vadd.f32 %v2176_v45, %v1819_v8 }
 0x179   : > { %3099 = vst [vmem:[%s3969_s30 + $0xe8] sm:$0xff] %v3543_v50  ;;  %3163 = vst [vmem:[%s3969_s30 + $0x2e8] sm:$0xff] %v3607_v14 }
 0x17a   : > { %v982_v21 = vpop.f32.mrb[60].mxu0  ;;  %v4227_v61 = vpop.f32.mrb[60].mxu1 }
 0x17b   : > { %5081 = vst [vmem:[#allocation22_spill] sm:$0xff] %v4227_v61  ;;  %v1500_v20 = vadd.f32 %v1499_v39, %v982_v21  ;;  %v1820_v47 = vmul.f32 %v982_v21, %v982_v21  ;;  %v984_v55 = vpop.f32.mrb[61].mxu0  ;;  %v4229_v43 = vpop.f32.mrb[61].mxu1 }
 0x17c   : > { %5082 = vst [vmem:[#allocation23_spill] sm:$0xff] %v4229_v43  ;;  %v1633_v63 = vadd.f32 %v1632_v34, %v984_v55  ;;  %v1821_v1 = vmul.f32 %v984_v55, %v984_v55  ;;  %v3544_v6 = vpack.c.bf16 %v984_v55, %v982_v21  ;;  %v986_v2 = vpop.f32.mrb[62].mxu0  ;;  %v4231_v16 = vpop.f32.mrb[62].mxu1  ;;  %v3608_v39 = vpack.c.bf16 %v4229_v43, %v4227_v61 }
 0x17d   : > { %5083 = vst [vmem:[#allocation24_spill] sm:$0xff] %v4231_v16  ;;  %v2045_v23 = vadd.f32 %v2044_v51, %v1820_v47  ;;  %v1501_v50 = vadd.f32 %v1500_v20, %v986_v2  ;;  %v1822_v26 = vmul.f32 %v986_v2, %v986_v2  ;;  %v988_v37 = vpop.f32.mrb[63].mxu0  ;;  %v4235_v45 = vpop.f32.mrb[63].mxu1 }
 0x17e   : > { %5084 = vst [vmem:[#allocation25_spill] sm:$0xff] %v4235_v45  ;;  %v2178_v8 = vadd.f32 %v2177_v53, %v1821_v1  ;;  %3100 = vst [vmem:[%s3969_s30 + $0xf0] sm:$0xff] %v3544_v6  ;;  %v1634_v34 = vadd.f32 %v1633_v63, %v988_v37  ;;  %v1823_v14 = vmul.f32 %v988_v37, %v988_v37 }
 0x17f   : > { %v3545_v52 = vpack.c.bf16 %v988_v37, %v986_v2  ;;  %v2046_v55 = vadd.f32 %v2045_v23, %v1822_v26  ;;  %3164 = vst [vmem:[%s3969_s30 + $0x2f0] sm:$0xff] %v3608_v39  ;;  %v3609_v21 = vpack.c.bf16 %v4235_v45, %v4231_v16 }
 0x180   : > { %v2179_v47 = vadd.f32 %v2178_v8, %v1823_v14 }
 0x181   : > { %3101 = vst [vmem:[%s3969_s30 + $0xf8] sm:$0xff] %v3545_v52  ;;  %3165 = vst [vmem:[%s3969_s30 + $0x2f8] sm:$0xff] %v3609_v21 }
 0x182   : > { %v992_v20 = vpop.f32.mrb[64].mxu0  ;;  %v4243_v51 = vpop.f32.mrb[64].mxu1 }
 0x183   : > { %5085 = vst [vmem:[#allocation26_spill] sm:$0xff] %v4243_v51  ;;  %v1502_v32 = vadd.f32 %v1501_v50, %v992_v20  ;;  %v1824_v43 = vmul.f32 %v992_v20, %v992_v20  ;;  %v994_v61 = vpop.f32.mrb[65].mxu0  ;;  %v4245_v53 = vpop.f32.mrb[65].mxu1 }
 0x184   : > { %5086 = vst [vmem:[#allocation27_spill] sm:$0xff] %v4245_v53  ;;  %v1635_v63 = vadd.f32 %v1634_v34, %v994_v61  ;;  %v1825_v1 = vmul.f32 %v994_v61, %v994_v61  ;;  %v3546_v6 = vpack.c.bf16 %v994_v61, %v992_v20  ;;  %v996_v2 = vpop.f32.mrb[66].mxu0  ;;  %v4247_v23 = vpop.f32.mrb[66].mxu1  ;;  %v3610_v50 = vpack.c.bf16 %v4245_v53, %v4243_v51 }
 0x185   : > { %5087 = vst [vmem:[#allocation28_spill] sm:$0xff] %v4247_v23  ;;  %v2047_v26 = vadd.f32 %v2046_v55, %v1824_v43  ;;  %v1503_v52 = vadd.f32 %v1502_v32, %v996_v2  ;;  %v1826_v37 = vmul.f32 %v996_v2, %v996_v2  ;;  %v998_v39 = vpop.f32.mrb[67].mxu0  ;;  %v4251_v8 = vpop.f32.mrb[67].mxu1 }
 0x186   : > { %5088 = vst [vmem:[#allocation29_spill] sm:$0xff] %v4251_v8  ;;  %v2180_v14 = vadd.f32 %v2179_v47, %v1825_v1  ;;  %3102 = vst [vmem:[%s3969_s30 + $0x100] sm:$0xff] %v3546_v6  ;;  %v1636_v34 = vadd.f32 %v1635_v63, %v998_v39  ;;  %v1827_v21 = vmul.f32 %v998_v39, %v998_v39 }
 0x187   : > { %v3547_v45 = vpack.c.bf16 %v998_v39, %v996_v2  ;;  %v2048_v61 = vadd.f32 %v2047_v26, %v1826_v37  ;;  %3166 = vst [vmem:[%s3969_s30 + $0x300] sm:$0xff] %v3610_v50  ;;  %v3611_v20 = vpack.c.bf16 %v4251_v8, %v4247_v23 }
 0x188   : > { %v2181_v43 = vadd.f32 %v2180_v14, %v1827_v21 }
 0x189   : > { %3103 = vst [vmem:[%s3969_s30 + $0x108] sm:$0xff] %v3547_v45  ;;  %3167 = vst [vmem:[%s3969_s30 + $0x308] sm:$0xff] %v3611_v20 }
 0x18a   : > { %v1002_v32 = vpop.f32.mrb[68].mxu0  ;;  %v4259_v55 = vpop.f32.mrb[68].mxu1 }
 0x18b   : > { %5089 = vst [vmem:[#allocation30_spill] sm:$0xff] %v4259_v55  ;;  %v1504_v16 = vadd.f32 %v1503_v52, %v1002_v32  ;;  %v1828_v53 = vmul.f32 %v1002_v32, %v1002_v32  ;;  %v1004_v51 = vpop.f32.mrb[69].mxu0  ;;  %v4261_v47 = vpop.f32.mrb[69].mxu1 }
 0x18c   : > { %5090 = vst [vmem:[#allocation31_spill] sm:$0xff] %v4261_v47  ;;  %v1637_v63 = vadd.f32 %v1636_v34, %v1004_v51  ;;  %v1829_v1 = vmul.f32 %v1004_v51, %v1004_v51  ;;  %v3548_v6 = vpack.c.bf16 %v1004_v51, %v1002_v32  ;;  %v1006_v2 = vpop.f32.mrb[70].mxu0  ;;  %v4263_v26 = vpop.f32.mrb[70].mxu1  ;;  %v3612_v52 = vpack.c.bf16 %v4261_v47, %v4259_v55 }
 0x18d   : > { %5091 = vst [vmem:[#allocation32_spill] sm:$0xff] %v4263_v26  ;;  %v2049_v37 = vadd.f32 %v2048_v61, %v1828_v53  ;;  %v1505_v45 = vadd.f32 %v1504_v16, %v1006_v2  ;;  %v1830_v39 = vmul.f32 %v1006_v2, %v1006_v2  ;;  %v1008_v50 = vpop.f32.mrb[71].mxu0  ;;  %v4267_v14 = vpop.f32.mrb[71].mxu1 }
 0x18e   : > { %5092 = vst [vmem:[#allocation33_spill] sm:$0xff] %v4267_v14  ;;  %v2182_v21 = vadd.f32 %v2181_v43, %v1829_v1  ;;  %3104 = vst [vmem:[%s3969_s30 + $0x110] sm:$0xff] %v3548_v6  ;;  %v1638_v34 = vadd.f32 %v1637_v63, %v1008_v50  ;;  %v1831_v20 = vmul.f32 %v1008_v50, %v1008_v50 }
 0x18f   : > { %v3549_v8 = vpack.c.bf16 %v1008_v50, %v1006_v2  ;;  %v2050_v51 = vadd.f32 %v2049_v37, %v1830_v39  ;;  %3168 = vst [vmem:[%s3969_s30 + $0x310] sm:$0xff] %v3612_v52  ;;  %v3613_v32 = vpack.c.bf16 %v4267_v14, %v4263_v26 }
 0x190   : > { %v2183_v53 = vadd.f32 %v2182_v21, %v1831_v20 }
 0x191   : > { %3105 = vst [vmem:[%s3969_s30 + $0x118] sm:$0xff] %v3549_v8  ;;  %3169 = vst [vmem:[%s3969_s30 + $0x318] sm:$0xff] %v3613_v32 }
 0x192   : > { %v1012_v16 = vpop.f32.mrb[72].mxu0  ;;  %v4275_v61 = vpop.f32.mrb[72].mxu1 }
 0x193   : > { %5093 = vst [vmem:[#allocation34_spill] sm:$0xff] %v4275_v61  ;;  %v1506_v23 = vadd.f32 %v1505_v45, %v1012_v16  ;;  %v1832_v47 = vmul.f32 %v1012_v16, %v1012_v16  ;;  %v1014_v55 = vpop.f32.mrb[73].mxu0  ;;  %v4277_v43 = vpop.f32.mrb[73].mxu1 }
 0x194   : > { %5094 = vst [vmem:[#allocation35_spill] sm:$0xff] %v4277_v43  ;;  %v1639_v63 = vadd.f32 %v1638_v34, %v1014_v55  ;;  %v1833_v1 = vmul.f32 %v1014_v55, %v1014_v55  ;;  %v3550_v6 = vpack.c.bf16 %v1014_v55, %v1012_v16  ;;  %v1016_v2 = vpop.f32.mrb[74].mxu0  ;;  %v4279_v37 = vpop.f32.mrb[74].mxu1  ;;  %v3614_v45 = vpack.c.bf16 %v4277_v43, %v4275_v61 }
 0x195   : > { %5095 = vst [vmem:[#allocation36_spill] sm:$0xff] %v4279_v37  ;;  %v2051_v39 = vadd.f32 %v2050_v51, %v1832_v47  ;;  %v1507_v8 = vadd.f32 %v1506_v23, %v1016_v2  ;;  %v1834_v50 = vmul.f32 %v1016_v2, %v1016_v2  ;;  %v1018_v52 = vpop.f32.mrb[75].mxu0  ;;  %v4283_v21 = vpop.f32.mrb[75].mxu1 }
 0x196   : > { %5096 = vst [vmem:[#allocation37_spill] sm:$0xff] %v4283_v21  ;;  %v2184_v20 = vadd.f32 %v2183_v53, %v1833_v1  ;;  %3106 = vst [vmem:[%s3969_s30 + $0x120] sm:$0xff] %v3550_v6  ;;  %v1640_v34 = vadd.f32 %v1639_v63, %v1018_v52  ;;  %v1835_v32 = vmul.f32 %v1018_v52, %v1018_v52 }
 0x197   : > { %v3551_v14 = vpack.c.bf16 %v1018_v52, %v1016_v2  ;;  %v2052_v55 = vadd.f32 %v2051_v39, %v1834_v50  ;;  %3170 = vst [vmem:[%s3969_s30 + $0x320] sm:$0xff] %v3614_v45  ;;  %v3615_v16 = vpack.c.bf16 %v4283_v21, %v4279_v37 }
 0x198   : > { %v2185_v47 = vadd.f32 %v2184_v20, %v1835_v32 }
 0x199   : > { %3107 = vst [vmem:[%s3969_s30 + $0x128] sm:$0xff] %v3551_v14  ;;  %3171 = vst [vmem:[%s3969_s30 + $0x328] sm:$0xff] %v3615_v16 }
 0x19a   : > { %v1022_v23 = vpop.f32.mrb[76].mxu0  ;;  %v4291_v51 = vpop.f32.mrb[76].mxu1 }
 0x19b   : > { %5097 = vst [vmem:[#allocation38_spill] sm:$0xff] %v4291_v51  ;;  %v1508_v26 = vadd.f32 %v1507_v8, %v1022_v23  ;;  %v1836_v43 = vmul.f32 %v1022_v23, %v1022_v23  ;;  %v1024_v61 = vpop.f32.mrb[77].mxu0  ;;  %v4293_v53 = vpop.f32.mrb[77].mxu1 }
 0x19c   : > { %5098 = vst [vmem:[#allocation39_spill] sm:$0xff] %v4293_v53  ;;  %v1641_v63 = vadd.f32 %v1640_v34, %v1024_v61  ;;  %v1837_v1 = vmul.f32 %v1024_v61, %v1024_v61  ;;  %v3552_v6 = vpack.c.bf16 %v1024_v61, %v1022_v23  ;;  %v1026_v2 = vpop.f32.mrb[78].mxu0  ;;  %v4295_v39 = vpop.f32.mrb[78].mxu1  ;;  %v3616_v8 = vpack.c.bf16 %v4293_v53, %v4291_v51 }
 0x19d   : > { %5099 = vst [vmem:[#allocation40_spill] sm:$0xff] %v4295_v39  ;;  %v2053_v50 = vadd.f32 %v2052_v55, %v1836_v43  ;;  %v1509_v14 = vadd.f32 %v1508_v26, %v1026_v2  ;;  %v1838_v52 = vmul.f32 %v1026_v2, %v1026_v2  ;;  %v1028_v45 = vpop.f32.mrb[79].mxu0  ;;  %v4299_v20 = vpop.f32.mrb[79].mxu1 }
 0x19e   : > { %5100 = vst [vmem:[#allocation41_spill] sm:$0xff] %v4299_v20  ;;  %v2186_v32 = vadd.f32 %v2185_v47, %v1837_v1  ;;  %3108 = vst [vmem:[%s3969_s30 + $0x130] sm:$0xff] %v3552_v6  ;;  %v1642_v34 = vadd.f32 %v1641_v63, %v1028_v45  ;;  %v1839_v16 = vmul.f32 %v1028_v45, %v1028_v45 }
 0x19f   : > { %v3553_v21 = vpack.c.bf16 %v1028_v45, %v1026_v2  ;;  %v2054_v61 = vadd.f32 %v2053_v50, %v1838_v52  ;;  %3172 = vst [vmem:[%s3969_s30 + $0x330] sm:$0xff] %v3616_v8  ;;  %v3617_v23 = vpack.c.bf16 %v4299_v20, %v4295_v39 }
 0x1a0   : > { %v2187_v43 = vadd.f32 %v2186_v32, %v1839_v16 }
 0x1a1   : > { %3109 = vst [vmem:[%s3969_s30 + $0x138] sm:$0xff] %v3553_v21  ;;  %3173 = vst [vmem:[%s3969_s30 + $0x338] sm:$0xff] %v3617_v23 }
 0x1a2   : > { %v1032_v26 = vpop.f32.mrb[80].mxu0  ;;  %v4307_v55 = vpop.f32.mrb[80].mxu1 }
 0x1a3   : > { %5101 = vst [vmem:[#allocation42_spill] sm:$0xff] %v4307_v55  ;;  %v1510_v37 = vadd.f32 %v1509_v14, %v1032_v26  ;;  %v1840_v53 = vmul.f32 %v1032_v26, %v1032_v26  ;;  %v1034_v51 = vpop.f32.mrb[81].mxu0  ;;  %v4309_v47 = vpop.f32.mrb[81].mxu1 }
 0x1a4   : > { %5102 = vst [vmem:[#allocation43_spill] sm:$0xff] %v4309_v47  ;;  %v1643_v63 = vadd.f32 %v1642_v34, %v1034_v51  ;;  %v1841_v1 = vmul.f32 %v1034_v51, %v1034_v51  ;;  %v3554_v6 = vpack.c.bf16 %v1034_v51, %v1032_v26  ;;  %v1036_v2 = vpop.f32.mrb[82].mxu0  ;;  %v4311_v50 = vpop.f32.mrb[82].mxu1  ;;  %v3618_v14 = vpack.c.bf16 %v4309_v47, %v4307_v55 }
 0x1a5   : > { %5103 = vst [vmem:[#allocation44_spill] sm:$0xff] %v4311_v50  ;;  %v2055_v52 = vadd.f32 %v2054_v61, %v1840_v53  ;;  %v1511_v21 = vadd.f32 %v1510_v37, %v1036_v2  ;;  %v1842_v45 = vmul.f32 %v1036_v2, %v1036_v2  ;;  %v1038_v8 = vpop.f32.mrb[83].mxu0  ;;  %v4315_v32 = vpop.f32.mrb[83].mxu1 }
 0x1a6   : > { %5104 = vst [vmem:[#allocation45_spill] sm:$0xff] %v4315_v32  ;;  %v2188_v16 = vadd.f32 %v2187_v43, %v1841_v1  ;;  %3110 = vst [vmem:[%s3969_s30 + $0x140] sm:$0xff] %v3554_v6  ;;  %v1644_v34 = vadd.f32 %v1643_v63, %v1038_v8  ;;  %v1843_v23 = vmul.f32 %v1038_v8, %v1038_v8 }
 0x1a7   : > { %v3555_v20 = vpack.c.bf16 %v1038_v8, %v1036_v2  ;;  %v2056_v51 = vadd.f32 %v2055_v52, %v1842_v45  ;;  %3174 = vst [vmem:[%s3969_s30 + $0x340] sm:$0xff] %v3618_v14  ;;  %v3619_v26 = vpack.c.bf16 %v4315_v32, %v4311_v50 }
 0x1a8   : > { %v2189_v53 = vadd.f32 %v2188_v16, %v1843_v23 }
 0x1a9   : > { %3111 = vst [vmem:[%s3969_s30 + $0x148] sm:$0xff] %v3555_v20  ;;  %3175 = vst [vmem:[%s3969_s30 + $0x348] sm:$0xff] %v3619_v26 }
 0x1aa   : > { %v1042_v37 = vpop.f32.mrb[84].mxu0  ;;  %v4323_v61 = vpop.f32.mrb[84].mxu1 }
 0x1ab   : > { %5105 = vst [vmem:[#allocation46_spill] sm:$0xff] %v4323_v61  ;;  %v1512_v39 = vadd.f32 %v1511_v21, %v1042_v37  ;;  %v1844_v47 = vmul.f32 %v1042_v37, %v1042_v37  ;;  %v1044_v55 = vpop.f32.mrb[85].mxu0  ;;  %v4325_v43 = vpop.f32.mrb[85].mxu1 }
 0x1ac   : > { %5106 = vst [vmem:[#allocation47_spill] sm:$0xff] %v4325_v43  ;;  %v1645_v63 = vadd.f32 %v1644_v34, %v1044_v55  ;;  %v1845_v1 = vmul.f32 %v1044_v55, %v1044_v55  ;;  %v3556_v6 = vpack.c.bf16 %v1044_v55, %v1042_v37  ;;  %v1046_v2 = vpop.f32.mrb[86].mxu0  ;;  %v4327_v52 = vpop.f32.mrb[86].mxu1  ;;  %v3620_v21 = vpack.c.bf16 %v4325_v43, %v4323_v61 }
 0x1ad   : > { %5107 = vst [vmem:[#allocation48_spill] sm:$0xff] %v4327_v52  ;;  %v2057_v45 = vadd.f32 %v2056_v51, %v1844_v47  ;;  %v1513_v20 = vadd.f32 %v1512_v39, %v1046_v2  ;;  %v1846_v8 = vmul.f32 %v1046_v2, %v1046_v2  ;;  %v1048_v14 = vpop.f32.mrb[87].mxu0  ;;  %v4331_v16 = vpop.f32.mrb[87].mxu1 }
 0x1ae   : > { %5108 = vst [vmem:[#allocation49_spill] sm:$0xff] %v4331_v16  ;;  %v2190_v23 = vadd.f32 %v2189_v53, %v1845_v1  ;;  %3112 = vst [vmem:[%s3969_s30 + $0x150] sm:$0xff] %v3556_v6  ;;  %v1646_v34 = vadd.f32 %v1645_v63, %v1048_v14  ;;  %v1847_v26 = vmul.f32 %v1048_v14, %v1048_v14 }
 0x1af   : > { %v3557_v32 = vpack.c.bf16 %v1048_v14, %v1046_v2  ;;  %v2058_v55 = vadd.f32 %v2057_v45, %v1846_v8  ;;  %3176 = vst [vmem:[%s3969_s30 + $0x350] sm:$0xff] %v3620_v21  ;;  %v3621_v37 = vpack.c.bf16 %v4331_v16, %v4327_v52 }
 0x1b0   : > { %v2191_v47 = vadd.f32 %v2190_v23, %v1847_v26 }
 0x1b1   : > { %3113 = vst [vmem:[%s3969_s30 + $0x158] sm:$0xff] %v3557_v32  ;;  %3177 = vst [vmem:[%s3969_s30 + $0x358] sm:$0xff] %v3621_v37 }
 0x1b2   : > { %v1052_v39 = vpop.f32.mrb[88].mxu0  ;;  %v4339_v51 = vpop.f32.mrb[88].mxu1 }
 0x1b3   : > { %5109 = vst [vmem:[#allocation50_spill] sm:$0xff] %v4339_v51  ;;  %v1514_v50 = vadd.f32 %v1513_v20, %v1052_v39  ;;  %v1848_v43 = vmul.f32 %v1052_v39, %v1052_v39  ;;  %v1054_v61 = vpop.f32.mrb[89].mxu0  ;;  %v4341_v53 = vpop.f32.mrb[89].mxu1 }
 0x1b4   : > { %5110 = vst [vmem:[#allocation51_spill] sm:$0xff] %v4341_v53  ;;  %v1647_v63 = vadd.f32 %v1646_v34, %v1054_v61  ;;  %v1849_v1 = vmul.f32 %v1054_v61, %v1054_v61  ;;  %v3558_v6 = vpack.c.bf16 %v1054_v61, %v1052_v39  ;;  %v1056_v2 = vpop.f32.mrb[90].mxu0  ;;  %v4343_v45 = vpop.f32.mrb[90].mxu1  ;;  %v3622_v20 = vpack.c.bf16 %v4341_v53, %v4339_v51 }
 0x1b5   : > { %5111 = vst [vmem:[#allocation52_spill] sm:$0xff] %v4343_v45  ;;  %v2059_v8 = vadd.f32 %v2058_v55, %v1848_v43  ;;  %v1515_v32 = vadd.f32 %v1514_v50, %v1056_v2  ;;  %v1850_v14 = vmul.f32 %v1056_v2, %v1056_v2  ;;  %v1058_v21 = vpop.f32.mrb[91].mxu0  ;;  %v4347_v23 = vpop.f32.mrb[91].mxu1 }
 0x1b6   : > { %5112 = vst [vmem:[#allocation53_spill] sm:$0xff] %v4347_v23  ;;  %v2192_v26 = vadd.f32 %v2191_v47, %v1849_v1  ;;  %3114 = vst [vmem:[%s3969_s30 + $0x160] sm:$0xff] %v3558_v6  ;;  %v1648_v34 = vadd.f32 %v1647_v63, %v1058_v21  ;;  %v1851_v37 = vmul.f32 %v1058_v21, %v1058_v21 }
 0x1b7   : > { %v3559_v16 = vpack.c.bf16 %v1058_v21, %v1056_v2  ;;  %v2060_v61 = vadd.f32 %v2059_v8, %v1850_v14  ;;  %3178 = vst [vmem:[%s3969_s30 + $0x360] sm:$0xff] %v3622_v20  ;;  %v3623_v39 = vpack.c.bf16 %v4347_v23, %v4343_v45 }
 0x1b8   : > { %v2193_v43 = vadd.f32 %v2192_v26, %v1851_v37 }
 0x1b9   : > { %3115 = vst [vmem:[%s3969_s30 + $0x168] sm:$0xff] %v3559_v16  ;;  %3179 = vst [vmem:[%s3969_s30 + $0x368] sm:$0xff] %v3623_v39 }
 0x1ba   : > { %v1062_v50 = vpop.f32.mrb[92].mxu0  ;;  %v4355_v55 = vpop.f32.mrb[92].mxu1 }
 0x1bb   : > { %5113 = vst [vmem:[#allocation54_spill] sm:$0xff] %v4355_v55  ;;  %v1516_v52 = vadd.f32 %v1515_v32, %v1062_v50  ;;  %v1852_v53 = vmul.f32 %v1062_v50, %v1062_v50  ;;  %v1064_v51 = vpop.f32.mrb[93].mxu0  ;;  %v4357_v47 = vpop.f32.mrb[93].mxu1 }
 0x1bc   : > { %5114 = vst [vmem:[#allocation55_spill] sm:$0xff] %v4357_v47  ;;  %v1649_v63 = vadd.f32 %v1648_v34, %v1064_v51  ;;  %v1853_v1 = vmul.f32 %v1064_v51, %v1064_v51  ;;  %v3560_v6 = vpack.c.bf16 %v1064_v51, %v1062_v50  ;;  %v1066_v2 = vpop.f32.mrb[94].mxu0  ;;  %v4359_v8 = vpop.f32.mrb[94].mxu1  ;;  %v3624_v32 = vpack.c.bf16 %v4357_v47, %v4355_v55 }
 0x1bd   : > { %5115 = vst [vmem:[#allocation56_spill] sm:$0xff] %v4359_v8  ;;  %v2061_v14 = vadd.f32 %v2060_v61, %v1852_v53  ;;  %v1517_v16 = vadd.f32 %v1516_v52, %v1066_v2  ;;  %v1854_v21 = vmul.f32 %v1066_v2, %v1066_v2  ;;  %v1068_v20 = vpop.f32.mrb[95].mxu0  ;;  %v4363_v26 = vpop.f32.mrb[95].mxu1 }
 0x1be   : > { %5116 = vst [vmem:[#allocation57_spill] sm:$0xff] %v4363_v26  ;;  %v2194_v37 = vadd.f32 %v2193_v43, %v1853_v1  ;;  %3116 = vst [vmem:[%s3969_s30 + $0x170] sm:$0xff] %v3560_v6  ;;  %v1650_v34 = vadd.f32 %v1649_v63, %v1068_v20  ;;  %v1855_v39 = vmul.f32 %v1068_v20, %v1068_v20 }
 0x1bf   : > { %v3561_v23 = vpack.c.bf16 %v1068_v20, %v1066_v2  ;;  %v2062_v51 = vadd.f32 %v2061_v14, %v1854_v21  ;;  %3180 = vst [vmem:[%s3969_s30 + $0x370] sm:$0xff] %v3624_v32  ;;  %v3625_v50 = vpack.c.bf16 %v4363_v26, %v4359_v8 }
 0x1c0   : > { %v2195_v53 = vadd.f32 %v2194_v37, %v1855_v39 }
 0x1c1   : > { %3117 = vst [vmem:[%s3969_s30 + $0x178] sm:$0xff] %v3561_v23  ;;  %3181 = vst [vmem:[%s3969_s30 + $0x378] sm:$0xff] %v3625_v50 }
 0x1c2   : > { %v1072_v52 = vpop.f32.mrb[96].mxu0  ;;  %v4371_v61 = vpop.f32.mrb[96].mxu1 }
 0x1c3   : > { %5117 = vst [vmem:[#allocation58_spill] sm:$0xff] %v4371_v61  ;;  %v1518_v45 = vadd.f32 %v1517_v16, %v1072_v52  ;;  %v1856_v47 = vmul.f32 %v1072_v52, %v1072_v52  ;;  %v1074_v55 = vpop.f32.mrb[97].mxu0  ;;  %v4373_v43 = vpop.f32.mrb[97].mxu1 }
 0x1c4   : > { %5118 = vst [vmem:[#allocation59_spill] sm:$0xff] %v4373_v43  ;;  %v1651_v63 = vadd.f32 %v1650_v34, %v1074_v55  ;;  %v1857_v1 = vmul.f32 %v1074_v55, %v1074_v55  ;;  %v3562_v6 = vpack.c.bf16 %v1074_v55, %v1072_v52  ;;  %v1076_v2 = vpop.f32.mrb[98].mxu0  ;;  %v4375_v14 = vpop.f32.mrb[98].mxu1  ;;  %v3626_v16 = vpack.c.bf16 %v4373_v43, %v4371_v61 }
 0x1c5   : > { %5119 = vst [vmem:[#allocation60_spill] sm:$0xff] %v4375_v14  ;;  %v2063_v21 = vadd.f32 %v2062_v51, %v1856_v47  ;;  %v1519_v23 = vadd.f32 %v1518_v45, %v1076_v2  ;;  %v1858_v20 = vmul.f32 %v1076_v2, %v1076_v2  ;;  %v1078_v32 = vpop.f32.mrb[99].mxu0  ;;  %v4379_v37 = vpop.f32.mrb[99].mxu1 }
 0x1c6   : > { %5120 = vst [vmem:[#allocation61_spill] sm:$0xff] %v4379_v37  ;;  %v2196_v39 = vadd.f32 %v2195_v53, %v1857_v1  ;;  %3118 = vst [vmem:[%s3969_s30 + $0x180] sm:$0xff] %v3562_v6  ;;  %v1652_v34 = vadd.f32 %v1651_v63, %v1078_v32  ;;  %v1859_v50 = vmul.f32 %v1078_v32, %v1078_v32 }
 0x1c7   : > { %v3563_v26 = vpack.c.bf16 %v1078_v32, %v1076_v2  ;;  %v2064_v55 = vadd.f32 %v2063_v21, %v1858_v20  ;;  %3182 = vst [vmem:[%s3969_s30 + $0x380] sm:$0xff] %v3626_v16  ;;  %v3627_v52 = vpack.c.bf16 %v4379_v37, %v4375_v14 }
 0x1c8   : > { %v2197_v47 = vadd.f32 %v2196_v39, %v1859_v50 }
 0x1c9   : > { %3119 = vst [vmem:[%s3969_s30 + $0x188] sm:$0xff] %v3563_v26  ;;  %3183 = vst [vmem:[%s3969_s30 + $0x388] sm:$0xff] %v3627_v52 }
 0x1ca   : > { %v1082_v45 = vpop.f32.mrb[100].mxu0  ;;  %v4387_v51 = vpop.f32.mrb[100].mxu1 }
 0x1cb   : > { %5121 = vst [vmem:[#allocation62_spill] sm:$0xff] %v4387_v51  ;;  %v1520_v8 = vadd.f32 %v1519_v23, %v1082_v45  ;;  %v1860_v43 = vmul.f32 %v1082_v45, %v1082_v45  ;;  %v1084_v61 = vpop.f32.mrb[101].mxu0  ;;  %v4389_v53 = vpop.f32.mrb[101].mxu1 }
 0x1cc   : > { %5122 = vst [vmem:[#allocation63_spill] sm:$0xff] %v4389_v53  ;;  %v1653_v63 = vadd.f32 %v1652_v34, %v1084_v61  ;;  %v1861_v1 = vmul.f32 %v1084_v61, %v1084_v61  ;;  %v3564_v6 = vpack.c.bf16 %v1084_v61, %v1082_v45  ;;  %v1086_v2 = vpop.f32.mrb[102].mxu0  ;;  %v4391_v21 = vpop.f32.mrb[102].mxu1  ;;  %v3628_v23 = vpack.c.bf16 %v4389_v53, %v4387_v51 }
 0x1cd   : > { %5123 = vst [vmem:[#allocation64_spill] sm:$0xff] %v4391_v21  ;;  %v2065_v20 = vadd.f32 %v2064_v55, %v1860_v43  ;;  %v1521_v26 = vadd.f32 %v1520_v8, %v1086_v2  ;;  %v1862_v32 = vmul.f32 %v1086_v2, %v1086_v2  ;;  %v1088_v16 = vpop.f32.mrb[103].mxu0  ;;  %v4395_v39 = vpop.f32.mrb[103].mxu1 }
 0x1ce   : > { %5124 = vst [vmem:[#allocation65_spill] sm:$0xff] %v4395_v39  ;;  %v2198_v50 = vadd.f32 %v2197_v47, %v1861_v1  ;;  %3120 = vst [vmem:[%s3969_s30 + $0x190] sm:$0xff] %v3564_v6  ;;  %v1654_v34 = vadd.f32 %v1653_v63, %v1088_v16  ;;  %v1863_v52 = vmul.f32 %v1088_v16, %v1088_v16 }
 0x1cf   : > { %v3565_v37 = vpack.c.bf16 %v1088_v16, %v1086_v2  ;;  %v2066_v61 = vadd.f32 %v2065_v20, %v1862_v32  ;;  %3184 = vst [vmem:[%s3969_s30 + $0x390] sm:$0xff] %v3628_v23  ;;  %v3629_v45 = vpack.c.bf16 %v4395_v39, %v4391_v21 }
 0x1d0   : > { %v2199_v43 = vadd.f32 %v2198_v50, %v1863_v52 }
 0x1d1   : > { %3121 = vst [vmem:[%s3969_s30 + $0x198] sm:$0xff] %v3565_v37  ;;  %3185 = vst [vmem:[%s3969_s30 + $0x398] sm:$0xff] %v3629_v45 }
 0x1d2   : > { %v1092_v8 = vpop.f32.mrb[104].mxu0  ;;  %v4403_v55 = vpop.f32.mrb[104].mxu1 }
 0x1d3   : > { %5125 = vst [vmem:[#allocation66_spill] sm:$0xff] %v4403_v55  ;;  %v1522_v14 = vadd.f32 %v1521_v26, %v1092_v8  ;;  %v1864_v53 = vmul.f32 %v1092_v8, %v1092_v8  ;;  %v1094_v51 = vpop.f32.mrb[105].mxu0  ;;  %v4405_v47 = vpop.f32.mrb[105].mxu1 }
 0x1d4   : > { %5126 = vst [vmem:[#allocation67_spill] sm:$0xff] %v4405_v47  ;;  %v1655_v63 = vadd.f32 %v1654_v34, %v1094_v51  ;;  %v1865_v1 = vmul.f32 %v1094_v51, %v1094_v51  ;;  %v3566_v6 = vpack.c.bf16 %v1094_v51, %v1092_v8  ;;  %v1096_v2 = vpop.f32.mrb[106].mxu0  ;;  %v4407_v20 = vpop.f32.mrb[106].mxu1  ;;  %v3630_v26 = vpack.c.bf16 %v4405_v47, %v4403_v55 }
 0x1d5   : > { %5127 = vst [vmem:[#allocation68_spill] sm:$0xff] %v4407_v20  ;;  %v2067_v32 = vadd.f32 %v2066_v61, %v1864_v53  ;;  %v1523_v37 = vadd.f32 %v1522_v14, %v1096_v2  ;;  %v1866_v16 = vmul.f32 %v1096_v2, %v1096_v2  ;;  %v1098_v23 = vpop.f32.mrb[107].mxu0  ;;  %v4411_v50 = vpop.f32.mrb[107].mxu1 }
 0x1d6   : > { %5128 = vst [vmem:[#allocation69_spill] sm:$0xff] %v4411_v50  ;;  %v2200_v52 = vadd.f32 %v2199_v43, %v1865_v1  ;;  %3122 = vst [vmem:[%s3969_s30 + $0x1a0] sm:$0xff] %v3566_v6  ;;  %v1656_v34 = vadd.f32 %v1655_v63, %v1098_v23  ;;  %v1867_v45 = vmul.f32 %v1098_v23, %v1098_v23 }
 0x1d7   : > { %v3567_v39 = vpack.c.bf16 %v1098_v23, %v1096_v2  ;;  %v2068_v51 = vadd.f32 %v2067_v32, %v1866_v16  ;;  %3186 = vst [vmem:[%s3969_s30 + $0x3a0] sm:$0xff] %v3630_v26  ;;  %v3631_v8 = vpack.c.bf16 %v4411_v50, %v4407_v20 }
 0x1d8   : > { %v2201_v53 = vadd.f32 %v2200_v52, %v1867_v45 }
 0x1d9   : > { %3123 = vst [vmem:[%s3969_s30 + $0x1a8] sm:$0xff] %v3567_v39  ;;  %3187 = vst [vmem:[%s3969_s30 + $0x3a8] sm:$0xff] %v3631_v8 }
 0x1da   : > { %v1102_v14 = vpop.f32.mrb[108].mxu0  ;;  %v4419_v61 = vpop.f32.mrb[108].mxu1 }
 0x1db   : > { %5129 = vst [vmem:[#allocation70_spill] sm:$0xff] %v4419_v61  ;;  %v1524_v21 = vadd.f32 %v1523_v37, %v1102_v14  ;;  %v1868_v47 = vmul.f32 %v1102_v14, %v1102_v14  ;;  %v1104_v55 = vpop.f32.mrb[109].mxu0  ;;  %v4421_v43 = vpop.f32.mrb[109].mxu1 }
 0x1dc   : > { %5130 = vst [vmem:[#allocation71_spill] sm:$0xff] %v4421_v43  ;;  %v1657_v63 = vadd.f32 %v1656_v34, %v1104_v55  ;;  %v1869_v1 = vmul.f32 %v1104_v55, %v1104_v55  ;;  %v3568_v6 = vpack.c.bf16 %v1104_v55, %v1102_v14  ;;  %v1106_v2 = vpop.f32.mrb[110].mxu0  ;;  %v4423_v32 = vpop.f32.mrb[110].mxu1  ;;  %v3632_v37 = vpack.c.bf16 %v4421_v43, %v4419_v61 }
 0x1dd   : > { %v2069_v16 = vadd.f32 %v2068_v51, %v1868_v47  ;;  %v1525_v39 = vadd.f32 %v1524_v21, %v1106_v2  ;;  %v1870_v23 = vmul.f32 %v1106_v2, %v1106_v2  ;;  %v1108_v26 = vpop.f32.mrb[111].mxu0  ;;  %v4427_v52 = vpop.f32.mrb[111].mxu1 }
 0x1de   : > { %5131 = vst [vmem:[#allocation72_spill] sm:$0xff] %v4427_v52  ;;  %v2202_v45 = vadd.f32 %v2201_v53, %v1869_v1  ;;  %3124 = vst [vmem:[%s3969_s30 + $0x1b0] sm:$0xff] %v3568_v6  ;;  %v1658_v34 = vadd.f32 %v1657_v63, %v1108_v26  ;;  %v1871_v8 = vmul.f32 %v1108_v26, %v1108_v26 }
 0x1df   : > { %v3569_v50 = vpack.c.bf16 %v1108_v26, %v1106_v2  ;;  %v2070_v55 = vadd.f32 %v2069_v16, %v1870_v23  ;;  %3188 = vst [vmem:[%s3969_s30 + $0x3b0] sm:$0xff] %v3632_v37  ;;  %v3633_v14 = vpack.c.bf16 %v4427_v52, %v4423_v32 }
 0x1e0   : > { %v2203_v47 = vadd.f32 %v2202_v45, %v1871_v8 }
 0x1e1   : > { %3125 = vst [vmem:[%s3969_s30 + $0x1b8] sm:$0xff] %v3569_v50  ;;  %3189 = vst [vmem:[%s3969_s30 + $0x3b8] sm:$0xff] %v3633_v14 }
 0x1e2   : > { %v1112_v21 = vpop.f32.mrb[112].mxu0  ;;  %v4435_v61 = vpop.f32.mrb[112].mxu1 }
 0x1e3   : > { %v1526_v51 = vadd.f32 %v1525_v39, %v1112_v21  ;;  %v1872_v20 = vmul.f32 %v1112_v21, %v1112_v21  ;;  %v1114_v43 = vpop.f32.mrb[113].mxu0  ;;  %5132 = vst [vmem:[#allocation73_spill] sm:$0xff] %v4435_v61  ;;  %v4437_v2 = vpop.f32.mrb[113].mxu1 }
 0x1e4   : > { %v1659_v53 = vadd.f32 %v1658_v34, %v1114_v43  ;;  %v1873_v1 = vmul.f32 %v1114_v43, %v1114_v43  ;;  %v3570_v63 = vpack.c.bf16 %v1114_v43, %v1112_v21  ;;  %v1116_v6 = vpop.f32.mrb[114].mxu0  ;;  %5133 = vst [vmem:[#allocation74_spill] sm:$0xff] %v4437_v2  ;;  %v4439_v37 = vpop.f32.mrb[114].mxu1  ;;  %v3634_v21 = vpack.c.bf16 %v4437_v2, %v4435_v61 }
 0x1e5   : > { %v2071_v16 = vadd.f32 %v2070_v55, %v1872_v20  ;;  %v1527_v23 = vadd.f32 %v1526_v51, %v1116_v6  ;;  %v1874_v26 = vmul.f32 %v1116_v6, %v1116_v6  ;;  %v1118_v50 = vpop.f32.mrb[115].mxu0  ;;  %5134 = vst [vmem:[#allocation75_spill] sm:$0xff] %v4439_v37  ;;  %v4442_v34 = vpop.f32.mrb[115].mxu1 }
 0x1e6   : > { %v2204_v39 = vadd.f32 %v2203_v47, %v1873_v1  ;;  %3126 = vst [vmem:[%s3969_s30 + $0x1c0] sm:$0xff] %v3570_v63  ;;  %v1660_v45 = vadd.f32 %v1659_v53, %v1118_v50  ;;  %v1875_v8 = vmul.f32 %v1118_v50, %v1118_v50  ;;  %v3571_v14 = vpack.c.bf16 %v1118_v50, %v1116_v6 }
 0x1e7   : > { %5135 = vst [vmem:[#allocation76_spill] sm:$0xff] %v4442_v34  ;;  %v2072_v43 = vadd.f32 %v2071_v16, %v1874_v26  ;;  %v3635_v20 = vpack.c.bf16 %v4442_v34, %v4439_v37  ;;  %3190 = vst [vmem:[%s3969_s30 + $0x3c0] sm:$0xff] %v3634_v21 }
 0x1e8   : > { %v2205_v52 = vadd.f32 %v2204_v39, %v1875_v8  ;;  %3127 = vst [vmem:[%s3969_s30 + $0x1c8] sm:$0xff] %v3571_v14 }
 0x1e9   : > { %3191 = vst [vmem:[%s3969_s30 + $0x3c8] sm:$0xff] %v3635_v20 }
 0x1ea   : > { %v1122_v55 = vpop.f32.mrb[116].mxu0  ;;  %v4451_v1 = vpop.f32.mrb[116].mxu1 }
 0x1eb   : > { %v1528_v47 = vadd.f32 %v1527_v23, %v1122_v55  ;;  %v1876_v51 = vmul.f32 %v1122_v55, %v1122_v55  ;;  %v1124_v53 = vpop.f32.mrb[117].mxu0  ;;  %5136 = vst [vmem:[#allocation77_spill] sm:$0xff] %v4451_v1  ;;  %v4453_v50 = vpop.f32.mrb[117].mxu1 }
 0x1ec   : > { %v1661_v63 = vadd.f32 %v1660_v45, %v1124_v53  ;;  %v1877_v6 = vmul.f32 %v1124_v53, %v1124_v53  ;;  %v3572_v16 = vpack.c.bf16 %v1124_v53, %v1122_v55  ;;  %v1126_v26 = vpop.f32.mrb[118].mxu0  ;;  %5137 = vst [vmem:[#allocation78_spill] sm:$0xff] %v4453_v50  ;;  %v4455_v20 = vpop.f32.mrb[118].mxu1  ;;  %v3636_v53 = vpack.c.bf16 %v4453_v50, %v4451_v1 }
 0x1ed   : > { %v2073_v39 = vadd.f32 %v2072_v43, %v1876_v51  ;;  %v1529_v8 = vadd.f32 %v1528_v47, %v1126_v26  ;;  %v1878_v14 = vmul.f32 %v1126_v26, %v1126_v26  ;;  %v1128_v21 = vpop.f32.mrb[119].mxu0  ;;  %5138 = vst [vmem:[#allocation79_spill] sm:$0xff] %v4455_v20  ;;  %v4458_v45 = vpop.f32.mrb[119].mxu1 }
 0x1ee   : > { %v2206_v23 = vadd.f32 %v2205_v52, %v1877_v6  ;;  %3128 = vst [vmem:[%s3969_s30 + $0x1d0] sm:$0xff] %v3572_v16  ;;  %v1662_v34 = vadd.f32 %v1661_v63, %v1128_v21  ;;  %v1879_v37 = vmul.f32 %v1128_v21, %v1128_v21  ;;  %v3573_v2 = vpack.c.bf16 %v1128_v21, %v1126_v26 }
 0x1ef   : > { %5139 = vst [vmem:[#allocation80_spill] sm:$0xff] %v4458_v45  ;;  %v2074_v55 = vadd.f32 %v2073_v39, %v1878_v14  ;;  %v3637_v43 = vpack.c.bf16 %v4458_v45, %v4455_v20  ;;  %3192 = vst [vmem:[%s3969_s30 + $0x3d0] sm:$0xff] %v3636_v53 }
 0x1f0   : > { %v2207_v61 = vadd.f32 %v2206_v23, %v1879_v37  ;;  %3129 = vst [vmem:[%s3969_s30 + $0x1d8] sm:$0xff] %v3573_v2 }
 0x1f1   : > { %3193 = vst [vmem:[%s3969_s30 + $0x3d8] sm:$0xff] %v3637_v43 }
 0x1f2   : > { %v1132_v47 = vpop.f32.mrb[120].mxu0  ;;  %v4467_v6 = vpop.f32.mrb[120].mxu1 }
 0x1f3   : > { %v1530_v52 = vadd.f32 %v1529_v8, %v1132_v47  ;;  %v1880_v51 = vmul.f32 %v1132_v47, %v1132_v47  ;;  %v1134_v63 = vpop.f32.mrb[121].mxu0  ;;  %5140 = vst [vmem:[#allocation81_spill] sm:$0xff] %v4467_v6  ;;  %v4469_v21 = vpop.f32.mrb[121].mxu1 }
 0x1f4   : > { %v1663_v16 = vadd.f32 %v1662_v34, %v1134_v63  ;;  %v1881_v26 = vmul.f32 %v1134_v63, %v1134_v63  ;;  %v3574_v39 = vpack.c.bf16 %v1134_v63, %v1132_v47  ;;  %v1136_v14 = vpop.f32.mrb[122].mxu0  ;;  %5141 = vst [vmem:[#allocation82_spill] sm:$0xff] %v4469_v21  ;;  %v4471_v43 = vpop.f32.mrb[122].mxu1  ;;  %v3638_v63 = vpack.c.bf16 %v4469_v21, %v4467_v6 }
 0x1f5   : > { %v2075_v2 = vadd.f32 %v2074_v55, %v1880_v51  ;;  %v1531_v37 = vadd.f32 %v1530_v52, %v1136_v14  ;;  %v1882_v23 = vmul.f32 %v1136_v14, %v1136_v14  ;;  %v1138_v53 = vpop.f32.mrb[123].mxu0  ;;  %5142 = vst [vmem:[#allocation83_spill] sm:$0xff] %v4471_v43  ;;  %v4474_v34 = vpop.f32.mrb[123].mxu1 }
 0x1f6   : > { %v2208_v8 = vadd.f32 %v2207_v61, %v1881_v26  ;;  %3130 = vst [vmem:[%s3969_s30 + $0x1e0] sm:$0xff] %v3574_v39  ;;  %v1664_v45 = vadd.f32 %v1663_v16, %v1138_v53  ;;  %v1883_v20 = vmul.f32 %v1138_v53, %v1138_v53  ;;  %v3575_v50 = vpack.c.bf16 %v1138_v53, %v1136_v14 }
 0x1f7   : > { %5143 = vst [vmem:[#allocation84_spill] sm:$0xff] %v4474_v34  ;;  %v2076_v47 = vadd.f32 %v2075_v2, %v1882_v23  ;;  %v3639_v55 = vpack.c.bf16 %v4474_v34, %v4471_v43  ;;  %3194 = vst [vmem:[%s3969_s30 + $0x3e0] sm:$0xff] %v3638_v63 }
 0x1f8   : > { %v2209_v1 = vadd.f32 %v2208_v8, %v1883_v20  ;;  %3131 = vst [vmem:[%s3969_s30 + $0x1e8] sm:$0xff] %v3575_v50 }
 0x1f9   : > { %3195 = vst [vmem:[%s3969_s30 + $0x3e8] sm:$0xff] %v3639_v55 }
 0x1fa   : > { %v1142_v52 = vpop.f32.mrb[124].mxu0  ;;  %v4483_v26 = vpop.f32.mrb[124].mxu1 }
 0x1fb   : > { %v1532_v61 = vadd.f32 %v1531_v37, %v1142_v52  ;;  %v1884_v51 = vmul.f32 %v1142_v52, %v1142_v52  ;;  %v1144_v16 = vpop.f32.mrb[125].mxu0  ;;  %v4485_v53 = vpop.f32.mrb[125].mxu1 }
 0x1fc   : > { %v1665_v39 = vadd.f32 %v1664_v45, %v1144_v16  ;;  %v1885_v14 = vmul.f32 %v1144_v16, %v1144_v16  ;;  %v3576_v2 = vpack.c.bf16 %v1144_v16, %v1142_v52  ;;  %v1146_v23 = vpop.f32.mrb[126].mxu0  ;;  %v4487_v63 = vpop.f32.mrb[126].mxu1  ;;  %v1888_v45 = vmul.f32 %v3964_v9, %v3964_v9 }
 0x1fd   : > { %v2077_v20 = vadd.f32 %v2076_v47, %v1884_v51  ;;  %v1533_v50 = vadd.f32 %v1532_v61, %v1146_v23  ;;  %v1886_v8 = vmul.f32 %v1146_v23, %v1146_v23  ;;  %v1148_v34 = vpop.f32.mrb[127].mxu0  ;;  %v4490_v6 = vpop.f32.mrb[127].mxu1  ;;  %v3640_v61 = vpack.c.bf16 %v4485_v53, %v4483_v26 }
 0x1fe   : > { %v2210_v55 = vadd.f32 %v2209_v1, %v1885_v14  ;;  %3132 = vst [vmem:[%s3969_s30 + $0x1f0] sm:$0xff] %v3576_v2  ;;  %v1666_v37 = vadd.f32 %v1665_v39, %v1148_v34  ;;  %v1887_v43 = vmul.f32 %v1148_v34, %v1148_v34  ;;  %v3577_v21 = vpack.c.bf16 %v1148_v34, %v1146_v23 }
 0x1ff   : > { %v1534_v47 = vadd.f32 %v1533_v50, %v3964_v9  ;;  %v2078_v52 = vadd.f32 %v2077_v20, %v1886_v8  ;;  %v1889_v1 = vmul.f32 %v3972_v12, %v3972_v12  ;;  %v3641_v34 = vpack.c.bf16 %v4490_v6, %v4487_v63  ;;  %3196 = vst [vmem:[%s3969_s30 + $0x3f0] sm:$0xff] %v3640_v61 }
 0x200   : > { %v1667_v51 = vadd.f32 %v1666_v37, %v3972_v12  ;;  %v2211_v16 = vadd.f32 %v2210_v55, %v1887_v43  ;;  %3133 = vst [vmem:[%s3969_s30 + $0x1f8] sm:$0xff] %v3577_v21  ;;  %v1890_v39 = vmul.f32 %v3977_v17, %v3977_v17  ;;  %v1891_v2 = vmul.f32 %v3979_v22, %v3979_v22 }
 0x201   : > { %v1535_v14 = vadd.f32 %v1534_v47, %v3977_v17  ;;  %v2079_v9 = vadd.f32 %v2078_v52, %v1888_v45  ;;  %3197 = vst [vmem:[%s3969_s30 + $0x3f8] sm:$0xff] %v3641_v34  ;;  %v1892_v12 = vmul.f32 %v3989_v31, %v3989_v31  ;;  %v1893_v50 = vmul.f32 %v3992_v36, %v3992_v36 }
 0x202   : > { %v1668_v23 = vadd.f32 %v1667_v51, %v3979_v22  ;;  %v2212_v20 = vadd.f32 %v2211_v16, %v1889_v1  ;;  %v1894_v55 = vmul.f32 %v3994_v41, %v3994_v41  ;;  %v1895_v45 = vmul.f32 %v3999_v48, %v3999_v48 }
 0x203   : > { %v1536_v21 = vadd.f32 %v1535_v14, %v3989_v31  ;;  %v2080_v43 = vadd.f32 %v2079_v9, %v1890_v39  ;;  %v1896_v31 = vmul.f32 %v4009_v57, %v4009_v57 }
 0x204   : > { %v1669_v17 = vadd.f32 %v1668_v23, %v3992_v36  ;;  %v2213_v8 = vadd.f32 %v2212_v20, %v1891_v2  ;;  %v1897_v36 = vmul.f32 %v4012_v62, %v4012_v62 }
 0x205   : > { %v1537_v37 = vadd.f32 %v1536_v21, %v3994_v41  ;;  %v2081_v22 = vadd.f32 %v2080_v43, %v1892_v12  ;;  %v1898_v41 = vmul.f32 %v4014_v4, %v4014_v4 }
 0x206   : > { %v1670_v47 = vadd.f32 %v1669_v17, %v3999_v48  ;;  %v2214_v52 = vadd.f32 %v2213_v8, %v1893_v50  ;;  %v1899_v48 = vmul.f32 %v4019_v13, %v4019_v13 }
 0x207   : > { %v1538_v61 = vadd.f32 %v1537_v37, %v4009_v57  ;;  %v2082_v1 = vadd.f32 %v2081_v22, %v1894_v55  ;;  %v1900_v57 = vmul.f32 %v4029_v24, %v4029_v24 }
 0x208   : > { %v1671_v51 = vadd.f32 %v1670_v47, %v4012_v62  ;;  %v2215_v16 = vadd.f32 %v2214_v52, %v1895_v45  ;;  %v1901_v62 = vmul.f32 %v4032_v29, %v4032_v29 }
 0x209   : > { %v1539_v34 = vadd.f32 %v1538_v61, %v4014_v4  ;;  %v2083_v39 = vadd.f32 %v2082_v1, %v1896_v31  ;;  %v1902_v4 = vmul.f32 %v4034_v35, %v4034_v35 }
 0x20a   : > { %v1672_v14 = vadd.f32 %v1671_v51, %v4019_v13  ;;  %v2216_v9 = vadd.f32 %v2215_v16, %v1897_v36  ;;  %v1903_v13 = vmul.f32 %v4039_v44, %v4039_v44 }
 0x20b   : > { %v1540_v2 = vadd.f32 %v1539_v34, %v4029_v24  ;;  %v2084_v23 = vadd.f32 %v2083_v39, %v1898_v41  ;;  %v1904_v24 = vmul.f32 %v4049_v54, %v4049_v54 }
 0x20c   : > { %v1673_v20 = vadd.f32 %v1672_v14, %v4032_v29  ;;  %v2217_v12 = vadd.f32 %v2216_v9, %v1899_v48  ;;  %v1905_v29 = vmul.f32 %v4052_v60, %v4052_v60 }
 0x20d   : > { %v1541_v21 = vadd.f32 %v1540_v2, %v4034_v35  ;;  %v2085_v43 = vadd.f32 %v2084_v23, %v1900_v57  ;;  %v1906_v35 = vmul.f32 %v4054_v3, %v4054_v3 }
 0x20e   : > { %v1674_v50 = vadd.f32 %v1673_v20, %v4039_v44  ;;  %v2218_v17 = vadd.f32 %v2217_v12, %v1901_v62  ;;  %v1907_v44 = vmul.f32 %v4059_v11, %v4059_v11 }
 0x20f   : > { %v1542_v8 = vadd.f32 %v1541_v21, %v4049_v54  ;;  %v2086_v55 = vadd.f32 %v2085_v43, %v1902_v4  ;;  %v1908_v54 = vmul.f32 %v4067_v25, %v4067_v25 }
 0x210   : > { %v1675_v37 = vadd.f32 %v1674_v50, %v4052_v60  ;;  %v2219_v22 = vadd.f32 %v2218_v17, %v1903_v13  ;;  %v1909_v60 = vmul.f32 %v4069_v30, %v4069_v30 }
 0x211   : > { %v1543_v45 = vadd.f32 %v1542_v8, %v4054_v3  ;;  %v2087_v47 = vadd.f32 %v2086_v55, %v1904_v24  ;;  %v1910_v3 = vmul.f32 %v4071_v38, %v4071_v38 }
 0x212   : > { %v1676_v52 = vadd.f32 %v1675_v37, %v4059_v11  ;;  %v2220_v31 = vadd.f32 %v2219_v22, %v1905_v29  ;;  %v1911_v11 = vmul.f32 %v4075_v46, %v4075_v46 }
 0x213   : > { %v1544_v61 = vadd.f32 %v1543_v45, %v4067_v25  ;;  %v2088_v1 = vadd.f32 %v2087_v47, %v1906_v35  ;;  %v1912_v25 = vmul.f32 %v4083_v58, %v4083_v58 }
 0x214   : > { %v1677_v36 = vadd.f32 %v1676_v52, %v4069_v30  ;;  %v2221_v51 = vadd.f32 %v2220_v31, %v1907_v44  ;;  %v1913_v30 = vmul.f32 %v4085_v0, %v4085_v0 }
 0x215   : > { %v1545_v16 = vadd.f32 %v1544_v61, %v4071_v38  ;;  %v2089_v41 = vadd.f32 %v2088_v1, %v1908_v54  ;;  %v1914_v38 = vmul.f32 %v4087_v7, %v4087_v7 }
 0x216   : > { %v1678_v34 = vadd.f32 %v1677_v36, %v4075_v46  ;;  %v2222_v39 = vadd.f32 %v2221_v51, %v1909_v60  ;;  %v1915_v46 = vmul.f32 %v4091_v18, %v4091_v18 }
 0x217   : > { %v1546_v48 = vadd.f32 %v1545_v16, %v4083_v58  ;;  %v2090_v14 = vadd.f32 %v2089_v41, %v1910_v3  ;;  %v1916_v58 = vmul.f32 %v4099_v33, %v4099_v33 }
 0x218   : > { %v1679_v9 = vadd.f32 %v1678_v34, %v4085_v0  ;;  %v2223_v57 = vadd.f32 %v2222_v39, %v1911_v11  ;;  %v1917_v0 = vmul.f32 %v4101_v40, %v4101_v40 }
 0x219   : > { %v1547_v2 = vadd.f32 %v1546_v48, %v4087_v7  ;;  %v2091_v23 = vadd.f32 %v2090_v14, %v1912_v25  ;;  %v1918_v7 = vmul.f32 %v4103_v49, %v4103_v49 }
 0x21a   : > { %v1680_v62 = vadd.f32 %v1679_v9, %v4091_v18  ;;  %v2224_v20 = vadd.f32 %v2223_v57, %v1913_v30  ;;  %v1919_v18 = vmul.f32 %v4107_v56, %v4107_v56  ;;  %v5148_v57 = vld [vmem:[#allocation6_spill] sm:$0xff] }
 0x21b   : > { %v1548_v12 = vadd.f32 %v1547_v2, %v4099_v33  ;;  %v2092_v4 = vadd.f32 %v2091_v23, %v1914_v38  ;;  %v1920_v33 = vmul.f32 %v4115_v10, %v4115_v10  ;;  %v1932_v38 = vmul.f32 %v5148_v57, %v5148_v57 }
 0x21c   : > { %v1681_v21 = vadd.f32 %v1680_v62, %v4101_v40  ;;  %v2225_v43 = vadd.f32 %v2224_v20, %v1915_v46  ;;  %v1921_v40 = vmul.f32 %v4117_v19, %v4117_v19  ;;  %v5149_v46 = vld [vmem:[#allocation7_spill] sm:$0xff] }
 0x21d   : > { %v1549_v13 = vadd.f32 %v1548_v12, %v4103_v49  ;;  %v2093_v50 = vadd.f32 %v2092_v4, %v1916_v58  ;;  %v1922_v49 = vmul.f32 %v4119_v27, %v4119_v27  ;;  %v1933_v62 = vmul.f32 %v5149_v46, %v5149_v46  ;;  %v5150_v12 = vld [vmem:[#allocation8_spill] sm:$0xff] }
 0x21e   : > { %v1682_v17 = vadd.f32 %v1681_v21, %v4107_v56  ;;  %v2226_v24 = vadd.f32 %v2225_v43, %v1917_v0  ;;  %v1923_v56 = vmul.f32 %v4123_v42, %v4123_v42  ;;  %v1934_v4 = vmul.f32 %v5150_v12, %v5150_v12  ;;  %v5151_v43 = vld [vmem:[#allocation9_spill] sm:$0xff] }
 0x21f   : > { %v1550_v8 = vadd.f32 %v1549_v13, %v4115_v10  ;;  %v2094_v55 = vadd.f32 %v2093_v50, %v1918_v7  ;;  %v1924_v10 = vmul.f32 %v4131_v59, %v4131_v59  ;;  %v1935_v7 = vmul.f32 %v5151_v43, %v5151_v43 }
 0x220   : > { %v1683_v29 = vadd.f32 %v1682_v17, %v4117_v19  ;;  %v2227_v37 = vadd.f32 %v2226_v24, %v1919_v18  ;;  %v1925_v19 = vmul.f32 %v4133_v5, %v4133_v5  ;;  %v5152_v18 = vld [vmem:[#allocation10_spill] sm:$0xff] }
 0x221   : > { %v2095_v22 = vadd.f32 %v2094_v55, %v1920_v33  ;;  %v1551_v35 = vadd.f32 %v1550_v8, %v4119_v27  ;;  %v1926_v27 = vmul.f32 %v4135_v15, %v4135_v15  ;;  %v1936_v17 = vmul.f32 %v5152_v18, %v5152_v18  ;;  %v5153_v8 = vld [vmem:[#allocation11_spill] sm:$0xff] }
 0x222   : > { %v2228_v45 = vadd.f32 %v2227_v37, %v1921_v40  ;;  %v1684_v47 = vadd.f32 %v1683_v29, %v4123_v42  ;;  %v1927_v42 = vmul.f32 %v4139_v28, %v4139_v28  ;;  %v1937_v55 = vmul.f32 %v5153_v8, %v5153_v8  ;;  %v5154_v37 = vld [vmem:[#allocation12_spill] sm:$0xff] }
 0x223   : > { %v1552_v44 = vadd.f32 %v1551_v35, %v4131_v59  ;;  %v2096_v52 = vadd.f32 %v2095_v22, %v1922_v49  ;;  %v5144_v59 = vld [vmem:[#allocation2_spill] sm:$0xff]  ;;  %v1938_v49 = vmul.f32 %v5154_v37, %v5154_v37 }
 0x224   : > { %v1685_v31 = vadd.f32 %v1684_v47, %v4133_v5  ;;  %v2229_v54 = vadd.f32 %v2228_v45, %v1923_v56  ;;  %v1928_v51 = vmul.f32 %v5144_v59, %v5144_v59  ;;  %v5145_v5 = vld [vmem:[#allocation3_spill] sm:$0xff]  ;;  %v5155_v56 = vld [vmem:[#allocation13_spill] sm:$0xff] }
 0x225   : > { %v1553_v61 = vadd.f32 %v1552_v44, %v4135_v15  ;;  %v2097_v1 = vadd.f32 %v2096_v52, %v1924_v10  ;;  %v1929_v41 = vmul.f32 %v5145_v5, %v5145_v5  ;;  %v5146_v15 = vld [vmem:[#allocation4_spill] sm:$0xff]  ;;  %v1939_v45 = vmul.f32 %v5155_v56, %v5155_v56  ;;  %v5156_v44 = vld [vmem:[#allocation14_spill] sm:$0xff] }
 0x226   : > { %v1686_v60 = vadd.f32 %v1685_v31, %v4139_v28  ;;  %v2230_v36 = vadd.f32 %v2229_v54, %v1925_v19  ;;  %v1930_v39 = vmul.f32 %v5146_v15, %v5146_v15  ;;  %v5147_v28 = vld [vmem:[#allocation5_spill] sm:$0xff]  ;;  %v1940_v52 = vmul.f32 %v5156_v44, %v5156_v44  ;;  %v5157_v54 = vld [vmem:[#allocation15_spill] sm:$0xff] }
 0x227   : > { %v1554_v3 = vadd.f32 %v1553_v61, %v5144_v59  ;;  %v2098_v16 = vadd.f32 %v2097_v1, %v1926_v27  ;;  %v1931_v14 = vmul.f32 %v5147_v28, %v5147_v28  ;;  %v1941_v27 = vmul.f32 %v5157_v54, %v5157_v54 }
 0x228   : > { %v1687_v11 = vadd.f32 %v1686_v60, %v5145_v5  ;;  %v2231_v34 = vadd.f32 %v2230_v36, %v1927_v42  ;;  %v5158_v42 = vld [vmem:[#allocation16_spill] sm:$0xff] }
 0x229   : > { %v1555_v25 = vadd.f32 %v1554_v3, %v5146_v15  ;;  %v2099_v48 = vadd.f32 %v2098_v16, %v1928_v51  ;;  %v1942_v60 = vmul.f32 %v5158_v42, %v5158_v42  ;;  %v5159_v51 = vld [vmem:[#allocation17_spill] sm:$0xff] }
 0x22a   : > { %v1688_v30 = vadd.f32 %v1687_v11, %v5147_v28  ;;  %v2232_v9 = vadd.f32 %v2231_v34, %v1929_v41  ;;  %v1943_v3 = vmul.f32 %v5159_v51, %v5159_v51  ;;  %v5160_v41 = vld [vmem:[#allocation18_spill] sm:$0xff] }
 0x22b   : > { %v1556_v2 = vadd.f32 %v1555_v25, %v5148_v57  ;;  %v2100_v23 = vadd.f32 %v2099_v48, %v1930_v39  ;;  %v1944_v11 = vmul.f32 %v5160_v41, %v5160_v41  ;;  %v5161_v39 = vld [vmem:[#allocation19_spill] sm:$0xff] }
 0x22c   : > { %v1689_v20 = vadd.f32 %v1688_v30, %v5149_v46  ;;  %v2233_v58 = vadd.f32 %v2232_v9, %v1931_v14  ;;  %v1945_v25 = vmul.f32 %v5161_v39, %v5161_v39  ;;  %v5162_v14 = vld [vmem:[#allocation20_spill] sm:$0xff] }
 0x22d   : > { %v1557_v0 = vadd.f32 %v1556_v2, %v5150_v12  ;;  %v2101_v21 = vadd.f32 %v2100_v23, %v1932_v38  ;;  %v1946_v30 = vmul.f32 %v5162_v14, %v5162_v14  ;;  %v5163_v38 = vld [vmem:[#allocation21_spill] sm:$0xff] }
 0x22e   : > { %v1690_v13 = vadd.f32 %v1689_v20, %v5151_v43  ;;  %v2234_v50 = vadd.f32 %v2233_v58, %v1933_v62  ;;  %v1947_v2 = vmul.f32 %v5163_v38, %v5163_v38  ;;  %v5164_v62 = vld [vmem:[#allocation22_spill] sm:$0xff] }
 0x22f   : > { %v1558_v24 = vadd.f32 %v1557_v0, %v5152_v18  ;;  %v2102_v33 = vadd.f32 %v2101_v21, %v1934_v4  ;;  %v1948_v20 = vmul.f32 %v5164_v62, %v5164_v62  ;;  %v5165_v4 = vld [vmem:[#allocation23_spill] sm:$0xff] }
 0x230   : > { %v1691_v40 = vadd.f32 %v1690_v13, %v5153_v8  ;;  %v2235_v29 = vadd.f32 %v2234_v50, %v1935_v7  ;;  %v1949_v0 = vmul.f32 %v5165_v4, %v5165_v4  ;;  %v5166_v7 = vld [vmem:[#allocation24_spill] sm:$0xff] }
 0x231   : > { %v1559_v22 = vadd.f32 %v1558_v24, %v5154_v37  ;;  %v2103_v35 = vadd.f32 %v2102_v33, %v1936_v17  ;;  %v1950_v13 = vmul.f32 %v5166_v7, %v5166_v7  ;;  %v5167_v17 = vld [vmem:[#allocation25_spill] sm:$0xff] }
 0x232   : > { %v1692_v47 = vadd.f32 %v1691_v40, %v5155_v56  ;;  %v2236_v10 = vadd.f32 %v2235_v29, %v1937_v55  ;;  %v1951_v24 = vmul.f32 %v5167_v17, %v5167_v17  ;;  %v5168_v55 = vld [vmem:[#allocation26_spill] sm:$0xff] }
 0x233   : > { %v1560_v19 = vadd.f32 %v1559_v22, %v5156_v44  ;;  %v2104_v31 = vadd.f32 %v2103_v35, %v1938_v49  ;;  %v1952_v29 = vmul.f32 %v5168_v55, %v5168_v55  ;;  %v5169_v49 = vld [vmem:[#allocation27_spill] sm:$0xff] }
 0x234   : > { %v1693_v61 = vadd.f32 %v1692_v47, %v5157_v54  ;;  %v2237_v1 = vadd.f32 %v2236_v10, %v1939_v45  ;;  %v1953_v35 = vmul.f32 %v5169_v49, %v5169_v49  ;;  %v5170_v47 = vld [vmem:[#allocation28_spill] sm:$0xff] }
 0x235   : > { %v1561_v36 = vadd.f32 %v1560_v19, %v5158_v42  ;;  %v2105_v59 = vadd.f32 %v2104_v31, %v1940_v52  ;;  %v1954_v44 = vmul.f32 %v5170_v47, %v5170_v47  ;;  %v5171_v19 = vld [vmem:[#allocation29_spill] sm:$0xff] }
 0x236   : > { %v1694_v16 = vadd.f32 %v1693_v61, %v5159_v51  ;;  %v2238_v5 = vadd.f32 %v2237_v1, %v1941_v27  ;;  %v1955_v54 = vmul.f32 %v5171_v19, %v5171_v19  ;;  %v5172_v61 = vld [vmem:[#allocation30_spill] sm:$0xff] }
 0x237   : > { %v1562_v34 = vadd.f32 %v1561_v36, %v5160_v41  ;;  %v2106_v15 = vadd.f32 %v2105_v59, %v1942_v60  ;;  %v1956_v42 = vmul.f32 %v5172_v61, %v5172_v61  ;;  %v5173_v36 = vld [vmem:[#allocation31_spill] sm:$0xff] }
 0x238   : > { %v1695_v48 = vadd.f32 %v1694_v16, %v5161_v39  ;;  %v2239_v28 = vadd.f32 %v2238_v5, %v1943_v3  ;;  %v1957_v51 = vmul.f32 %v5173_v36, %v5173_v36  ;;  %v5174_v16 = vld [vmem:[#allocation32_spill] sm:$0xff] }
 0x239   : > { %v1563_v9 = vadd.f32 %v1562_v34, %v5162_v14  ;;  %v2107_v57 = vadd.f32 %v2106_v15, %v1944_v11  ;;  %v1958_v41 = vmul.f32 %v5174_v16, %v5174_v16  ;;  %v5175_v34 = vld [vmem:[#allocation33_spill] sm:$0xff] }
 0x23a   : > { %v1696_v23 = vadd.f32 %v1695_v48, %v5163_v38  ;;  %v2240_v46 = vadd.f32 %v2239_v28, %v1945_v25  ;;  %v1959_v39 = vmul.f32 %v5175_v34, %v5175_v34  ;;  %v5176_v48 = vld [vmem:[#allocation34_spill] sm:$0xff] }
 0x23b   : > { %v1564_v58 = vadd.f32 %v1563_v9, %v5164_v62  ;;  %v2108_v12 = vadd.f32 %v2107_v57, %v1946_v30  ;;  %v1960_v14 = vmul.f32 %v5176_v48, %v5176_v48  ;;  %v5177_v9 = vld [vmem:[#allocation35_spill] sm:$0xff] }
 0x23c   : > { %v1697_v21 = vadd.f32 %v1696_v23, %v5165_v4  ;;  %v2241_v43 = vadd.f32 %v2240_v46, %v1947_v2  ;;  %v1961_v38 = vmul.f32 %v5177_v9, %v5177_v9  ;;  %v5178_v23 = vld [vmem:[#allocation36_spill] sm:$0xff] }
 0x23d   : > { %v1565_v50 = vadd.f32 %v1564_v58, %v5166_v7  ;;  %v2109_v18 = vadd.f32 %v2108_v12, %v1948_v20  ;;  %v1962_v62 = vmul.f32 %v5178_v23, %v5178_v23  ;;  %v5179_v58 = vld [vmem:[#allocation37_spill] sm:$0xff] }
 0x23e   : > { %v1698_v33 = vadd.f32 %v1697_v21, %v5167_v17  ;;  %v2242_v8 = vadd.f32 %v2241_v43, %v1949_v0  ;;  %v1963_v4 = vmul.f32 %v5179_v58, %v5179_v58  ;;  %v5180_v21 = vld [vmem:[#allocation38_spill] sm:$0xff] }
 0x23f   : > { %v1566_v40 = vadd.f32 %v1565_v50, %v5168_v55  ;;  %v2110_v37 = vadd.f32 %v2109_v18, %v1950_v13  ;;  %v1964_v7 = vmul.f32 %v5180_v21, %v5180_v21  ;;  %v5181_v50 = vld [vmem:[#allocation39_spill] sm:$0xff] }
 0x240   : > { %v1699_v22 = vadd.f32 %v1698_v33, %v5169_v49  ;;  %v2243_v56 = vadd.f32 %v2242_v8, %v1951_v24  ;;  %v1965_v17 = vmul.f32 %v5181_v50, %v5181_v50  ;;  %v5182_v33 = vld [vmem:[#allocation40_spill] sm:$0xff] }
 0x241   : > { %v2111_v45 = vadd.f32 %v2110_v37, %v1952_v29  ;;  %v1567_v10 = vadd.f32 %v1566_v40, %v5170_v47  ;;  %v1966_v55 = vmul.f32 %v5182_v33, %v5182_v33  ;;  %v5183_v29 = vld [vmem:[#allocation41_spill] sm:$0xff] }
 0x242   : > { %v2244_v52 = vadd.f32 %v2243_v56, %v1953_v35  ;;  %v1700_v31 = vadd.f32 %v1699_v22, %v5171_v19  ;;  %v1967_v49 = vmul.f32 %v5183_v29, %v5183_v29  ;;  %v5184_v35 = vld [vmem:[#allocation42_spill] sm:$0xff] }
 0x243   : > { %v2112_v27 = vadd.f32 %v2111_v45, %v1954_v44  ;;  %v1568_v1 = vadd.f32 %v1567_v10, %v5172_v61  ;;  %v1968_v45 = vmul.f32 %v5184_v35, %v5184_v35  ;;  %v5185_v10 = vld [vmem:[#allocation43_spill] sm:$0xff] }
 0x244   : > { %v2245_v60 = vadd.f32 %v2244_v52, %v1955_v54  ;;  %v1701_v59 = vadd.f32 %v1700_v31, %v5173_v36  ;;  %v1969_v52 = vmul.f32 %v5185_v10, %v5185_v10  ;;  %v5186_v31 = vld [vmem:[#allocation44_spill] sm:$0xff] }
 0x245   : > { %v2113_v3 = vadd.f32 %v2112_v27, %v1956_v42  ;;  %v1569_v5 = vadd.f32 %v1568_v1, %v5174_v16  ;;  %v1970_v27 = vmul.f32 %v5186_v31, %v5186_v31  ;;  %v5187_v1 = vld [vmem:[#allocation45_spill] sm:$0xff] }
 0x246   : > { %v2246_v11 = vadd.f32 %v2245_v60, %v1957_v51  ;;  %v1702_v15 = vadd.f32 %v1701_v59, %v5175_v34  ;;  %v1971_v60 = vmul.f32 %v5187_v1, %v5187_v1  ;;  %v5188_v59 = vld [vmem:[#allocation46_spill] sm:$0xff] }
 0x247   : > { %v2114_v25 = vadd.f32 %v2113_v3, %v1958_v41  ;;  %v1570_v28 = vadd.f32 %v1569_v5, %v5176_v48  ;;  %v1972_v3 = vmul.f32 %v5188_v59, %v5188_v59  ;;  %v5189_v5 = vld [vmem:[#allocation47_spill] sm:$0xff] }
 0x248   : > { %v2247_v30 = vadd.f32 %v2246_v11, %v1959_v39  ;;  %v1703_v57 = vadd.f32 %v1702_v15, %v5177_v9  ;;  %v1973_v11 = vmul.f32 %v5189_v5, %v5189_v5  ;;  %v5190_v15 = vld [vmem:[#allocation48_spill] sm:$0xff] }
 0x249   : > { %v2115_v2 = vadd.f32 %v2114_v25, %v1960_v14  ;;  %v1571_v46 = vadd.f32 %v1570_v28, %v5178_v23  ;;  %v1974_v25 = vmul.f32 %v5190_v15, %v5190_v15  ;;  %v5191_v28 = vld [vmem:[#allocation49_spill] sm:$0xff] }
 0x24a   : > { %v2248_v20 = vadd.f32 %v2247_v30, %v1961_v38  ;;  %v1704_v12 = vadd.f32 %v1703_v57, %v5179_v58  ;;  %v1975_v30 = vmul.f32 %v5191_v28, %v5191_v28  ;;  %v5192_v57 = vld [vmem:[#allocation50_spill] sm:$0xff] }
 0x24b   : > { %v2116_v0 = vadd.f32 %v2115_v2, %v1962_v62  ;;  %v1572_v43 = vadd.f32 %v1571_v46, %v5180_v21  ;;  %v1976_v2 = vmul.f32 %v5192_v57, %v5192_v57  ;;  %v5193_v46 = vld [vmem:[#allocation51_spill] sm:$0xff] }
 0x24c   : > { %v2249_v13 = vadd.f32 %v2248_v20, %v1963_v4  ;;  %v1705_v18 = vadd.f32 %v1704_v12, %v5181_v50  ;;  %v1977_v20 = vmul.f32 %v5193_v46, %v5193_v46  ;;  %v5194_v12 = vld [vmem:[#allocation52_spill] sm:$0xff] }
 0x24d   : > { %v2117_v24 = vadd.f32 %v2116_v0, %v1964_v7  ;;  %v1573_v8 = vadd.f32 %v1572_v43, %v5182_v33  ;;  %v1978_v0 = vmul.f32 %v5194_v12, %v5194_v12  ;;  %v5195_v43 = vld [vmem:[#allocation53_spill] sm:$0xff] }
 0x24e   : > { %v2250_v40 = vadd.f32 %v2249_v13, %v1965_v17  ;;  %v1706_v37 = vadd.f32 %v1705_v18, %v5183_v29  ;;  %v1979_v13 = vmul.f32 %v5195_v43, %v5195_v43  ;;  %v5196_v18 = vld [vmem:[#allocation54_spill] sm:$0xff] }
 0x24f   : > { %v2118_v22 = vadd.f32 %v2117_v24, %v1966_v55  ;;  %v1574_v56 = vadd.f32 %v1573_v8, %v5184_v35  ;;  %v1980_v24 = vmul.f32 %v5196_v18, %v5196_v18  ;;  %v5197_v8 = vld [vmem:[#allocation55_spill] sm:$0xff] }
 0x250   : > { %v2251_v47 = vadd.f32 %v2250_v40, %v1967_v49  ;;  %v1707_v44 = vadd.f32 %v1706_v37, %v5185_v10  ;;  %v1981_v40 = vmul.f32 %v5197_v8, %v5197_v8  ;;  %v5198_v37 = vld [vmem:[#allocation56_spill] sm:$0xff] }
 0x251   : > { %v2119_v19 = vadd.f32 %v2118_v22, %v1968_v45  ;;  %v1575_v54 = vadd.f32 %v1574_v56, %v5186_v31  ;;  %v1982_v22 = vmul.f32 %v5198_v37, %v5198_v37  ;;  %v5199_v56 = vld [vmem:[#allocation57_spill] sm:$0xff] }
 0x252   : > { %v2252_v61 = vadd.f32 %v2251_v47, %v1969_v52  ;;  %v1708_v42 = vadd.f32 %v1707_v44, %v5187_v1  ;;  %v1983_v47 = vmul.f32 %v5199_v56, %v5199_v56  ;;  %v5200_v44 = vld [vmem:[#allocation58_spill] sm:$0xff] }
 0x253   : > { %v2120_v36 = vadd.f32 %v2119_v19, %v1970_v27  ;;  %v1576_v51 = vadd.f32 %v1575_v54, %v5188_v59  ;;  %v1984_v19 = vmul.f32 %v5200_v44, %v5200_v44  ;;  %v5201_v54 = vld [vmem:[#allocation59_spill] sm:$0xff] }
 0x254   : > { %v2253_v16 = vadd.f32 %v2252_v61, %v1971_v60  ;;  %v1709_v41 = vadd.f32 %v1708_v42, %v5189_v5  ;;  %v1985_v61 = vmul.f32 %v5201_v54, %v5201_v54  ;;  %v5202_v42 = vld [vmem:[#allocation60_spill] sm:$0xff] }
 0x255   : > { %v2121_v34 = vadd.f32 %v2120_v36, %v1972_v3  ;;  %v1577_v39 = vadd.f32 %v1576_v51, %v5190_v15  ;;  %v1986_v36 = vmul.f32 %v5202_v42, %v5202_v42  ;;  %v5203_v51 = vld [vmem:[#allocation61_spill] sm:$0xff] }
 0x256   : > { %v2254_v48 = vadd.f32 %v2253_v16, %v1973_v11  ;;  %v1710_v14 = vadd.f32 %v1709_v41, %v5191_v28  ;;  %v1987_v16 = vmul.f32 %v5203_v51, %v5203_v51  ;;  %v5204_v41 = vld [vmem:[#allocation62_spill] sm:$0xff] }
 0x257   : > { %v2122_v9 = vadd.f32 %v2121_v34, %v1974_v25  ;;  %v1578_v38 = vadd.f32 %v1577_v39, %v5192_v57  ;;  %v1988_v34 = vmul.f32 %v5204_v41, %v5204_v41  ;;  %v5205_v39 = vld [vmem:[#allocation63_spill] sm:$0xff] }
 0x258   : > { %v2255_v23 = vadd.f32 %v2254_v48, %v1975_v30  ;;  %v1711_v62 = vadd.f32 %v1710_v14, %v5193_v46  ;;  %v1989_v48 = vmul.f32 %v5205_v39, %v5205_v39  ;;  %v5206_v14 = vld [vmem:[#allocation64_spill] sm:$0xff] }
 0x259   : > { %v2123_v58 = vadd.f32 %v2122_v9, %v1976_v2  ;;  %v1579_v4 = vadd.f32 %v1578_v38, %v5194_v12  ;;  %v1990_v9 = vmul.f32 %v5206_v14, %v5206_v14  ;;  %v5207_v38 = vld [vmem:[#allocation65_spill] sm:$0xff] }
 0x25a   : > { %v2256_v21 = vadd.f32 %v2255_v23, %v1977_v20  ;;  %v1712_v7 = vadd.f32 %v1711_v62, %v5195_v43  ;;  %v1991_v23 = vmul.f32 %v5207_v38, %v5207_v38  ;;  %v5208_v62 = vld [vmem:[#allocation66_spill] sm:$0xff] }
 0x25b   : > { %v2124_v50 = vadd.f32 %v2123_v58, %v1978_v0  ;;  %v1580_v17 = vadd.f32 %v1579_v4, %v5196_v18  ;;  %v1992_v58 = vmul.f32 %v5208_v62, %v5208_v62  ;;  %v5209_v4 = vld [vmem:[#allocation67_spill] sm:$0xff] }
 0x25c   : > { %v2257_v33 = vadd.f32 %v2256_v21, %v1979_v13  ;;  %v1713_v55 = vadd.f32 %v1712_v7, %v5197_v8  ;;  %v1993_v21 = vmul.f32 %v5209_v4, %v5209_v4  ;;  %v5210_v7 = vld [vmem:[#allocation68_spill] sm:$0xff] }
 0x25d   : > { %v2125_v29 = vadd.f32 %v2124_v50, %v1980_v24  ;;  %v1581_v49 = vadd.f32 %v1580_v17, %v5198_v37  ;;  %v1994_v50 = vmul.f32 %v5210_v7, %v5210_v7  ;;  %v5211_v17 = vld [vmem:[#allocation69_spill] sm:$0xff] }
 0x25e   : > { %v2258_v35 = vadd.f32 %v2257_v33, %v1981_v40  ;;  %v1714_v45 = vadd.f32 %v1713_v55, %v5199_v56  ;;  %v1995_v33 = vmul.f32 %v5211_v17, %v5211_v17  ;;  %v5212_v55 = vld [vmem:[#allocation70_spill] sm:$0xff] }
 0x25f   : > { %v2126_v10 = vadd.f32 %v2125_v29, %v1982_v22  ;;  %v1582_v52 = vadd.f32 %v1581_v49, %v5200_v44  ;;  %v1996_v29 = vmul.f32 %v5212_v55, %v5212_v55  ;;  %v5213_v49 = vld [vmem:[#allocation71_spill] sm:$0xff]  ;;  %v5214_v44 = vld [vmem:[#allocation72_spill] sm:$0xff] }
 0x260   : > { %v2259_v31 = vadd.f32 %v2258_v35, %v1983_v47  ;;  %v1715_v27 = vadd.f32 %v1714_v45, %v5201_v54  ;;  %v1997_v35 = vmul.f32 %v5213_v49, %v5213_v49  ;;  %v1998_v47 = vmul.f32 %v4423_v32, %v4423_v32  ;;  %v5215_v54 = vld [vmem:[#allocation73_spill] sm:$0xff] }
 0x261   : > { %v2127_v1 = vadd.f32 %v2126_v10, %v1984_v19  ;;  %v1583_v60 = vadd.f32 %v1582_v52, %v5202_v42  ;;  %v1999_v19 = vmul.f32 %v5214_v44, %v5214_v44  ;;  %v5216_v42 = vld [vmem:[#allocation74_spill] sm:$0xff] }
 0x262   : > { %v2260_v59 = vadd.f32 %v2259_v31, %v1985_v61  ;;  %v1716_v3 = vadd.f32 %v1715_v27, %v5203_v51  ;;  %v2000_v61 = vmul.f32 %v5215_v54, %v5215_v54 }
 0x263   : > { %v2128_v5 = vadd.f32 %v2127_v1, %v1986_v36  ;;  %v1584_v11 = vadd.f32 %v1583_v60, %v5204_v41  ;;  %v2001_v36 = vmul.f32 %v5216_v42, %v5216_v42 }
 0x264   : > { %v2261_v15 = vadd.f32 %v2260_v59, %v1987_v16  ;;  %v1717_v25 = vadd.f32 %v1716_v3, %v5205_v39 }
 0x265   : > { %v2129_v28 = vadd.f32 %v2128_v5, %v1988_v34  ;;  %v1585_v30 = vadd.f32 %v1584_v11, %v5206_v14  ;;  %v5218_v5 = vld [vmem:[#allocation76_spill] sm:$0xff] }
 0x266   : > { %v2262_v57 = vadd.f32 %v2261_v15, %v1989_v48  ;;  %v1718_v2 = vadd.f32 %v1717_v25, %v5207_v38  ;;  %v2003_v11 = vmul.f32 %v5218_v5, %v5218_v5  ;;  %v5219_v15 = vld [vmem:[#allocation77_spill] sm:$0xff] }
 0x267   : > { %v2130_v46 = vadd.f32 %v2129_v28, %v1990_v9  ;;  %v1586_v20 = vadd.f32 %v1585_v30, %v5208_v62  ;;  %v2004_v25 = vmul.f32 %v5219_v15, %v5219_v15  ;;  %v5220_v28 = vld [vmem:[#allocation78_spill] sm:$0xff] }
 0x268   : > { %v2263_v12 = vadd.f32 %v2262_v57, %v1991_v23  ;;  %v1719_v0 = vadd.f32 %v1718_v2, %v5209_v4  ;;  %v2005_v30 = vmul.f32 %v5220_v28, %v5220_v28  ;;  %v5221_v57 = vld [vmem:[#allocation79_spill] sm:$0xff] }
 0x269   : > { %v2131_v43 = vadd.f32 %v2130_v46, %v1992_v58  ;;  %v1587_v13 = vadd.f32 %v1586_v20, %v5210_v7  ;;  %v2006_v2 = vmul.f32 %v5221_v57, %v5221_v57  ;;  %v5222_v46 = vld [vmem:[#allocation80_spill] sm:$0xff] }
 0x26a   : > { %v2264_v18 = vadd.f32 %v2263_v12, %v1993_v21  ;;  %v1720_v24 = vadd.f32 %v1719_v0, %v5211_v17  ;;  %v2007_v20 = vmul.f32 %v5222_v46, %v5222_v46  ;;  %v5223_v12 = vld [vmem:[#allocation81_spill] sm:$0xff] }
 0x26b   : > { %v2132_v8 = vadd.f32 %v2131_v43, %v1994_v50  ;;  %v1588_v40 = vadd.f32 %v1587_v13, %v5212_v55  ;;  %v2008_v0 = vmul.f32 %v5223_v12, %v5223_v12  ;;  %v5224_v43 = vld [vmem:[#allocation82_spill] sm:$0xff]  ;;  %v5226_v55 = vld [vmem:[#allocation84_spill] sm:$0xff] }
 0x26c   : > { %v2265_v37 = vadd.f32 %v2264_v18, %v1995_v33  ;;  %v1721_v22 = vadd.f32 %v1720_v24, %v5213_v49  ;;  %v2009_v13 = vmul.f32 %v5224_v43, %v5224_v43  ;;  %v5225_v18 = vld [vmem:[#allocation83_spill] sm:$0xff]  ;;  %v2012_v33 = vmul.f32 %v4483_v26, %v4483_v26 }
 0x26d   : > { %v2133_v56 = vadd.f32 %v2132_v8, %v1996_v29  ;;  %v1589_v45 = vadd.f32 %v1588_v40, %v4423_v32  ;;  %v5217_v32 = vld [vmem:[#allocation75_spill] sm:$0xff]  ;;  %v2010_v24 = vmul.f32 %v5225_v18, %v5225_v18  ;;  %v2011_v29 = vmul.f32 %v5226_v55, %v5226_v55 }
 0x26e   : > { %v2266_v10 = vadd.f32 %v2265_v37, %v1997_v35  ;;  %v1722_v52 = vadd.f32 %v1721_v22, %v5214_v44  ;;  %v2002_v3 = vmul.f32 %v5217_v32, %v5217_v32  ;;  %v2013_v37 = vmul.f32 %v4485_v53, %v4485_v53 }
 0x26f   : > { %v2134_v31 = vadd.f32 %v2133_v56, %v1998_v47  ;;  %v1590_v27 = vadd.f32 %v1589_v45, %v5215_v54 }
 0x270   : > { %v2267_v1 = vadd.f32 %v2266_v10, %v1999_v19  ;;  %v1723_v60 = vadd.f32 %v1722_v52, %v5216_v42  ;;  %v2014_v10 = vmul.f32 %v4487_v63, %v4487_v63  ;;  %v2015_v19 = vmul.f32 %v4490_v6, %v4490_v6 }
 0x271   : > { %v2135_v59 = vadd.f32 %v2134_v31, %v2000_v61  ;;  %v1591_v51 = vadd.f32 %v1590_v27, %v5217_v32  ;;  %v3765_v42 = vmov 1966171168  }
 0x272   : > { %v2268_v16 = vadd.f32 %v2267_v1, %v2001_v36  ;;  %v1724_v41 = vadd.f32 %v1723_v60, %v5218_v5  ;;  %v1741_v60 = vunpack.c.l.s4 %v3765_v42  ;;  %v1743_v36 = vlaneseq }
 0x273   : > { %v2136_v34 = vadd.f32 %v2135_v59, %v2002_v3  ;;  %v1592_v39 = vadd.f32 %v1591_v51, %v5219_v15 }
 0x274   : > { %v2269_v48 = vadd.f32 %v2268_v16, %v2003_v11  ;;  %v1725_v14 = vadd.f32 %v1724_v41, %v5220_v28  ;;  %v1742_v41 = vunpack.c.0.s8 %v1741_v60  ;;  %v1744_v11 = vshrl.u32 %v1743_v36, 7 }
 0x275   : > { %v2137_v9 = vadd.f32 %v2136_v34, %v2004_v25  ;;  %v1593_v38 = vadd.f32 %v1592_v39, %v5221_v57  ;;  %vm1757_vm0 = vcmp.lt.s32.totalorder %v1743_v36, 256 }
 0x276   : > { %v2270_v23 = vadd.f32 %v2269_v48, %v2005_v30  ;;  %v1726_v62 = vadd.f32 %v1725_v14, %v5222_v46 }
 0x277   : > { %v2138_v58 = vadd.f32 %v2137_v9, %v2006_v2  ;;  %v1594_v4 = vadd.f32 %v1593_v38, %v5223_v12  ;;  %v1745_v9 = vsub.s32 %v1742_v41, %v1744_v11 }
 0x278   : > { %v2271_v21 = vadd.f32 %v2270_v23, %v2007_v20  ;;  %v1727_v7 = vadd.f32 %v1726_v62, %v5224_v43 }
 0x279   : > { %v2139_v50 = vadd.f32 %v2138_v58, %v2008_v0  ;;  %v1595_v17 = vadd.f32 %v1594_v4, %v5225_v18 }
 0x27a   : > { %v2272_v8 = vadd.f32 %v2271_v21, %v2009_v13  ;;  %v1728_v40 = vadd.f32 %v1727_v7, %v5226_v55 }
 0x27b   : > { %v2140_v49 = vadd.f32 %v2139_v50, %v2010_v24  ;;  %v1596_v22 = vadd.f32 %v1595_v17, %v4483_v26 }
 0x27c   : > { %v2273_v35 = vadd.f32 %v2272_v8, %v2011_v29  ;;  %v1729_v56 = vadd.f32 %v1728_v40, %v4485_v53 }
 0x27d   : > { %v2141_v45 = vadd.f32 %v2140_v49, %v2012_v33  ;;  %v1597_v47 = vadd.f32 %v1596_v22, %v4487_v63 }
 0x27e   : > { %v2274_v44 = vadd.f32 %v2273_v35, %v2013_v37  ;;  %v1730_v52 = vadd.f32 %v1729_v56, %v4490_v6 }
 0x27f   : > { %v1598_v31 = vrot.slane %v1597_v47, 4  ;;  %v2142_v54 = vadd.f32 %v2141_v45, %v2014_v10 }
 0x280   : > { %v1731_v27 = vrot.slane %v1730_v52, 4  ;;  %v2275_v26 = vadd.f32 %v2274_v44, %v2015_v19 }
 0x281   : > { %v1599_v61 = vadd.f32 %v1598_v31, %v1597_v47  ;;  %v2143_v1 = vrot.slane %v2142_v54, 4 }
 0x282   : > { %v1732_v53 = vadd.f32 %v1731_v27, %v1730_v52  ;;  %v2276_v59 = vrot.slane %v2275_v26, 4 }
 0x283   : > { %v1600_v63 = vrot.slane %v1599_v61, 2  ;;  %v2144_v32 = vadd.f32 %v2143_v1, %v2142_v54 }
 0x284   : > { %v1733_v51 = vrot.slane %v1732_v53, 2  ;;  %v2277_v3 = vadd.f32 %v2276_v59, %v2275_v26 }
 0x285   : > { %v1601_v16 = vadd.f32 %v1600_v63, %v1599_v61  ;;  %v2145_v5 = vrot.slane %v2144_v32, 2 }
 0x286   : > { %v1734_v6 = vadd.f32 %v1733_v51, %v1732_v53  ;;  %v2278_v34 = vrot.slane %v2277_v3, 2 }
 0x287   : > { %v1602_v15 = vrot.slane %v1601_v16, 1  ;;  %v2146_v39 = vadd.f32 %v2145_v5, %v2144_v32 }
 0x288   : > { %v1735_v25 = vrot.slane %v1734_v6, 1  ;;  %v2279_v48 = vadd.f32 %v2278_v34, %v2277_v3 }
 0x289   : > { %v1603_v28 = vadd.f32 %v1602_v15, %v1601_v16  ;;  %v2147_v14 = vrot.slane %v2146_v39, 1 }
 0x28a   : > { %v1736_v30 = vadd.f32 %v1735_v25, %v1734_v6  ;;  %v2280_v57 = vrot.slane %v2279_v48, 1 }
 0x28b   : > { %v2148_v38 = vadd.f32 %v2147_v14, %v2146_v39 }
 0x28c   : > { %v1739_v2 = vcombine.low %v1603_v28, %v1736_v30  ;;  %v2281_v23 = vadd.f32 %v2280_v57, %v2279_v48 }
 0x28e   : > { %v1746_v46 = vrot.slane %v1739_v2, %v1745_v9  ;;  %v2284_v62 = vcombine.low %v2148_v38, %v2281_v23 }
 0x290   : > { %v1753_v20 = vrot.slane %v1746_v46, %v1745_v9  ;;  %v2291_v58 = vrot.slane %v2284_v62, %v1745_v9 }
 0x292   : > { %1759 = vst.msk [vmem:[%s188_s6] ss:$2 sm:$0x3] %vm1757_vm0, %v1753_v20  ;;  %v2298_v12 = vrot.slane %v2291_v58, %v1745_v9 }
 0x294   : > { %3381 = vst.msk [vmem:[%s188_s6 + $0x1] ss:$2 sm:$0x3] %vm1757_vm0, %v2298_v12 }
 0x295 PF: > { %s14_s12 = sadd.s32 1, %s3762_s12  }
 0x296   : > { %p11_p5 = scmp.ge.s32.totalorder %s14_s12, 4  }
 0x298   :  { %13 = sbr.rel (!%p11_p5) target bundleno = 1 (0x1), region = 71 }

// kernel: residual_block.4
= control target key start
LH: loop header
LB: loop body
LE: loop exit
PB: predicated region body
PF: predicated region fallthrough
CT: control target
= control target key end

     0   :  { %s4794_s21 = smov 0   ;;  %s7177_s0 = inlined_call_operand.vmem [shape: bf16[2048,256], index: 0, kind: input, shape index: {}]   ;;  %s7178_s1 = inlined_call_operand.vmem [shape: f32[2,2,256], index: 1, kind: input, shape index: {}]   ;;  %s7179_s2 = inlined_call_operand.vmem [shape: f32[1,256], index: 2, kind: input, shape index: {}]   ;;  %s7180_s3 = inlined_call_operand.vmem [shape: f32[1,256], index: 3, kind: input, shape index: {}]   ;;  %s7181_s4 = inlined_call_operand.vmem [shape: bf16[256,256], index: 4, kind: input, shape index: {}]   ;;  %s7182_s5 = inlined_call_operand.vmem [shape: bf16[2048,256], index: 5, kind: output, shape index: {0}]   ;;  %s7183_s6 = inlined_call_operand.vmem [shape: f32[2,2,256], index: 6, kind: output, shape index: {1}]  }
   0x1 LB: > { %s4800_s22 = sadd.s32 4294967295, %s4756_s21   ;;  %p4352_p0 = scmp.ge.s32.totalorder %s4756_s21, 1  ;;  %s4756_s21 = sphi %s4794_s21, %s17_s21  }
   0x2   : > { %p217_p1 = scmp.lt.s32.totalorder %s4756_s21, 3 }
   0x4   : > { %p218_p2 = pnand %p4352_p0, %p217_p1 }
   0x6   : > { %221 = sbr.rel (%p218_p2) target bundleno = 705 (0x2c1), region = 40 }
   0xd   : > { %v4698_v0 = vld [vmem:[%s7181_s4 + $0x4] ss:$8 sps:$4 sm:$0xff]   ;;  %v4700_v1 = vld [vmem:[%s7181_s4] ss:$8 sps:$4 sm:$0xff]   ;;  %v4701_v2 = vld [vmem:[%s7181_s4 + $0x14] ss:$8 sps:$4 sm:$0xff]   ;;  %v7184_v43 = vlaneseq }
   0xe   : > { %1857 = vmatprep.subr.bf16.mxu0 %v4698_v0  ;;  %4657 = vmatprep.subr.bf16.mxu1 %v4698_v0  ;;  %v4703_v3 = vld [vmem:[%s7181_s4 + $0x10] ss:$8 sps:$4 sm:$0xff]   ;;  %v4704_v4 = vld [vmem:[%s7181_s4 + $0x24] ss:$8 sps:$4 sm:$0xff]   ;;  %v4706_v5 = vld [vmem:[%s7181_s4 + $0x20] ss:$8 sps:$4 sm:$0xff]  }
   0xf   : > { %1858 = vmatpush1.bf16.msra.mxu0 %v4700_v1  ;;  %4673 = vmatpush1.bf16.msra.mxu1 %v4700_v1  ;;  %v4707_v6 = vld [vmem:[%s7181_s4 + $0x34] ss:$8 sps:$4 sm:$0xff]   ;;  %v4709_v7 = vld [vmem:[%s7181_s4 + $0x30] ss:$8 sps:$4 sm:$0xff]   ;;  %v4710_v8 = vld [vmem:[%s7181_s4 + $0x44] ss:$8 sps:$4 sm:$0xff]  }
  0x10   : > { %1859 = vmatprep.subr.bf16.mxu0 %v4701_v2  ;;  %4658 = vmatprep.subr.bf16.mxu1 %v4701_v2  ;;  %v4712_v9 = vld [vmem:[%s7181_s4 + $0x40] ss:$8 sps:$4 sm:$0xff]   ;;  %v4713_v10 = vld [vmem:[%s7181_s4 + $0x54] ss:$8 sps:$4 sm:$0xff]   ;;  %v4715_v11 = vld [vmem:[%s7181_s4 + $0x50] ss:$8 sps:$4 sm:$0xff]  }
  0x11   : > { %v4716_v12 = vld [vmem:[%s7181_s4 + $0x64] ss:$8 sps:$4 sm:$0xff]   ;;  %vm299_vm0 = vcmask 1041408   ;;  %v4718_v16 = vld [vmem:[%s7181_s4 + $0x60] ss:$8 sps:$4 sm:$0xff]   ;;  %s4353_s11 = sshll.u32 %s4800_s22, 7 }
  0x12   : > { %v4361_v13 = vld.sshfl [vmem:[%s7178_s1] sm:$0x33 pattern:$0x76325410]  ;;  %v4719_v20 = vld [vmem:[%s7181_s4 + $0x74] ss:$8 sps:$4 sm:$0xff]  }
  0x13   : > { %1860 = vmatpush1.bf16.msra.mxu0 %v4703_v3  ;;  %4674 = vmatpush1.bf16.msra.mxu1 %v4703_v3  ;;  %v4362_v14 = vld.sshfl [vmem:[%s7178_s1 + $0x4] sm:$0x33 pattern:$0x76325410]  ;;  %v286_v15 = vcombine.high %v4361_v13, %v4361_v13  ;;  %v300_v18 = vsel %vm299_vm0, %v4361_v13, 0.0  ;;  %p255_p3 = scmp.lt.s32.totalorder %s4353_s11, 255 }
  0x14   : > { %1861 = vmatprep.subr.bf16.mxu0 %v4704_v4  ;;  %4659 = vmatprep.subr.bf16.mxu1 %v4704_v4  ;;  %v294_v17 = vcombine.high %v4362_v14, %v4362_v14  ;;  %v301_v19 = vsel %vm299_vm0, %v4362_v14, 0.0  ;;  %v4721_v26 = vld [vmem:[%s7181_s4 + $0x70] ss:$8 sps:$4 sm:$0xff]   ;;  %v4722_v27 = vld [vmem:[%s7181_s4 + $0x84] ss:$8 sps:$4 sm:$0xff]   ;;  %v4905_v47 = vshrl.u32 %v7184_v43, 7 }
  0x15   : > { %v302_v21 = vadd.f32 %v301_v19, %v300_v18  ;;  %v303_v22 = vsel %vm299_vm0, %v286_v15, 0.0  ;;  %v4724_v32 = vld [vmem:[%s7181_s4 + $0x80] ss:$8 sps:$4 sm:$0xff]   ;;  %v4725_v33 = vld [vmem:[%s7181_s4 + $0x94] ss:$8 sps:$4 sm:$0xff]   ;;  %s7454_s11 = smov (!%p255_p3, %s4353_s11), 255 }
  0x16   : > { %v304_v23 = vsel %vm299_vm0, %v294_v17, 0.0  ;;  %v4727_v38 = vld [vmem:[%s7181_s4 + $0x90] ss:$8 sps:$4 sm:$0xff]   ;;  %v4728_v39 = vld [vmem:[%s7181_s4 + $0xa4] ss:$8 sps:$4 sm:$0xff]   ;;  %s4526_s26 = sshll.u32 %s7454_s11, 3 }
  0x17   : > { %1862 = vmatpush1.bf16.msra.mxu0 %v4706_v5  ;;  %4675 = vmatpush1.bf16.msra.mxu1 %v4706_v5  ;;  %v305_v24 = vadd.f32 %v304_v23, %v303_v22  ;;  %v4860_v25 = vmul.f32 0.00048828125, %v302_v21  ;;  %v4758_v41 = vmov 1966171168   ;;  %v4730_v44 = vld [vmem:[%s7181_s4 + $0xa0] ss:$8 sps:$4 sm:$0xff]   ;;  %s4899_s7 = scalar_lea.vmem %s7177_s0, %s4526_s26  ;;  %v7185_v56 = vsub.s32 0, %v4905_v47  ;;  %s6047_s16 = scalar_lea.vmem %s7182_s5, %s4526_s26 }
  0x18   : > { %1863 = vmatprep.subr.bf16.mxu0 %v4707_v6  ;;  %4660 = vmatprep.subr.bf16.mxu1 %v4707_v6  ;;  %v326_v42 = vunpack.c.l.s4 %v4758_v41  ;;  %v4731_v45 = vld [vmem:[%s7181_s4 + $0xb4] ss:$8 sps:$4 sm:$0xff]   ;;  %v4908_v48 = vld [vmem:[%s4899_s7] sm:$0xff]  ;;  %v4733_v49 = vld [vmem:[%s7181_s4 + $0xb0] ss:$8 sps:$4 sm:$0xff]   ;;  %v7186_v57 = vsub.s32 1, %v4905_v47 }
  0x19   : > { %v4868_v28 = vmul.f32 0.00048828125, %v305_v24  ;;  %v308_v29 = vmul.f32 %v4860_v25, %v4860_v25  ;;  %v4914_v50 = vld [vmem:[%s4899_s7 + $0x8] sm:$0xff]  ;;  %v4917_v51 = vld [vmem:[%s4899_s7 + $0x10] sm:$0xff]  ;;  %v4923_v53 = vld [vmem:[%s4899_s7 + $0x18] sm:$0xff]  ;;  %v502_v58 = vunpack.c.l.bf16 %v4908_v48  ;;  %v503_v62 = vunpack.c.h.bf16 %v4908_v48  ;;  %p268_p4 = scmp.lt.s32.totalorder %s4800_s22, 1 }
  0x1a   : > { %v327_v46 = vunpack.c.0.s8 %v326_v42  ;;  %v4734_v52 = vld [vmem:[%s7181_s4 + $0xc4] ss:$8 sps:$4 sm:$0xff]   ;;  %v4938_v60 = vld [vmem:[%s4899_s7 + $0x30] sm:$0xff]  ;;  %v504_v63 = vunpack.c.l.bf16 %v4914_v50  ;;  %v505_v0 = vunpack.c.h.bf16 %v4914_v50  ;;  %v507_v1 = vunpack.c.h.bf16 %v4917_v51  ;;  %v4945_v2 = vld [vmem:[%s4899_s7 + $0x38] sm:$0xff] }
  0x1b   : > { %1864 = vmatpush1.bf16.msra.mxu0 %v4709_v7  ;;  %4676 = vmatpush1.bf16.msra.mxu1 %v4709_v7  ;;  %v309_v30 = vmul.f32 %v4868_v28, %v4868_v28  ;;  %v312_v31 = vrot.slane %v308_v29, 7  ;;  %v4926_v54 = vld [vmem:[%s4899_s7 + $0x20] sm:$0xff]  ;;  %v4935_v59 = vld [vmem:[%s4899_s7 + $0x28] sm:$0xff]  ;;  %v509_v4 = vunpack.c.h.bf16 %v4923_v53  ;;  %v506_v5 = vunpack.c.l.bf16 %v4917_v51  ;;  %v4971_v17 = vld [vmem:[%s4899_s7 + $0x58] sm:$0xff]  ;;  %s7456_s22 = smov (!%p268_p4, %s4800_s22), 1 }
  0x1c   : > { %1865 = vmatprep.subr.bf16.mxu0 %v4710_v8  ;;  %4661 = vmatprep.subr.bf16.mxu1 %v4710_v8  ;;  %v4929_v55 = vsub.s32 %v327_v46, %v4905_v47  ;;  %v4736_v3 = vld [vmem:[%s7181_s4 + $0xc0] ss:$8 sps:$4 sm:$0xff]   ;;  %v508_v6 = vunpack.c.l.bf16 %v4923_v53  ;;  %v511_v7 = vunpack.c.h.bf16 %v4926_v54  ;;  %v510_v13 = vunpack.c.l.bf16 %v4926_v54  ;;  %v4743_v41 = vld [vmem:[%s7181_s4 + $0xf4] ss:$8 sps:$4 sm:$0xff]   ;;  %s4528_s11 = sshll.u32 %s7456_s22, 2 }
  0x1d   : > { %v313_v34 = vrot.slane %v309_v30, 7  ;;  %v316_v35 = vsub.f32 %v4860_v25, %v312_v31  ;;  %v4955_v8 = vld [vmem:[%s4899_s7 + $0x40] sm:$0xff]  ;;  %v512_v14 = vunpack.c.l.bf16 %v4935_v59  ;;  %v515_v15 = vunpack.c.h.bf16 %v4938_v60  ;;  %v4980_v23 = vld [vmem:[%s4899_s7 + $0x68] sm:$0xff]  ;;  %v4987_v30 = vld [vmem:[%s4899_s7 + $0x70] sm:$0xff]  ;;  %s272_s17 = scalar_lea.vmem %s7183_s6, %s4528_s11 }
  0x1e   : > { %7297 = vst [vmem:[#allocation2_spill] sm:$0xff] %v4929_v55  ;;  %v517_v19 = vunpack.c.h.bf16 %v4945_v2  ;;  %v516_v21 = vunpack.c.l.bf16 %v4945_v2  ;;  %v4977_v22 = vld [vmem:[%s4899_s7 + $0x60] sm:$0xff]  ;;  %v519_v24 = vunpack.c.h.bf16 %v4955_v8  ;;  %v4990_v31 = vld [vmem:[%s4899_s7 + $0x78] sm:$0xff]  ;;  %v5064_v29 = vld [vmem:[%s4899_s7 + $0xd0] sm:$0xff] }
  0x1f   : > { %1866 = vmatpush1.bf16.msra.mxu0 %v4712_v9  ;;  %4677 = vmatpush1.bf16.msra.mxu1 %v4712_v9  ;;  %v317_v36 = vsub.f32 %v4868_v28, %v313_v34  ;;  %v318_v37 = vadd.f32 0.001, %v316_v35  ;;  %v4958_v9 = vld [vmem:[%s4899_s7 + $0x48] sm:$0xff]  ;;  %v5067_v42 = vld [vmem:[%s4899_s7 + $0xd8] sm:$0xff]  ;;  %v276_v51 = vld [vmem:[%s7180_s3] sm:$0x3] }
  0x20   : > { %1867 = vmatprep.subr.bf16.mxu0 %v4713_v10  ;;  %4662 = vmatprep.subr.bf16.mxu1 %v4713_v10  ;;  %7298 = vst [vmem:[#allocation3_spill] sm:$0xff] %v5067_v42 }
  0x21   : > { %v319_v40 = vadd.f32 0.001, %v317_v36  ;;  %4746 = vrsqrt.f32 %v318_v37  ;;  %v5000_v37 = vld [vmem:[%s4899_s7 + $0x80] sm:$0xff]  ;;  %v5058_v36 = vld [vmem:[%s4899_s7 + $0xc8] sm:$0xff] }
  0x23   : > { %1868 = vmatpush1.bf16.msra.mxu0 %v4715_v11  ;;  %4678 = vmatpush1.bf16.msra.mxu1 %v4715_v11  ;;  %4748 = vrsqrt.f32 %v319_v40  ;;  %v4737_v11 = vld [vmem:[%s7181_s4 + $0xd4] ss:$8 sps:$4 sm:$0xff]   ;;  %v5055_v40 = vld [vmem:[%s4899_s7 + $0xc0] sm:$0xff] }
  0x24   : > { %1869 = vmatprep.subr.bf16.mxu0 %v4716_v12  ;;  %4663 = vmatprep.subr.bf16.mxu1 %v4716_v12  ;;  %v513_v12 = vunpack.c.h.bf16 %v4935_v59 }
  0x27   : > { %1870 = vmatpush1.bf16.msra.mxu0 %v4718_v16  ;;  %4679 = vmatpush1.bf16.msra.mxu1 %v4718_v16  ;;  %v4968_v16 = vld [vmem:[%s4899_s7 + $0x50] sm:$0xff] }
  0x28   : > { %1871 = vmatprep.subr.bf16.mxu0 %v4719_v20  ;;  %4664 = vmatprep.subr.bf16.mxu1 %v4719_v20  ;;  %v514_v20 = vunpack.c.l.bf16 %v4938_v60  ;;  %v7303_v60 = vunpack.c.l.bf16 %v4958_v9  ;;  %v7304_v2 = vunpack.c.h.bf16 %v4968_v16 }
  0x2b   : > { %1872 = vmatpush1.bf16.msra.mxu0 %v4721_v26  ;;  %4680 = vmatpush1.bf16.msra.mxu1 %v4721_v26  ;;  %v4747_v61 = vpop.eup %4746 }
  0x2c   : > { %1873 = vmatprep.subr.bf16.mxu0 %v4722_v27  ;;  %4665 = vmatprep.subr.bf16.mxu1 %v4722_v27  ;;  %v5087_v27 = vld [vmem:[%s4899_s7 + $0xe0] sm:$0xff] }
  0x2d   : > { %v4749_v10 = vpop.eup %4748  ;;  %7299 = vst [vmem:[#allocation4_spill] sm:$0xff] %v5087_v27 }
  0x2e   : > { %v324_v18 = vcombine.low %v4747_v61, %v4749_v10  ;;  %v5022_v10 = vld [vmem:[%s4899_s7 + $0xa0] sm:$0xff] }
  0x2f   : > { %1874 = vmatpush1.bf16.msra.mxu0 %v4724_v32  ;;  %4681 = vmatpush1.bf16.msra.mxu1 %v4724_v32  ;;  %v4739_v32 = vld [vmem:[%s7181_s4 + $0xd0] ss:$8 sps:$4 sm:$0xff]   ;;  %v4742_v61 = vld [vmem:[%s7181_s4 + $0xe0] ss:$8 sps:$4 sm:$0xff]  }
  0x30   : > { %1875 = vmatprep.subr.bf16.mxu0 %v4725_v33  ;;  %4666 = vmatprep.subr.bf16.mxu1 %v4725_v33  ;;  %v331_v33 = vrot.slane %v324_v18, %v4929_v55  ;;  %v275_v18 = vld [vmem:[%s7179_s2] sm:$0x3] }
  0x32   : > { %v332_v46 = vcombine.high %v331_v33, %v331_v33  ;;  %v5042_v33 = vld [vmem:[%s4899_s7 + $0xb0] sm:$0xff] }
  0x33   : > { %1876 = vmatpush1.bf16.msra.mxu0 %v4727_v38  ;;  %4682 = vmatpush1.bf16.msra.mxu1 %v4727_v38  ;;  %v5003_v38 = vld [vmem:[%s4899_s7 + $0x88] sm:$0xff] }
  0x34   : > { %1877 = vmatprep.subr.bf16.mxu0 %v4728_v39  ;;  %4667 = vmatprep.subr.bf16.mxu1 %v4728_v39  ;;  %v4740_v39 = vld [vmem:[%s7181_s4 + $0xe4] ss:$8 sps:$4 sm:$0xff]  }
  0x37   : > { %1878 = vmatpush1.bf16.msra.mxu0 %v4730_v44  ;;  %4683 = vmatpush1.bf16.msra.mxu1 %v4730_v44  ;;  %v339_v44 = vrot.slane %v332_v46, %v4929_v55 }
  0x38   : > { %1879 = vmatprep.subr.bf16.mxu0 %v4731_v45  ;;  %4668 = vmatprep.subr.bf16.mxu1 %v4731_v45  ;;  %v5013_v45 = vld [vmem:[%s4899_s7 + $0x90] sm:$0xff] }
  0x39   : > { %v341_v35 = vmul.f32 %v339_v44, %v275_v18  ;;  %v4745_v44 = vld [vmem:[%s7181_s4 + $0xf0] ss:$8 sps:$4 sm:$0xff]  }
  0x3b   : > { %1880 = vmatpush1.bf16.msra.mxu0 %v4733_v49  ;;  %4684 = vmatpush1.bf16.msra.mxu1 %v4733_v49  ;;  %v5032_v49 = vld [vmem:[%s4899_s7 + $0xa8] sm:$0xff]  ;;  %v5078_v18 = vrot.slane %v341_v35, %v7185_v56  ;;  %v5082_v46 = vrot.slane %v341_v35, %v7186_v57 }
  0x3c   : > { %1881 = vmatprep.subr.bf16.mxu0 %v4734_v52  ;;  %4669 = vmatprep.subr.bf16.mxu1 %v4734_v52  ;;  %v5045_v52 = vld [vmem:[%s4899_s7 + $0xb8] sm:$0xff] }
  0x3d   : > { %v353_v35 = vmul.f32 %v5078_v18, %v4860_v25  ;;  %v354_v43 = vmul.f32 %v5082_v46, %v4868_v28  ;;  %v759_v25 = vmul.f32 %v503_v62, %v5082_v46  ;;  %v761_v28 = vmul.f32 %v505_v0, %v5082_v46 }
  0x3e   : > { %v758_v57 = vmul.f32 %v502_v58, %v5078_v18  ;;  %v765_v62 = vmul.f32 %v509_v4, %v5082_v46  ;;  %v762_v0 = vmul.f32 %v506_v5, %v5078_v18  ;;  %v764_v50 = vmul.f32 %v508_v6, %v5078_v18 }
  0x3f   : > { %1882 = vmatpush1.bf16.msra.mxu0 %v4736_v3  ;;  %4685 = vmatpush1.bf16.msra.mxu1 %v4736_v3  ;;  %v5019_v3 = vld [vmem:[%s4899_s7 + $0x98] sm:$0xff]  ;;  %v767_v58 = vmul.f32 %v511_v7, %v5082_v46  ;;  %v768_v53 = vmul.f32 %v512_v14, %v5078_v18  ;;  %v771_v4 = vmul.f32 %v515_v15, %v5082_v46  ;;  %v7302_v14 = vunpack.c.l.bf16 %v4955_v8 }
  0x40   : > { %1883 = vmatprep.subr.bf16.mxu0 %v4737_v11  ;;  %4670 = vmatprep.subr.bf16.mxu1 %v4737_v11  ;;  %v773_v5 = vmul.f32 %v517_v19, %v5082_v46  ;;  %v770_v7 = vmul.f32 %v514_v20, %v5078_v18  ;;  %v772_v54 = vmul.f32 %v516_v21, %v5078_v18  ;;  %v7306_v8 = vunpack.c.l.bf16 %v4968_v16 }
  0x41   : > { %v775_v59 = vmul.f32 %v519_v24, %v5082_v46  ;;  %v5168_v15 = vmul.f32 %v7302_v14, %v5078_v18  ;;  %v5173_v19 = vmul.f32 %v7303_v60, %v5078_v18  ;;  %v5178_v20 = vmul.f32 %v7304_v2, %v5082_v46 }
  0x42   : > { %v7305_v24 = vunpack.c.h.bf16 %v4971_v17  ;;  %v7310_v16 = vunpack.c.l.bf16 %v4977_v22  ;;  %v7312_v2 = vsub.s32 1, %v4905_v47 }
  0x43   : > { %1884 = vmatpush1.bf16.msra.mxu0 %v4739_v32  ;;  %4686 = vmatpush1.bf16.msra.mxu1 %v4739_v32  ;;  %v760_v32 = vmul.f32 %v504_v63, %v5078_v18  ;;  %v769_v63 = vmul.f32 %v513_v12, %v5082_v46  ;;  %v7301_v12 = vunpack.c.h.bf16 %v4958_v9  ;;  %v7307_v9 = vunpack.c.l.bf16 %v4971_v17 }
  0x44   : > { %1885 = vmatprep.subr.bf16.mxu0 %v4740_v39  ;;  %4671 = vmatprep.subr.bf16.mxu1 %v4740_v39  ;;  %v5090_v39 = vld [vmem:[%s4899_s7 + $0xe8] sm:$0xff]  ;;  %v5208_v14 = vmul.f32 %v7310_v16, %v5078_v18  ;;  %v7311_v17 = vunpack.c.l.bf16 %v4980_v23 }
  0x45   : > { %7300 = vst [vmem:[#allocation5_spill] sm:$0xff] %v5090_v39 }
  0x46   : > { %v5213_v60 = vmul.f32 %v7311_v17, %v5078_v18 }
  0x47   : > { %1886 = vmatpush1.bf16.msra.mxu0 %v4742_v61  ;;  %4687 = vmatpush1.bf16.msra.mxu1 %v4742_v61 }
  0x48   : > { %1887 = vmatprep.subr.bf16.mxu0 %v4743_v41  ;;  %4672 = vmatprep.subr.bf16.mxu1 %v4743_v41  ;;  %v357_v41 = vcombine.low %v353_v35, %v354_v43  ;;  %v763_v43 = vmul.f32 %v507_v1, %v5082_v46  ;;  %v766_v1 = vmul.f32 %v510_v13, %v5078_v18 }
  0x49   : > { %v777_v13 = vmul.f32 %v7301_v12, %v5082_v46  ;;  %v5188_v35 = vmul.f32 %v7306_v8, %v5078_v18  ;;  %v7313_v8 = vsub.s32 0, %v4905_v47  ;;  %v7317_v47 = vunpack.c.l.bf16 %v4990_v31 }
  0x4a   : > { %v364_v48 = vrot.slane %v357_v41, %v4929_v55  ;;  %v5193_v41 = vmul.f32 %v7307_v9, %v5078_v18 }
  0x4b   : > { %1888 = vmatpush1.bf16.msra.mxu0 %v4745_v44  ;;  %4688 = vmatpush1.bf16.msra.mxu1 %v4745_v44  ;;  %v5183_v44 = vmul.f32 %v7305_v24, %v5082_v46 }
  0x4c   : > { %v371_v6 = vrot.slane %v364_v48, %v4929_v55  ;;  %v7308_v48 = vunpack.c.h.bf16 %v4977_v22  ;;  %v7315_v22 = vunpack.c.h.bf16 %v4990_v31 }
  0x4e   : > { %v373_v21 = vsub.f32 %v276_v51, %v371_v6  ;;  %v5198_v12 = vmul.f32 %v7308_v48, %v5082_v46  ;;  %v7309_v51 = vunpack.c.h.bf16 %v4980_v23  ;;  %v7314_v48 = vunpack.c.h.bf16 %v4987_v30 }
  0x4f   : > { %v5231_v16 = vmul.f32 %v7315_v22, %v5082_v46  ;;  %v7316_v23 = vunpack.c.l.bf16 %v4987_v30 }
  0x50   : > { %v5203_v6 = vmul.f32 %v7309_v51, %v5082_v46  ;;  %v5217_v24 = vrot.slane %v373_v21, %v7312_v2  ;;  %v5221_v9 = vrot.slane %v373_v21, %v7313_v8  ;;  %v5226_v51 = vmul.f32 %v7314_v48, %v5082_v46 }
  0x51   : > { %v5236_v17 = vmul.f32 %v7316_v23, %v5078_v18  ;;  %v5241_v21 = vmul.f32 %v7317_v47, %v5078_v18  ;;  %v7318_v2 = vunpack.c.h.bf16 %v5000_v37  ;;  %v7319_v48 = vunpack.c.h.bf16 %v5003_v38 }
  0x52   : > { %v1026_v56 = vadd.f32 %v5217_v24, %v759_v25  ;;  %v1028_v30 = vadd.f32 %v5217_v24, %v761_v28  ;;  %v1025_v23 = vadd.f32 %v5221_v9, %v758_v57  ;;  %v1027_v31 = vadd.f32 %v5221_v9, %v760_v32 }
  0x53   : > { %v5246_v8 = vmul.f32 %v7318_v2, %v5082_v46  ;;  %v5251_v22 = vmul.f32 %v7319_v48, %v5082_v46  ;;  %v1030_v47 = vadd.f32 %v5217_v24, %v763_v43  ;;  %v1032_v34 = vadd.f32 %v5217_v24, %v765_v62 }
  0x54   : > { %v1029_v2 = vadd.f32 %v5221_v9, %v762_v0  ;;  %v1031_v61 = vadd.f32 %v5221_v9, %v764_v50  ;;  %v1282_v11 = vmax.f32 %v1026_v56, 0.0  ;;  %v1284_v26 = vmax.f32 %v1028_v30, 0.0 }
  0x55   : > { %v1281_v48 = vmax.f32 %v1025_v23, 0.0  ;;  %v1283_v55 = vmax.f32 %v1027_v31, 0.0  ;;  %v1286_v39 = vmax.f32 %v1030_v47, 0.0  ;;  %v1288_v25 = vmax.f32 %v1032_v34, 0.0 }
  0x56   : > { %v1285_v27 = vmax.f32 %v1029_v2, 0.0  ;;  %v7320_v57 = vunpack.c.l.bf16 %v5000_v37  ;;  %v1538_v32 = vpack.c.bf16 %v1284_v26, %v1282_v11  ;;  %v1034_v62 = vadd.f32 %v5217_v24, %v767_v58 }
  0x57   : > { %v1537_v43 = vpack.c.bf16 %v1283_v55, %v1281_v48  ;;  %v1036_v0 = vadd.f32 %v5217_v24, %v769_v63  ;;  %v1540_v42 = vpack.c.bf16 %v1288_v25, %v1286_v39  ;;  %v1287_v50 = vmax.f32 %v1031_v61, 0.0 }
  0x58   : > { %v5264_v28 = vmul.f32 %v7320_v57, %v5078_v18  ;;  %v1033_v56 = vadd.f32 %v5221_v9, %v766_v1  ;;  %v1035_v30 = vadd.f32 %v5221_v9, %v768_v53  ;;  %1889 = vmatprep.mubr.bf16.mxu0 %v1538_v32  ;;  %v1290_v34 = vmax.f32 %v1034_v62, 0.0 }
  0x59   : > { %v1292_v23 = vmax.f32 %v1036_v0, 0.0  ;;  %v1038_v31 = vadd.f32 %v5217_v24, %v771_v4  ;;  %v7321_v37 = vunpack.c.l.bf16 %v5003_v38  ;;  %1890 = vmatmul.mubr.bf16.vlgmr.msra.gmra.mrb[0].mxu0 %v1537_v43  ;;  %v1040_v58 = vadd.f32 %v5217_v24, %v773_v5 }
  0x5a   : > { %v1289_v55 = vmax.f32 %v1033_v56, 0.0  ;;  %v1291_v11 = vmax.f32 %v1035_v30, 0.0  ;;  %v7322_v39 = vunpack.c.h.bf16 %v5013_v45  ;;  %1899 = vmatprep.mubr.bf16.mxu0 %v1540_v42  ;;  %v1037_v63 = vadd.f32 %v5221_v9, %v770_v7 }
  0x5b   : > { %v792_v26 = vmul.f32 %v7321_v37, %v5078_v18  ;;  %v1039_v1 = vadd.f32 %v5221_v9, %v772_v54  ;;  %v7323_v53 = vunpack.c.h.bf16 %v5019_v3  ;;  %v7324_v38 = vunpack.c.l.bf16 %v5013_v45 }
  0x5c   : > { %v795_v61 = vmul.f32 %v7322_v39, %v5082_v46  ;;  %v1539_v2 = vpack.c.bf16 %v1287_v50, %v1285_v27  ;;  %v1042_v5 = vadd.f32 %v5217_v24, %v775_v59  ;;  %v1044_v48 = vadd.f32 %v5217_v24, %v777_v13 }
  0x5d   : > { %v797_v4 = vmul.f32 %v7323_v53, %v5082_v46  ;;  %v794_v47 = vmul.f32 %v7324_v38, %v5078_v18  ;;  %v7325_v42 = vunpack.c.l.bf16 %v5019_v3  ;;  %v1542_v7 = vpack.c.bf16 %v1292_v23, %v1290_v34 }
  0x5e   : > { %v1294_v57 = vmax.f32 %v1038_v31, 0.0  ;;  %v1041_v54 = vadd.f32 %v5221_v9, %v5168_v15  ;;  %v1043_v32 = vadd.f32 %v5221_v9, %v5173_v19  ;;  %v1541_v43 = vpack.c.bf16 %v1291_v11, %v1289_v55 }
  0x5f   : > { %v796_v25 = vmul.f32 %v7325_v42, %v5078_v18  ;;  %v1296_v45 = vmax.f32 %v1040_v58, 0.0  ;;  %v1046_v27 = vadd.f32 %v5217_v24, %v5178_v20  ;;  %v1048_v59 = vadd.f32 %v5217_v24, %v5183_v44 }
  0x60   : > { %v1293_v13 = vmax.f32 %v1037_v63, 0.0  ;;  %v1295_v62 = vmax.f32 %v1039_v1, 0.0  ;;  %v1045_v3 = vadd.f32 %v5221_v9, %v5188_v35  ;;  %v1047_v0 = vadd.f32 %v5221_v9, %v5193_v41 }
  0x61   : > { %v1298_v15 = vmax.f32 %v1042_v5, 0.0  ;;  %v1300_v50 = vmax.f32 %v1044_v48, 0.0  ;;  %v1297_v56 = vmax.f32 %v1041_v54, 0.0  ;;  %v1050_v19 = vadd.f32 %v5217_v24, %v5198_v12  ;;  %1900 = vmatmul.mubr.bf16.gmra.mrb[4].mxu0 %v1539_v2 }
  0x62   : > { %v1299_v30 = vmax.f32 %v1043_v32, 0.0  ;;  %v1302_v34 = vmax.f32 %v1046_v27, 0.0  ;;  %v1304_v20 = vmax.f32 %v1048_v59, 0.0  ;;  %v1052_v44 = vadd.f32 %v5217_v24, %v5203_v6  ;;  %1909 = vmatprep.mubr.bf16.mxu0 %v1542_v7 }
  0x63   : > { %v1301_v23 = vmax.f32 %v1045_v3, 0.0  ;;  %v1303_v31 = vmax.f32 %v1047_v0, 0.0  ;;  %v1049_v35 = vadd.f32 %v5221_v9, %v5208_v14  ;;  %v1051_v41 = vadd.f32 %v5221_v9, %v5213_v60 }
  0x64   : > { %v1544_v37 = vpack.c.bf16 %v1296_v45, %v1294_v57  ;;  %v1306_v55 = vmax.f32 %v1050_v19, 0.0  ;;  %v1308_v11 = vmax.f32 %v1052_v44, 0.0  ;;  %v1054_v12 = vadd.f32 %v5217_v24, %v5226_v51 }
  0x65   : > { %v1543_v58 = vpack.c.bf16 %v1295_v62, %v1293_v13  ;;  %v1305_v39 = vmax.f32 %v1049_v35, 0.0  ;;  %v1307_v63 = vmax.f32 %v1051_v41, 0.0  ;;  %v1056_v6 = vadd.f32 %v5217_v24, %v5231_v16 }
  0x66   : > { %v1546_v1 = vpack.c.bf16 %v1300_v50, %v1298_v15  ;;  %v5315_v53 = vpack.c.bf16 %v1299_v30, %v1297_v56  ;;  %v1053_v14 = vadd.f32 %v5221_v9, %v5236_v17  ;;  %v1055_v60 = vadd.f32 %v5221_v9, %v5241_v21 }
  0x67   : > { %v5321_v38 = vpack.c.bf16 %v1304_v20, %v1302_v34  ;;  %v5323_v2 = vpack.c.bf16 %v1303_v31, %v1301_v23  ;;  %v1058_v51 = vadd.f32 %v5217_v24, %v5246_v8  ;;  %v1060_v5 = vadd.f32 %v5217_v24, %v5251_v22 }
  0x68   : > { %v5329_v16 = vpack.c.bf16 %v1308_v11, %v1306_v55  ;;  %v1310_v48 = vmax.f32 %v1054_v12, 0.0  ;;  %v1057_v42 = vadd.f32 %v5221_v9, %v5264_v28  ;;  %v1059_v17 = vadd.f32 %v5221_v9, %v792_v26 }
  0x69   : > { %v5334_v7 = vpack.c.bf16 %v1307_v63, %v1305_v39  ;;  %v1312_v21 = vmax.f32 %v1056_v6, 0.0  ;;  %v1062_v57 = vadd.f32 %v5217_v24, %v795_v61  ;;  %v1064_v54 = vadd.f32 %v5217_v24, %v797_v4  ;;  %1910 = vmatmul.mubr.bf16.gmra.mrb[8].mxu0 %v1541_v43 }
  0x6a   : > { %v1309_v32 = vmax.f32 %v1053_v14, 0.0  ;;  %v1311_v8 = vmax.f32 %v1055_v60, 0.0  ;;  %v1061_v45 = vadd.f32 %v5221_v9, %v794_v47  ;;  %v1063_v22 = vadd.f32 %v5221_v9, %v796_v25  ;;  %1919 = vmatprep.mubr.bf16.mxu0 %v1544_v37 }
  0x6b   : > { %v1314_v27 = vmax.f32 %v1058_v51, 0.0  ;;  %v1316_v59 = vmax.f32 %v1060_v5, 0.0  ;;  %v1313_v13 = vmax.f32 %v1057_v42, 0.0  ;;  %v7326_v28 = vunpack.c.h.bf16 %v5022_v10 }
  0x6c   : > { %v1315_v62 = vmax.f32 %v1059_v17, 0.0  ;;  %v1318_v3 = vmax.f32 %v1062_v57, 0.0  ;;  %v1320_v61 = vmax.f32 %v1064_v54, 0.0  ;;  %v7327_v4 = vunpack.c.h.bf16 %v5032_v49 }
  0x6d   : > { %v799_v26 = vmul.f32 %v7326_v28, %v5082_v46  ;;  %v1317_v15 = vmax.f32 %v1061_v45, 0.0  ;;  %v1319_v47 = vmax.f32 %v1063_v22, 0.0  ;;  %v7328_v25 = vunpack.c.l.bf16 %v5022_v10 }
  0x6e   : > { %v801_v0 = vmul.f32 %v7327_v4, %v5082_v46  ;;  %v7329_v50 = vunpack.c.l.bf16 %v5032_v49  ;;  %v7330_v34 = vunpack.c.h.bf16 %v5042_v33  ;;  %v7331_v44 = vunpack.c.h.bf16 %v5045_v52 }
  0x6f   : > { %v798_v43 = vmul.f32 %v7328_v25, %v5078_v18  ;;  %v1066_v19 = vadd.f32 %v5217_v24, %v799_v26  ;;  %v5360_v31 = vpack.c.bf16 %v1312_v21, %v1310_v48  ;;  %v7332_v49 = vunpack.c.l.bf16 %v5042_v33 }
  0x70   : > { %v800_v56 = vmul.f32 %v7329_v50, %v5078_v18  ;;  %v1068_v30 = vadd.f32 %v5217_v24, %v801_v0  ;;  %v803_v20 = vmul.f32 %v7330_v34, %v5082_v46  ;;  %v805_v23 = vmul.f32 %v7331_v44, %v5082_v46  ;;  %v7343_v34 = vld [vmem:[#allocation4_spill] sm:$0xff] }
  0x71   : > { %v1065_v10 = vadd.f32 %v5221_v9, %v798_v43  ;;  %v802_v41 = vmul.f32 %v7332_v49, %v5078_v18  ;;  %v5367_v37 = vpack.c.bf16 %v1311_v8, %v1309_v32  ;;  %v7333_v12 = vunpack.c.l.bf16 %v5045_v52  ;;  %1920 = vmatmul.mubr.bf16.gmra.mrb[12].mxu0 %v1543_v58  ;;  %v404_v49 = vld [vmem:[%s4899_s7 + $0xf0] sm:$0xff] }
  0x72   : > { %v1067_v35 = vadd.f32 %v5221_v9, %v800_v56  ;;  %v1070_v55 = vadd.f32 %v5217_v24, %v803_v20  ;;  %v1072_v11 = vadd.f32 %v5217_v24, %v805_v23  ;;  %v5374_v63 = vpack.c.bf16 %v1316_v59, %v1314_v27  ;;  %1929 = vmatprep.mubr.bf16.mxu0 %v1546_v1  ;;  %v7339_v1 = vld [vmem:[#allocation3_spill] sm:$0xff] }
  0x73   : > { %v804_v39 = vmul.f32 %v7333_v12, %v5078_v18  ;;  %v5376_v6 = vpack.c.bf16 %v1315_v62, %v1313_v13  ;;  %v5378_v14 = vpack.c.bf16 %v1320_v61, %v1318_v3  ;;  %v7334_v33 = vunpack.c.h.bf16 %v5055_v40  ;;  %v7345_v12 = vld [vmem:[#allocation5_spill] sm:$0xff] }
  0x74   : > { %v5383_v51 = vpack.c.bf16 %v1319_v47, %v1317_v15  ;;  %v1322_v5 = vmax.f32 %v1066_v19, 0.0  ;;  %v1324_v48 = vmax.f32 %v1068_v30, 0.0  ;;  %v1321_v42 = vmax.f32 %v1065_v10, 0.0 }
  0x75   : > { %v807_v60 = vmul.f32 %v7334_v33, %v5082_v46  ;;  %v1323_v17 = vmax.f32 %v1067_v35, 0.0  ;;  %v1326_v21 = vmax.f32 %v1070_v55, 0.0  ;;  %v1069_v52 = vadd.f32 %v5221_v9, %v802_v41  ;;  %v405_v41 = vld [vmem:[%s4899_s7 + $0xf8] sm:$0xff] }
  0x76   : > { %v7335_v57 = vunpack.c.h.bf16 %v5058_v36  ;;  %v1328_v32 = vmax.f32 %v1072_v11, 0.0  ;;  %v1071_v8 = vadd.f32 %v5221_v9, %v804_v39  ;;  %v7336_v45 = vunpack.c.l.bf16 %v5055_v40 }
  0x77   : > { %v7337_v27 = vunpack.c.l.bf16 %v5058_v36  ;;  %v1074_v59 = vadd.f32 %v5217_v24, %v807_v60  ;;  %v7338_v28 = vunpack.c.h.bf16 %v5064_v29  ;;  %v7340_v62 = vunpack.c.h.bf16 %v7339_v1 }
  0x78   : > { %v809_v54 = vmul.f32 %v7335_v57, %v5082_v46  ;;  %v806_v22 = vmul.f32 %v7336_v45, %v5078_v18  ;;  %v5404_v61 = vpack.c.bf16 %v1324_v48, %v1322_v5  ;;  %v7341_v4 = vunpack.c.l.bf16 %v5064_v29  ;;  %v438_v45 = vld [vmem:[%s4899_s7 + $0x200] sm:$0xff] }
  0x79   : > { %v808_v58 = vmul.f32 %v7337_v27, %v5078_v18  ;;  %v811_v26 = vmul.f32 %v7338_v28, %v5082_v46  ;;  %v813_v3 = vmul.f32 %v7340_v62, %v5082_v46  ;;  %v5411_v15 = vpack.c.bf16 %v1323_v17, %v1321_v42  ;;  %1930 = vmatmul.mubr.bf16.gmra.mrb[16].mxu0 %v5315_v53 }
  0x7a   : > { %v1076_v13 = vadd.f32 %v5217_v24, %v809_v54  ;;  %v1073_v40 = vadd.f32 %v5221_v9, %v806_v22  ;;  %v810_v0 = vmul.f32 %v7341_v4, %v5078_v18  ;;  %v7342_v43 = vunpack.c.l.bf16 %v7339_v1  ;;  %1939 = vmatprep.mubr.bf16.mxu0 %v5321_v38  ;;  %v439_v38 = vld [vmem:[%s4899_s7 + $0x208] sm:$0xff] }
  0x7b   : > { %v1075_v36 = vadd.f32 %v5221_v9, %v808_v58  ;;  %v1078_v47 = vadd.f32 %v5217_v24, %v811_v26  ;;  %v1080_v25 = vadd.f32 %v5217_v24, %v813_v3  ;;  %v5418_v56 = vpack.c.bf16 %v1328_v32, %v1326_v21 }
  0x7c   : > { %v812_v50 = vmul.f32 %v7342_v43, %v5078_v18  ;;  %v1325_v19 = vmax.f32 %v1069_v52, 0.0  ;;  %v1077_v30 = vadd.f32 %v5221_v9, %v810_v0  ;;  %v7344_v20 = vunpack.c.h.bf16 %v7343_v34 }
  0x7d   : > { %v1327_v44 = vmax.f32 %v1071_v8, 0.0  ;;  %v1330_v23 = vmax.f32 %v1074_v59, 0.0  ;;  %v1332_v10 = vmax.f32 %v1076_v13, 0.0  ;;  %v1329_v55 = vmax.f32 %v1073_v40, 0.0 }
  0x7e   : > { %v815_v29 = vmul.f32 %v7344_v20, %v5082_v46  ;;  %v1079_v35 = vadd.f32 %v5221_v9, %v812_v50  ;;  %v1331_v11 = vmax.f32 %v1075_v36, 0.0  ;;  %v7346_v39 = vunpack.c.h.bf16 %v7345_v12 }
  0x7f   : > { %v1334_v5 = vmax.f32 %v1078_v47, 0.0  ;;  %v1336_v48 = vmax.f32 %v1080_v25, 0.0  ;;  %v7347_v42 = vunpack.c.l.bf16 %v7343_v34  ;;  %v7348_v21 = vunpack.c.l.bf16 %v7345_v12  ;;  %v406_v34 = vld [vmem:[%s4899_s7 + $0x100] sm:$0xff] }
  0x80   : > { %v817_v33 = vmul.f32 %v7346_v39, %v5082_v46  ;;  %v1082_v60 = vadd.f32 %v5217_v24, %v815_v29  ;;  %v1333_v57 = vmax.f32 %v1077_v30, 0.0  ;;  %v563_v32 = vunpack.c.h.bf16 %v404_v49 }
  0x81   : > { %v814_v17 = vmul.f32 %v7347_v42, %v5078_v18  ;;  %v816_v52 = vmul.f32 %v7348_v21, %v5078_v18  ;;  %v565_v8 = vunpack.c.h.bf16 %v405_v41  ;;  %v1335_v53 = vmax.f32 %v1079_v35, 0.0  ;;  %1940 = vmatmul.mubr.bf16.gmra.mrb[20].mxu0 %v5323_v2  ;;  %v440_v21 = vld [vmem:[%s4899_s7 + $0x210] sm:$0xff] }
  0x82   : > { %v1084_v54 = vadd.f32 %v5217_v24, %v817_v33  ;;  %v562_v58 = vunpack.c.l.bf16 %v404_v49  ;;  %v1338_v59 = vmax.f32 %v1082_v60, 0.0  ;;  %v819_v28 = vmul.f32 %v563_v32, %v5082_v46  ;;  %1949 = vmatprep.mubr.bf16.mxu0 %v5329_v16 }
  0x83   : > { %v1081_v22 = vadd.f32 %v5221_v9, %v814_v17  ;;  %v1083_v27 = vadd.f32 %v5221_v9, %v816_v52  ;;  %v821_v26 = vmul.f32 %v565_v8, %v5082_v46  ;;  %v5446_v1 = vpack.c.bf16 %v1327_v44, %v1325_v19  ;;  %v441_v52 = vld [vmem:[%s4899_s7 + $0x218] sm:$0xff] }
  0x84   : > { %v1340_v13 = vmax.f32 %v1084_v54, 0.0  ;;  %v5448_v62 = vpack.c.bf16 %v1332_v10, %v1330_v23  ;;  %v564_v3 = vunpack.c.l.bf16 %v405_v41  ;;  %v630_v40 = vunpack.c.l.bf16 %v438_v45  ;;  %v407_v23 = vld [vmem:[%s4899_s7 + $0x108] sm:$0xff] }
  0x85   : > { %v5450_v36 = vpack.c.bf16 %v1331_v11, %v1329_v55  ;;  %v1337_v4 = vmax.f32 %v1081_v22, 0.0  ;;  %v1339_v0 = vmax.f32 %v1083_v27, 0.0  ;;  %v818_v47 = vmul.f32 %v562_v58, %v5078_v18 }
  0x86   : > { %v5453_v25 = vpack.c.bf16 %v1336_v48, %v1334_v5  ;;  %v5455_v43 = vpack.c.bf16 %v1335_v53, %v1333_v57  ;;  %v631_v50 = vunpack.c.h.bf16 %v438_v45  ;;  %v632_v30 = vunpack.c.l.bf16 %v439_v38 }
  0x87   : > { %v5458_v19 = vpack.c.bf16 %v1340_v13, %v1338_v59  ;;  %v5461_v20 = vadd.f32 %v5217_v24, %v819_v28  ;;  %v5464_v29 = vadd.f32 %v5217_v24, %v821_v26  ;;  %v633_v44 = vunpack.c.h.bf16 %v439_v38 }
  0x88   : > { %v820_v10 = vmul.f32 %v564_v3, %v5078_v18  ;;  %v887_v35 = vmul.f32 %v631_v50, %v5082_v46  ;;  %v886_v49 = vmul.f32 %v630_v40, %v5078_v18  ;;  %v888_v41 = vmul.f32 %v632_v30, %v5078_v18 }
  0x89   : > { %v5473_v55 = vpack.c.bf16 %v1339_v0, %v1337_v4  ;;  %v5476_v11 = vadd.f32 %v5221_v9, %v818_v47  ;;  %v889_v12 = vmul.f32 %v633_v44, %v5082_v46  ;;  %v567_v2 = vunpack.c.h.bf16 %v406_v34  ;;  %v408_v4 = vld [vmem:[%s4899_s7 + $0x110] sm:$0xff]  ;;  %1950 = vmatmul.mubr.bf16.gmra.mrb[24].mxu0 %v5334_v7 }
  0x8a   : > { %v1154_v39 = vadd.f32 %v5217_v24, %v887_v35  ;;  %v1153_v33 = vadd.f32 %v5221_v9, %v886_v49  ;;  %v1155_v60 = vadd.f32 %v5221_v9, %v888_v41  ;;  %v569_v5 = vunpack.c.h.bf16 %v407_v23  ;;  %1959 = vmatprep.mubr.bf16.mxu0 %v5360_v31 }
  0x8b   : > { %v1342_v48 = vmax.f32 %v5461_v20, 0.0  ;;  %v1156_v42 = vadd.f32 %v5217_v24, %v889_v12  ;;  %v823_v16 = vmul.f32 %v567_v2, %v5082_v46  ;;  %v566_v17 = vunpack.c.l.bf16 %v406_v34  ;;  %v409_v34 = vld [vmem:[%s4899_s7 + $0x118] sm:$0xff] }
  0x8c   : > { %v1410_v57 = vmax.f32 %v1154_v39, 0.0  ;;  %v1409_v54 = vmax.f32 %v1153_v33, 0.0  ;;  %v1411_v32 = vmax.f32 %v1155_v60, 0.0  ;;  %v825_v8 = vmul.f32 %v569_v5, %v5082_v46  ;;  %v442_v5 = vld [vmem:[%s4899_s7 + $0x220] sm:$0xff] }
  0x8d   : > { %v1087_v45 = vadd.f32 %v5221_v9, %v820_v10  ;;  %v1412_v53 = vmax.f32 %v1156_v42, 0.0  ;;  %v568_v22 = vunpack.c.l.bf16 %v407_v23  ;;  %v822_v27 = vmul.f32 %v566_v17, %v5078_v18 }
  0x8e   : > { %v1344_v58 = vmax.f32 %v5464_v29, 0.0  ;;  %v1601_v59 = vpack.c.bf16 %v1411_v32, %v1409_v54  ;;  %v635_v13 = vunpack.c.h.bf16 %v440_v21  ;;  %v637_v28 = vunpack.c.h.bf16 %v441_v52 }
  0x8f   : > { %v1602_v26 = vpack.c.bf16 %v1412_v53, %v1410_v57  ;;  %v1090_v38 = vadd.f32 %v5217_v24, %v823_v16  ;;  %v1092_v3 = vadd.f32 %v5217_v24, %v825_v8  ;;  %v824_v40 = vmul.f32 %v568_v22, %v5078_v18 }
  0x90   : > { %v1341_v0 = vmax.f32 %v5476_v11, 0.0  ;;  %v891_v47 = vmul.f32 %v635_v13, %v5082_v46  ;;  %v893_v50 = vmul.f32 %v637_v28, %v5082_v46  ;;  %v634_v30 = vunpack.c.l.bf16 %v440_v21  ;;  %v410_v28 = vld [vmem:[%s4899_s7 + $0x120] sm:$0xff] }
  0x91   : > { %v1343_v20 = vmax.f32 %v1087_v45, 0.0  ;;  %2209 = vmatprep.mubr.bf16.mxu1 %v1602_v26  ;;  %v1089_v29 = vadd.f32 %v5221_v9, %v822_v27  ;;  %v1091_v44 = vadd.f32 %v5221_v9, %v824_v40  ;;  %v636_v23 = vunpack.c.l.bf16 %v441_v52  ;;  %v443_v52 = vld [vmem:[%s4899_s7 + $0x228] sm:$0xff]  ;;  %1960 = vmatmul.mubr.bf16.gmra.mrb[28].mxu0 %v5367_v37 }
  0x92   : > { %2210 = vmatmul.mubr.bf16.vlgmr.msra.gmra.mrb[0].mxu1 %v1601_v59  ;;  %v1158_v7 = vadd.f32 %v5217_v24, %v891_v47  ;;  %v1160_v10 = vadd.f32 %v5217_v24, %v893_v50  ;;  %v890_v35 = vmul.f32 %v634_v30, %v5078_v18  ;;  %v571_v49 = vunpack.c.h.bf16 %v408_v4  ;;  %1969 = vmatprep.mubr.bf16.mxu0 %v5374_v63 }
  0x93   : > { %v1346_v41 = vmax.f32 %v1090_v38, 0.0  ;;  %v1348_v11 = vmax.f32 %v1092_v3, 0.0  ;;  %v892_v31 = vmul.f32 %v636_v23, %v5078_v18  ;;  %v573_v12 = vunpack.c.h.bf16 %v409_v34 }
  0x94   : > { %v1414_v2 = vmax.f32 %v1158_v7, 0.0  ;;  %v1416_v39 = vmax.f32 %v1160_v10, 0.0  ;;  %v1157_v33 = vadd.f32 %v5221_v9, %v890_v35  ;;  %v570_v60 = vunpack.c.l.bf16 %v408_v4  ;;  %v411_v4 = vld [vmem:[%s4899_s7 + $0x128] sm:$0xff] }
  0x95   : > { %v5509_v42 = vpack.c.bf16 %v1344_v58, %v1342_v48  ;;  %v1345_v16 = vmax.f32 %v1089_v29, 0.0  ;;  %v1347_v17 = vmax.f32 %v1091_v44, 0.0  ;;  %v1159_v21 = vadd.f32 %v5221_v9, %v892_v31  ;;  %v445_v31 = vld [vmem:[%s4899_s7 + $0x238] sm:$0xff] }
  0x96   : > { %v1604_v57 = vpack.c.bf16 %v1416_v39, %v1414_v2  ;;  %v1413_v54 = vmax.f32 %v1157_v33, 0.0  ;;  %v827_v32 = vmul.f32 %v571_v49, %v5082_v46  ;;  %v829_v8 = vmul.f32 %v573_v12, %v5082_v46 }
  0x97   : > { %v5515_v45 = vpack.c.bf16 %v1343_v20, %v1341_v0  ;;  %v1415_v53 = vmax.f32 %v1159_v21, 0.0  ;;  %v572_v22 = vunpack.c.l.bf16 %v409_v34  ;;  %v639_v27 = vunpack.c.h.bf16 %v442_v5 }
  0x98   : > { %v5518_v48 = vpack.c.bf16 %v1348_v11, %v1346_v41  ;;  %2219 = vmatprep.mubr.bf16.mxu1 %v1604_v57  ;;  %v826_v58 = vmul.f32 %v570_v60, %v5078_v18  ;;  %v641_v59 = vunpack.c.h.bf16 %v443_v52  ;;  %v638_v13 = vunpack.c.l.bf16 %v442_v5  ;;  %v444_v11 = vld [vmem:[%s4899_s7 + $0x230] sm:$0xff] }
  0x99   : > { %v5523_v26 = vpack.c.bf16 %v1347_v17, %v1345_v16  ;;  %v1603_v38 = vpack.c.bf16 %v1415_v53, %v1413_v54  ;;  %v895_v3 = vmul.f32 %v639_v27, %v5082_v46  ;;  %v640_v40 = vunpack.c.l.bf16 %v443_v52  ;;  %1970 = vmatmul.mubr.bf16.gmra.mrb[32].mxu0 %v5376_v6 }
  0x9a   : > { %v5528_v0 = vadd.f32 %v5217_v24, %v827_v32  ;;  %v1096_v37 = vadd.f32 %v5217_v24, %v829_v8  ;;  %v897_v47 = vmul.f32 %v641_v59, %v5082_v46  ;;  %v894_v50 = vmul.f32 %v638_v13, %v5078_v18  ;;  %v412_v32 = vld [vmem:[%s4899_s7 + $0x130] sm:$0xff]  ;;  %1979 = vmatprep.mubr.bf16.mxu0 %v5378_v14 }
  0x9b   : > { %2220 = vmatmul.mubr.bf16.gmra.mrb[4].mxu1 %v1603_v38  ;;  %v828_v63 = vmul.f32 %v572_v22, %v5078_v18  ;;  %v1162_v30 = vadd.f32 %v5217_v24, %v895_v3  ;;  %v896_v34 = vmul.f32 %v640_v40, %v5078_v18  ;;  %v575_v20 = vunpack.c.h.bf16 %v410_v28 }
  0x9c   : > { %v5537_v29 = vadd.f32 %v5221_v9, %v826_v58  ;;  %v1164_v44 = vadd.f32 %v5217_v24, %v897_v47  ;;  %v1161_v23 = vadd.f32 %v5221_v9, %v894_v50  ;;  %v577_v7 = vunpack.c.h.bf16 %v411_v4 }
  0x9d   : > { %v1418_v10 = vmax.f32 %v1162_v30, 0.0  ;;  %v1163_v35 = vadd.f32 %v5221_v9, %v896_v34  ;;  %v831_v49 = vmul.f32 %v575_v20, %v5082_v46  ;;  %v574_v41 = vunpack.c.l.bf16 %v410_v28  ;;  %v413_v28 = vld [vmem:[%s4899_s7 + $0x138] sm:$0xff] }
  0x9e   : > { %v1350_v12 = vmax.f32 %v5528_v0, 0.0  ;;  %v1420_v2 = vmax.f32 %v1164_v44, 0.0  ;;  %v1417_v39 = vmax.f32 %v1161_v23, 0.0  ;;  %v833_v33 = vmul.f32 %v577_v7, %v5082_v46  ;;  %v446_v7 = vld [vmem:[%s4899_s7 + $0x240] sm:$0xff] }
  0x9f   : > { %v1352_v60 = vmax.f32 %v1096_v37, 0.0  ;;  %v1419_v5 = vmax.f32 %v1163_v35, 0.0  ;;  %v576_v16 = vunpack.c.l.bf16 %v411_v4  ;;  %v830_v17 = vmul.f32 %v574_v41, %v5078_v18 }
  0xa0   : > { %v1095_v21 = vadd.f32 %v5221_v9, %v828_v63  ;;  %v1606_v52 = vpack.c.bf16 %v1420_v2, %v1418_v10  ;;  %v643_v57 = vunpack.c.h.bf16 %v444_v11  ;;  %v645_v54 = vunpack.c.h.bf16 %v445_v31 }
  0xa1   : > { %v1349_v8 = vmax.f32 %v5537_v29, 0.0  ;;  %v1605_v53 = vpack.c.bf16 %v1419_v5, %v1417_v39  ;;  %v1098_v22 = vadd.f32 %v5217_v24, %v831_v49  ;;  %v832_v27 = vmul.f32 %v576_v16, %v5078_v18  ;;  %1980 = vmatmul.mubr.bf16.gmra.mrb[36].mxu0 %v5383_v51 }
  0xa2   : > { %2229 = vmatprep.mubr.bf16.mxu1 %v1606_v52  ;;  %v1100_v58 = vadd.f32 %v5217_v24, %v833_v33  ;;  %v899_v6 = vmul.f32 %v643_v57, %v5082_v46  ;;  %v901_v59 = vmul.f32 %v645_v54, %v5082_v46  ;;  %v642_v13 = vunpack.c.l.bf16 %v444_v11  ;;  %v447_v11 = vld [vmem:[%s4899_s7 + $0x248] sm:$0xff]  ;;  %1989 = vmatprep.mubr.bf16.mxu0 %v5404_v61  ;;  %v414_v57 = vld [vmem:[%s4899_s7 + $0x140] sm:$0xff] }
  0xa3   : > { %2230 = vmatmul.mubr.bf16.gmra.mrb[8].mxu1 %v1605_v53  ;;  %v1097_v38 = vadd.f32 %v5221_v9, %v830_v17  ;;  %v1099_v14 = vadd.f32 %v5221_v9, %v832_v27  ;;  %v644_v3 = vunpack.c.l.bf16 %v445_v31  ;;  %v579_v40 = vunpack.c.h.bf16 %v412_v32 }
  0xa4   : > { %v1351_v4 = vmax.f32 %v1095_v21, 0.0  ;;  %v1166_v0 = vadd.f32 %v5217_v24, %v899_v6  ;;  %v1168_v37 = vadd.f32 %v5217_v24, %v901_v59  ;;  %v898_v47 = vmul.f32 %v642_v13, %v5078_v18 }
  0xa5   : > { %v1354_v50 = vmax.f32 %v1098_v22, 0.0  ;;  %v900_v63 = vmul.f32 %v644_v3, %v5078_v18  ;;  %v581_v30 = vunpack.c.h.bf16 %v413_v28  ;;  %v835_v34 = vmul.f32 %v579_v40, %v5082_v46 }
  0xa6   : > { %v1356_v20 = vmax.f32 %v1100_v58, 0.0  ;;  %v1422_v29 = vmax.f32 %v1166_v0, 0.0  ;;  %v1424_v44 = vmax.f32 %v1168_v37, 0.0  ;;  %v1165_v23 = vadd.f32 %v5221_v9, %v898_v47 }
  0xa7   : > { %v5568_v10 = vpack.c.bf16 %v1352_v60, %v1350_v12  ;;  %v1353_v35 = vmax.f32 %v1097_v38, 0.0  ;;  %v1355_v49 = vmax.f32 %v1099_v14, 0.0  ;;  %v1167_v41 = vadd.f32 %v5221_v9, %v900_v63  ;;  %v448_v63 = vld [vmem:[%s4899_s7 + $0x250] sm:$0xff] }
  0xa8   : > { %v1608_v31 = vpack.c.bf16 %v1424_v44, %v1422_v29  ;;  %v1421_v2 = vmax.f32 %v1165_v23, 0.0  ;;  %v837_v39 = vmul.f32 %v581_v30, %v5082_v46  ;;  %v578_v33 = vunpack.c.l.bf16 %v412_v32  ;;  %v449_v30 = vld [vmem:[%s4899_s7 + $0x258] sm:$0xff] }
  0xa9   : > { %v5575_v5 = vpack.c.bf16 %v1351_v4, %v1349_v8  ;;  %v1423_v12 = vmax.f32 %v1167_v41, 0.0  ;;  %v5578_v60 = vadd.f32 %v5217_v24, %v835_v34  ;;  %v647_v16 = vunpack.c.h.bf16 %v446_v7  ;;  %v415_v8 = vld [vmem:[%s4899_s7 + $0x148] sm:$0xff]  ;;  %1990 = vmatmul.mubr.bf16.gmra.mrb[40].mxu0 %v5411_v15 }
  0xaa   : > { %v5580_v17 = vpack.c.bf16 %v1356_v20, %v1354_v50  ;;  %2239 = vmatprep.mubr.bf16.mxu1 %v1608_v31  ;;  %v580_v21 = vunpack.c.l.bf16 %v413_v28  ;;  %v649_v51 = vunpack.c.h.bf16 %v447_v11  ;;  %v646_v52 = vunpack.c.l.bf16 %v446_v7  ;;  %1999 = vmatprep.mubr.bf16.mxu0 %v5418_v56 }
  0xab   : > { %v5583_v54 = vpack.c.bf16 %v1355_v49, %v1353_v35  ;;  %v1607_v32 = vpack.c.bf16 %v1423_v12, %v1421_v2  ;;  %v903_v53 = vmul.f32 %v647_v16, %v5082_v46  ;;  %v648_v61 = vunpack.c.l.bf16 %v447_v11  ;;  %v416_v2 = vld [vmem:[%s4899_s7 + $0x150] sm:$0xff] }
  0xac   : > { %v5588_v22 = vadd.f32 %v5217_v24, %v837_v39  ;;  %v834_v27 = vmul.f32 %v578_v33, %v5078_v18  ;;  %v905_v58 = vmul.f32 %v649_v51, %v5082_v46  ;;  %v902_v6 = vmul.f32 %v646_v52, %v5078_v18  ;;  %v417_v52 = vld [vmem:[%s4899_s7 + $0x158] sm:$0xff] }
  0xad   : > { %2240 = vmatmul.mubr.bf16.gmra.mrb[12].mxu1 %v1607_v32  ;;  %v1358_v59 = vmax.f32 %v5578_v60, 0.0  ;;  %v1170_v13 = vadd.f32 %v5217_v24, %v903_v53  ;;  %v904_v28 = vmul.f32 %v648_v61, %v5078_v18  ;;  %v583_v38 = vunpack.c.h.bf16 %v414_v57 }
  0xae   : > { %v836_v14 = vmul.f32 %v580_v21, %v5078_v18  ;;  %v1172_v3 = vadd.f32 %v5217_v24, %v905_v58  ;;  %v1169_v40 = vadd.f32 %v5221_v9, %v902_v6  ;;  %v585_v4 = vunpack.c.h.bf16 %v415_v8 }
  0xaf   : > { %v1426_v0 = vmax.f32 %v1170_v13, 0.0  ;;  %v1171_v37 = vadd.f32 %v5221_v9, %v904_v28  ;;  %v839_v47 = vmul.f32 %v583_v38, %v5082_v46  ;;  %v582_v50 = vunpack.c.l.bf16 %v414_v57 }
  0xb0   : > { %v1101_v34 = vadd.f32 %v5221_v9, %v834_v27  ;;  %v1428_v20 = vmax.f32 %v1172_v3, 0.0  ;;  %v1425_v29 = vmax.f32 %v1169_v40, 0.0  ;;  %v841_v44 = vmul.f32 %v585_v4, %v5082_v46 }
  0xb1   : > { %v1360_v23 = vmax.f32 %v5588_v22, 0.0  ;;  %v1427_v7 = vmax.f32 %v1171_v37, 0.0  ;;  %v584_v35 = vunpack.c.l.bf16 %v415_v8  ;;  %v838_v49 = vmul.f32 %v582_v50, %v5078_v18  ;;  %2000 = vmatmul.mubr.bf16.gmra.mrb[44].mxu0 %v5446_v1 }
  0xb2   : > { %v1103_v41 = vadd.f32 %v5221_v9, %v836_v14  ;;  %v1610_v11 = vpack.c.bf16 %v1428_v20, %v1426_v0  ;;  %v651_v31 = vunpack.c.h.bf16 %v448_v63  ;;  %v653_v15 = vunpack.c.h.bf16 %v449_v30  ;;  %v450_v0 = vld [vmem:[%s4899_s7 + $0x260] sm:$0xff]  ;;  %2009 = vmatprep.mubr.bf16.mxu0 %v5448_v62 }
  0xb3   : > { %v1609_v39 = vpack.c.bf16 %v1427_v7, %v1425_v29  ;;  %v1106_v33 = vadd.f32 %v5217_v24, %v839_v47  ;;  %v1108_v12 = vadd.f32 %v5217_v24, %v841_v44  ;;  %v840_v56 = vmul.f32 %v584_v35, %v5078_v18 }
  0xb4   : > { %v1357_v60 = vmax.f32 %v1101_v34, 0.0  ;;  %2249 = vmatprep.mubr.bf16.mxu1 %v1610_v11  ;;  %v907_v16 = vmul.f32 %v651_v31, %v5082_v46  ;;  %v909_v21 = vmul.f32 %v653_v15, %v5082_v46  ;;  %v650_v51 = vunpack.c.l.bf16 %v448_v63  ;;  %v418_v11 = vld [vmem:[%s4899_s7 + $0x160] sm:$0xff] }
  0xb5   : > { %2250 = vmatmul.mubr.bf16.gmra.mrb[16].mxu1 %v1609_v39  ;;  %v1105_v57 = vadd.f32 %v5221_v9, %v838_v49  ;;  %v1107_v32 = vadd.f32 %v5221_v9, %v840_v56  ;;  %v652_v53 = vunpack.c.l.bf16 %v449_v30  ;;  %v587_v61 = vunpack.c.h.bf16 %v416_v2  ;;  %v451_v30 = vld [vmem:[%s4899_s7 + $0x268] sm:$0xff] }
  0xb6   : > { %v1359_v8 = vmax.f32 %v1103_v41, 0.0  ;;  %v1174_v22 = vadd.f32 %v5217_v24, %v907_v16  ;;  %v1176_v27 = vadd.f32 %v5217_v24, %v909_v21  ;;  %v906_v58 = vmul.f32 %v650_v51, %v5078_v18 }
  0xb7   : > { %v1362_v6 = vmax.f32 %v1106_v33, 0.0  ;;  %v1364_v13 = vmax.f32 %v1108_v12, 0.0  ;;  %v908_v28 = vmul.f32 %v652_v53, %v5078_v18  ;;  %v589_v38 = vunpack.c.h.bf16 %v417_v52  ;;  %v419_v33 = vld [vmem:[%s4899_s7 + $0x168] sm:$0xff] }
  0xb8   : > { %v1430_v14 = vmax.f32 %v1174_v22, 0.0  ;;  %v1432_v3 = vmax.f32 %v1176_v27, 0.0  ;;  %v1173_v40 = vadd.f32 %v5221_v9, %v906_v58  ;;  %v843_v4 = vmul.f32 %v587_v61, %v5082_v46 }
  0xb9   : > { %v5628_v37 = vpack.c.bf16 %v1360_v23, %v1358_v59  ;;  %v1361_v47 = vmax.f32 %v1105_v57, 0.0  ;;  %v1363_v50 = vmax.f32 %v1107_v32, 0.0  ;;  %v1175_v63 = vadd.f32 %v5221_v9, %v908_v28  ;;  %2010 = vmatmul.mubr.bf16.gmra.mrb[48].mxu0 %v5450_v36  ;;  %v453_v28 = vld [vmem:[%s4899_s7 + $0x278] sm:$0xff] }
  0xba   : > { %v1612_v34 = vpack.c.bf16 %v1432_v3, %v1430_v14  ;;  %v1429_v20 = vmax.f32 %v1173_v40, 0.0  ;;  %v845_v1 = vmul.f32 %v589_v38, %v5082_v46  ;;  %v586_v29 = vunpack.c.l.bf16 %v416_v2  ;;  %2019 = vmatprep.mubr.bf16.mxu0 %v5453_v25 }
  0xbb   : > { %v5633_v44 = vpack.c.bf16 %v1359_v8, %v1357_v60  ;;  %v1431_v7 = vmax.f32 %v1175_v63, 0.0  ;;  %v588_v35 = vunpack.c.l.bf16 %v417_v52  ;;  %v655_v49 = vunpack.c.h.bf16 %v450_v0 }
  0xbc   : > { %v5635_v62 = vpack.c.bf16 %v1364_v13, %v1362_v6  ;;  %2259 = vmatprep.mubr.bf16.mxu1 %v1612_v34  ;;  %v5638_v59 = vadd.f32 %v5217_v24, %v843_v4  ;;  %v657_v23 = vunpack.c.h.bf16 %v451_v30  ;;  %v654_v41 = vunpack.c.l.bf16 %v450_v0  ;;  %v452_v13 = vld [vmem:[%s4899_s7 + $0x270] sm:$0xff] }
  0xbd   : > { %v5641_v31 = vpack.c.bf16 %v1363_v50, %v1361_v47  ;;  %v1611_v15 = vpack.c.bf16 %v1431_v7, %v1429_v20  ;;  %v911_v39 = vmul.f32 %v655_v49, %v5082_v46  ;;  %v656_v2 = vunpack.c.l.bf16 %v451_v30  ;;  %v420_v7 = vld [vmem:[%s4899_s7 + $0x170] sm:$0xff] }
  0xbe   : > { %v5646_v12 = vadd.f32 %v5217_v24, %v845_v1  ;;  %v842_v56 = vmul.f32 %v586_v29, %v5078_v18  ;;  %v913_v60 = vmul.f32 %v657_v23, %v5082_v46  ;;  %v910_v16 = vmul.f32 %v654_v41, %v5078_v18  ;;  %v421_v41 = vld [vmem:[%s4899_s7 + $0x178] sm:$0xff] }
  0xbf   : > { %2260 = vmatmul.mubr.bf16.gmra.mrb[20].mxu1 %v1611_v15  ;;  %v844_v21 = vmul.f32 %v588_v35, %v5078_v18  ;;  %v1178_v51 = vadd.f32 %v5217_v24, %v911_v39  ;;  %v912_v52 = vmul.f32 %v656_v2, %v5078_v18  ;;  %v591_v57 = vunpack.c.h.bf16 %v418_v11 }
  0xc0   : > { %v1366_v32 = vmax.f32 %v5638_v59, 0.0  ;;  %v1180_v53 = vadd.f32 %v5217_v24, %v913_v60  ;;  %v1177_v61 = vadd.f32 %v5221_v9, %v910_v16  ;;  %v593_v8 = vunpack.c.h.bf16 %v419_v33 }
  0xc1   : > { %v1434_v22 = vmax.f32 %v1178_v51, 0.0  ;;  %v1179_v27 = vadd.f32 %v5221_v9, %v912_v52  ;;  %v847_v58 = vmul.f32 %v591_v57, %v5082_v46  ;;  %v590_v6 = vunpack.c.l.bf16 %v418_v11  ;;  %2020 = vmatmul.mubr.bf16.gmra.mrb[52].mxu0 %v5455_v43 }
  0xc2   : > { %v1109_v38 = vadd.f32 %v5221_v9, %v842_v56  ;;  %v1436_v36 = vmax.f32 %v1180_v53, 0.0  ;;  %v1433_v14 = vmax.f32 %v1177_v61, 0.0  ;;  %v849_v3 = vmul.f32 %v593_v8, %v5082_v46  ;;  %2029 = vmatprep.mubr.bf16.mxu0 %v5458_v19  ;;  %v454_v8 = vld [vmem:[%s4899_s7 + $0x280] sm:$0xff] }
  0xc3   : > { %v1111_v40 = vadd.f32 %v5221_v9, %v844_v21  ;;  %v1435_v4 = vmax.f32 %v1179_v27, 0.0  ;;  %v592_v0 = vunpack.c.l.bf16 %v419_v33  ;;  %v846_v25 = vmul.f32 %v590_v6, %v5078_v18 }
  0xc4   : > { %v1368_v47 = vmax.f32 %v5646_v12, 0.0  ;;  %v1614_v50 = vpack.c.bf16 %v1436_v36, %v1434_v22  ;;  %v659_v63 = vunpack.c.h.bf16 %v452_v13  ;;  %v661_v30 = vunpack.c.h.bf16 %v453_v28 }
  0xc5   : > { %v1613_v34 = vpack.c.bf16 %v1435_v4, %v1433_v14  ;;  %v1114_v20 = vadd.f32 %v5217_v24, %v847_v58  ;;  %v1116_v1 = vadd.f32 %v5217_v24, %v849_v3  ;;  %v848_v29 = vmul.f32 %v592_v0, %v5078_v18 }
  0xc6   : > { %v1365_v35 = vmax.f32 %v1109_v38, 0.0  ;;  %2269 = vmatprep.mubr.bf16.mxu1 %v1614_v50  ;;  %v915_v49 = vmul.f32 %v659_v63, %v5082_v46  ;;  %v917_v59 = vmul.f32 %v661_v30, %v5082_v46  ;;  %v658_v23 = vunpack.c.l.bf16 %v452_v13  ;;  %v455_v13 = vld [vmem:[%s4899_s7 + $0x288] sm:$0xff]  ;;  %v422_v50 = vld [vmem:[%s4899_s7 + $0x180] sm:$0xff] }
  0xc7   : > { %v1367_v11 = vmax.f32 %v1111_v40, 0.0  ;;  %2270 = vmatmul.mubr.bf16.gmra.mrb[24].mxu1 %v1613_v34  ;;  %v1113_v15 = vadd.f32 %v5221_v9, %v846_v25  ;;  %v1115_v39 = vadd.f32 %v5221_v9, %v848_v29  ;;  %v660_v2 = vunpack.c.l.bf16 %v453_v28 }
  0xc8   : > { %v1182_v33 = vadd.f32 %v5217_v24, %v915_v49  ;;  %v1184_v12 = vadd.f32 %v5217_v24, %v917_v59  ;;  %v914_v56 = vmul.f32 %v658_v23, %v5078_v18  ;;  %v595_v60 = vunpack.c.h.bf16 %v420_v7 }
  0xc9   : > { %v1370_v16 = vmax.f32 %v1114_v20, 0.0  ;;  %v1372_v21 = vmax.f32 %v1116_v1, 0.0  ;;  %v916_v51 = vmul.f32 %v660_v2, %v5078_v18  ;;  %v597_v52 = vunpack.c.h.bf16 %v421_v41  ;;  %v423_v1 = vld [vmem:[%s4899_s7 + $0x188] sm:$0xff]  ;;  %2030 = vmatmul.mubr.bf16.gmra.mrb[56].mxu0 %v5473_v55 }
  0xca   : > { %v1438_v57 = vmax.f32 %v1182_v33, 0.0  ;;  %v1440_v53 = vmax.f32 %v1184_v12, 0.0  ;;  %v1181_v61 = vadd.f32 %v5221_v9, %v914_v56  ;;  %v594_v43 = vunpack.c.l.bf16 %v420_v7  ;;  %2039 = vmatprep.mubr.bf16.mxu0 %v5509_v42 }
  0xcb   : > { %v5685_v22 = vpack.c.bf16 %v1368_v47, %v1366_v32  ;;  %v1369_v27 = vmax.f32 %v1113_v15, 0.0  ;;  %v1371_v58 = vmax.f32 %v1115_v39, 0.0  ;;  %v1183_v6 = vadd.f32 %v5221_v9, %v916_v51 }
  0xcc   : > { %v1616_v19 = vpack.c.bf16 %v1440_v53, %v1438_v57  ;;  %v1437_v28 = vmax.f32 %v1181_v61, 0.0  ;;  %v851_v38 = vmul.f32 %v595_v60, %v5082_v46  ;;  %v853_v36 = vmul.f32 %v597_v52, %v5082_v46  ;;  %v456_v60 = vld [vmem:[%s4899_s7 + $0x290] sm:$0xff] }
  0xcd   : > { %v5691_v14 = vpack.c.bf16 %v1367_v11, %v1365_v35  ;;  %v1439_v3 = vmax.f32 %v1183_v6, 0.0  ;;  %v596_v40 = vunpack.c.l.bf16 %v421_v41  ;;  %v663_v4 = vunpack.c.h.bf16 %v454_v8 }
  0xce   : > { %v5693_v32 = vpack.c.bf16 %v1372_v21, %v1370_v16  ;;  %2279 = vmatprep.mubr.bf16.mxu1 %v1616_v19  ;;  %v850_v0 = vmul.f32 %v594_v43, %v5078_v18  ;;  %v665_v25 = vunpack.c.h.bf16 %v455_v13  ;;  %v662_v47 = vunpack.c.l.bf16 %v454_v8  ;;  %v457_v16 = vld [vmem:[%s4899_s7 + $0x298] sm:$0xff]  ;;  %v424_v19 = vld [vmem:[%s4899_s7 + $0x190] sm:$0xff] }
  0xcf   : > { %v5697_v63 = vpack.c.bf16 %v1371_v58, %v1369_v27  ;;  %v1615_v30 = vpack.c.bf16 %v1439_v3, %v1437_v28  ;;  %v919_v34 = vmul.f32 %v663_v4, %v5082_v46  ;;  %v664_v20 = vunpack.c.l.bf16 %v455_v13 }
  0xd0   : > { %v5703_v29 = vadd.f32 %v5217_v24, %v851_v38  ;;  %v5706_v7 = vadd.f32 %v5217_v24, %v853_v36  ;;  %v921_v35 = vmul.f32 %v665_v25, %v5082_v46  ;;  %v918_v49 = vmul.f32 %v662_v47, %v5078_v18  ;;  %v425_v47 = vld [vmem:[%s4899_s7 + $0x198] sm:$0xff] }
  0xd1   : > { %2280 = vmatmul.mubr.bf16.gmra.mrb[28].mxu1 %v1615_v30  ;;  %v852_v59 = vmul.f32 %v596_v40, %v5078_v18  ;;  %v1186_v23 = vadd.f32 %v5217_v24, %v919_v34  ;;  %v920_v55 = vmul.f32 %v664_v20, %v5078_v18  ;;  %v599_v41 = vunpack.c.h.bf16 %v422_v50  ;;  %2040 = vmatmul.mubr.bf16.gmra.mrb[60].mxu0 %v5515_v45 }
  0xd2   : > { %v5715_v11 = vadd.f32 %v5221_v9, %v850_v0  ;;  %v1188_v15 = vadd.f32 %v5217_v24, %v921_v35  ;;  %v1185_v39 = vadd.f32 %v5221_v9, %v918_v49  ;;  %v601_v2 = vunpack.c.h.bf16 %v423_v1  ;;  %2049 = vmatprep.mubr.bf16.mxu0 %v5518_v48 }
  0xd3   : > { %v1442_v33 = vmax.f32 %v1186_v23, 0.0  ;;  %v1187_v12 = vadd.f32 %v5221_v9, %v920_v55  ;;  %v855_v42 = vmul.f32 %v599_v41, %v5082_v46  ;;  %v598_v56 = vunpack.c.l.bf16 %v422_v50 }
  0xd4   : > { %v1374_v21 = vmax.f32 %v5703_v29, 0.0  ;;  %v1444_v51 = vmax.f32 %v1188_v15, 0.0  ;;  %v1441_v52 = vmax.f32 %v1185_v39, 0.0  ;;  %v857_v57 = vmul.f32 %v601_v2, %v5082_v46  ;;  %v458_v15 = vld [vmem:[%s4899_s7 + $0x2a0] sm:$0xff] }
  0xd5   : > { %v1376_v53 = vmax.f32 %v5706_v7, 0.0  ;;  %v1443_v61 = vmax.f32 %v1187_v12, 0.0  ;;  %v600_v43 = vunpack.c.l.bf16 %v423_v1  ;;  %v854_v8 = vmul.f32 %v598_v56, %v5078_v18 }
  0xd6   : > { %v1119_v27 = vadd.f32 %v5221_v9, %v852_v59  ;;  %v1618_v58 = vpack.c.bf16 %v1444_v51, %v1442_v33  ;;  %v667_v6 = vunpack.c.h.bf16 %v456_v60  ;;  %v669_v13 = vunpack.c.h.bf16 %v457_v16 }
  0xd7   : > { %v1373_v28 = vmax.f32 %v5715_v11, 0.0  ;;  %v1617_v38 = vpack.c.bf16 %v1443_v61, %v1441_v52  ;;  %v1122_v36 = vadd.f32 %v5217_v24, %v855_v42  ;;  %v856_v3 = vmul.f32 %v600_v43, %v5078_v18  ;;  %v459_v42 = vld [vmem:[%s4899_s7 + $0x2a8] sm:$0xff] }
  0xd8   : > { %2289 = vmatprep.mubr.bf16.mxu1 %v1618_v58  ;;  %v1124_v40 = vadd.f32 %v5217_v24, %v857_v57  ;;  %v923_v4 = vmul.f32 %v667_v6, %v5082_v46  ;;  %v925_v0 = vmul.f32 %v669_v13, %v5082_v46  ;;  %v666_v25 = vunpack.c.l.bf16 %v456_v60  ;;  %v426_v58 = vld [vmem:[%s4899_s7 + $0x1a0] sm:$0xff] }
  0xd9   : > { %2290 = vmatmul.mubr.bf16.gmra.mrb[32].mxu1 %v1617_v38  ;;  %v1121_v50 = vadd.f32 %v5221_v9, %v854_v8  ;;  %v1123_v30 = vadd.f32 %v5221_v9, %v856_v3  ;;  %v668_v34 = vunpack.c.l.bf16 %v457_v16  ;;  %v603_v20 = vunpack.c.h.bf16 %v424_v19  ;;  %2050 = vmatmul.mubr.bf16.gmra.mrb[64].mxu0 %v5523_v26  ;;  %v427_v38 = vld [vmem:[%s4899_s7 + $0x1a8] sm:$0xff] }
  0xda   : > { %v1375_v45 = vmax.f32 %v1119_v27, 0.0  ;;  %v1190_v1 = vadd.f32 %v5217_v24, %v923_v4  ;;  %v1192_v29 = vadd.f32 %v5217_v24, %v925_v0  ;;  %v922_v7 = vmul.f32 %v666_v25, %v5078_v18  ;;  %2059 = vmatprep.mubr.bf16.mxu0 %v5568_v10 }
  0xdb   : > { %v1378_v35 = vmax.f32 %v1122_v36, 0.0  ;;  %v924_v49 = vmul.f32 %v668_v34, %v5078_v18  ;;  %v605_v48 = vunpack.c.h.bf16 %v425_v47  ;;  %v859_v59 = vmul.f32 %v603_v20, %v5082_v46 }
  0xdc   : > { %v1380_v23 = vmax.f32 %v1124_v40, 0.0  ;;  %v1446_v55 = vmax.f32 %v1190_v1, 0.0  ;;  %v1448_v41 = vmax.f32 %v1192_v29, 0.0  ;;  %v1189_v11 = vadd.f32 %v5221_v9, %v922_v7  ;;  %v460_v7 = vld [vmem:[%s4899_s7 + $0x2b0] sm:$0xff] }
  0xdd   : > { %v5747_v39 = vpack.c.bf16 %v1376_v53, %v1374_v21  ;;  %v1377_v2 = vmax.f32 %v1121_v50, 0.0  ;;  %v1379_v33 = vmax.f32 %v1123_v30, 0.0  ;;  %v1191_v12 = vadd.f32 %v5221_v9, %v924_v49 }
  0xde   : > { %v1620_v56 = vpack.c.bf16 %v1448_v41, %v1446_v55  ;;  %v1445_v60 = vmax.f32 %v1189_v11, 0.0  ;;  %v861_v16 = vmul.f32 %v605_v48, %v5082_v46  ;;  %v602_v51 = vunpack.c.l.bf16 %v424_v19 }
  0xdf   : > { %v5752_v52 = vpack.c.bf16 %v1375_v45, %v1373_v28  ;;  %v1447_v57 = vmax.f32 %v1191_v12, 0.0  ;;  %v5755_v61 = vadd.f32 %v5217_v24, %v859_v59  ;;  %v671_v21 = vunpack.c.h.bf16 %v458_v15 }
  0xe0   : > { %v5758_v53 = vpack.c.bf16 %v1380_v23, %v1378_v35  ;;  %2299 = vmatprep.mubr.bf16.mxu1 %v1620_v56  ;;  %v604_v43 = vunpack.c.l.bf16 %v425_v47  ;;  %v673_v8 = vunpack.c.h.bf16 %v459_v42  ;;  %v670_v27 = vunpack.c.l.bf16 %v458_v15  ;;  %v461_v35 = vld [vmem:[%s4899_s7 + $0x2b8] sm:$0xff]  ;;  %v428_v56 = vld [vmem:[%s4899_s7 + $0x1b0] sm:$0xff] }
  0xe1   : > { %v5762_v6 = vpack.c.bf16 %v1379_v33, %v1377_v2  ;;  %v1619_v13 = vpack.c.bf16 %v1447_v57, %v1445_v60  ;;  %v927_v19 = vmul.f32 %v671_v21, %v5082_v46  ;;  %v672_v28 = vunpack.c.l.bf16 %v459_v42  ;;  %2060 = vmatmul.mubr.bf16.gmra.mrb[68].mxu0 %v5575_v5 }
  0xe2   : > { %v5767_v36 = vadd.f32 %v5217_v24, %v861_v16  ;;  %v858_v26 = vmul.f32 %v602_v51, %v5078_v18  ;;  %v929_v3 = vmul.f32 %v673_v8, %v5082_v46  ;;  %v926_v40 = vmul.f32 %v670_v27, %v5078_v18  ;;  %2069 = vmatprep.mubr.bf16.mxu0 %v5580_v17  ;;  %v429_v8 = vld [vmem:[%s4899_s7 + $0x1b8] sm:$0xff] }
  0xe3   : > { %2300 = vmatmul.mubr.bf16.gmra.mrb[36].mxu1 %v1619_v13  ;;  %v1382_v10 = vmax.f32 %v5755_v61, 0.0  ;;  %v1194_v4 = vadd.f32 %v5217_v24, %v927_v19  ;;  %v928_v0 = vmul.f32 %v672_v28, %v5078_v18  ;;  %v607_v25 = vunpack.c.h.bf16 %v426_v58 }
  0xe4   : > { %v860_v47 = vmul.f32 %v604_v43, %v5078_v18  ;;  %v1196_v50 = vadd.f32 %v5217_v24, %v929_v3  ;;  %v1193_v30 = vadd.f32 %v5221_v9, %v926_v40  ;;  %v609_v34 = vunpack.c.h.bf16 %v427_v38 }
  0xe5   : > { %v1450_v20 = vmax.f32 %v1194_v4, 0.0  ;;  %v1195_v45 = vadd.f32 %v5221_v9, %v928_v0  ;;  %v863_v1 = vmul.f32 %v607_v25, %v5082_v46  ;;  %v606_v29 = vunpack.c.l.bf16 %v426_v58 }
  0xe6   : > { %v1125_v49 = vadd.f32 %v5221_v9, %v858_v26  ;;  %v1452_v48 = vmax.f32 %v1196_v50, 0.0  ;;  %v1449_v59 = vmax.f32 %v1193_v30, 0.0  ;;  %v865_v23 = vmul.f32 %v609_v34, %v5082_v46  ;;  %v462_v30 = vld [vmem:[%s4899_s7 + $0x2c0] sm:$0xff] }
  0xe7   : > { %v1384_v55 = vmax.f32 %v5767_v36, 0.0  ;;  %v1451_v41 = vmax.f32 %v1195_v45, 0.0  ;;  %v608_v11 = vunpack.c.l.bf16 %v427_v38  ;;  %v862_v15 = vmul.f32 %v606_v29, %v5078_v18  ;;  %v463_v29 = vld [vmem:[%s4899_s7 + $0x2c8] sm:$0xff] }
  0xe8   : > { %v1127_v2 = vadd.f32 %v5221_v9, %v860_v47  ;;  %v1622_v33 = vpack.c.bf16 %v1452_v48, %v1450_v20  ;;  %v675_v12 = vunpack.c.h.bf16 %v460_v7  ;;  %v677_v42 = vunpack.c.h.bf16 %v461_v35 }
  0xe9   : > { %v1621_v60 = vpack.c.bf16 %v1451_v41, %v1449_v59  ;;  %v1130_v16 = vadd.f32 %v5217_v24, %v863_v1  ;;  %v1132_v51 = vadd.f32 %v5217_v24, %v865_v23  ;;  %v864_v57 = vmul.f32 %v608_v11, %v5078_v18  ;;  %2070 = vmatmul.mubr.bf16.gmra.mrb[72].mxu0 %v5583_v54 }
  0xea   : > { %v1381_v61 = vmax.f32 %v1125_v49, 0.0  ;;  %2309 = vmatprep.mubr.bf16.mxu1 %v1622_v33  ;;  %v931_v5 = vmul.f32 %v675_v12, %v5082_v46  ;;  %v933_v21 = vmul.f32 %v677_v42, %v5082_v46  ;;  %v674_v43 = vunpack.c.l.bf16 %v460_v7  ;;  %2079 = vmatprep.mubr.bf16.mxu0 %v5628_v37 }
  0xeb   : > { %2310 = vmatmul.mubr.bf16.gmra.mrb[40].mxu1 %v1621_v60  ;;  %v1129_v27 = vadd.f32 %v5221_v9, %v862_v15  ;;  %v1131_v17 = vadd.f32 %v5221_v9, %v864_v57  ;;  %v676_v58 = vunpack.c.l.bf16 %v461_v35  ;;  %v611_v13 = vunpack.c.h.bf16 %v428_v56 }
  0xec   : > { %v1383_v19 = vmax.f32 %v1127_v2, 0.0  ;;  %v1198_v28 = vadd.f32 %v5217_v24, %v931_v5  ;;  %v1200_v38 = vadd.f32 %v5217_v24, %v933_v21  ;;  %v930_v36 = vmul.f32 %v674_v43, %v5078_v18  ;;  %v430_v2 = vld [vmem:[%s4899_s7 + $0x1c0] sm:$0xff] }
  0xed   : > { %v1386_v26 = vmax.f32 %v1130_v16, 0.0  ;;  %v1388_v3 = vmax.f32 %v1132_v51, 0.0  ;;  %v932_v40 = vmul.f32 %v676_v58, %v5078_v18  ;;  %v613_v4 = vunpack.c.h.bf16 %v429_v8 }
  0xee   : > { %v1454_v0 = vmax.f32 %v1198_v28, 0.0  ;;  %v1456_v25 = vmax.f32 %v1200_v38, 0.0  ;;  %v1197_v47 = vadd.f32 %v5221_v9, %v930_v36  ;;  %v867_v50 = vmul.f32 %v611_v13, %v5082_v46  ;;  %v464_v36 = vld [vmem:[%s4899_s7 + $0x2d0] sm:$0xff] }
  0xef   : > { %v5805_v34 = vpack.c.bf16 %v1384_v55, %v1382_v10  ;;  %v1385_v20 = vmax.f32 %v1129_v27, 0.0  ;;  %v1387_v45 = vmax.f32 %v1131_v17, 0.0  ;;  %v1199_v1 = vadd.f32 %v5221_v9, %v932_v40 }
  0xf0   : > { %v1624_v7 = vpack.c.bf16 %v1456_v25, %v1454_v0  ;;  %v1453_v35 = vmax.f32 %v1197_v47, 0.0  ;;  %v869_v49 = vmul.f32 %v613_v4, %v5082_v46  ;;  %v610_v48 = vunpack.c.l.bf16 %v428_v56  ;;  %v431_v56 = vld [vmem:[%s4899_s7 + $0x1c8] sm:$0xff] }
  0xf1   : > { %v5812_v59 = vpack.c.bf16 %v1383_v19, %v1381_v61  ;;  %v1455_v10 = vmax.f32 %v1199_v1, 0.0  ;;  %v612_v23 = vunpack.c.l.bf16 %v429_v8  ;;  %v679_v55 = vunpack.c.h.bf16 %v462_v30  ;;  %2080 = vmatmul.mubr.bf16.gmra.mrb[76].mxu0 %v5633_v44 }
  0xf2   : > { %v5814_v41 = vpack.c.bf16 %v1388_v3, %v1386_v26  ;;  %2319 = vmatprep.mubr.bf16.mxu1 %v1624_v7  ;;  %v5817_v11 = vadd.f32 %v5217_v24, %v867_v50  ;;  %v681_v54 = vunpack.c.h.bf16 %v463_v29  ;;  %v678_v15 = vunpack.c.l.bf16 %v462_v30  ;;  %v465_v26 = vld [vmem:[%s4899_s7 + $0x2d8] sm:$0xff]  ;;  %2089 = vmatprep.mubr.bf16.mxu0 %v5635_v62  ;;  %v432_v62 = vld [vmem:[%s4899_s7 + $0x1d0] sm:$0xff] }
  0xf3   : > { %v5820_v33 = vpack.c.bf16 %v1387_v45, %v1385_v20  ;;  %v1623_v12 = vpack.c.bf16 %v1455_v10, %v1453_v35  ;;  %v935_v42 = vmul.f32 %v679_v55, %v5082_v46  ;;  %v680_v37 = vunpack.c.l.bf16 %v463_v29 }
  0xf4   : > { %v5825_v60 = vadd.f32 %v5217_v24, %v869_v49  ;;  %v866_v16 = vmul.f32 %v610_v48, %v5078_v18  ;;  %v937_v51 = vmul.f32 %v681_v54, %v5082_v46  ;;  %v934_v57 = vmul.f32 %v678_v15, %v5078_v18 }
  0xf5   : > { %2320 = vmatmul.mubr.bf16.gmra.mrb[44].mxu1 %v1623_v12  ;;  %v868_v61 = vmul.f32 %v612_v23, %v5078_v18  ;;  %v1202_v5 = vadd.f32 %v5217_v24, %v935_v42  ;;  %v936_v21 = vmul.f32 %v680_v37, %v5078_v18  ;;  %v615_v43 = vunpack.c.h.bf16 %v430_v2 }
  0xf6   : > { %v1390_v8 = vmax.f32 %v5817_v11, 0.0  ;;  %v1204_v27 = vadd.f32 %v5217_v24, %v937_v51  ;;  %v1201_v17 = vadd.f32 %v5221_v9, %v934_v57  ;;  %v617_v58 = vunpack.c.h.bf16 %v431_v56  ;;  %v433_v11 = vld [vmem:[%s4899_s7 + $0x1d8] sm:$0xff] }
  0xf7   : > { %v1458_v13 = vmax.f32 %v1202_v5, 0.0  ;;  %v1203_v19 = vadd.f32 %v5221_v9, %v936_v21  ;;  %v871_v28 = vmul.f32 %v615_v43, %v5082_v46  ;;  %v614_v38 = vunpack.c.l.bf16 %v430_v2 }
  0xf8   : > { %v1133_v3 = vadd.f32 %v5221_v9, %v866_v16  ;;  %v1460_v40 = vmax.f32 %v1204_v27, 0.0  ;;  %v1457_v4 = vmax.f32 %v1201_v17, 0.0  ;;  %v873_v0 = vmul.f32 %v617_v58, %v5082_v46  ;;  %v466_v17 = vld [vmem:[%s4899_s7 + $0x2e0] sm:$0xff] }
  0xf9   : > { %v1135_v25 = vadd.f32 %v5221_v9, %v868_v61  ;;  %v1459_v47 = vmax.f32 %v1203_v19, 0.0  ;;  %v616_v50 = vunpack.c.l.bf16 %v431_v56  ;;  %v870_v30 = vmul.f32 %v614_v38, %v5078_v18  ;;  %2090 = vmatmul.mubr.bf16.gmra.mrb[80].mxu0 %v5641_v31  ;;  %v467_v38 = vld [vmem:[%s4899_s7 + $0x2e8] sm:$0xff] }
  0xfa   : > { %v1392_v20 = vmax.f32 %v5825_v60, 0.0  ;;  %v1626_v45 = vpack.c.bf16 %v1460_v40, %v1458_v13  ;;  %v683_v44 = vunpack.c.h.bf16 %v464_v36  ;;  %v685_v1 = vunpack.c.h.bf16 %v465_v26  ;;  %2099 = vmatprep.mubr.bf16.mxu0 %v5685_v22 }
  0xfb   : > { %v1625_v29 = vpack.c.bf16 %v1459_v47, %v1457_v4  ;;  %v1138_v7 = vadd.f32 %v5217_v24, %v871_v28  ;;  %v1140_v35 = vadd.f32 %v5217_v24, %v873_v0  ;;  %v872_v49 = vmul.f32 %v616_v50, %v5078_v18 }
  0xfc   : > { %v1389_v48 = vmax.f32 %v1133_v3, 0.0  ;;  %2329 = vmatprep.mubr.bf16.mxu1 %v1626_v45  ;;  %v939_v10 = vmul.f32 %v683_v44, %v5082_v46  ;;  %v941_v23 = vmul.f32 %v685_v1, %v5082_v46  ;;  %v682_v55 = vunpack.c.l.bf16 %v464_v36 }
  0xfd   : > { %v1391_v54 = vmax.f32 %v1135_v25, 0.0  ;;  %2330 = vmatmul.mubr.bf16.gmra.mrb[48].mxu1 %v1625_v29  ;;  %v1137_v15 = vadd.f32 %v5221_v9, %v870_v30  ;;  %v1139_v2 = vadd.f32 %v5221_v9, %v872_v49  ;;  %v684_v12 = vunpack.c.l.bf16 %v465_v26  ;;  %v434_v30 = vld [vmem:[%s4899_s7 + $0x1e0] sm:$0xff]  ;;  %v435_v29 = vld [vmem:[%s4899_s7 + $0x1e8] sm:$0xff] }
  0xfe   : > { %v1206_v42 = vadd.f32 %v5217_v24, %v939_v10  ;;  %v1208_v37 = vadd.f32 %v5217_v24, %v941_v23  ;;  %v938_v56 = vmul.f32 %v682_v55, %v5078_v18  ;;  %v619_v60 = vunpack.c.h.bf16 %v432_v62 }
  0xff   : > { %v1394_v16 = vmax.f32 %v1138_v7, 0.0  ;;  %v1396_v51 = vmax.f32 %v1140_v35, 0.0  ;;  %v940_v57 = vmul.f32 %v684_v12, %v5078_v18  ;;  %v621_v61 = vunpack.c.h.bf16 %v433_v11 }
 0x100   : > { %v1462_v5 = vmax.f32 %v1206_v42, 0.0  ;;  %v1464_v21 = vmax.f32 %v1208_v37, 0.0  ;;  %v1205_v43 = vadd.f32 %v5221_v9, %v938_v56  ;;  %v618_v27 = vunpack.c.l.bf16 %v432_v62 }
 0x101   : > { %v5864_v58 = vpack.c.bf16 %v1392_v20, %v1390_v8  ;;  %v1393_v13 = vmax.f32 %v1137_v15, 0.0  ;;  %v1395_v19 = vmax.f32 %v1139_v2, 0.0  ;;  %v1207_v28 = vadd.f32 %v5221_v9, %v940_v57  ;;  %2100 = vmatmul.mubr.bf16.gmra.mrb[84].mxu0 %v5691_v14 }
 0x102   : > { %v1628_v36 = vpack.c.bf16 %v1464_v21, %v1462_v5  ;;  %v1461_v26 = vmax.f32 %v1205_v43, 0.0  ;;  %v875_v31 = vmul.f32 %v619_v60, %v5082_v46  ;;  %v620_v3 = vunpack.c.l.bf16 %v433_v11  ;;  %2109 = vmatprep.mubr.bf16.mxu0 %v5693_v32  ;;  %v468_v60 = vld [vmem:[%s4899_s7 + $0x2f0] sm:$0xff] }
 0x103   : > { %v5869_v40 = vpack.c.bf16 %v1391_v54, %v1389_v48  ;;  %v1463_v4 = vmax.f32 %v1207_v28, 0.0  ;;  %v877_v0 = vmul.f32 %v621_v61, %v5082_v46  ;;  %v687_v22 = vunpack.c.h.bf16 %v466_v17  ;;  %v436_v28 = vld [vmem:[%s4899_s7 + $0x1f0] sm:$0xff] }
 0x104   : > { %v5872_v8 = vpack.c.bf16 %v1396_v51, %v1394_v16  ;;  %2339 = vmatprep.mubr.bf16.mxu1 %v1628_v36  ;;  %v874_v25 = vmul.f32 %v618_v27, %v5078_v18  ;;  %v689_v47 = vunpack.c.h.bf16 %v467_v38  ;;  %v686_v50 = vunpack.c.l.bf16 %v466_v17  ;;  %v469_v16 = vld [vmem:[%s4899_s7 + $0x2f8] sm:$0xff] }
 0x105   : > { %v5876_v20 = vpack.c.bf16 %v1395_v19, %v1393_v13  ;;  %v1627_v45 = vpack.c.bf16 %v1463_v4, %v1461_v26  ;;  %v943_v44 = vmul.f32 %v687_v22, %v5082_v46  ;;  %v688_v1 = vunpack.c.l.bf16 %v467_v38 }
 0x106   : > { %v5881_v7 = vadd.f32 %v5217_v24, %v875_v31  ;;  %v876_v35 = vmul.f32 %v620_v3, %v5078_v18  ;;  %v945_v49 = vmul.f32 %v689_v47, %v5082_v46  ;;  %v942_v62 = vmul.f32 %v686_v50, %v5078_v18 }
 0x107   : > { %2340 = vmatmul.mubr.bf16.gmra.mrb[52].mxu1 %v1627_v45  ;;  %v1144_v48 = vadd.f32 %v5217_v24, %v877_v0  ;;  %v1210_v10 = vadd.f32 %v5217_v24, %v943_v44  ;;  %v944_v23 = vmul.f32 %v688_v1, %v5078_v18  ;;  %v623_v55 = vunpack.c.h.bf16 %v434_v30 }
 0x108   : > { %v1141_v11 = vadd.f32 %v5221_v9, %v874_v25  ;;  %v1212_v54 = vadd.f32 %v5217_v24, %v945_v49  ;;  %v1209_v15 = vadd.f32 %v5221_v9, %v942_v62  ;;  %v625_v2 = vunpack.c.h.bf16 %v435_v29  ;;  %v437_v25 = vld [vmem:[%s4899_s7 + $0x1f8] sm:$0xff] }
 0x109   : > { %v1466_v12 = vmax.f32 %v1210_v10, 0.0  ;;  %v1211_v42 = vadd.f32 %v5221_v9, %v944_v23  ;;  %v879_v37 = vmul.f32 %v623_v55, %v5082_v46  ;;  %v622_v56 = vunpack.c.l.bf16 %v434_v30  ;;  %2110 = vmatmul.mubr.bf16.gmra.mrb[88].mxu0 %v5697_v63 }
 0x10a   : > { %v1143_v14 = vadd.f32 %v5221_v9, %v876_v35  ;;  %v1468_v51 = vmax.f32 %v1212_v54, 0.0  ;;  %v1465_v57 = vmax.f32 %v1209_v15, 0.0  ;;  %v881_v61 = vmul.f32 %v625_v2, %v5082_v46  ;;  %2119 = vmatprep.mubr.bf16.mxu0 %v5747_v39 }
 0x10b   : > { %v1398_v5 = vmax.f32 %v5881_v7, 0.0  ;;  %v1467_v21 = vmax.f32 %v1211_v42, 0.0  ;;  %v1146_v32 = vadd.f32 %v5217_v24, %v879_v37  ;;  %v624_v43 = vunpack.c.l.bf16 %v435_v29 }
 0x10c   : > { %v1630_v27 = vpack.c.bf16 %v1468_v51, %v1466_v12  ;;  %v878_v17 = vmul.f32 %v622_v56, %v5078_v18  ;;  %v691_v13 = vunpack.c.h.bf16 %v468_v60  ;;  %v693_v19 = vunpack.c.h.bf16 %v469_v16  ;;  %v471_v12 = vld [vmem:[%s4899_s7 + $0x308] sm:$0xff] }
 0x10d   : > { %v1400_v38 = vmax.f32 %v1144_v48, 0.0  ;;  %v1397_v36 = vmax.f32 %v1141_v11, 0.0  ;;  %v1629_v26 = vpack.c.bf16 %v1467_v21, %v1465_v57  ;;  %v1148_v31 = vadd.f32 %v5217_v24, %v881_v61  ;;  %v470_v11 = vld [vmem:[%s4899_s7 + $0x300] sm:$0xff] }
 0x10e   : > { %v1399_v3 = vmax.f32 %v1143_v14, 0.0  ;;  %2349 = vmatprep.mubr.bf16.mxu1 %v1630_v27  ;;  %v947_v4 = vmul.f32 %v691_v13, %v5082_v46  ;;  %v949_v0 = vmul.f32 %v693_v19, %v5082_v46  ;;  %v690_v22 = vunpack.c.l.bf16 %v468_v60 }
 0x10f   : > { %2350 = vmatmul.mubr.bf16.gmra.mrb[56].mxu1 %v1629_v26  ;;  %v1402_v47 = vmax.f32 %v1146_v32, 0.0  ;;  %v880_v50 = vmul.f32 %v624_v43, %v5078_v18  ;;  %v692_v30 = vunpack.c.l.bf16 %v469_v16  ;;  %v627_v45 = vunpack.c.h.bf16 %v436_v28  ;;  %v472_v43 = vld [vmem:[%s4899_s7 + $0x310] sm:$0xff] }
 0x110   : > { %v5911_v44 = vadd.f32 %v5221_v9, %v878_v17  ;;  %v1214_v1 = vadd.f32 %v5217_v24, %v947_v4  ;;  %v1216_v29 = vadd.f32 %v5217_v24, %v949_v0  ;;  %v946_v7 = vmul.f32 %v690_v22, %v5078_v18 }
 0x111   : > { %v1404_v35 = vmax.f32 %v1148_v31, 0.0  ;;  %v948_v49 = vmul.f32 %v692_v30, %v5078_v18  ;;  %v629_v62 = vunpack.c.h.bf16 %v437_v25  ;;  %v883_v48 = vmul.f32 %v627_v45, %v5082_v46  ;;  %2120 = vmatmul.mubr.bf16.gmra.mrb[92].mxu0 %v5752_v52 }
 0x112   : > { %v1470_v10 = vmax.f32 %v1214_v1, 0.0  ;;  %v1472_v63 = vmax.f32 %v1216_v29, 0.0  ;;  %v1213_v23 = vadd.f32 %v5221_v9, %v946_v7  ;;  %v626_v55 = vunpack.c.l.bf16 %v436_v28  ;;  %v473_v28 = vld [vmem:[%s4899_s7 + $0x318] sm:$0xff]  ;;  %2129 = vmatprep.mubr.bf16.mxu0 %v5758_v53  ;;  %v474_v29 = vld [vmem:[%s4899_s7 + $0x320] sm:$0xff]  ;;  %v475_v7 = vld [vmem:[%s4899_s7 + $0x328] sm:$0xff] }
 0x113   : > { %v5921_v54 = vpack.c.bf16 %v1400_v38, %v1398_v5  ;;  %v5923_v15 = vpack.c.bf16 %v1399_v3, %v1397_v36  ;;  %v5926_v2 = vadd.f32 %v5221_v9, %v880_v50  ;;  %v1215_v39 = vadd.f32 %v5221_v9, %v948_v49 }
 0x114   : > { %v1632_v42 = vpack.c.bf16 %v1472_v63, %v1470_v10  ;;  %v1469_v37 = vmax.f32 %v1213_v23, 0.0  ;;  %v885_v56 = vmul.f32 %v629_v62, %v5082_v46  ;;  %v5932_v60 = vadd.f32 %v5217_v24, %v883_v48 }
 0x115   : > { %v1401_v16 = vmax.f32 %v5911_v44, 0.0  ;;  %v1471_v14 = vmax.f32 %v1215_v39, 0.0  ;;  %v628_v51 = vunpack.c.l.bf16 %v437_v25  ;;  %v695_v57 = vunpack.c.h.bf16 %v470_v11 }
 0x116   : > { %v5935_v61 = vpack.c.bf16 %v1404_v35, %v1402_v47  ;;  %2359 = vmatprep.mubr.bf16.mxu1 %v1632_v42  ;;  %v882_v5 = vmul.f32 %v626_v55, %v5078_v18  ;;  %v697_v21 = vunpack.c.h.bf16 %v471_v12  ;;  %v694_v32 = vunpack.c.l.bf16 %v470_v11 }
 0x117   : > { %v1403_v27 = vmax.f32 %v5926_v2, 0.0  ;;  %v1631_v17 = vpack.c.bf16 %v1471_v14, %v1469_v37  ;;  %v951_v13 = vmul.f32 %v695_v57, %v5082_v46  ;;  %v696_v19 = vunpack.c.l.bf16 %v471_v12  ;;  %v476_v37 = vld [vmem:[%s4899_s7 + $0x330] sm:$0xff] }
 0x118   : > { %v5944_v38 = vadd.f32 %v5217_v24, %v885_v56  ;;  %v1406_v36 = vmax.f32 %v5932_v60, 0.0  ;;  %v953_v26 = vmul.f32 %v697_v21, %v5082_v46  ;;  %v950_v31 = vmul.f32 %v694_v32, %v5078_v18 }
 0x119   : > { %2360 = vmatmul.mubr.bf16.gmra.mrb[60].mxu1 %v1631_v17  ;;  %v5951_v3 = vmul.f32 %v628_v51, %v5078_v18  ;;  %v1218_v4 = vadd.f32 %v5217_v24, %v951_v13  ;;  %v952_v52 = vmul.f32 %v696_v19, %v5078_v18  ;;  %v699_v0 = vunpack.c.h.bf16 %v472_v43  ;;  %2130 = vmatmul.mubr.bf16.gmra.mrb[96].mxu0 %v5762_v6  ;;  %v477_v17 = vld [vmem:[%s4899_s7 + $0x338] sm:$0xff] }
 0x11a   : > { %v5956_v22 = vadd.f32 %v5221_v9, %v882_v5  ;;  %v1220_v25 = vadd.f32 %v5217_v24, %v953_v26  ;;  %v1217_v47 = vadd.f32 %v5221_v9, %v950_v31  ;;  %v701_v50 = vunpack.c.h.bf16 %v473_v28  ;;  %2139 = vmatprep.mubr.bf16.mxu0 %v5805_v34 }
 0x11b   : > { %v1474_v30 = vmax.f32 %v1218_v4, 0.0  ;;  %v1219_v53 = vadd.f32 %v5221_v9, %v952_v52  ;;  %v955_v45 = vmul.f32 %v699_v0, %v5082_v46  ;;  %v698_v1 = vunpack.c.l.bf16 %v472_v43 }
 0x11c   : > { %v1408_v35 = vmax.f32 %v5944_v38, 0.0  ;;  %v1476_v49 = vmax.f32 %v1220_v25, 0.0  ;;  %v1473_v62 = vmax.f32 %v1217_v47, 0.0  ;;  %v957_v48 = vmul.f32 %v701_v50, %v5082_v46  ;;  %v484_v38 = vld [vmem:[%s4899_s7 + $0x370] sm:$0xff] }
 0x11d   : > { %v1475_v10 = vmax.f32 %v1219_v53, 0.0  ;;  %v1222_v63 = vadd.f32 %v5217_v24, %v955_v45  ;;  %v700_v23 = vunpack.c.l.bf16 %v473_v28  ;;  %v954_v55 = vmul.f32 %v698_v1, %v5078_v18  ;;  %v478_v1 = vld [vmem:[%s4899_s7 + $0x340] sm:$0xff] }
 0x11e   : > { %v1634_v11 = vpack.c.bf16 %v1476_v49, %v1474_v30  ;;  %v1224_v39 = vadd.f32 %v5217_v24, %v957_v48  ;;  %v703_v12 = vunpack.c.h.bf16 %v474_v29  ;;  %v705_v42 = vunpack.c.h.bf16 %v475_v7  ;;  %v479_v48 = vld [vmem:[%s4899_s7 + $0x348] sm:$0xff] }
 0x11f   : > { %v1633_v56 = vpack.c.bf16 %v1475_v10, %v1473_v62  ;;  %v1478_v14 = vmax.f32 %v1222_v63, 0.0  ;;  %v956_v51 = vmul.f32 %v700_v23, %v5078_v18  ;;  %v1221_v57 = vadd.f32 %v5221_v9, %v954_v55 }
 0x120   : > { %2369 = vmatprep.mubr.bf16.mxu1 %v1634_v11  ;;  %v1480_v5 = vmax.f32 %v1224_v39, 0.0  ;;  %v959_v21 = vmul.f32 %v703_v12, %v5082_v46  ;;  %v961_v32 = vmul.f32 %v705_v42, %v5082_v46  ;;  %v702_v43 = vunpack.c.l.bf16 %v474_v29 }
 0x121   : > { %2370 = vmatmul.mubr.bf16.gmra.mrb[64].mxu1 %v1633_v56  ;;  %v1223_v13 = vadd.f32 %v5221_v9, %v956_v51  ;;  %v1477_v19 = vmax.f32 %v1221_v57, 0.0  ;;  %v704_v28 = vunpack.c.l.bf16 %v475_v7  ;;  %v707_v26 = vunpack.c.h.bf16 %v476_v37  ;;  %2140 = vmatmul.mubr.bf16.gmra.mrb[100].mxu0 %v5812_v59  ;;  %v480_v57 = vld [vmem:[%s4899_s7 + $0x350] sm:$0xff] }
 0x122   : > { %v1636_v31 = vpack.c.bf16 %v1480_v5, %v1478_v14  ;;  %v1226_v6 = vadd.f32 %v5217_v24, %v959_v21  ;;  %v1228_v4 = vadd.f32 %v5217_v24, %v961_v32  ;;  %v958_v52 = vmul.f32 %v702_v43, %v5078_v18  ;;  %2149 = vmatprep.mubr.bf16.mxu0 %v5814_v41 }
 0x123   : > { %v1479_v0 = vmax.f32 %v1223_v13, 0.0  ;;  %v960_v25 = vmul.f32 %v704_v28, %v5078_v18  ;;  %v709_v47 = vunpack.c.h.bf16 %v477_v17  ;;  %v963_v34 = vmul.f32 %v707_v26, %v5082_v46 }
 0x124   : > { %2379 = vmatprep.mubr.bf16.mxu1 %v1636_v31  ;;  %v1482_v50 = vmax.f32 %v1226_v6, 0.0  ;;  %v1484_v30 = vmax.f32 %v1228_v4, 0.0  ;;  %v1225_v53 = vadd.f32 %v5221_v9, %v958_v52  ;;  %v706_v45 = vunpack.c.l.bf16 %v476_v37 }
 0x125   : > { %v1635_v29 = vpack.c.bf16 %v1479_v0, %v1477_v19  ;;  %v1227_v7 = vadd.f32 %v5221_v9, %v960_v25  ;;  %v965_v49 = vmul.f32 %v709_v47, %v5082_v46  ;;  %v1230_v62 = vadd.f32 %v5217_v24, %v963_v34 }
 0x126   : > { %v1638_v10 = vpack.c.bf16 %v1484_v30, %v1482_v50  ;;  %v1481_v63 = vmax.f32 %v1225_v53, 0.0  ;;  %v708_v23 = vunpack.c.l.bf16 %v477_v17  ;;  %v962_v55 = vmul.f32 %v706_v45, %v5078_v18  ;;  %v481_v17 = vld [vmem:[%s4899_s7 + $0x358] sm:$0xff]  ;;  %v482_v30 = vld [vmem:[%s4899_s7 + $0x360] sm:$0xff]  ;;  %v483_v53 = vld [vmem:[%s4899_s7 + $0x368] sm:$0xff] }
 0x127   : > { %v1483_v11 = vmax.f32 %v1227_v7, 0.0  ;;  %v1232_v39 = vadd.f32 %v5217_v24, %v965_v49  ;;  %v1486_v12 = vmax.f32 %v1230_v62, 0.0  ;;  %v711_v42 = vunpack.c.h.bf16 %v478_v1 }
 0x128   : > { %v964_v37 = vmul.f32 %v708_v23, %v5078_v18  ;;  %v1229_v56 = vadd.f32 %v5221_v9, %v962_v55  ;;  %v713_v14 = vunpack.c.h.bf16 %v479_v48  ;;  %v710_v51 = vunpack.c.l.bf16 %v478_v1 }
 0x129   : > { %v5998_v5 = vadd.f32 %v5221_v9, %v5951_v3  ;;  %2380 = vmatmul.mubr.bf16.gmra.mrb[68].mxu1 %v1635_v29  ;;  %v1488_v21 = vmax.f32 %v1232_v39, 0.0  ;;  %v967_v32 = vmul.f32 %v711_v42, %v5082_v46  ;;  %v712_v43 = vunpack.c.l.bf16 %v479_v48  ;;  %2150 = vmatmul.mubr.bf16.gmra.mrb[104].mxu0 %v5820_v33 }
 0x12a   : > { %2389 = vmatprep.mubr.bf16.mxu1 %v1638_v10  ;;  %v1637_v59 = vpack.c.bf16 %v1483_v11, %v1481_v63  ;;  %v1231_v13 = vadd.f32 %v5221_v9, %v964_v37  ;;  %v969_v19 = vmul.f32 %v713_v14, %v5082_v46  ;;  %v966_v41 = vmul.f32 %v710_v51, %v5078_v18 }
 0x12b   : > { %v1485_v28 = vmax.f32 %v1229_v56, 0.0  ;;  %v1234_v3 = vadd.f32 %v5217_v24, %v967_v32  ;;  %v968_v26 = vmul.f32 %v712_v43, %v5078_v18  ;;  %v715_v31 = vunpack.c.h.bf16 %v480_v57  ;;  %2159 = vmatprep.mubr.bf16.mxu0 %v5864_v58 }
 0x12c   : > { %v1640_v6 = vpack.c.bf16 %v1488_v21, %v1486_v12  ;;  %v1236_v4 = vadd.f32 %v5217_v24, %v969_v19  ;;  %v1233_v52 = vadd.f32 %v5221_v9, %v966_v41  ;;  %v717_v0 = vunpack.c.h.bf16 %v481_v17 }
 0x12d   : > { %v1487_v25 = vmax.f32 %v1231_v13, 0.0  ;;  %v1235_v47 = vadd.f32 %v5221_v9, %v968_v26  ;;  %v971_v34 = vmul.f32 %v715_v31, %v5082_v46  ;;  %v714_v50 = vunpack.c.l.bf16 %v480_v57  ;;  %v485_v31 = vld [vmem:[%s4899_s7 + $0x378] sm:$0xff] }
 0x12e   : > { %v1490_v45 = vmax.f32 %v1234_v3, 0.0  ;;  %v1492_v1 = vmax.f32 %v1236_v4, 0.0  ;;  %v1489_v29 = vmax.f32 %v1233_v52, 0.0  ;;  %v973_v7 = vmul.f32 %v717_v0, %v5082_v46 }
 0x12f   : > { %v1491_v49 = vmax.f32 %v1235_v47, 0.0  ;;  %v1238_v62 = vadd.f32 %v5217_v24, %v971_v34  ;;  %v716_v48 = vunpack.c.l.bf16 %v481_v17  ;;  %v970_v10 = vmul.f32 %v714_v50, %v5078_v18 }
 0x130   : > { %v6021_v63 = vpack.c.bf16 %v1403_v27, %v1401_v16  ;;  %v1240_v23 = vadd.f32 %v5217_v24, %v973_v7  ;;  %v719_v55 = vunpack.c.h.bf16 %v482_v30  ;;  %v721_v11 = vunpack.c.h.bf16 %v483_v53  ;;  %v6068_v7 = vld [vmem:[%s4899_s7 + $0x388] sm:$0xff] }
 0x131   : > { %v6029_v39 = vpack.c.bf16 %v1408_v35, %v1406_v36  ;;  %v1405_v33 = vmax.f32 %v5956_v22, 0.0  ;;  %2390 = vmatmul.mubr.bf16.gmra.mrb[72].mxu1 %v1637_v59  ;;  %v972_v44 = vmul.f32 %v716_v48, %v5078_v18  ;;  %v6034_v2 = vadd.f32 %v5221_v9, %v970_v10  ;;  %v1891_v36 = vpop.f32.mrb[0].mxu0  ;;  %2160 = vmatmul.mubr.bf16.gmra.mrb[108].mxu0 %v5869_v40 }
 0x132   : > { %v1407_v16 = vmax.f32 %v5998_v5, 0.0  ;;  %2399 = vmatprep.mubr.bf16.mxu1 %v1640_v6  ;;  %v975_v58 = vmul.f32 %v719_v55, %v5082_v46  ;;  %v977_v60 = vmul.f32 %v721_v11, %v5082_v46  ;;  %v718_v27 = vunpack.c.l.bf16 %v482_v30  ;;  %v1893_v56 = vpop.f32.mrb[1].mxu0  ;;  %v6062_v30 = vld [vmem:[%s4899_s7 + $0x380] sm:$0xff]  ;;  %2169 = vmatprep.mubr.bf16.mxu0 %v5872_v8 }
 0x133   : > { %v1639_v35 = vpack.c.bf16 %v1487_v25, %v1485_v28  ;;  %v1642_v12 = vpack.c.bf16 %v1492_v1, %v1490_v45  ;;  %v6040_v42 = vpack.c.bf16 %v1491_v49, %v1489_v29  ;;  %v1494_v37 = vmax.f32 %v1238_v62, 0.0  ;;  %v1895_v17 = vpop.f32.mrb[2].mxu0 }
 0x134   : > { %v1496_v14 = vmax.f32 %v1240_v23, 0.0  ;;  %v6050_v51 = vadd.f32 %v5221_v9, %v972_v44  ;;  %v1493_v57 = vmax.f32 %v6034_v2, 0.0  ;;  %v720_v21 = vunpack.c.l.bf16 %v483_v53  ;;  %v1897_v28 = vpop.f32.mrb[3].mxu0 }
 0x135   : > { %v2819_v32 = vmul.f32 %v1891_v36, %v1891_v36  ;;  %v4529_v43 = vpack.c.bf16 %v1893_v56, %v1891_v36  ;;  %v1242_v59 = vadd.f32 %v5217_v24, %v975_v58  ;;  %v723_v13 = vunpack.c.h.bf16 %v484_v38  ;;  %v1901_v10 = vpop.f32.mrb[4].mxu0 }
 0x136   : > { %v2530_v19 = vadd.f32 %v1895_v17, %v1891_v36  ;;  %v2821_v41 = vmul.f32 %v1895_v17, %v1895_v17  ;;  %v1244_v3 = vadd.f32 %v5217_v24, %v977_v60  ;;  %v974_v26 = vmul.f32 %v718_v27, %v5078_v18  ;;  %v1903_v60 = vpop.f32.mrb[5].mxu0 }
 0x137   : > { %v2820_v6 = vmul.f32 %v1893_v56, %v1893_v56  ;;  %4129 = vst [vmem:[%s6047_s16] sm:$0xff] %v4529_v43  ;;  %v2663_v4 = vadd.f32 %v1897_v28, %v1893_v56  ;;  %v2822_v52 = vmul.f32 %v1897_v28, %v1897_v28  ;;  %v4530_v0 = vpack.c.bf16 %v1897_v28, %v1895_v17 }
 0x138   : > { %v3075_v25 = vadd.f32 %v2821_v41, %v2819_v32  ;;  %v1644_v47 = vpack.c.bf16 %v1496_v14, %v1494_v37  ;;  %v1495_v34 = vmax.f32 %v6050_v51, 0.0  ;;  %v976_v50 = vmul.f32 %v720_v21, %v5078_v18  ;;  %v1905_v37 = vpop.f32.mrb[6].mxu0 }
 0x139   : > { %v3208_v53 = vadd.f32 %v2822_v52, %v2820_v6  ;;  %4130 = vst [vmem:[%s6047_s16 + $0x8] sm:$0xff] %v4530_v0  ;;  %2400 = vmatmul.mubr.bf16.gmra.mrb[76].mxu1 %v1639_v35  ;;  %v725_v45 = vunpack.c.h.bf16 %v485_v31  ;;  %v979_v1 = vmul.f32 %v723_v13, %v5082_v46  ;;  %v722_v29 = vunpack.c.l.bf16 %v484_v38  ;;  %v1907_v32 = vpop.f32.mrb[7].mxu0  ;;  %2170 = vmatmul.mubr.bf16.gmra.mrb[112].mxu0 %v5876_v20 }
 0x13a   : > { %2409 = vmatprep.mubr.bf16.mxu1 %v1642_v12  ;;  %v1498_v40 = vmax.f32 %v1242_v59, 0.0  ;;  %v1500_v49 = vmax.f32 %v1244_v3, 0.0  ;;  %v6071_v62 = vadd.f32 %v5221_v9, %v974_v26  ;;  %v724_v48 = vunpack.c.l.bf16 %v485_v31  ;;  %2179 = vmatprep.mubr.bf16.mxu0 %v5921_v54 }
 0x13b   : > { %v6074_v23 = vadd.f32 %v5221_v9, %v976_v50  ;;  %v981_v8 = vmul.f32 %v725_v45, %v5082_v46  ;;  %v6078_v55 = vadd.f32 %v5217_v24, %v979_v1  ;;  %v727_v11 = vunpack.c.h.bf16 %v6062_v30 }
 0x13c   : > { %v2531_v44 = vadd.f32 %v2530_v19, %v1901_v10  ;;  %v2823_v58 = vmul.f32 %v1901_v10, %v1901_v10  ;;  %v978_v27 = vmul.f32 %v722_v29, %v5078_v18  ;;  %v729_v38 = vunpack.c.h.bf16 %v6068_v7 }
 0x13d   : > { %v2664_v36 = vadd.f32 %v2663_v4, %v1903_v60  ;;  %v2824_v35 = vmul.f32 %v1903_v60, %v1903_v60  ;;  %v4531_v12 = vpack.c.bf16 %v1903_v60, %v1901_v10  ;;  %v980_v56 = vmul.f32 %v724_v48, %v5078_v18  ;;  %v488_v4 = vld [vmem:[%s4899_s7 + $0x390] sm:$0xff] }
 0x13e   : > { %v3076_v14 = vadd.f32 %v3075_v25, %v2823_v58  ;;  %v2532_v51 = vadd.f32 %v2531_v44, %v1905_v37  ;;  %v2825_v21 = vmul.f32 %v1905_v37, %v1905_v37  ;;  %v1248_v43 = vadd.f32 %v5217_v24, %v981_v8 }
 0x13f   : > { %v3209_v17 = vadd.f32 %v3208_v53, %v2824_v35  ;;  %4131 = vst [vmem:[%s6047_s16 + $0x10] sm:$0xff] %v4531_v12  ;;  %v2665_v59 = vadd.f32 %v2664_v36, %v1907_v32  ;;  %v2826_v13 = vmul.f32 %v1907_v32, %v1907_v32  ;;  %v4532_v19 = vpack.c.bf16 %v1907_v32, %v1905_v37 }
 0x140   : > { %v3077_v41 = vadd.f32 %v3076_v14, %v2825_v21  ;;  %v6091_v28 = vpack.c.bf16 %v1407_v16, %v1405_v33  ;;  %v1643_v3 = vpack.c.bf16 %v1495_v34, %v1493_v57  ;;  %v1646_v26 = vpack.c.bf16 %v1500_v49, %v1498_v40  ;;  %v1911_v57 = vpop.f32.mrb[8].mxu0 }
 0x141   : > { %v3210_v31 = vadd.f32 %v3209_v17, %v2826_v13  ;;  %4132 = vst [vmem:[%s6047_s16 + $0x18] sm:$0xff] %v4532_v19  ;;  %2410 = vmatmul.mubr.bf16.gmra.mrb[80].mxu1 %v6040_v42  ;;  %v1497_v6 = vmax.f32 %v6071_v62, 0.0  ;;  %v983_v20 = vmul.f32 %v727_v11, %v5082_v46  ;;  %v726_v22 = vunpack.c.l.bf16 %v6062_v30  ;;  %v1913_v34 = vpop.f32.mrb[9].mxu0  ;;  %2180 = vmatmul.mubr.bf16.gmra.mrb[116].mxu0 %v5923_v15 }
 0x142   : > { %2419 = vmatprep.mubr.bf16.mxu1 %v1644_v47  ;;  %v1499_v5 = vmax.f32 %v6074_v23, 0.0  ;;  %v1502_v33 = vmax.f32 %v6078_v55, 0.0  ;;  %v985_v2 = vmul.f32 %v729_v38, %v5082_v46  ;;  %v728_v16 = vunpack.c.l.bf16 %v6068_v7  ;;  %v1915_v29 = vpop.f32.mrb[10].mxu0  ;;  %v489_v23 = vld [vmem:[%s4899_s7 + $0x398] sm:$0xff]  ;;  %2189 = vmatprep.mubr.bf16.mxu0 %v5935_v61 }
 0x143   : > { %v1504_v54 = vmax.f32 %v1248_v43, 0.0  ;;  %v6107_v42 = vadd.f32 %v5221_v9, %v978_v27  ;;  %v6110_v52 = vadd.f32 %v5221_v9, %v980_v56  ;;  %v6113_v0 = vadd.f32 %v5217_v24, %v983_v20  ;;  %v1917_v48 = vpop.f32.mrb[11].mxu0  ;;  %v490_v56 = vld [vmem:[%s4899_s7 + $0x3a0] sm:$0xff] }
 0x144   : > { %v2533_v25 = vadd.f32 %v2532_v51, %v1911_v57  ;;  %v2827_v47 = vmul.f32 %v1911_v57, %v1911_v57  ;;  %v982_v50 = vmul.f32 %v726_v22, %v5078_v18  ;;  %v731_v30 = vunpack.c.h.bf16 %v488_v4  ;;  %v1921_v32 = vpop.f32.mrb[12].mxu0 }
 0x145   : > { %v2666_v53 = vadd.f32 %v2665_v59, %v1913_v34  ;;  %v2828_v45 = vmul.f32 %v1913_v34, %v1913_v34  ;;  %v4533_v1 = vpack.c.bf16 %v1913_v34, %v1911_v57  ;;  %v1252_v7 = vadd.f32 %v5217_v24, %v985_v2 }
 0x146   : > { %v3078_v40 = vadd.f32 %v3077_v41, %v2827_v47  ;;  %v2534_v49 = vadd.f32 %v2533_v25, %v1915_v29  ;;  %v2829_v62 = vmul.f32 %v1915_v29, %v1915_v29  ;;  %v984_v10 = vmul.f32 %v728_v16, %v5078_v18  ;;  %v1923_v41 = vpop.f32.mrb[13].mxu0 }
 0x147   : > { %v3211_v8 = vadd.f32 %v3210_v31, %v2828_v45  ;;  %4133 = vst [vmem:[%s6047_s16 + $0x20] sm:$0xff] %v4533_v1  ;;  %v2667_v55 = vadd.f32 %v2666_v53, %v1917_v48  ;;  %v2830_v11 = vmul.f32 %v1917_v48, %v1917_v48  ;;  %v4534_v44 = vpack.c.bf16 %v1917_v48, %v1915_v29  ;;  %v1925_v22 = vpop.f32.mrb[14].mxu0 }
 0x148   : > { %v3079_v58 = vadd.f32 %v3078_v40, %v2829_v62  ;;  %v1645_v60 = vpack.c.bf16 %v1499_v5, %v1497_v6  ;;  %v1648_v27 = vpack.c.bf16 %v1504_v54, %v1502_v33  ;;  %v1501_v38 = vmax.f32 %v6107_v42, 0.0  ;;  %v1927_v16 = vpop.f32.mrb[15].mxu0  ;;  %v491_v54 = vld [vmem:[%s4899_s7 + $0x3a8] sm:$0xff] }
 0x149   : > { %v3212_v36 = vadd.f32 %v3211_v8, %v2830_v11  ;;  %4134 = vst [vmem:[%s6047_s16 + $0x28] sm:$0xff] %v4534_v44  ;;  %2420 = vmatmul.mubr.bf16.gmra.mrb[84].mxu1 %v1643_v3  ;;  %v733_v35 = vunpack.c.h.bf16 %v489_v23  ;;  %v987_v12 = vmul.f32 %v731_v30, %v5082_v46  ;;  %v730_v37 = vunpack.c.l.bf16 %v488_v4  ;;  %2190 = vmatmul.mubr.bf16.gmra.mrb[120].mxu0 %v6021_v63 }
 0x14a   : > { %2429 = vmatprep.mubr.bf16.mxu1 %v1646_v26  ;;  %v1503_v14 = vmax.f32 %v6110_v52, 0.0  ;;  %v1506_v51 = vmax.f32 %v6113_v0, 0.0  ;;  %v1508_v15 = vmax.f32 %v1252_v7, 0.0  ;;  %v732_v21 = vunpack.c.l.bf16 %v489_v23  ;;  %2199 = vmatprep.mubr.bf16.mxu0 %v6029_v39  ;;  %v492_v7 = vld [vmem:[%s4899_s7 + $0x3b0] sm:$0xff] }
 0x14b   : > { %v6129_v43 = vadd.f32 %v5221_v9, %v982_v50  ;;  %v6132_v17 = vadd.f32 %v5221_v9, %v984_v10  ;;  %v989_v61 = vmul.f32 %v733_v35, %v5082_v46  ;;  %v6136_v59 = vadd.f32 %v5217_v24, %v987_v12 }
 0x14c   : > { %v2535_v13 = vadd.f32 %v2534_v49, %v1921_v32  ;;  %v2831_v19 = vmul.f32 %v1921_v32, %v1921_v32  ;;  %v986_v3 = vmul.f32 %v730_v37, %v5078_v18  ;;  %v735_v26 = vunpack.c.h.bf16 %v490_v56  ;;  %v1931_v48 = vpop.f32.mrb[16].mxu0 }
 0x14d   : > { %v2668_v31 = vadd.f32 %v2667_v55, %v1923_v41  ;;  %v2832_v6 = vmul.f32 %v1923_v41, %v1923_v41  ;;  %v4535_v20 = vpack.c.bf16 %v1923_v41, %v1921_v32  ;;  %v988_v4 = vmul.f32 %v732_v21, %v5078_v18  ;;  %v1933_v44 = vpop.f32.mrb[17].mxu0  ;;  %v493_v21 = vld [vmem:[%s4899_s7 + $0x3b8] sm:$0xff] }
 0x14e   : > { %v3080_v5 = vadd.f32 %v3079_v58, %v2831_v19  ;;  %v2536_v33 = vadd.f32 %v2535_v13, %v1925_v22  ;;  %v2833_v2 = vmul.f32 %v1925_v22, %v1925_v22  ;;  %v1256_v57 = vadd.f32 %v5217_v24, %v989_v61  ;;  %v1935_v35 = vpop.f32.mrb[18].mxu0 }
 0x14f   : > { %v3213_v42 = vadd.f32 %v3212_v36, %v2832_v6  ;;  %4135 = vst [vmem:[%s6047_s16 + $0x30] sm:$0xff] %v4535_v20  ;;  %v2669_v52 = vadd.f32 %v2668_v31, %v1927_v16  ;;  %v2834_v0 = vmul.f32 %v1927_v16, %v1927_v16  ;;  %v4536_v25 = vpack.c.bf16 %v1927_v16, %v1925_v22  ;;  %v494_v20 = vld [vmem:[%s4899_s7 + $0x3c0] sm:$0xff] }
 0x150   : > { %v3081_v47 = vadd.f32 %v3080_v5, %v2833_v2  ;;  %v1647_v34 = vpack.c.bf16 %v1503_v14, %v1501_v38  ;;  %v1650_v50 = vpack.c.bf16 %v1508_v15, %v1506_v51  ;;  %v1505_v30 = vmax.f32 %v6129_v43, 0.0  ;;  %v1937_v51 = vpop.f32.mrb[19].mxu0 }
 0x151   : > { %v3214_v53 = vadd.f32 %v3213_v42, %v2834_v0  ;;  %4136 = vst [vmem:[%s6047_s16 + $0x38] sm:$0xff] %v4536_v25  ;;  %2430 = vmatmul.mubr.bf16.gmra.mrb[88].mxu1 %v1645_v60  ;;  %v737_v45 = vunpack.c.h.bf16 %v491_v54  ;;  %v991_v1 = vmul.f32 %v735_v26, %v5082_v46  ;;  %v734_v29 = vunpack.c.l.bf16 %v490_v56  ;;  %2200 = vmatmul.mubr.bf16.gmra.mrb[124].mxu0 %v6091_v28 }
 0x152   : > { %2439 = vmatprep.mubr.bf16.mxu1 %v1648_v27  ;;  %v1507_v40 = vmax.f32 %v6132_v17, 0.0  ;;  %v1510_v49 = vmax.f32 %v6136_v59, 0.0  ;;  %v1512_v63 = vmax.f32 %v1256_v57, 0.0  ;;  %v736_v62 = vunpack.c.l.bf16 %v491_v54 }
 0x153   : > { %v6152_v10 = vadd.f32 %v5221_v9, %v986_v3  ;;  %v6155_v23 = vadd.f32 %v5221_v9, %v988_v4  ;;  %v993_v39 = vmul.f32 %v737_v45, %v5082_v46  ;;  %v6159_v8 = vadd.f32 %v5217_v24, %v991_v1 }
 0x154   : > { %v2537_v55 = vadd.f32 %v2536_v33, %v1931_v48  ;;  %v2835_v11 = vmul.f32 %v1931_v48, %v1931_v48  ;;  %v990_v58 = vmul.f32 %v734_v29, %v5078_v18  ;;  %v739_v60 = vunpack.c.h.bf16 %v492_v7  ;;  %v1941_v28 = vpop.f32.mrb[20].mxu0 }
 0x155   : > { %v2670_v27 = vadd.f32 %v2669_v52, %v1933_v44  ;;  %v2836_v38 = vmul.f32 %v1933_v44, %v1933_v44  ;;  %v4537_v36 = vpack.c.bf16 %v1933_v44, %v1931_v48  ;;  %v992_v12 = vmul.f32 %v736_v62, %v5078_v18  ;;  %v1943_v0 = vpop.f32.mrb[21].mxu0 }
 0x156   : > { %v3082_v37 = vadd.f32 %v3081_v47, %v2835_v11  ;;  %v2538_v56 = vadd.f32 %v2537_v55, %v1935_v35  ;;  %v2837_v14 = vmul.f32 %v1935_v35, %v1935_v35  ;;  %v1260_v15 = vadd.f32 %v5217_v24, %v993_v39 }
 0x157   : > { %v3215_v32 = vadd.f32 %v3214_v53, %v2836_v38  ;;  %4137 = vst [vmem:[%s6047_s16 + $0x40] sm:$0xff] %v4537_v36  ;;  %v2671_v43 = vadd.f32 %v2670_v27, %v1937_v51  ;;  %v2838_v17 = vmul.f32 %v1937_v51, %v1937_v51  ;;  %v4538_v61 = vpack.c.bf16 %v1937_v51, %v1935_v35  ;;  %v1945_v53 = vpop.f32.mrb[22].mxu0 }
 0x158   : > { %v3083_v59 = vadd.f32 %v3082_v37, %v2837_v14  ;;  %v1649_v13 = vpack.c.bf16 %v1507_v40, %v1505_v30  ;;  %v1652_v19 = vpack.c.bf16 %v1512_v63, %v1510_v49  ;;  %v1509_v41 = vmax.f32 %v6152_v10, 0.0  ;;  %v1947_v40 = vpop.f32.mrb[23].mxu0  ;;  %v495_v63 = vld [vmem:[%s4899_s7 + $0x3c8] sm:$0xff] }
 0x159   : > { %v3216_v3 = vadd.f32 %v3215_v32, %v2838_v17  ;;  %4138 = vst [vmem:[%s6047_s16 + $0x48] sm:$0xff] %v4538_v61  ;;  %2440 = vmatmul.mubr.bf16.gmra.mrb[92].mxu1 %v1647_v34  ;;  %v741_v26 = vunpack.c.h.bf16 %v493_v21  ;;  %v995_v31 = vmul.f32 %v739_v60, %v5082_v46  ;;  %v738_v6 = vunpack.c.l.bf16 %v492_v7 }
 0x15a   : > { %2449 = vmatprep.mubr.bf16.mxu1 %v1650_v50  ;;  %v1511_v22 = vmax.f32 %v6155_v23, 0.0  ;;  %v1514_v4 = vmax.f32 %v6159_v8, 0.0  ;;  %v1516_v5 = vmax.f32 %v1260_v15, 0.0  ;;  %v740_v33 = vunpack.c.l.bf16 %v493_v21 }
 0x15b   : > { %v6174_v2 = vadd.f32 %v5221_v9, %v990_v58  ;;  %v6177_v16 = vadd.f32 %v5221_v9, %v992_v12  ;;  %v997_v57 = vmul.f32 %v741_v26, %v5082_v46  ;;  %v6181_v54 = vadd.f32 %v5217_v24, %v995_v31  ;;  %v6211_v26 = vld [vmem:[%s4899_s7 + $0x3d0] sm:$0xff] }
 0x15c   : > { %v2539_v42 = vadd.f32 %v2538_v56, %v1941_v28  ;;  %v2839_v52 = vmul.f32 %v1941_v28, %v1941_v28  ;;  %v994_v25 = vmul.f32 %v738_v6, %v5078_v18  ;;  %v743_v47 = vunpack.c.h.bf16 %v494_v20  ;;  %v1951_v12 = vpop.f32.mrb[24].mxu0 }
 0x15d   : > { %v2672_v34 = vadd.f32 %v2671_v43, %v1943_v0  ;;  %v2840_v50 = vmul.f32 %v1943_v0, %v1943_v0  ;;  %v4539_v30 = vpack.c.bf16 %v1943_v0, %v1941_v28  ;;  %v996_v45 = vmul.f32 %v740_v33, %v5078_v18  ;;  %v1953_v32 = vpop.f32.mrb[25].mxu0 }
 0x15e   : > { %v3084_v1 = vadd.f32 %v3083_v59, %v2839_v52  ;;  %v2540_v29 = vadd.f32 %v2539_v42, %v1945_v53  ;;  %v2841_v7 = vmul.f32 %v1945_v53, %v1945_v53  ;;  %v6186_v49 = vadd.f32 %v5217_v24, %v997_v57 }
 0x15f   : > { %v3217_v62 = vadd.f32 %v3216_v3, %v2840_v50  ;;  %4139 = vst [vmem:[%s6047_s16 + $0x50] sm:$0xff] %v4539_v30  ;;  %v2673_v48 = vadd.f32 %v2672_v34, %v1947_v40  ;;  %v2842_v10 = vmul.f32 %v1947_v40, %v1947_v40  ;;  %v4540_v23 = vpack.c.bf16 %v1947_v40, %v1945_v53 }
 0x160   : > { %v3085_v39 = vadd.f32 %v3084_v1, %v2841_v7  ;;  %v1651_v8 = vpack.c.bf16 %v1511_v22, %v1509_v41  ;;  %v1654_v55 = vpack.c.bf16 %v1516_v5, %v1514_v4  ;;  %v745_v44 = vunpack.c.h.bf16 %v495_v63 }
 0x161   : > { %v3218_v11 = vadd.f32 %v3217_v62, %v2842_v10  ;;  %4140 = vst [vmem:[%s6047_s16 + $0x58] sm:$0xff] %v4540_v23  ;;  %2450 = vmatmul.mubr.bf16.gmra.mrb[96].mxu1 %v1649_v13  ;;  %v999_v58 = vmul.f32 %v743_v47, %v5082_v46  ;;  %v742_v60 = vunpack.c.l.bf16 %v494_v20  ;;  %v1513_v27 = vmax.f32 %v6174_v2, 0.0 }
 0x162   : > { %2459 = vmatprep.mubr.bf16.mxu1 %v1652_v19  ;;  %v1515_v38 = vmax.f32 %v6177_v16, 0.0  ;;  %v1518_v36 = vmax.f32 %v6181_v54, 0.0  ;;  %v744_v35 = vunpack.c.l.bf16 %v495_v63  ;;  %v1520_v37 = vmax.f32 %v6186_v49, 0.0  ;;  %v1955_v19 = vpop.f32.mrb[26].mxu0  ;;  %v6222_v54 = vld [vmem:[%s4899_s7 + $0x3d8] sm:$0xff] }
 0x163   : > { %v6197_v56 = vadd.f32 %v5221_v9, %v994_v25  ;;  %v6200_v14 = vadd.f32 %v5221_v9, %v996_v45  ;;  %v1001_v51 = vmul.f32 %v745_v44, %v5082_v46  ;;  %v2541_v15 = vadd.f32 %v2540_v29, %v1951_v12  ;;  %v1957_v22 = vpop.f32.mrb[27].mxu0 }
 0x164   : > { %v2843_v21 = vmul.f32 %v1951_v12, %v1951_v12  ;;  %v6204_v43 = vadd.f32 %v5217_v24, %v999_v58  ;;  %v998_v17 = vmul.f32 %v742_v60, %v5078_v18  ;;  %v2674_v61 = vadd.f32 %v2673_v48, %v1953_v32  ;;  %v1961_v29 = vpop.f32.mrb[28].mxu0  ;;  %v6249_v60 = vld [vmem:[%s4899_s7 + $0x3e0] sm:$0xff] }
 0x165   : > { %v2844_v59 = vmul.f32 %v1953_v32, %v1953_v32  ;;  %v4541_v13 = vpack.c.bf16 %v1953_v32, %v1951_v12  ;;  %v6207_v41 = vpop.f32.mrb[0].mxu1  ;;  %v1000_v3 = vmul.f32 %v744_v35, %v5078_v18  ;;  %v2542_v6 = vadd.f32 %v2541_v15, %v1955_v19  ;;  %v1963_v10 = vpop.f32.mrb[29].mxu0 }
 0x166   : > { %v3086_v31 = vadd.f32 %v3085_v39, %v2843_v21  ;;  %v2845_v20 = vmul.f32 %v1955_v19, %v1955_v19  ;;  %v6213_v4 = vpop.f32.mrb[1].mxu1  ;;  %v6216_v5 = vadd.f32 %v5217_v24, %v1001_v51  ;;  %v2675_v28 = vadd.f32 %v2674_v61, %v1957_v22  ;;  %v1965_v44 = vpop.f32.mrb[30].mxu0  ;;  %v6262_v61 = vld [vmem:[%s4899_s7 + $0x3e8] sm:$0xff] }
 0x167   : > { %v3219_v33 = vadd.f32 %v3218_v11, %v2844_v59  ;;  %4141 = vst [vmem:[%s6047_s16 + $0x60] sm:$0xff] %v4541_v13  ;;  %v2846_v2 = vmul.f32 %v1957_v22, %v1957_v22  ;;  %v4542_v16 = vpack.c.bf16 %v1957_v22, %v1955_v19  ;;  %v6219_v57 = vpop.f32.mrb[2].mxu1  ;;  %v4593_v52 = vpack.c.bf16 %v6213_v4, %v6207_v41  ;;  %v1967_v35 = vpop.f32.mrb[31].mxu0 }
 0x168   : > { %v3087_v42 = vadd.f32 %v3086_v31, %v2845_v20  ;;  %v6226_v0 = vpop.f32.mrb[3].mxu1  ;;  %v747_v25 = vunpack.c.h.bf16 %v6211_v26  ;;  %v1653_v34 = vpack.c.bf16 %v1515_v38, %v1513_v27  ;;  %v1656_v30 = vpack.c.bf16 %v1520_v37, %v1518_v36 }
 0x169   : > { %v3220_v47 = vadd.f32 %v3219_v33, %v2846_v2  ;;  %4142 = vst [vmem:[%s6047_s16 + $0x68] sm:$0xff] %v4542_v16  ;;  %2460 = vmatmul.mubr.bf16.gmra.mrb[100].mxu1 %v1651_v8  ;;  %v4594_v50 = vpack.c.bf16 %v6226_v0, %v6219_v57  ;;  %4193 = vst [vmem:[%s6047_s16 + $0x200] sm:$0xff] %v4593_v52  ;;  %v1517_v53 = vmax.f32 %v6197_v56, 0.0  ;;  %v1519_v45 = vmax.f32 %v6200_v14, 0.0 }
 0x16a   : > { %2469 = vmatprep.mubr.bf16.mxu1 %v1654_v55  ;;  %v749_v1 = vunpack.c.h.bf16 %v6222_v54  ;;  %v1522_v7 = vmax.f32 %v6204_v43, 0.0  ;;  %v1524_v40 = vmax.f32 %v6216_v5, 0.0  ;;  %v6240_v49 = vadd.f32 %v5221_v9, %v998_v17 }
 0x16b   : > { %4194 = vst [vmem:[%s6047_s16 + $0x208] sm:$0xff] %v4594_v50  ;;  %v6243_v63 = vadd.f32 %v5221_v9, %v1000_v3  ;;  %v2543_v62 = vadd.f32 %v2542_v6, %v1961_v29  ;;  %v2847_v48 = vmul.f32 %v1961_v29, %v1961_v29  ;;  %v1003_v23 = vmul.f32 %v747_v25, %v5082_v46 }
 0x16c   : > { %v746_v39 = vunpack.c.l.bf16 %v6211_v26  ;;  %v2676_v8 = vadd.f32 %v2675_v28, %v1963_v10  ;;  %v2848_v55 = vmul.f32 %v1963_v10, %v1963_v10  ;;  %v4543_v11 = vpack.c.bf16 %v1963_v10, %v1961_v29  ;;  %v1971_v33 = vpop.f32.mrb[32].mxu0 }
 0x16d   : > { %v748_v58 = vunpack.c.l.bf16 %v6222_v54  ;;  %v3088_v27 = vadd.f32 %v3087_v42, %v2847_v48  ;;  %v2544_v38 = vadd.f32 %v2543_v62, %v1965_v44  ;;  %v2849_v36 = vmul.f32 %v1965_v44, %v1965_v44  ;;  %v1973_v25 = vpop.f32.mrb[33].mxu0 }
 0x16e   : > { %v6251_v12 = vpop.f32.mrb[4].mxu1  ;;  %v1005_v37 = vmul.f32 %v749_v1, %v5082_v46  ;;  %v3221_v56 = vadd.f32 %v3220_v47, %v2848_v55  ;;  %4143 = vst [vmem:[%s6047_s16 + $0x70] sm:$0xff] %v4543_v11  ;;  %v2677_v14 = vadd.f32 %v2676_v8, %v1967_v35  ;;  %v2850_v51 = vmul.f32 %v1967_v35, %v1967_v35 }
 0x16f   : > { %v4544_v15 = vpack.c.bf16 %v1967_v35, %v1965_v44  ;;  %v6255_v21 = vpop.f32.mrb[5].mxu1  ;;  %v3089_v32 = vadd.f32 %v3088_v27, %v2849_v36  ;;  %v751_v59 = vunpack.c.h.bf16 %v6249_v60  ;;  %v1655_v19 = vpack.c.bf16 %v1519_v45, %v1517_v53  ;;  %v1975_v45 = vpop.f32.mrb[34].mxu0 }
 0x170   : > { %v4595_v43 = vpack.c.bf16 %v6255_v21, %v6251_v12  ;;  %v6259_v17 = vpop.f32.mrb[6].mxu1  ;;  %v3222_v13 = vadd.f32 %v3221_v56, %v2850_v51  ;;  %v1658_v26 = vpack.c.bf16 %v1524_v40, %v1522_v7  ;;  %v1270_v31 = vadd.f32 %v5217_v24, %v1003_v23 }
 0x171   : > { %4144 = vst [vmem:[%s6047_s16 + $0x78] sm:$0xff] %v4544_v15  ;;  %2470 = vmatmul.mubr.bf16.gmra.mrb[104].mxu1 %v1653_v34  ;;  %v6266_v3 = vpop.f32.mrb[7].mxu1  ;;  %v1521_v20 = vmax.f32 %v6240_v49, 0.0  ;;  %v1272_v22 = vadd.f32 %v5217_v24, %v1005_v37  ;;  %v1002_v5 = vmul.f32 %v746_v39, %v5078_v18  ;;  %v1523_v28 = vmax.f32 %v6243_v63, 0.0  ;;  %v1977_v49 = vpop.f32.mrb[35].mxu0 }
 0x172   : > { %2479 = vmatprep.mubr.bf16.mxu1 %v1656_v30  ;;  %4195 = vst [vmem:[%s6047_s16 + $0x210] sm:$0xff] %v4595_v43  ;;  %v4596_v6 = vpack.c.bf16 %v6266_v3, %v6259_v17  ;;  %v1526_v2 = vmax.f32 %v1270_v31, 0.0  ;;  %v1004_v16 = vmul.f32 %v748_v58, %v5078_v18  ;;  %v753_v54 = vunpack.c.h.bf16 %v6262_v61  ;;  %v6294_v58 = vld [vmem:[%s4899_s7 + $0x3f0] sm:$0xff] }
 0x173   : > { %v2545_v42 = vadd.f32 %v2544_v38, %v1971_v33  ;;  %v2851_v52 = vmul.f32 %v1971_v33, %v1971_v33  ;;  %v1528_v47 = vmax.f32 %v1272_v22, 0.0  ;;  %v1007_v34 = vmul.f32 %v751_v59, %v5082_v46 }
 0x174   : > { %4196 = vst [vmem:[%s6047_s16 + $0x218] sm:$0xff] %v4596_v6  ;;  %v2678_v50 = vadd.f32 %v2677_v14, %v1973_v25  ;;  %v2852_v30 = vmul.f32 %v1973_v25, %v1973_v25  ;;  %v4545_v53 = vpack.c.bf16 %v1973_v25, %v1971_v33  ;;  %v6281_v1 = vadd.f32 %v5221_v9, %v1002_v5  ;;  %v1981_v15 = vpop.f32.mrb[36].mxu0 }
 0x175   : > { %v3090_v29 = vadd.f32 %v3089_v32, %v2851_v52  ;;  %v2546_v7 = vadd.f32 %v2545_v42, %v1975_v45  ;;  %v2853_v40 = vmul.f32 %v1975_v45, %v1975_v45  ;;  %v1271_v62 = vadd.f32 %v5221_v9, %v1004_v16  ;;  %v1983_v31 = vpop.f32.mrb[37].mxu0  ;;  %v6312_v52 = vld [vmem:[%s4899_s7 + $0x3f8] sm:$0xff] }
 0x176   : > { %v6283_v63 = vpop.f32.mrb[8].mxu1  ;;  %v3223_v48 = vadd.f32 %v3222_v13, %v2852_v30  ;;  %4145 = vst [vmem:[%s6047_s16 + $0x80] sm:$0xff] %v4545_v53  ;;  %v2679_v10 = vadd.f32 %v2678_v50, %v1977_v49  ;;  %v2854_v23 = vmul.f32 %v1977_v49, %v1977_v49  ;;  %v4546_v39 = vpack.c.bf16 %v1977_v49, %v1975_v45 }
 0x177   : > { %v6287_v8 = vpop.f32.mrb[9].mxu1  ;;  %v3091_v55 = vadd.f32 %v3090_v29, %v2853_v40  ;;  %v1657_v38 = vpack.c.bf16 %v1523_v28, %v1521_v20  ;;  %v1660_v35 = vpack.c.bf16 %v1528_v47, %v1526_v2  ;;  %v1525_v56 = vmax.f32 %v6281_v1, 0.0  ;;  %v1985_v28 = vpop.f32.mrb[38].mxu0 }
 0x178   : > { %v4597_v11 = vpack.c.bf16 %v6287_v8, %v6283_v63  ;;  %v6291_v44 = vpop.f32.mrb[10].mxu1  ;;  %v3224_v27 = vadd.f32 %v3223_v48, %v2854_v23  ;;  %4146 = vst [vmem:[%s6047_s16 + $0x88] sm:$0xff] %v4546_v39  ;;  %v1009_v14 = vmul.f32 %v753_v54, %v5082_v46  ;;  %v1274_v51 = vadd.f32 %v5217_v24, %v1007_v34  ;;  %v1987_v54 = vpop.f32.mrb[39].mxu0 }
 0x179   : > { %2480 = vmatmul.mubr.bf16.gmra.mrb[108].mxu1 %v1655_v19  ;;  %v6297_v36 = vpop.f32.mrb[11].mxu1  ;;  %v1527_v32 = vmax.f32 %v1271_v62, 0.0  ;;  %v750_v43 = vunpack.c.l.bf16 %v6249_v60  ;;  %v752_v59 = vunpack.c.l.bf16 %v6262_v61  ;;  %v755_v13 = vunpack.c.h.bf16 %v6294_v58 }
 0x17a   : > { %2489 = vmatprep.mubr.bf16.mxu1 %v1658_v26  ;;  %4197 = vst [vmem:[%s6047_s16 + $0x220] sm:$0xff] %v4597_v11  ;;  %v4598_v37 = vpack.c.bf16 %v6297_v36, %v6291_v44  ;;  %v2547_v19 = vadd.f32 %v2546_v7, %v1981_v15  ;;  %v2855_v26 = vmul.f32 %v1981_v15, %v1981_v15  ;;  %v1530_v20 = vmax.f32 %v1274_v51, 0.0 }
 0x17b   : > { %v1276_v6 = vadd.f32 %v5217_v24, %v1009_v14  ;;  %v2680_v22 = vadd.f32 %v2679_v10, %v1983_v31  ;;  %v2856_v5 = vmul.f32 %v1983_v31, %v1983_v31  ;;  %v4547_v33 = vpack.c.bf16 %v1983_v31, %v1981_v15 }
 0x17c   : > { %4198 = vst [vmem:[%s6047_s16 + $0x228] sm:$0xff] %v4598_v37  ;;  %v1006_v2 = vmul.f32 %v750_v43, %v5078_v18  ;;  %v3092_v60 = vadd.f32 %v3091_v55, %v2855_v26  ;;  %v2548_v61 = vadd.f32 %v2547_v19, %v1985_v28  ;;  %v2857_v16 = vmul.f32 %v1985_v28, %v1985_v28  ;;  %v1991_v39 = vpop.f32.mrb[40].mxu0 }
 0x17d   : > { %v1532_v42 = vmax.f32 %v1276_v6, 0.0  ;;  %v3225_v25 = vadd.f32 %v3224_v27, %v2856_v5  ;;  %4147 = vst [vmem:[%s6047_s16 + $0x90] sm:$0xff] %v4547_v33  ;;  %v2681_v47 = vadd.f32 %v2680_v22, %v1987_v54  ;;  %v2858_v34 = vmul.f32 %v1987_v54, %v1987_v54 }
 0x17e   : > { %v4548_v50 = vpack.c.bf16 %v1987_v54, %v1985_v28  ;;  %v3093_v30 = vadd.f32 %v3092_v60, %v2857_v16  ;;  %v1008_v45 = vmul.f32 %v752_v59, %v5078_v18  ;;  %v1273_v1 = vadd.f32 %v5221_v9, %v1006_v2 }
 0x17f   : > { %v3226_v29 = vadd.f32 %v3225_v25, %v2858_v34  ;;  %v757_v40 = vunpack.c.h.bf16 %v6312_v52  ;;  %v1011_v49 = vmul.f32 %v755_v13, %v5082_v46  ;;  %v1659_v62 = vpack.c.bf16 %v1527_v32, %v1525_v56  ;;  %v1993_v56 = vpop.f32.mrb[41].mxu0 }
 0x180   : > { %v6315_v53 = vpop.f32.mrb[12].mxu1  ;;  %4148 = vst [vmem:[%s6047_s16 + $0x98] sm:$0xff] %v4548_v50  ;;  %v1275_v23 = vadd.f32 %v5221_v9, %v1008_v45  ;;  %v1662_v11 = vpack.c.bf16 %v1532_v42, %v1530_v20  ;;  %v1529_v27 = vmax.f32 %v1273_v1, 0.0  ;;  %v2549_v14 = vadd.f32 %v2548_v61, %v1991_v39  ;;  %v1995_v13 = vpop.f32.mrb[42].mxu0 }
 0x181   : > { %2490 = vmatmul.mubr.bf16.gmra.mrb[112].mxu1 %v1657_v38  ;;  %v6320_v7 = vpop.f32.mrb[13].mxu1  ;;  %v1013_v38 = vmul.f32 %v757_v40, %v5082_v46  ;;  %v1278_v37 = vadd.f32 %v5217_v24, %v1011_v49  ;;  %v754_v15 = vunpack.c.l.bf16 %v6294_v58  ;;  %v2682_v32 = vadd.f32 %v2681_v47, %v1993_v56  ;;  %v1997_v6 = vpop.f32.mrb[43].mxu0 }
 0x182   : > { %2499 = vmatprep.mubr.bf16.mxu1 %v1660_v35  ;;  %v4599_v48 = vpack.c.bf16 %v6320_v7, %v6315_v53  ;;  %v6326_v10 = vpop.f32.mrb[14].mxu1  ;;  %v2859_v35 = vmul.f32 %v1991_v39, %v1991_v39  ;;  %v2860_v43 = vmul.f32 %v1993_v56, %v1993_v56  ;;  %v4549_v59 = vpack.c.bf16 %v1993_v56, %v1991_v39 }
 0x183   : > { %v6329_v55 = vpop.f32.mrb[15].mxu1  ;;  %v1531_v19 = vmax.f32 %v1275_v23, 0.0  ;;  %v2550_v26 = vadd.f32 %v2549_v14, %v1995_v13  ;;  %v2861_v31 = vmul.f32 %v1995_v13, %v1995_v13  ;;  %v1280_v20 = vadd.f32 %v5217_v24, %v1013_v38 }
 0x184   : > { %4199 = vst [vmem:[%s6047_s16 + $0x230] sm:$0xff] %v4599_v48  ;;  %v4600_v51 = vpack.c.bf16 %v6329_v55, %v6326_v10  ;;  %v3094_v46 = vadd.f32 %v3093_v30, %v2859_v35  ;;  %v3227_v22 = vadd.f32 %v3226_v29, %v2860_v43  ;;  %4149 = vst [vmem:[%s6047_s16 + $0xa0] sm:$0xff] %v4549_v59  ;;  %v756_v16 = vunpack.c.l.bf16 %v6312_v52  ;;  %v2001_v34 = vpop.f32.mrb[44].mxu0 }
 0x185   : > { %v2683_v5 = vadd.f32 %v2682_v32, %v1997_v6  ;;  %v2862_v33 = vmul.f32 %v1997_v6, %v1997_v6  ;;  %v4550_v28 = vpack.c.bf16 %v1997_v6, %v1995_v13  ;;  %v1010_v54 = vmul.f32 %v754_v15, %v5078_v18  ;;  %v2003_v52 = vpop.f32.mrb[45].mxu0 }
 0x186   : > { %4200 = vst [vmem:[%s6047_s16 + $0x238] sm:$0xff] %v4600_v51  ;;  %v3095_v2 = vadd.f32 %v3094_v46, %v2861_v31  ;;  %v1534_v25 = vmax.f32 %v1278_v37, 0.0  ;;  %v1536_v47 = vmax.f32 %v1280_v20, 0.0  ;;  %v1661_v50 = vpack.c.bf16 %v1531_v19, %v1529_v27  ;;  %v2005_v39 = vpop.f32.mrb[46].mxu0 }
 0x187   : > { %v3228_v60 = vadd.f32 %v3227_v22, %v2862_v33  ;;  %4150 = vst [vmem:[%s6047_s16 + $0xa8] sm:$0xff] %v4550_v28  ;;  %v1012_v45 = vmul.f32 %v756_v16, %v5078_v18  ;;  %v2551_v1 = vadd.f32 %v2550_v26, %v2001_v34  ;;  %v2863_v29 = vmul.f32 %v2001_v34, %v2001_v34  ;;  %v2007_v37 = vpop.f32.mrb[47].mxu0 }
 0x188   : > { %v6340_v58 = vpop.f32.mrb[16].mxu1  ;;  %v1277_v49 = vadd.f32 %v5221_v9, %v1010_v54  ;;  %v2864_v48 = vmul.f32 %v2003_v52, %v2003_v52  ;;  %v4551_v23 = vpack.c.bf16 %v2003_v52, %v2001_v34  ;;  %v2865_v38 = vmul.f32 %v2005_v39, %v2005_v39 }
 0x189   : > { %2500 = vmatmul.mubr.bf16.gmra.mrb[116].mxu1 %v1659_v62  ;;  %v6343_v61 = vpop.f32.mrb[17].mxu1  ;;  %v2684_v62 = vadd.f32 %v2683_v5, %v2003_v52  ;;  %v3096_v27 = vadd.f32 %v3095_v2, %v2863_v29  ;;  %v2552_v18 = vadd.f32 %v2551_v1, %v2005_v39  ;;  %v1664_v14 = vpack.c.bf16 %v1536_v47, %v1534_v25 }
 0x18a   : > { %2509 = vmatprep.mubr.bf16.mxu1 %v1662_v11  ;;  %v4601_v24 = vpack.c.bf16 %v6343_v61, %v6340_v58  ;;  %v6349_v42 = vpop.f32.mrb[18].mxu1  ;;  %v1279_v11 = vadd.f32 %v5221_v9, %v1012_v45  ;;  %v3229_v35 = vadd.f32 %v3228_v60, %v2864_v48  ;;  %4151 = vst [vmem:[%s6047_s16 + $0xb0] sm:$0xff] %v4551_v23  ;;  %v1533_v59 = vmax.f32 %v1277_v49, 0.0 }
 0x18b   : > { %v6351_v30 = vpop.f32.mrb[19].mxu1  ;;  %v2685_v56 = vadd.f32 %v2684_v62, %v2007_v37  ;;  %v2866_v51 = vmul.f32 %v2007_v37, %v2007_v37  ;;  %v4552_v15 = vpack.c.bf16 %v2007_v37, %v2005_v39  ;;  %v3097_v32 = vadd.f32 %v3096_v27, %v2865_v38 }
 0x18c   : > { %4201 = vst [vmem:[%s6047_s16 + $0x240] sm:$0xff] %v4601_v24  ;;  %v4602_v40 = vpack.c.bf16 %v6351_v30, %v6349_v42  ;;  %v1535_v13 = vmax.f32 %v1279_v11, 0.0  ;;  %v2011_v9 = vpop.f32.mrb[48].mxu0 }
 0x18d   : > { %v3230_v43 = vadd.f32 %v3229_v35, %v2866_v51  ;;  %4152 = vst [vmem:[%s6047_s16 + $0xb8] sm:$0xff] %v4552_v15  ;;  %v2553_v26 = vadd.f32 %v2552_v18, %v2011_v9  ;;  %v2867_v31 = vmul.f32 %v2011_v9, %v2011_v9  ;;  %v2013_v6 = vpop.f32.mrb[49].mxu0 }
 0x18e   : > { %4202 = vst [vmem:[%s6047_s16 + $0x248] sm:$0xff] %v4602_v40  ;;  %v2686_v5 = vadd.f32 %v2685_v56, %v2013_v6  ;;  %v2868_v33 = vmul.f32 %v2013_v6, %v2013_v6  ;;  %v4553_v28 = vpack.c.bf16 %v2013_v6, %v2011_v9  ;;  %v2015_v2 = vpop.f32.mrb[50].mxu0  ;;  %v1663_v60 = vpack.c.bf16 %v1535_v13, %v1533_v59 }
 0x18f   : > { %v3098_v54 = vadd.f32 %v3097_v32, %v2867_v31  ;;  %v2554_v24 = vadd.f32 %v2553_v26, %v2015_v2  ;;  %v2869_v25 = vmul.f32 %v2015_v2, %v2015_v2  ;;  %v2017_v47 = vpop.f32.mrb[51].mxu0 }
 0x190   : > { %v3231_v34 = vadd.f32 %v3230_v43, %v2868_v33  ;;  %4153 = vst [vmem:[%s6047_s16 + $0xc0] sm:$0xff] %v4553_v28  ;;  %v2870_v45 = vmul.f32 %v2017_v47, %v2017_v47  ;;  %v4554_v1 = vpack.c.bf16 %v2017_v47, %v2015_v2 }
 0x191   : > { %2510 = vmatmul.mubr.bf16.gmra.mrb[120].mxu1 %v1661_v50  ;;  %v2687_v50 = vadd.f32 %v2686_v5, %v2017_v47  ;;  %v3099_v29 = vadd.f32 %v3098_v54, %v2869_v25 }
 0x192   : > { %2519 = vmatprep.mubr.bf16.mxu1 %v1664_v14  ;;  %v6362_v19 = vpop.f32.mrb[20].mxu1  ;;  %v3232_v40 = vadd.f32 %v3231_v34, %v2870_v45  ;;  %4154 = vst [vmem:[%s6047_s16 + $0xc8] sm:$0xff] %v4554_v1 }
 0x193   : > { %v6364_v46 = vpop.f32.mrb[21].mxu1 }
 0x194   : > { %v4603_v20 = vpack.c.bf16 %v6364_v46, %v6362_v19  ;;  %v6368_v22 = vpop.f32.mrb[22].mxu1  ;;  %v2021_v62 = vpop.f32.mrb[52].mxu0 }
 0x195   : > { %v6370_v16 = vpop.f32.mrb[23].mxu1  ;;  %v2555_v23 = vadd.f32 %v2554_v24, %v2021_v62  ;;  %v2871_v39 = vmul.f32 %v2021_v62, %v2021_v62  ;;  %v2023_v11 = vpop.f32.mrb[53].mxu0 }
 0x196   : > { %4203 = vst [vmem:[%s6047_s16 + $0x250] sm:$0xff] %v4603_v20  ;;  %v4604_v52 = vpack.c.bf16 %v6370_v16, %v6368_v22  ;;  %v2688_v38 = vadd.f32 %v2687_v50, %v2023_v11  ;;  %v2872_v37 = vmul.f32 %v2023_v11, %v2023_v11  ;;  %v4555_v14 = vpack.c.bf16 %v2023_v11, %v2021_v62  ;;  %v2025_v35 = vpop.f32.mrb[54].mxu0 }
 0x197   : > { %v3100_v51 = vadd.f32 %v3099_v29, %v2871_v39  ;;  %v2556_v15 = vadd.f32 %v2555_v23, %v2025_v35  ;;  %v2873_v32 = vmul.f32 %v2025_v35, %v2025_v35  ;;  %v2027_v43 = vpop.f32.mrb[55].mxu0 }
 0x198   : > { %4204 = vst [vmem:[%s6047_s16 + $0x258] sm:$0xff] %v4604_v52  ;;  %v3233_v59 = vadd.f32 %v3232_v40, %v2872_v37  ;;  %4155 = vst [vmem:[%s6047_s16 + $0xd0] sm:$0xff] %v4555_v14  ;;  %v2689_v13 = vadd.f32 %v2688_v38, %v2027_v43  ;;  %v2874_v9 = vmul.f32 %v2027_v43, %v2027_v43 }
 0x199   : > { %2520 = vmatmul.mubr.bf16.gmra.mrb[124].mxu1 %v1663_v60  ;;  %v4556_v26 = vpack.c.bf16 %v2027_v43, %v2025_v35  ;;  %v3101_v31 = vadd.f32 %v3100_v51, %v2873_v32 }
 0x19a   : > { %v6378_v49 = vpop.f32.mrb[24].mxu1  ;;  %v3234_v20 = vadd.f32 %v3233_v59, %v2874_v9 }
 0x19b   : > { %v6380_v48 = vpop.f32.mrb[25].mxu1  ;;  %4156 = vst [vmem:[%s6047_s16 + $0xd8] sm:$0xff] %v4556_v26 }
 0x19c   : > { %v4605_v27 = vpack.c.bf16 %v6380_v48, %v6378_v49  ;;  %v6384_v18 = vpop.f32.mrb[26].mxu1  ;;  %v2031_v5 = vpop.f32.mrb[56].mxu0 }
 0x19d   : > { %v6386_v56 = vpop.f32.mrb[27].mxu1  ;;  %v2557_v33 = vadd.f32 %v2556_v15, %v2031_v5  ;;  %v2875_v28 = vmul.f32 %v2031_v5, %v2031_v5  ;;  %v2033_v2 = vpop.f32.mrb[57].mxu0 }
 0x19e   : > { %4205 = vst [vmem:[%s6047_s16 + $0x260] sm:$0xff] %v4605_v27  ;;  %v4606_v6 = vpack.c.bf16 %v6386_v56, %v6384_v18  ;;  %v2690_v54 = vadd.f32 %v2689_v13, %v2033_v2  ;;  %v2876_v24 = vmul.f32 %v2033_v2, %v2033_v2  ;;  %v4557_v25 = vpack.c.bf16 %v2033_v2, %v2031_v5  ;;  %v2035_v47 = vpop.f32.mrb[58].mxu0 }
 0x19f   : > { %v3102_v50 = vadd.f32 %v3101_v31, %v2875_v28  ;;  %v2558_v45 = vadd.f32 %v2557_v33, %v2035_v47  ;;  %v2877_v1 = vmul.f32 %v2035_v47, %v2035_v47  ;;  %v2037_v29 = vpop.f32.mrb[59].mxu0 }
 0x1a0   : > { %4206 = vst [vmem:[%s6047_s16 + $0x268] sm:$0xff] %v4606_v6  ;;  %v3235_v40 = vadd.f32 %v3234_v20, %v2876_v24  ;;  %4157 = vst [vmem:[%s6047_s16 + $0xe0] sm:$0xff] %v4557_v25  ;;  %v2691_v62 = vadd.f32 %v2690_v54, %v2037_v29  ;;  %v2878_v23 = vmul.f32 %v2037_v29, %v2037_v29 }
 0x1a1   : > { %v4558_v39 = vpack.c.bf16 %v2037_v29, %v2035_v47  ;;  %v3103_v27 = vadd.f32 %v3102_v50, %v2877_v1 }
 0x1a2   : > { %v3236_v37 = vadd.f32 %v3235_v40, %v2878_v23 }
 0x1a3   : > { %4158 = vst [vmem:[%s6047_s16 + $0xe8] sm:$0xff] %v4558_v39 }
 0x1a4   : > { %v6394_v60 = vpop.f32.mrb[28].mxu1  ;;  %v2041_v35 = vpop.f32.mrb[60].mxu0 }
 0x1a5   : > { %v6396_v34 = vpop.f32.mrb[29].mxu1  ;;  %v2559_v51 = vadd.f32 %v2558_v45, %v2041_v35  ;;  %v2879_v15 = vmul.f32 %v2041_v35, %v2041_v35  ;;  %v2043_v32 = vpop.f32.mrb[61].mxu0 }
 0x1a6   : > { %v6398_v52 = vpop.f32.mrb[30].mxu1  ;;  %v4607_v38 = vpack.c.bf16 %v6396_v34, %v6394_v60  ;;  %v2692_v59 = vadd.f32 %v2691_v62, %v2043_v32  ;;  %v2880_v13 = vmul.f32 %v2043_v32, %v2043_v32  ;;  %v4559_v9 = vpack.c.bf16 %v2043_v32, %v2041_v35  ;;  %v2045_v26 = vpop.f32.mrb[62].mxu0 }
 0x1a7   : > { %v6401_v11 = vpop.f32.mrb[31].mxu1  ;;  %v3104_v6 = vadd.f32 %v3103_v27, %v2879_v15  ;;  %v2560_v20 = vadd.f32 %v2559_v51, %v2045_v26  ;;  %v2881_v5 = vmul.f32 %v2045_v26, %v2045_v26  ;;  %v2047_v33 = vpop.f32.mrb[63].mxu0 }
 0x1a8   : > { %v4608_v14 = vpack.c.bf16 %v6401_v11, %v6398_v52  ;;  %4207 = vst [vmem:[%s6047_s16 + $0x270] sm:$0xff] %v4607_v38  ;;  %v3237_v2 = vadd.f32 %v3236_v37, %v2880_v13  ;;  %4159 = vst [vmem:[%s6047_s16 + $0xf0] sm:$0xff] %v4559_v9  ;;  %v2693_v54 = vadd.f32 %v2692_v59, %v2047_v33 }
 0x1a9   : > { %v2882_v24 = vmul.f32 %v2047_v33, %v2047_v33  ;;  %v4560_v25 = vpack.c.bf16 %v2047_v33, %v2045_v26  ;;  %v3105_v50 = vadd.f32 %v3104_v6, %v2881_v5 }
 0x1aa   : > { %4208 = vst [vmem:[%s6047_s16 + $0x278] sm:$0xff] %v4608_v14 }
 0x1ab   : > { %v3238_v1 = vadd.f32 %v3237_v2, %v2882_v24  ;;  %4160 = vst [vmem:[%s6047_s16 + $0xf8] sm:$0xff] %v4560_v25 }
 0x1ac   : > { %v6410_v43 = vpop.f32.mrb[32].mxu1  ;;  %v2051_v40 = vpop.f32.mrb[64].mxu0 }
 0x1ad   : > { %v6412_v31 = vpop.f32.mrb[33].mxu1  ;;  %v2561_v62 = vadd.f32 %v2560_v20, %v2051_v40  ;;  %v2883_v23 = vmul.f32 %v2051_v40, %v2051_v40  ;;  %v2053_v39 = vpop.f32.mrb[65].mxu0 }
 0x1ae   : > { %v6414_v28 = vpop.f32.mrb[34].mxu1  ;;  %v4609_v45 = vpack.c.bf16 %v6412_v31, %v6410_v43  ;;  %v2694_v27 = vadd.f32 %v2693_v54, %v2053_v39  ;;  %v2884_v38 = vmul.f32 %v2053_v39, %v2053_v39  ;;  %v4561_v37 = vpack.c.bf16 %v2053_v39, %v2051_v40  ;;  %v2055_v14 = vpop.f32.mrb[66].mxu0 }
 0x1af   : > { %v6417_v47 = vpop.f32.mrb[35].mxu1  ;;  %v3106_v35 = vadd.f32 %v3105_v50, %v2883_v23  ;;  %v2562_v51 = vadd.f32 %v2561_v62, %v2055_v14  ;;  %v2885_v15 = vmul.f32 %v2055_v14, %v2055_v14  ;;  %v2057_v32 = vpop.f32.mrb[67].mxu0 }
 0x1b0   : > { %v4610_v29 = vpack.c.bf16 %v6417_v47, %v6414_v28  ;;  %4209 = vst [vmem:[%s6047_s16 + $0x280] sm:$0xff] %v4609_v45  ;;  %v3239_v13 = vadd.f32 %v3238_v1, %v2884_v38  ;;  %4161 = vst [vmem:[%s6047_s16 + $0x100] sm:$0xff] %v4561_v37  ;;  %v2695_v9 = vadd.f32 %v2694_v27, %v2057_v32 }
 0x1b1   : > { %v2886_v26 = vmul.f32 %v2057_v32, %v2057_v32  ;;  %v4562_v6 = vpack.c.bf16 %v2057_v32, %v2055_v14  ;;  %v3107_v5 = vadd.f32 %v3106_v35, %v2885_v15 }
 0x1b2   : > { %4210 = vst [vmem:[%s6047_s16 + $0x288] sm:$0xff] %v4610_v29 }
 0x1b3   : > { %v3240_v54 = vadd.f32 %v3239_v13, %v2886_v26  ;;  %4162 = vst [vmem:[%s6047_s16 + $0x108] sm:$0xff] %v4562_v6 }
 0x1b4   : > { %v2061_v50 = vpop.f32.mrb[68].mxu0 }
 0x1b5   : > { %v2563_v45 = vadd.f32 %v2562_v51, %v2061_v50  ;;  %v2887_v1 = vmul.f32 %v2061_v50, %v2061_v50  ;;  %v2063_v29 = vpop.f32.mrb[69].mxu0 }
 0x1b6   : > { %v6426_v59 = vpop.f32.mrb[36].mxu1  ;;  %v2696_v40 = vadd.f32 %v2695_v9, %v2063_v29  ;;  %v2888_v62 = vmul.f32 %v2063_v29, %v2063_v29  ;;  %v4563_v23 = vpack.c.bf16 %v2063_v29, %v2061_v50  ;;  %v2065_v39 = vpop.f32.mrb[70].mxu0 }
 0x1b7   : > { %v6429_v20 = vpop.f32.mrb[37].mxu1  ;;  %v3108_v27 = vadd.f32 %v3107_v5, %v2887_v1  ;;  %v2564_v38 = vadd.f32 %v2563_v45, %v2065_v39  ;;  %v2889_v37 = vmul.f32 %v2065_v39, %v2065_v39  ;;  %v2067_v14 = vpop.f32.mrb[71].mxu0 }
 0x1b8   : > { %v4611_v33 = vpack.c.bf16 %v6429_v20, %v6426_v59  ;;  %v6433_v2 = vpop.f32.mrb[38].mxu1  ;;  %v3241_v15 = vadd.f32 %v3240_v54, %v2888_v62  ;;  %4163 = vst [vmem:[%s6047_s16 + $0x110] sm:$0xff] %v4563_v23  ;;  %v2697_v32 = vadd.f32 %v2696_v40, %v2067_v14  ;;  %v2890_v51 = vmul.f32 %v2067_v14, %v2067_v14 }
 0x1b9   : > { %v6436_v24 = vpop.f32.mrb[39].mxu1  ;;  %v4564_v13 = vpack.c.bf16 %v2067_v14, %v2065_v39  ;;  %v3109_v9 = vadd.f32 %v3108_v27, %v2889_v37 }
 0x1ba   : > { %7349 = vst [vmem:[#allocation3_spill] sm:$0xff] %v6436_v24  ;;  %4211 = vst [vmem:[%s6047_s16 + $0x290] sm:$0xff] %v4611_v33  ;;  %v4612_v25 = vpack.c.bf16 %v6436_v24, %v6433_v2  ;;  %v3242_v5 = vadd.f32 %v3241_v15, %v2890_v51 }
 0x1bb   : > { %4164 = vst [vmem:[%s6047_s16 + $0x118] sm:$0xff] %v4564_v13 }
 0x1bc   : > { %4212 = vst [vmem:[%s6047_s16 + $0x298] sm:$0xff] %v4612_v25  ;;  %v2071_v50 = vpop.f32.mrb[72].mxu0 }
 0x1bd   : > { %v2565_v45 = vadd.f32 %v2564_v38, %v2071_v50  ;;  %v2891_v1 = vmul.f32 %v2071_v50, %v2071_v50  ;;  %v2073_v29 = vpop.f32.mrb[73].mxu0 }
 0x1be   : > { %v6442_v35 = vpop.f32.mrb[40].mxu1  ;;  %v2698_v40 = vadd.f32 %v2697_v32, %v2073_v29  ;;  %v2892_v62 = vmul.f32 %v2073_v29, %v2073_v29  ;;  %v4565_v23 = vpack.c.bf16 %v2073_v29, %v2071_v50  ;;  %v2075_v39 = vpop.f32.mrb[74].mxu0 }
 0x1bf   : > { %7350 = vst [vmem:[#allocation4_spill] sm:$0xff] %v6442_v35  ;;  %v6445_v26 = vpop.f32.mrb[41].mxu1  ;;  %v3110_v27 = vadd.f32 %v3109_v9, %v2891_v1  ;;  %v2566_v37 = vadd.f32 %v2565_v45, %v2075_v39  ;;  %v2893_v14 = vmul.f32 %v2075_v39, %v2075_v39  ;;  %v2077_v15 = vpop.f32.mrb[75].mxu0 }
 0x1c0   : > { %7351 = vst [vmem:[#allocation5_spill] sm:$0xff] %v6445_v26  ;;  %v4613_v6 = vpack.c.bf16 %v6445_v26, %v6442_v35  ;;  %v6449_v33 = vpop.f32.mrb[42].mxu1  ;;  %v3243_v51 = vadd.f32 %v3242_v5, %v2892_v62  ;;  %4165 = vst [vmem:[%s6047_s16 + $0x120] sm:$0xff] %v4565_v23  ;;  %v2699_v13 = vadd.f32 %v2698_v40, %v2077_v15 }
 0x1c1   : > { %7352 = vst [vmem:[#allocation6_spill] sm:$0xff] %v6449_v33  ;;  %v6452_v25 = vpop.f32.mrb[43].mxu1 }
 0x1c2   : > { %7353 = vst [vmem:[#allocation7_spill] sm:$0xff] %v6452_v25  ;;  %4213 = vst [vmem:[%s6047_s16 + $0x2a0] sm:$0xff] %v4613_v6  ;;  %v4614_v54 = vpack.c.bf16 %v6452_v25, %v6449_v33  ;;  %v2894_v6 = vmul.f32 %v2077_v15, %v2077_v15  ;;  %v4566_v25 = vpack.c.bf16 %v2077_v15, %v2075_v39 }
 0x1c3   : > { %v3111_v33 = vadd.f32 %v3110_v27, %v2893_v14 }
 0x1c4   : > { %4214 = vst [vmem:[%s6047_s16 + $0x2a8] sm:$0xff] %v4614_v54  ;;  %v3244_v26 = vadd.f32 %v3243_v51, %v2894_v6  ;;  %4166 = vst [vmem:[%s6047_s16 + $0x128] sm:$0xff] %v4566_v25  ;;  %v2081_v50 = vpop.f32.mrb[76].mxu0 }
 0x1c5   : > { %v2567_v45 = vadd.f32 %v2566_v37, %v2081_v50  ;;  %v2895_v1 = vmul.f32 %v2081_v50, %v2081_v50  ;;  %v2083_v29 = vpop.f32.mrb[77].mxu0 }
 0x1c6   : > { %v2700_v25 = vadd.f32 %v2699_v13, %v2083_v29  ;;  %v2896_v62 = vmul.f32 %v2083_v29, %v2083_v29  ;;  %v4567_v23 = vpack.c.bf16 %v2083_v29, %v2081_v50  ;;  %v2085_v39 = vpop.f32.mrb[78].mxu0 }
 0x1c7   : > { %v3112_v27 = vadd.f32 %v3111_v33, %v2895_v1  ;;  %v2568_v14 = vadd.f32 %v2567_v45, %v2085_v39  ;;  %v2897_v15 = vmul.f32 %v2085_v39, %v2085_v39  ;;  %v2087_v51 = vpop.f32.mrb[79].mxu0 }
 0x1c8   : > { %v6459_v38 = vpop.f32.mrb[44].mxu1  ;;  %v3245_v6 = vadd.f32 %v3244_v26, %v2896_v62  ;;  %4167 = vst [vmem:[%s6047_s16 + $0x130] sm:$0xff] %v4567_v23  ;;  %v2701_v37 = vadd.f32 %v2700_v25, %v2087_v51 }
 0x1c9   : > { %7354 = vst [vmem:[#allocation8_spill] sm:$0xff] %v6459_v38  ;;  %v6462_v32 = vpop.f32.mrb[45].mxu1 }
 0x1ca   : > { %7355 = vst [vmem:[#allocation9_spill] sm:$0xff] %v6462_v32  ;;  %v4615_v54 = vpack.c.bf16 %v6462_v32, %v6459_v38  ;;  %v6466_v9 = vpop.f32.mrb[46].mxu1  ;;  %v2898_v32 = vmul.f32 %v2087_v51, %v2087_v51  ;;  %v4568_v38 = vpack.c.bf16 %v2087_v51, %v2085_v39 }
 0x1cb   : > { %7356 = vst [vmem:[#allocation10_spill] sm:$0xff] %v6466_v9  ;;  %v6468_v5 = vpop.f32.mrb[47].mxu1 }
 0x1cc   : > { %7357 = vst [vmem:[#allocation11_spill] sm:$0xff] %v6468_v5  ;;  %4215 = vst [vmem:[%s6047_s16 + $0x2b0] sm:$0xff] %v4615_v54  ;;  %v4616_v40 = vpack.c.bf16 %v6468_v5, %v6466_v9  ;;  %v3113_v54 = vadd.f32 %v3112_v27, %v2897_v15  ;;  %v3246_v5 = vadd.f32 %v3245_v6, %v2898_v32  ;;  %v2091_v45 = vpop.f32.mrb[80].mxu0 }
 0x1cd   : > { %4168 = vst [vmem:[%s6047_s16 + $0x138] sm:$0xff] %v4568_v38  ;;  %v2569_v1 = vadd.f32 %v2568_v14, %v2091_v45  ;;  %v2899_v29 = vmul.f32 %v2091_v45, %v2091_v45 }
 0x1ce   : > { %4216 = vst [vmem:[%s6047_s16 + $0x2b8] sm:$0xff] %v4616_v40  ;;  %v2093_v40 = vpop.f32.mrb[81].mxu0 }
 0x1cf   : > { %v2702_v38 = vadd.f32 %v2701_v37, %v2093_v40  ;;  %v2900_v25 = vmul.f32 %v2093_v40, %v2093_v40  ;;  %v4569_v62 = vpack.c.bf16 %v2093_v40, %v2091_v45  ;;  %v2095_v23 = vpop.f32.mrb[82].mxu0  ;;  %v3114_v39 = vadd.f32 %v3113_v54, %v2899_v29 }
 0x1d0   : > { %v6475_v35 = vpop.f32.mrb[48].mxu1  ;;  %v2570_v27 = vadd.f32 %v2569_v1, %v2095_v23  ;;  %v2901_v15 = vmul.f32 %v2095_v23, %v2095_v23  ;;  %v2097_v51 = vpop.f32.mrb[83].mxu0 }
 0x1d1   : > { %7358 = vst [vmem:[#allocation12_spill] sm:$0xff] %v6475_v35  ;;  %v6478_v13 = vpop.f32.mrb[49].mxu1  ;;  %v3247_v6 = vadd.f32 %v3246_v5, %v2900_v25  ;;  %4169 = vst [vmem:[%s6047_s16 + $0x140] sm:$0xff] %v4569_v62  ;;  %v2902_v14 = vmul.f32 %v2097_v51, %v2097_v51 }
 0x1d2   : > { %7359 = vst [vmem:[#allocation13_spill] sm:$0xff] %v6478_v13  ;;  %v4617_v33 = vpack.c.bf16 %v6478_v13, %v6475_v35  ;;  %v6482_v50 = vpop.f32.mrb[50].mxu1  ;;  %v2703_v13 = vadd.f32 %v2702_v38, %v2097_v51  ;;  %v4570_v35 = vpack.c.bf16 %v2097_v51, %v2095_v23  ;;  %v3115_v9 = vadd.f32 %v3114_v39, %v2901_v15 }
 0x1d3   : > { %v6484_v26 = vpop.f32.mrb[51].mxu1 }
 0x1d4   : > { %7360 = vst [vmem:[#allocation14_spill] sm:$0xff] %v6484_v26  ;;  %4217 = vst [vmem:[%s6047_s16 + $0x2c0] sm:$0xff] %v4617_v33  ;;  %v4618_v32 = vpack.c.bf16 %v6484_v26, %v6482_v50  ;;  %v3248_v33 = vadd.f32 %v3247_v6, %v2902_v14  ;;  %v2101_v37 = vpop.f32.mrb[84].mxu0 }
 0x1d5   : > { %4170 = vst [vmem:[%s6047_s16 + $0x148] sm:$0xff] %v4570_v35  ;;  %v2571_v45 = vadd.f32 %v2570_v27, %v2101_v37  ;;  %v2903_v54 = vmul.f32 %v2101_v37, %v2101_v37  ;;  %v2103_v1 = vpop.f32.mrb[85].mxu0 }
 0x1d6   : > { %4218 = vst [vmem:[%s6047_s16 + $0x2c8] sm:$0xff] %v4618_v32  ;;  %v2704_v40 = vadd.f32 %v2703_v13, %v2103_v1  ;;  %v2904_v32 = vmul.f32 %v2103_v1, %v2103_v1  ;;  %v4571_v38 = vpack.c.bf16 %v2103_v1, %v2101_v37  ;;  %v2105_v35 = vpop.f32.mrb[86].mxu0 }
 0x1d7   : > { %v3116_v62 = vadd.f32 %v3115_v9, %v2903_v54  ;;  %v2572_v23 = vadd.f32 %v2571_v45, %v2105_v35  ;;  %v2905_v39 = vmul.f32 %v2105_v35, %v2105_v35  ;;  %v2107_v27 = vpop.f32.mrb[87].mxu0 }
 0x1d8   : > { %v3249_v15 = vadd.f32 %v3248_v33, %v2904_v32  ;;  %4171 = vst [vmem:[%s6047_s16 + $0x150] sm:$0xff] %v4571_v38  ;;  %v2705_v51 = vadd.f32 %v2704_v40, %v2107_v27  ;;  %v2906_v6 = vmul.f32 %v2107_v27, %v2107_v27  ;;  %v4572_v14 = vpack.c.bf16 %v2107_v27, %v2105_v35 }
 0x1da   : > { %v6492_v24 = vpop.f32.mrb[52].mxu1  ;;  %v3250_v37 = vadd.f32 %v3249_v15, %v2906_v6  ;;  %4172 = vst [vmem:[%s6047_s16 + $0x158] sm:$0xff] %v4572_v14 }
 0x1db   : > { %7361 = vst [vmem:[#allocation15_spill] sm:$0xff] %v6492_v24  ;;  %v6494_v26 = vpop.f32.mrb[53].mxu1 }
 0x1dc   : > { %7362 = vst [vmem:[#allocation16_spill] sm:$0xff] %v6494_v26  ;;  %v4619_v5 = vpack.c.bf16 %v6494_v26, %v6492_v24  ;;  %v6498_v29 = vpop.f32.mrb[54].mxu1  ;;  %v3117_v26 = vadd.f32 %v3116_v62, %v2905_v39  ;;  %v2111_v24 = vpop.f32.mrb[88].mxu0 }
 0x1dd   : > { %7363 = vst [vmem:[#allocation17_spill] sm:$0xff] %v6498_v29  ;;  %v6500_v25 = vpop.f32.mrb[55].mxu1  ;;  %v2573_v45 = vadd.f32 %v2572_v23, %v2111_v24  ;;  %v2907_v33 = vmul.f32 %v2111_v24, %v2111_v24  ;;  %v2113_v54 = vpop.f32.mrb[89].mxu0 }
 0x1de   : > { %7364 = vst [vmem:[#allocation18_spill] sm:$0xff] %v6500_v25  ;;  %4219 = vst [vmem:[%s6047_s16 + $0x2d0] sm:$0xff] %v4619_v5  ;;  %v4620_v13 = vpack.c.bf16 %v6500_v25, %v6498_v29  ;;  %v2706_v32 = vadd.f32 %v2705_v51, %v2113_v54  ;;  %v2908_v38 = vmul.f32 %v2113_v54, %v2113_v54  ;;  %v2115_v62 = vpop.f32.mrb[90].mxu0 }
 0x1df   : > { %v4573_v35 = vpack.c.bf16 %v2113_v54, %v2111_v24  ;;  %v3118_v27 = vadd.f32 %v3117_v26, %v2907_v33  ;;  %v2574_v15 = vadd.f32 %v2573_v45, %v2115_v62  ;;  %v2909_v6 = vmul.f32 %v2115_v62, %v2115_v62  ;;  %v2117_v23 = vpop.f32.mrb[91].mxu0 }
 0x1e0   : > { %4220 = vst [vmem:[%s6047_s16 + $0x2d8] sm:$0xff] %v4620_v13  ;;  %v3251_v14 = vadd.f32 %v3250_v37, %v2908_v38  ;;  %v2707_v13 = vadd.f32 %v2706_v32, %v2117_v23  ;;  %v2910_v25 = vmul.f32 %v2117_v23, %v2117_v23 }
 0x1e1   : > { %4173 = vst [vmem:[%s6047_s16 + $0x160] sm:$0xff] %v4573_v35 }
 0x1e2   : > { %v6508_v1 = vpop.f32.mrb[56].mxu1  ;;  %v3252_v24 = vadd.f32 %v3251_v14, %v2910_v25 }
 0x1e3   : > { %7365 = vst [vmem:[#allocation19_spill] sm:$0xff] %v6508_v1  ;;  %v6510_v9 = vpop.f32.mrb[57].mxu1 }
 0x1e4   : > { %7366 = vst [vmem:[#allocation20_spill] sm:$0xff] %v6510_v9  ;;  %v4621_v5 = vpack.c.bf16 %v6510_v9, %v6508_v1  ;;  %v6514_v40 = vpop.f32.mrb[58].mxu1  ;;  %v4574_v9 = vpack.c.bf16 %v2117_v23, %v2115_v62  ;;  %v3119_v1 = vadd.f32 %v3118_v27, %v2909_v6  ;;  %v2121_v54 = vpop.f32.mrb[92].mxu0 }
 0x1e5   : > { %v6516_v39 = vpop.f32.mrb[59].mxu1  ;;  %v2575_v29 = vadd.f32 %v2574_v15, %v2121_v54  ;;  %v2911_v26 = vmul.f32 %v2121_v54, %v2121_v54  ;;  %v2123_v45 = vpop.f32.mrb[93].mxu0 }
 0x1e6   : > { %7367 = vst [vmem:[#allocation21_spill] sm:$0xff] %v6516_v39  ;;  %4221 = vst [vmem:[%s6047_s16 + $0x2e0] sm:$0xff] %v4621_v5  ;;  %v4622_v51 = vpack.c.bf16 %v6516_v39, %v6514_v40  ;;  %v2708_v5 = vadd.f32 %v2707_v13, %v2123_v45  ;;  %v2912_v37 = vmul.f32 %v2123_v45, %v2123_v45  ;;  %v2125_v32 = vpop.f32.mrb[94].mxu0 }
 0x1e7   : > { %4174 = vst [vmem:[%s6047_s16 + $0x168] sm:$0xff] %v4574_v9  ;;  %v4575_v38 = vpack.c.bf16 %v2123_v45, %v2121_v54  ;;  %v3120_v62 = vadd.f32 %v3119_v1, %v2911_v26  ;;  %v2576_v27 = vadd.f32 %v2575_v29, %v2125_v32  ;;  %v2913_v25 = vmul.f32 %v2125_v32, %v2125_v32  ;;  %v2127_v9 = vpop.f32.mrb[95].mxu0 }
 0x1e8   : > { %4222 = vst [vmem:[%s6047_s16 + $0x2e8] sm:$0xff] %v4622_v51  ;;  %v3253_v15 = vadd.f32 %v3252_v24, %v2912_v37  ;;  %v2709_v23 = vadd.f32 %v2708_v5, %v2127_v9  ;;  %v2914_v14 = vmul.f32 %v2127_v9, %v2127_v9  ;;  %v4576_v51 = vpack.c.bf16 %v2127_v9, %v2125_v32 }
 0x1e9   : > { %4175 = vst [vmem:[%s6047_s16 + $0x170] sm:$0xff] %v4575_v38  ;;  %v3121_v54 = vadd.f32 %v3120_v62, %v2913_v25 }
 0x1ea   : > { %v3254_v39 = vadd.f32 %v3253_v15, %v2914_v14  ;;  %4176 = vst [vmem:[%s6047_s16 + $0x178] sm:$0xff] %v4576_v51 }
 0x1ec   : > { %v6524_v33 = vpop.f32.mrb[60].mxu1  ;;  %v2131_v1 = vpop.f32.mrb[96].mxu0 }
 0x1ed   : > { %7368 = vst [vmem:[#allocation22_spill] sm:$0xff] %v6524_v33  ;;  %v6526_v35 = vpop.f32.mrb[61].mxu1  ;;  %v2577_v24 = vadd.f32 %v2576_v27, %v2131_v1  ;;  %v2915_v26 = vmul.f32 %v2131_v1, %v2131_v1  ;;  %v2133_v5 = vpop.f32.mrb[97].mxu0 }
 0x1ee   : > { %7369 = vst [vmem:[#allocation23_spill] sm:$0xff] %v6526_v35  ;;  %v6528_v6 = vpop.f32.mrb[62].mxu1  ;;  %v4623_v45 = vpack.c.bf16 %v6526_v35, %v6524_v33  ;;  %v2710_v38 = vadd.f32 %v2709_v23, %v2133_v5  ;;  %v2916_v32 = vmul.f32 %v2133_v5, %v2133_v5  ;;  %v4577_v62 = vpack.c.bf16 %v2133_v5, %v2131_v1  ;;  %v2135_v25 = vpop.f32.mrb[98].mxu0 }
 0x1ef   : > { %7370 = vst [vmem:[#allocation24_spill] sm:$0xff] %v6528_v6  ;;  %v6531_v13 = vpop.f32.mrb[63].mxu1  ;;  %v3122_v15 = vadd.f32 %v3121_v54, %v2915_v26  ;;  %v2578_v14 = vadd.f32 %v2577_v24, %v2135_v25  ;;  %v2917_v51 = vmul.f32 %v2135_v25, %v2135_v25 }
 0x1f0   : > { %7371 = vst [vmem:[#allocation25_spill] sm:$0xff] %v6531_v13  ;;  %v4624_v29 = vpack.c.bf16 %v6531_v13, %v6528_v6  ;;  %4223 = vst [vmem:[%s6047_s16 + $0x2f0] sm:$0xff] %v4623_v45  ;;  %v2137_v45 = vpop.f32.mrb[99].mxu0  ;;  %v3255_v27 = vadd.f32 %v3254_v39, %v2916_v32 }
 0x1f1   : > { %4177 = vst [vmem:[%s6047_s16 + $0x180] sm:$0xff] %v4577_v62  ;;  %v2711_v13 = vadd.f32 %v2710_v38, %v2137_v45  ;;  %v2918_v6 = vmul.f32 %v2137_v45, %v2137_v45  ;;  %v4578_v35 = vpack.c.bf16 %v2137_v45, %v2135_v25  ;;  %v3123_v1 = vadd.f32 %v3122_v15, %v2917_v51 }
 0x1f2   : > { %4224 = vst [vmem:[%s6047_s16 + $0x2f8] sm:$0xff] %v4624_v29 }
 0x1f3   : > { %v3256_v33 = vadd.f32 %v3255_v27, %v2918_v6  ;;  %4178 = vst [vmem:[%s6047_s16 + $0x188] sm:$0xff] %v4578_v35 }
 0x1f4   : > { %v6540_v37 = vpop.f32.mrb[64].mxu1  ;;  %v2141_v24 = vpop.f32.mrb[100].mxu0 }
 0x1f5   : > { %7372 = vst [vmem:[#allocation26_spill] sm:$0xff] %v6540_v37  ;;  %v6542_v9 = vpop.f32.mrb[65].mxu1  ;;  %v2579_v39 = vadd.f32 %v2578_v14, %v2141_v24  ;;  %v2919_v26 = vmul.f32 %v2141_v24, %v2141_v24  ;;  %v2143_v38 = vpop.f32.mrb[101].mxu0 }
 0x1f6   : > { %7373 = vst [vmem:[#allocation27_spill] sm:$0xff] %v6542_v9  ;;  %v6544_v29 = vpop.f32.mrb[66].mxu1  ;;  %v4625_v5 = vpack.c.bf16 %v6542_v9, %v6540_v37  ;;  %v2712_v62 = vadd.f32 %v2711_v13, %v2143_v38  ;;  %v2920_v25 = vmul.f32 %v2143_v38, %v2143_v38  ;;  %v4579_v15 = vpack.c.bf16 %v2143_v38, %v2141_v24  ;;  %v2145_v51 = vpop.f32.mrb[102].mxu0 }
 0x1f7   : > { %7374 = vst [vmem:[#allocation28_spill] sm:$0xff] %v6544_v29  ;;  %v6547_v23 = vpop.f32.mrb[67].mxu1  ;;  %v3124_v35 = vadd.f32 %v3123_v1, %v2919_v26  ;;  %v2580_v6 = vadd.f32 %v2579_v39, %v2145_v51  ;;  %v2921_v27 = vmul.f32 %v2145_v51, %v2145_v51 }
 0x1f8   : > { %7375 = vst [vmem:[#allocation29_spill] sm:$0xff] %v6547_v23  ;;  %v4626_v54 = vpack.c.bf16 %v6547_v23, %v6544_v29  ;;  %4225 = vst [vmem:[%s6047_s16 + $0x300] sm:$0xff] %v4625_v5  ;;  %v2147_v5 = vpop.f32.mrb[103].mxu0  ;;  %v3257_v14 = vadd.f32 %v3256_v33, %v2920_v25 }
 0x1f9   : > { %4179 = vst [vmem:[%s6047_s16 + $0x190] sm:$0xff] %v4579_v15  ;;  %v2713_v23 = vadd.f32 %v2712_v62, %v2147_v5  ;;  %v2922_v29 = vmul.f32 %v2147_v5, %v2147_v5  ;;  %v4580_v9 = vpack.c.bf16 %v2147_v5, %v2145_v51  ;;  %v3125_v24 = vadd.f32 %v3124_v35, %v2921_v27 }
 0x1fa   : > { %4226 = vst [vmem:[%s6047_s16 + $0x308] sm:$0xff] %v4626_v54 }
 0x1fb   : > { %v3258_v37 = vadd.f32 %v3257_v14, %v2922_v29  ;;  %4180 = vst [vmem:[%s6047_s16 + $0x198] sm:$0xff] %v4580_v9 }
 0x1fc   : > { %v6556_v32 = vpop.f32.mrb[68].mxu1  ;;  %v2151_v39 = vpop.f32.mrb[104].mxu0 }
 0x1fd   : > { %7376 = vst [vmem:[#allocation30_spill] sm:$0xff] %v6556_v32  ;;  %v6558_v45 = vpop.f32.mrb[69].mxu1  ;;  %v2581_v33 = vadd.f32 %v2580_v6, %v2151_v39  ;;  %v2923_v26 = vmul.f32 %v2151_v39, %v2151_v39  ;;  %v2153_v62 = vpop.f32.mrb[105].mxu0 }
 0x1fe   : > { %7377 = vst [vmem:[#allocation31_spill] sm:$0xff] %v6558_v45  ;;  %v6560_v54 = vpop.f32.mrb[70].mxu1  ;;  %v4627_v38 = vpack.c.bf16 %v6558_v45, %v6556_v32  ;;  %v2714_v15 = vadd.f32 %v2713_v23, %v2153_v62  ;;  %v2924_v51 = vmul.f32 %v2153_v62, %v2153_v62  ;;  %v4581_v35 = vpack.c.bf16 %v2153_v62, %v2151_v39  ;;  %v2155_v27 = vpop.f32.mrb[106].mxu0 }
 0x1ff   : > { %7378 = vst [vmem:[#allocation32_spill] sm:$0xff] %v6560_v54  ;;  %v6563_v13 = vpop.f32.mrb[71].mxu1  ;;  %v3126_v9 = vadd.f32 %v3125_v24, %v2923_v26  ;;  %v2582_v29 = vadd.f32 %v2581_v33, %v2155_v27  ;;  %v2925_v14 = vmul.f32 %v2155_v27, %v2155_v27 }
 0x200   : > { %7379 = vst [vmem:[#allocation33_spill] sm:$0xff] %v6563_v13  ;;  %v4628_v1 = vpack.c.bf16 %v6563_v13, %v6560_v54  ;;  %4227 = vst [vmem:[%s6047_s16 + $0x310] sm:$0xff] %v4627_v38  ;;  %v2157_v38 = vpop.f32.mrb[107].mxu0  ;;  %v3259_v6 = vadd.f32 %v3258_v37, %v2924_v51 }
 0x201   : > { %4181 = vst [vmem:[%s6047_s16 + $0x1a0] sm:$0xff] %v4581_v35  ;;  %v2715_v13 = vadd.f32 %v2714_v15, %v2157_v38  ;;  %v2926_v54 = vmul.f32 %v2157_v38, %v2157_v38  ;;  %v4582_v45 = vpack.c.bf16 %v2157_v38, %v2155_v27  ;;  %v3127_v39 = vadd.f32 %v3126_v9, %v2925_v14 }
 0x202   : > { %4228 = vst [vmem:[%s6047_s16 + $0x318] sm:$0xff] %v4628_v1 }
 0x203   : > { %v3260_v32 = vadd.f32 %v3259_v6, %v2926_v54  ;;  %4182 = vst [vmem:[%s6047_s16 + $0x1a8] sm:$0xff] %v4582_v45 }
 0x204   : > { %v6572_v25 = vpop.f32.mrb[72].mxu1  ;;  %v2161_v33 = vpop.f32.mrb[108].mxu0 }
 0x205   : > { %7380 = vst [vmem:[#allocation34_spill] sm:$0xff] %v6572_v25  ;;  %v6574_v5 = vpop.f32.mrb[73].mxu1  ;;  %v2583_v37 = vadd.f32 %v2582_v29, %v2161_v33  ;;  %v2927_v26 = vmul.f32 %v2161_v33, %v2161_v33  ;;  %v2163_v15 = vpop.f32.mrb[109].mxu0 }
 0x206   : > { %7381 = vst [vmem:[#allocation35_spill] sm:$0xff] %v6574_v5  ;;  %v6576_v1 = vpop.f32.mrb[74].mxu1  ;;  %v4629_v62 = vpack.c.bf16 %v6574_v5, %v6572_v25  ;;  %v2716_v35 = vadd.f32 %v2715_v13, %v2163_v15  ;;  %v2928_v27 = vmul.f32 %v2163_v15, %v2163_v15  ;;  %v4583_v9 = vpack.c.bf16 %v2163_v15, %v2161_v33  ;;  %v2165_v14 = vpop.f32.mrb[110].mxu0 }
 0x207   : > { %7382 = vst [vmem:[#allocation36_spill] sm:$0xff] %v6576_v1  ;;  %v6579_v23 = vpop.f32.mrb[75].mxu1  ;;  %v3128_v45 = vadd.f32 %v3127_v39, %v2927_v26  ;;  %v2584_v54 = vadd.f32 %v2583_v37, %v2165_v14  ;;  %v2929_v6 = vmul.f32 %v2165_v14, %v2165_v14 }
 0x208   : > { %7383 = vst [vmem:[#allocation37_spill] sm:$0xff] %v6579_v23  ;;  %v4630_v24 = vpack.c.bf16 %v6579_v23, %v6576_v1  ;;  %4229 = vst [vmem:[%s6047_s16 + $0x320] sm:$0xff] %v4629_v62  ;;  %v2167_v62 = vpop.f32.mrb[111].mxu0  ;;  %v3261_v29 = vadd.f32 %v3260_v32, %v2928_v27 }
 0x209   : > { %4183 = vst [vmem:[%s6047_s16 + $0x1b0] sm:$0xff] %v4583_v9  ;;  %v2717_v23 = vadd.f32 %v2716_v35, %v2167_v62  ;;  %v2930_v1 = vmul.f32 %v2167_v62, %v2167_v62  ;;  %v4584_v5 = vpack.c.bf16 %v2167_v62, %v2165_v14  ;;  %v3129_v33 = vadd.f32 %v3128_v45, %v2929_v6 }
 0x20a   : > { %4230 = vst [vmem:[%s6047_s16 + $0x328] sm:$0xff] %v4630_v24 }
 0x20b   : > { %v3262_v25 = vadd.f32 %v3261_v29, %v2930_v1  ;;  %4184 = vst [vmem:[%s6047_s16 + $0x1b8] sm:$0xff] %v4584_v5 }
 0x20c   : > { %v6588_v51 = vpop.f32.mrb[76].mxu1  ;;  %v2171_v37 = vpop.f32.mrb[112].mxu0 }
 0x20d   : > { %7384 = vst [vmem:[#allocation38_spill] sm:$0xff] %v6588_v51  ;;  %v6590_v38 = vpop.f32.mrb[77].mxu1  ;;  %v2585_v32 = vadd.f32 %v2584_v54, %v2171_v37  ;;  %v2931_v26 = vmul.f32 %v2171_v37, %v2171_v37  ;;  %v2173_v35 = vpop.f32.mrb[113].mxu0 }
 0x20e   : > { %7385 = vst [vmem:[#allocation39_spill] sm:$0xff] %v6590_v38  ;;  %v6592_v24 = vpop.f32.mrb[78].mxu1  ;;  %v4631_v15 = vpack.c.bf16 %v6590_v38, %v6588_v51  ;;  %v2718_v9 = vadd.f32 %v2717_v23, %v2173_v35  ;;  %v2932_v14 = vmul.f32 %v2173_v35, %v2173_v35  ;;  %v4585_v45 = vpack.c.bf16 %v2173_v35, %v2171_v37  ;;  %v2175_v6 = vpop.f32.mrb[114].mxu0 }
 0x20f   : > { %7386 = vst [vmem:[#allocation40_spill] sm:$0xff] %v6592_v24  ;;  %v6595_v13 = vpop.f32.mrb[79].mxu1  ;;  %v3130_v5 = vadd.f32 %v3129_v33, %v2931_v26  ;;  %v2586_v1 = vadd.f32 %v2585_v32, %v2175_v6  ;;  %v2933_v29 = vmul.f32 %v2175_v6, %v2175_v6 }
 0x210   : > { %7387 = vst [vmem:[#allocation41_spill] sm:$0xff] %v6595_v13  ;;  %v4632_v39 = vpack.c.bf16 %v6595_v13, %v6592_v24  ;;  %4231 = vst [vmem:[%s6047_s16 + $0x330] sm:$0xff] %v4631_v15  ;;  %v2177_v15 = vpop.f32.mrb[115].mxu0  ;;  %v3263_v54 = vadd.f32 %v3262_v25, %v2932_v14 }
 0x211   : > { %4185 = vst [vmem:[%s6047_s16 + $0x1c0] sm:$0xff] %v4585_v45  ;;  %v2719_v13 = vadd.f32 %v2718_v9, %v2177_v15  ;;  %v2934_v24 = vmul.f32 %v2177_v15, %v2177_v15  ;;  %v4586_v38 = vpack.c.bf16 %v2177_v15, %v2175_v6  ;;  %v3131_v37 = vadd.f32 %v3130_v5, %v2933_v29 }
 0x212   : > { %4232 = vst [vmem:[%s6047_s16 + $0x338] sm:$0xff] %v4632_v39 }
 0x213   : > { %v3264_v51 = vadd.f32 %v3263_v54, %v2934_v24  ;;  %4186 = vst [vmem:[%s6047_s16 + $0x1c8] sm:$0xff] %v4586_v38 }
 0x214   : > { %v6604_v27 = vpop.f32.mrb[80].mxu1  ;;  %v2181_v32 = vpop.f32.mrb[116].mxu0 }
 0x215   : > { %7388 = vst [vmem:[#allocation42_spill] sm:$0xff] %v6604_v27  ;;  %v6606_v62 = vpop.f32.mrb[81].mxu1  ;;  %v2587_v25 = vadd.f32 %v2586_v1, %v2181_v32  ;;  %v2935_v26 = vmul.f32 %v2181_v32, %v2181_v32  ;;  %v2183_v9 = vpop.f32.mrb[117].mxu0 }
 0x216   : > { %7389 = vst [vmem:[#allocation43_spill] sm:$0xff] %v6606_v62  ;;  %v6608_v39 = vpop.f32.mrb[82].mxu1  ;;  %v4633_v35 = vpack.c.bf16 %v6606_v62, %v6604_v27  ;;  %v2720_v45 = vadd.f32 %v2719_v13, %v2183_v9  ;;  %v2936_v6 = vmul.f32 %v2183_v9, %v2183_v9  ;;  %v4587_v5 = vpack.c.bf16 %v2183_v9, %v2181_v32  ;;  %v2185_v29 = vpop.f32.mrb[118].mxu0 }
 0x217   : > { %7390 = vst [vmem:[#allocation44_spill] sm:$0xff] %v6608_v39  ;;  %v6611_v23 = vpop.f32.mrb[83].mxu1  ;;  %v3132_v38 = vadd.f32 %v3131_v37, %v2935_v26  ;;  %v2588_v24 = vadd.f32 %v2587_v25, %v2185_v29  ;;  %v2937_v54 = vmul.f32 %v2185_v29, %v2185_v29 }
 0x218   : > { %7391 = vst [vmem:[#allocation45_spill] sm:$0xff] %v6611_v23  ;;  %v4634_v33 = vpack.c.bf16 %v6611_v23, %v6608_v39  ;;  %4233 = vst [vmem:[%s6047_s16 + $0x340] sm:$0xff] %v4633_v35  ;;  %v2187_v35 = vpop.f32.mrb[119].mxu0  ;;  %v3265_v1 = vadd.f32 %v3264_v51, %v2936_v6 }
 0x219   : > { %4187 = vst [vmem:[%s6047_s16 + $0x1d0] sm:$0xff] %v4587_v5  ;;  %v2721_v23 = vadd.f32 %v2720_v45, %v2187_v35  ;;  %v2938_v39 = vmul.f32 %v2187_v35, %v2187_v35  ;;  %v4588_v62 = vpack.c.bf16 %v2187_v35, %v2185_v29  ;;  %v3133_v32 = vadd.f32 %v3132_v38, %v2937_v54 }
 0x21a   : > { %4234 = vst [vmem:[%s6047_s16 + $0x348] sm:$0xff] %v4634_v33 }
 0x21b   : > { %v3266_v27 = vadd.f32 %v3265_v1, %v2938_v39  ;;  %4188 = vst [vmem:[%s6047_s16 + $0x1d8] sm:$0xff] %v4588_v62 }
 0x21c   : > { %v6620_v14 = vpop.f32.mrb[84].mxu1  ;;  %v2191_v25 = vpop.f32.mrb[120].mxu0 }
 0x21d   : > { %7392 = vst [vmem:[#allocation46_spill] sm:$0xff] %v6620_v14  ;;  %v6622_v15 = vpop.f32.mrb[85].mxu1  ;;  %v2589_v51 = vadd.f32 %v2588_v24, %v2191_v25  ;;  %v2939_v26 = vmul.f32 %v2191_v25, %v2191_v25  ;;  %v2193_v45 = vpop.f32.mrb[121].mxu0 }
 0x21e   : > { %7393 = vst [vmem:[#allocation47_spill] sm:$0xff] %v6622_v15  ;;  %v6624_v33 = vpop.f32.mrb[86].mxu1  ;;  %v4635_v9 = vpack.c.bf16 %v6622_v15, %v6620_v14  ;;  %v2722_v5 = vadd.f32 %v2721_v23, %v2193_v45  ;;  %v2940_v29 = vmul.f32 %v2193_v45, %v2193_v45  ;;  %v4589_v38 = vpack.c.bf16 %v2193_v45, %v2191_v25  ;;  %v2195_v54 = vpop.f32.mrb[122].mxu0 }
 0x21f   : > { %7394 = vst [vmem:[#allocation48_spill] sm:$0xff] %v6624_v33  ;;  %v6627_v13 = vpop.f32.mrb[87].mxu1  ;;  %v3134_v62 = vadd.f32 %v3133_v32, %v2939_v26  ;;  %v2590_v39 = vadd.f32 %v2589_v51, %v2195_v54  ;;  %v2941_v1 = vmul.f32 %v2195_v54, %v2195_v54 }
 0x220   : > { %7395 = vst [vmem:[#allocation49_spill] sm:$0xff] %v6627_v13  ;;  %v4636_v37 = vpack.c.bf16 %v6627_v13, %v6624_v33  ;;  %4235 = vst [vmem:[%s6047_s16 + $0x350] sm:$0xff] %v4635_v9  ;;  %v2197_v9 = vpop.f32.mrb[123].mxu0  ;;  %v3267_v24 = vadd.f32 %v3266_v27, %v2940_v29 }
 0x221   : > { %4189 = vst [vmem:[%s6047_s16 + $0x1e0] sm:$0xff] %v4589_v38  ;;  %v2723_v13 = vadd.f32 %v2722_v5, %v2197_v9  ;;  %v2942_v33 = vmul.f32 %v2197_v9, %v2197_v9  ;;  %v4590_v15 = vpack.c.bf16 %v2197_v9, %v2195_v54  ;;  %v3135_v25 = vadd.f32 %v3134_v62, %v2941_v1 }
 0x222   : > { %4236 = vst [vmem:[%s6047_s16 + $0x358] sm:$0xff] %v4636_v37 }
 0x223   : > { %v3268_v14 = vadd.f32 %v3267_v24, %v2942_v33  ;;  %4190 = vst [vmem:[%s6047_s16 + $0x1e8] sm:$0xff] %v4590_v15 }
 0x224   : > { %v6636_v6 = vpop.f32.mrb[88].mxu1  ;;  %v2201_v51 = vpop.f32.mrb[124].mxu0 }
 0x225   : > { %7396 = vst [vmem:[#allocation50_spill] sm:$0xff] %v6636_v6  ;;  %v6638_v35 = vpop.f32.mrb[89].mxu1  ;;  %v2591_v27 = vadd.f32 %v2590_v39, %v2201_v51  ;;  %v2943_v26 = vmul.f32 %v2201_v51, %v2201_v51  ;;  %v2203_v5 = vpop.f32.mrb[125].mxu0 }
 0x226   : > { %7397 = vst [vmem:[#allocation51_spill] sm:$0xff] %v6638_v35  ;;  %v6640_v37 = vpop.f32.mrb[90].mxu1  ;;  %v4637_v45 = vpack.c.bf16 %v6638_v35, %v6636_v6  ;;  %v2724_v38 = vadd.f32 %v2723_v13, %v2203_v5  ;;  %v2944_v54 = vmul.f32 %v2203_v5, %v2203_v5  ;;  %v4591_v62 = vpack.c.bf16 %v2203_v5, %v2201_v51  ;;  %v2205_v1 = vpop.f32.mrb[126].mxu0 }
 0x227   : > { %7398 = vst [vmem:[#allocation52_spill] sm:$0xff] %v6640_v37  ;;  %v6643_v23 = vpop.f32.mrb[91].mxu1  ;;  %v3136_v33 = vadd.f32 %v3135_v25, %v2943_v26  ;;  %v2592_v15 = vadd.f32 %v2591_v27, %v2205_v1  ;;  %v2945_v24 = vmul.f32 %v2205_v1, %v2205_v1  ;;  %v2947_v13 = vmul.f32 %v6207_v41, %v6207_v41 }
 0x228   : > { %7399 = vst [vmem:[#allocation53_spill] sm:$0xff] %v6643_v23  ;;  %v4638_v32 = vpack.c.bf16 %v6643_v23, %v6640_v37  ;;  %4237 = vst [vmem:[%s6047_s16 + $0x360] sm:$0xff] %v4637_v45  ;;  %v2207_v23 = vpop.f32.mrb[127].mxu0 }
 0x229   : > { %4191 = vst [vmem:[%s6047_s16 + $0x1f0] sm:$0xff] %v4591_v62  ;;  %v2725_v39 = vadd.f32 %v2724_v38, %v2207_v23  ;;  %v2946_v37 = vmul.f32 %v2207_v23, %v2207_v23  ;;  %v4592_v35 = vpack.c.bf16 %v2207_v23, %v2205_v1  ;;  %v2593_v25 = vadd.f32 %v2592_v15, %v6207_v41 }
 0x22a   : > { %4238 = vst [vmem:[%s6047_s16 + $0x368] sm:$0xff] %v4638_v32  ;;  %v3269_v32 = vadd.f32 %v3268_v14, %v2944_v54  ;;  %v3137_v51 = vadd.f32 %v3136_v33, %v2945_v24  ;;  %v2948_v14 = vmul.f32 %v6213_v4, %v6213_v4  ;;  %v2949_v38 = vmul.f32 %v6219_v57, %v6219_v57 }
 0x22b   : > { %v2726_v26 = vadd.f32 %v2725_v39, %v6213_v4  ;;  %4192 = vst [vmem:[%s6047_s16 + $0x1f8] sm:$0xff] %v4592_v35  ;;  %v2594_v54 = vadd.f32 %v2593_v25, %v6219_v57  ;;  %v2950_v62 = vmul.f32 %v6226_v0, %v6226_v0  ;;  %v2951_v4 = vmul.f32 %v6251_v12, %v6251_v12 }
 0x22c   : > { %v6652_v29 = vpop.f32.mrb[92].mxu1  ;;  %v3270_v5 = vadd.f32 %v3269_v32, %v2946_v37  ;;  %v3138_v41 = vadd.f32 %v3137_v51, %v2947_v13  ;;  %v2952_v57 = vmul.f32 %v6255_v21, %v6255_v21 }
 0x22d   : > { %v6654_v9 = vpop.f32.mrb[93].mxu1  ;;  %v2727_v1 = vadd.f32 %v2726_v26, %v6226_v0  ;;  %v2595_v35 = vadd.f32 %v2594_v54, %v6251_v12  ;;  %v2953_v0 = vmul.f32 %v6259_v17, %v6259_v17  ;;  %v2956_v54 = vmul.f32 %v6287_v8, %v6287_v8 }
 0x22e   : > { %v6656_v45 = vpop.f32.mrb[94].mxu1  ;;  %v4639_v27 = vpack.c.bf16 %v6654_v9, %v6652_v29  ;;  %v3271_v33 = vadd.f32 %v3270_v5, %v2948_v14  ;;  %v3139_v37 = vadd.f32 %v3138_v41, %v2949_v38  ;;  %v2955_v5 = vmul.f32 %v6283_v63, %v6283_v63 }
 0x22f   : > { %v6659_v6 = vpop.f32.mrb[95].mxu1  ;;  %v2728_v24 = vadd.f32 %v2727_v1, %v6255_v21  ;;  %v2596_v13 = vadd.f32 %v2595_v35, %v6259_v17 }
 0x230   : > { %v4640_v23 = vpack.c.bf16 %v6659_v6, %v6656_v45  ;;  %4239 = vst [vmem:[%s6047_s16 + $0x370] sm:$0xff] %v4639_v27  ;;  %v3272_v32 = vadd.f32 %v3271_v33, %v2950_v62  ;;  %v3140_v25 = vadd.f32 %v3139_v37, %v2951_v4  ;;  %v2954_v27 = vmul.f32 %v6266_v3, %v6266_v3 }
 0x231   : > { %v2729_v21 = vadd.f32 %v2728_v24, %v6266_v3  ;;  %v2597_v17 = vadd.f32 %v2596_v13, %v6283_v63  ;;  %v2957_v3 = vmul.f32 %v6291_v44, %v6291_v44  ;;  %v2958_v63 = vmul.f32 %v6297_v36, %v6297_v36 }
 0x232   : > { %4240 = vst [vmem:[%s6047_s16 + $0x378] sm:$0xff] %v4640_v23  ;;  %v3273_v14 = vadd.f32 %v3272_v32, %v2952_v57  ;;  %v3141_v23 = vadd.f32 %v3140_v25, %v2953_v0  ;;  %v2959_v37 = vmul.f32 %v6315_v53, %v6315_v53  ;;  %v2960_v32 = vmul.f32 %v6320_v7, %v6320_v7 }
 0x233   : > { %v2730_v41 = vadd.f32 %v2729_v21, %v6287_v8  ;;  %v2598_v1 = vadd.f32 %v2597_v17, %v6291_v44  ;;  %v2962_v21 = vmul.f32 %v6329_v55, %v6329_v55  ;;  %v2963_v17 = vmul.f32 %v6340_v58, %v6340_v58 }
 0x234   : > { %v6683_v15 = vpop.f32.mrb[96].mxu1  ;;  %v3274_v62 = vadd.f32 %v3273_v14, %v2954_v27  ;;  %v3142_v33 = vadd.f32 %v3141_v23, %v2955_v5 }
 0x235   : > { %v6688_v39 = vpop.f32.mrb[97].mxu1  ;;  %v2731_v4 = vadd.f32 %v2730_v41, %v6297_v36  ;;  %v2599_v57 = vadd.f32 %v2598_v1, %v6315_v53  ;;  %v2961_v36 = vmul.f32 %v6326_v10, %v6326_v10 }
 0x236   : > { %v4641_v12 = vpack.c.bf16 %v6688_v39, %v6683_v15  ;;  %v6695_v51 = vpop.f32.mrb[98].mxu1  ;;  %v3275_v35 = vadd.f32 %v3274_v62, %v2956_v54  ;;  %v3143_v8 = vadd.f32 %v3142_v33, %v2957_v3  ;;  %v2964_v54 = vmul.f32 %v6343_v61, %v6343_v61 }
 0x237   : > { %v6700_v26 = vpop.f32.mrb[99].mxu1  ;;  %v2732_v44 = vadd.f32 %v2731_v4, %v6320_v7  ;;  %v2600_v25 = vadd.f32 %v2599_v57, %v6326_v10  ;;  %v2967_v4 = vmul.f32 %v6362_v19, %v6362_v19  ;;  %v2968_v57 = vmul.f32 %v6364_v46, %v6364_v46 }
 0x238   : > { %4241 = vst [vmem:[%s6047_s16 + $0x380] sm:$0xff] %v4641_v12  ;;  %v4642_v38 = vpack.c.bf16 %v6700_v26, %v6695_v51  ;;  %v3276_v0 = vadd.f32 %v3275_v35, %v2958_v63  ;;  %v3144_v12 = vadd.f32 %v3143_v8, %v2959_v37 }
 0x239   : > { %v2733_v7 = vadd.f32 %v2732_v44, %v6329_v55  ;;  %v2601_v10 = vadd.f32 %v2600_v25, %v6340_v58  ;;  %v2965_v55 = vmul.f32 %v6349_v42, %v6349_v42  ;;  %v2966_v58 = vmul.f32 %v6351_v30, %v6351_v30 }
 0x23a   : > { %4242 = vst [vmem:[%s6047_s16 + $0x388] sm:$0xff] %v4642_v38  ;;  %v3277_v14 = vadd.f32 %v3276_v0, %v2960_v32  ;;  %v3145_v23 = vadd.f32 %v3144_v12, %v2961_v36  ;;  %v2970_v25 = vmul.f32 %v6370_v16, %v6370_v16 }
 0x23b   : > { %v2734_v41 = vadd.f32 %v2733_v7, %v6343_v61  ;;  %v2602_v3 = vadd.f32 %v2601_v10, %v6349_v42 }
 0x23c   : > { %v6721_v24 = vpop.f32.mrb[100].mxu1  ;;  %v3278_v62 = vadd.f32 %v3277_v14, %v2962_v21  ;;  %v3146_v1 = vadd.f32 %v3145_v23, %v2963_v17  ;;  %v2971_v21 = vmul.f32 %v6378_v49, %v6378_v49  ;;  %v2972_v17 = vmul.f32 %v6380_v48, %v6380_v48 }
 0x23d   : > { %v6726_v13 = vpop.f32.mrb[101].mxu1  ;;  %v2735_v33 = vadd.f32 %v2734_v41, %v6351_v30  ;;  %v2603_v35 = vadd.f32 %v2602_v3, %v6362_v19  ;;  %v2969_v30 = vmul.f32 %v6368_v22, %v6368_v22 }
 0x23e   : > { %v4643_v53 = vpack.c.bf16 %v6726_v13, %v6721_v24  ;;  %v6733_v27 = vpop.f32.mrb[102].mxu1  ;;  %v3279_v63 = vadd.f32 %v3278_v62, %v2964_v54  ;;  %v3147_v61 = vadd.f32 %v3146_v1, %v2965_v55  ;;  %v2975_v55 = vmul.f32 %v6394_v60, %v6394_v60 }
 0x23f   : > { %v6738_v5 = vpop.f32.mrb[103].mxu1  ;;  %v2736_v42 = vadd.f32 %v2735_v33, %v6364_v46  ;;  %v2604_v44 = vadd.f32 %v2603_v35, %v6368_v22 }
 0x240   : > { %4243 = vst [vmem:[%s6047_s16 + $0x390] sm:$0xff] %v4643_v53  ;;  %v4644_v38 = vpack.c.bf16 %v6738_v5, %v6733_v27  ;;  %v3280_v8 = vadd.f32 %v3279_v63, %v2966_v58  ;;  %v3148_v0 = vadd.f32 %v3147_v61, %v2967_v4  ;;  %v2976_v58 = vmul.f32 %v6396_v34, %v6396_v34 }
 0x241   : > { %v2737_v46 = vadd.f32 %v2736_v42, %v6370_v16  ;;  %v2605_v22 = vadd.f32 %v2604_v44, %v6378_v49  ;;  %v2973_v16 = vmul.f32 %v6384_v18, %v6384_v18  ;;  %v2974_v49 = vmul.f32 %v6386_v56, %v6386_v56 }
 0x242   : > { %4244 = vst [vmem:[%s6047_s16 + $0x398] sm:$0xff] %v4644_v38  ;;  %v3281_v12 = vadd.f32 %v3280_v8, %v2968_v57  ;;  %v3149_v7 = vadd.f32 %v3148_v0, %v2969_v30  ;;  %v2978_v57 = vmul.f32 %v6401_v11, %v6401_v11  ;;  %v2979_v30 = vmul.f32 %v6410_v43, %v6410_v43 }
 0x243   : > { %v2738_v10 = vadd.f32 %v2737_v46, %v6380_v48  ;;  %v2606_v38 = vadd.f32 %v2605_v22, %v6384_v18 }
 0x244   : > { %v6759_v37 = vpop.f32.mrb[104].mxu1  ;;  %v3282_v23 = vadd.f32 %v3281_v12, %v2970_v25  ;;  %v3150_v54 = vadd.f32 %v3149_v7, %v2971_v21 }
 0x245   : > { %v6764_v32 = vpop.f32.mrb[105].mxu1  ;;  %v2739_v41 = vadd.f32 %v2738_v10, %v6386_v56  ;;  %v2607_v3 = vadd.f32 %v2606_v38, %v6394_v60  ;;  %v2977_v56 = vmul.f32 %v6398_v52, %v6398_v52 }
 0x246   : > { %v4645_v19 = vpack.c.bf16 %v6764_v32, %v6759_v37  ;;  %v6771_v36 = vpop.f32.mrb[106].mxu1  ;;  %v3283_v62 = vadd.f32 %v3282_v23, %v2972_v17  ;;  %v3151_v48 = vadd.f32 %v3150_v54, %v2973_v16  ;;  %v2984_v23 = vmul.f32 %v6429_v20, %v6429_v20 }
 0x247   : > { %v6776_v53 = vpop.f32.mrb[107].mxu1  ;;  %v2740_v18 = vadd.f32 %v2739_v41, %v6396_v34  ;;  %v2608_v4 = vadd.f32 %v2607_v3, %v6398_v52 }
 0x248   : > { %4245 = vst [vmem:[%s6047_s16 + $0x3a0] sm:$0xff] %v4645_v19  ;;  %v4646_v14 = vpack.c.bf16 %v6776_v53, %v6771_v36  ;;  %v3284_v33 = vadd.f32 %v3283_v62, %v2974_v49  ;;  %v3152_v35 = vadd.f32 %v3151_v48, %v2975_v55  ;;  %v2980_v19 = vmul.f32 %v6412_v31, %v6412_v31  ;;  %v7400_v62 = vld [vmem:[#allocation3_spill] sm:$0xff] }
 0x249   : > { %v2741_v34 = vadd.f32 %v2740_v18, %v6401_v11  ;;  %v2609_v52 = vadd.f32 %v2608_v4, %v6410_v43  ;;  %v2981_v11 = vmul.f32 %v6414_v28, %v6414_v28  ;;  %v2982_v43 = vmul.f32 %v6417_v47, %v6417_v47  ;;  %v7402_v4 = vld [vmem:[#allocation5_spill] sm:$0xff] }
 0x24a   : > { %4246 = vst [vmem:[%s6047_s16 + $0x3a8] sm:$0xff] %v4646_v14  ;;  %v3285_v42 = vadd.f32 %v3284_v33, %v2976_v58  ;;  %v3153_v44 = vadd.f32 %v3152_v35, %v2977_v56  ;;  %v2983_v14 = vmul.f32 %v6426_v59, %v6426_v59  ;;  %v2986_v55 = vmul.f32 %v7400_v62, %v7400_v62  ;;  %v7401_v58 = vld [vmem:[#allocation4_spill] sm:$0xff] }
 0x24b   : > { %v2742_v25 = vadd.f32 %v2741_v34, %v6412_v31  ;;  %v2610_v21 = vadd.f32 %v2609_v52, %v6414_v28  ;;  %v2987_v18 = vmul.f32 %v7401_v58, %v7401_v58  ;;  %v2988_v35 = vmul.f32 %v7402_v4, %v7402_v4  ;;  %v7403_v34 = vld [vmem:[#allocation6_spill] sm:$0xff] }
 0x24c   : > { %v6797_v1 = vpop.f32.mrb[108].mxu1  ;;  %v3286_v46 = vadd.f32 %v3285_v42, %v2978_v57  ;;  %v3154_v12 = vadd.f32 %v3153_v44, %v2979_v30  ;;  %v2989_v42 = vmul.f32 %v7403_v34, %v7403_v34  ;;  %v7404_v44 = vld [vmem:[#allocation7_spill] sm:$0xff] }
 0x24d   : > { %v6802_v63 = vpop.f32.mrb[109].mxu1  ;;  %v2743_v7 = vadd.f32 %v2742_v25, %v6417_v47  ;;  %v2611_v17 = vadd.f32 %v2610_v21, %v6426_v59  ;;  %v2985_v47 = vmul.f32 %v6433_v2, %v6433_v2 }
 0x24e   : > { %v4647_v60 = vpack.c.bf16 %v6802_v63, %v6797_v1  ;;  %v6809_v61 = vpop.f32.mrb[110].mxu1  ;;  %v3287_v22 = vadd.f32 %v3286_v46, %v2980_v19  ;;  %v3155_v31 = vadd.f32 %v3154_v12, %v2981_v11  ;;  %v7405_v46 = vld [vmem:[#allocation8_spill] sm:$0xff] }
 0x24f   : > { %v6814_v8 = vpop.f32.mrb[111].mxu1  ;;  %v2744_v28 = vadd.f32 %v2743_v7, %v6429_v20  ;;  %v2612_v54 = vadd.f32 %v2611_v17, %v6433_v2  ;;  %v2991_v11 = vmul.f32 %v7405_v46, %v7405_v46 }
 0x250   : > { %4247 = vst [vmem:[%s6047_s16 + $0x3b0] sm:$0xff] %v4647_v60  ;;  %v4648_v0 = vpack.c.bf16 %v6814_v8, %v6809_v61  ;;  %v3288_v16 = vadd.f32 %v3287_v22, %v2982_v43  ;;  %v3156_v49 = vadd.f32 %v3155_v31, %v2983_v14  ;;  %v7406_v22 = vld [vmem:[#allocation9_spill] sm:$0xff] }
 0x251   : > { %v2745_v20 = vadd.f32 %v2744_v28, %v7400_v62  ;;  %v2613_v2 = vadd.f32 %v2612_v54, %v7401_v58  ;;  %v2992_v7 = vmul.f32 %v7406_v22, %v7406_v22  ;;  %v7409_v58 = vld [vmem:[#allocation12_spill] sm:$0xff] }
 0x252   : > { %4248 = vst [vmem:[%s6047_s16 + $0x3b8] sm:$0xff] %v4648_v0  ;;  %v3289_v3 = vadd.f32 %v3288_v16, %v2984_v23  ;;  %v3157_v33 = vadd.f32 %v3156_v49, %v2985_v47  ;;  %v2990_v0 = vmul.f32 %v7404_v44, %v7404_v44  ;;  %v7407_v23 = vld [vmem:[#allocation10_spill] sm:$0xff] }
 0x253   : > { %v2746_v60 = vadd.f32 %v2745_v20, %v7402_v4  ;;  %v2614_v30 = vadd.f32 %v2613_v2, %v7403_v34  ;;  %v2993_v28 = vmul.f32 %v7407_v23, %v7407_v23  ;;  %v7410_v4 = vld [vmem:[#allocation13_spill] sm:$0xff]  ;;  %v2997_v34 = vmul.f32 %v6482_v50, %v6482_v50 }
 0x254   : > { %v6835_v10 = vpop.f32.mrb[112].mxu1  ;;  %v3290_v57 = vadd.f32 %v3289_v3, %v2986_v55  ;;  %v3158_v52 = vadd.f32 %v3157_v33, %v2987_v18  ;;  %v2995_v18 = vmul.f32 %v7409_v58, %v7409_v58 }
 0x255   : > { %v6840_v38 = vpop.f32.mrb[113].mxu1  ;;  %v2747_v19 = vadd.f32 %v2746_v60, %v7404_v44  ;;  %v2615_v12 = vadd.f32 %v2614_v30, %v7405_v46 }
 0x256   : > { %v4649_v59 = vpack.c.bf16 %v6840_v38, %v6835_v10  ;;  %v6847_v41 = vpop.f32.mrb[114].mxu1  ;;  %v3291_v25 = vadd.f32 %v3290_v57, %v2988_v35  ;;  %v3159_v21 = vadd.f32 %v3158_v52, %v2989_v42  ;;  %v2996_v35 = vmul.f32 %v7410_v4, %v7410_v4  ;;  %v7411_v52 = vld [vmem:[#allocation14_spill] sm:$0xff] }
 0x257   : > { %v6852_v48 = vpop.f32.mrb[115].mxu1  ;;  %v2748_v14 = vadd.f32 %v2747_v19, %v7406_v22  ;;  %v2616_v16 = vadd.f32 %v2615_v12, %v7407_v23  ;;  %v2998_v44 = vmul.f32 %v7411_v52, %v7411_v52  ;;  %v7413_v22 = vld [vmem:[#allocation16_spill] sm:$0xff]  ;;  %v7414_v23 = vld [vmem:[#allocation17_spill] sm:$0xff] }
 0x258   : > { %4249 = vst [vmem:[%s6047_s16 + $0x3c0] sm:$0xff] %v4649_v59  ;;  %v4650_v56 = vpack.c.bf16 %v6852_v48, %v6847_v41  ;;  %v3292_v17 = vadd.f32 %v3291_v25, %v2990_v0  ;;  %v3160_v47 = vadd.f32 %v3159_v21, %v2991_v11  ;;  %v7408_v59 = vld [vmem:[#allocation11_spill] sm:$0xff] }
 0x259   : > { %v2994_v62 = vmul.f32 %v7408_v59, %v7408_v59  ;;  %v2749_v55 = vadd.f32 %v2748_v14, %v7408_v59  ;;  %v2617_v2 = vadd.f32 %v2616_v16, %v7409_v58  ;;  %v7412_v25 = vld [vmem:[#allocation15_spill] sm:$0xff] }
 0x25a   : > { %4250 = vst [vmem:[%s6047_s16 + $0x3c8] sm:$0xff] %v4650_v56  ;;  %v3293_v20 = vadd.f32 %v3292_v17, %v2992_v7  ;;  %v3161_v33 = vadd.f32 %v3160_v47, %v2993_v28  ;;  %v2999_v46 = vmul.f32 %v7412_v25, %v7412_v25  ;;  %v3000_v7 = vmul.f32 %v7413_v22, %v7413_v22 }
 0x25b   : > { %v2750_v60 = vadd.f32 %v2749_v55, %v7410_v4  ;;  %v2618_v42 = vadd.f32 %v2617_v2, %v6482_v50  ;;  %v3001_v28 = vmul.f32 %v7414_v23, %v7414_v23  ;;  %v7416_v2 = vld [vmem:[#allocation19_spill] sm:$0xff] }
 0x25c   : > { %v6873_v43 = vpop.f32.mrb[116].mxu1  ;;  %v3294_v57 = vadd.f32 %v3293_v20, %v2994_v62  ;;  %v3162_v30 = vadd.f32 %v3161_v33, %v2995_v18  ;;  %v7415_v62 = vld [vmem:[#allocation18_spill] sm:$0xff]  ;;  %v3003_v33 = vmul.f32 %v7416_v2, %v7416_v2 }
 0x25d   : > { %v6878_v31 = vpop.f32.mrb[117].mxu1  ;;  %v2751_v0 = vadd.f32 %v2750_v60, %v7411_v52  ;;  %v2619_v11 = vadd.f32 %v2618_v42, %v7412_v25  ;;  %v3002_v55 = vmul.f32 %v7415_v62, %v7415_v62  ;;  %v7417_v60 = vld [vmem:[#allocation20_spill] sm:$0xff] }
 0x25e   : > { %v4651_v54 = vpack.c.bf16 %v6878_v31, %v6873_v43  ;;  %v6885_v49 = vpop.f32.mrb[118].mxu1  ;;  %v3295_v19 = vadd.f32 %v3294_v57, %v2996_v35  ;;  %v3163_v12 = vadd.f32 %v3162_v30, %v2997_v34  ;;  %v3004_v57 = vmul.f32 %v7417_v60, %v7417_v60 }
 0x25f   : > { %v6890_v3 = vpop.f32.mrb[119].mxu1  ;;  %v2752_v50 = vadd.f32 %v2751_v0, %v7413_v22  ;;  %v2620_v16 = vadd.f32 %v2619_v11, %v7414_v23  ;;  %v3005_v30 = vmul.f32 %v6514_v40, %v6514_v40  ;;  %v7418_v0 = vld [vmem:[#allocation21_spill] sm:$0xff]  ;;  %v7419_v11 = vld [vmem:[#allocation22_spill] sm:$0xff] }
 0x260   : > { %4251 = vst [vmem:[%s6047_s16 + $0x3d0] sm:$0xff] %v4651_v54  ;;  %v4652_v56 = vpack.c.bf16 %v6890_v3, %v6885_v49  ;;  %v3296_v14 = vadd.f32 %v3295_v19, %v2998_v44  ;;  %v3164_v47 = vadd.f32 %v3163_v12, %v2999_v46  ;;  %v3006_v19 = vmul.f32 %v7418_v0, %v7418_v0 }
 0x261   : > { %v2753_v20 = vadd.f32 %v2752_v50, %v7415_v62  ;;  %v3007_v12 = vmul.f32 %v7419_v11, %v7419_v11 }
 0x262   : > { %4252 = vst [vmem:[%s6047_s16 + $0x3d8] sm:$0xff] %v4652_v56  ;;  %v3297_v58 = vadd.f32 %v3296_v14, %v3000_v7  ;;  %v2621_v56 = vadd.f32 %v2620_v16, %v7416_v2  ;;  %v3165_v4 = vadd.f32 %v3164_v47, %v3001_v28  ;;  %v7420_v14 = vld [vmem:[#allocation23_spill] sm:$0xff]  ;;  %v7421_v47 = vld [vmem:[#allocation24_spill] sm:$0xff]  ;;  %v7422_v2 = vld [vmem:[#allocation25_spill] sm:$0xff] }
 0x263   : > { %v2754_v34 = vadd.f32 %v2753_v20, %v7417_v60  ;;  %v3008_v23 = vmul.f32 %v7420_v14, %v7420_v14  ;;  %v7423_v60 = vld [vmem:[#allocation26_spill] sm:$0xff] }
 0x264   : > { %v6911_v21 = vpop.f32.mrb[120].mxu1  ;;  %v3298_v42 = vadd.f32 %v3297_v58, %v3002_v55  ;;  %v2622_v52 = vadd.f32 %v2621_v56, %v6514_v40  ;;  %v3166_v44 = vadd.f32 %v3165_v4, %v3003_v33  ;;  %v3010_v33 = vmul.f32 %v7422_v2, %v7422_v2 }
 0x265   : > { %v6916_v17 = vpop.f32.mrb[121].mxu1  ;;  %v2755_v25 = vadd.f32 %v2754_v34, %v7418_v0  ;;  %v3011_v34 = vmul.f32 %v7423_v60, %v7423_v60 }
 0x266   : > { %v4653_v54 = vpack.c.bf16 %v6916_v17, %v6911_v21  ;;  %v6923_v59 = vpop.f32.mrb[122].mxu1  ;;  %v3299_v46 = vadd.f32 %v3298_v42, %v3004_v57  ;;  %v2623_v22 = vadd.f32 %v2622_v52, %v7419_v11  ;;  %v3167_v7 = vadd.f32 %v3166_v44, %v3005_v30  ;;  %v7424_v52 = vld [vmem:[#allocation27_spill] sm:$0xff] }
 0x267   : > { %v6928_v18 = vpop.f32.mrb[123].mxu1  ;;  %v2756_v40 = vadd.f32 %v2755_v25, %v7420_v14  ;;  %v3012_v0 = vmul.f32 %v7424_v52, %v7424_v52 }
 0x268   : > { %4253 = vst [vmem:[%s6047_s16 + $0x3e0] sm:$0xff] %v4653_v54  ;;  %v4654_v35 = vpack.c.bf16 %v6928_v18, %v6923_v59  ;;  %v3300_v28 = vadd.f32 %v3299_v46, %v3006_v19  ;;  %v3009_v54 = vmul.f32 %v7421_v47, %v7421_v47  ;;  %v2624_v62 = vadd.f32 %v2623_v22, %v7421_v47  ;;  %v7425_v46 = vld [vmem:[#allocation28_spill] sm:$0xff] }
 0x269   : > { %v3168_v55 = vadd.f32 %v3167_v7, %v3007_v12  ;;  %v2757_v56 = vadd.f32 %v2756_v40, %v7422_v2  ;;  %v3013_v12 = vmul.f32 %v7425_v46, %v7425_v46  ;;  %v7426_v7 = vld [vmem:[#allocation29_spill] sm:$0xff] }
 0x26a   : > { %4254 = vst [vmem:[%s6047_s16 + $0x3e8] sm:$0xff] %v4654_v35  ;;  %v3301_v4 = vadd.f32 %v3300_v28, %v3008_v23  ;;  %v2625_v57 = vadd.f32 %v2624_v62, %v7423_v60  ;;  %v3014_v23 = vmul.f32 %v7426_v7, %v7426_v7  ;;  %v7427_v28 = vld [vmem:[#allocation30_spill] sm:$0xff] }
 0x26b   : > { %v3169_v42 = vadd.f32 %v3168_v55, %v3009_v54  ;;  %v2758_v44 = vadd.f32 %v2757_v56, %v7424_v52  ;;  %v3015_v54 = vmul.f32 %v7427_v28, %v7427_v28  ;;  %v7428_v55 = vld [vmem:[#allocation31_spill] sm:$0xff]  ;;  %v7429_v56 = vld [vmem:[#allocation32_spill] sm:$0xff] }
 0x26c   : > { %v6949_v50 = vpop.f32.mrb[124].mxu1  ;;  %v3302_v19 = vadd.f32 %v3301_v4, %v3010_v33  ;;  %v2626_v11 = vadd.f32 %v2625_v57, %v7425_v46  ;;  %v3016_v2 = vmul.f32 %v7428_v55, %v7428_v55  ;;  %v3017_v60 = vmul.f32 %v7429_v56, %v7429_v56  ;;  %v7432_v46 = vld [vmem:[#allocation35_spill] sm:$0xff] }
 0x26d   : > { %v6954_v16 = vpop.f32.mrb[125].mxu1  ;;  %v3170_v25 = vadd.f32 %v3169_v42, %v3011_v34  ;;  %v2759_v14 = vadd.f32 %v2758_v44, %v7426_v7  ;;  %v7430_v34 = vld [vmem:[#allocation33_spill] sm:$0xff]  ;;  %v7431_v44 = vld [vmem:[#allocation34_spill] sm:$0xff]  ;;  %v7433_v7 = vld [vmem:[#allocation36_spill] sm:$0xff] }
 0x26e   : > { %v4655_v20 = vpack.c.bf16 %v6954_v16, %v6949_v50  ;;  %v6961_v58 = vpop.f32.mrb[126].mxu1  ;;  %v3303_v22 = vadd.f32 %v3302_v19, %v3012_v0  ;;  %v2627_v47 = vadd.f32 %v2626_v11, %v7427_v28  ;;  %v3019_v19 = vmul.f32 %v7431_v44, %v7431_v44  ;;  %v7434_v28 = vld [vmem:[#allocation37_spill] sm:$0xff] }
 0x26f   : > { %v6966_v35 = vpop.f32.mrb[127].mxu1  ;;  %v3171_v40 = vadd.f32 %v3170_v25, %v3013_v12  ;;  %v3020_v12 = vmul.f32 %v7432_v46, %v7432_v46 }
 0x270   : > { %4255 = vst [vmem:[%s6047_s16 + $0x3f0] sm:$0xff] %v4655_v20  ;;  %v4656_v30 = vpack.c.bf16 %v6966_v35, %v6961_v58  ;;  %v3304_v62 = vadd.f32 %v3303_v22, %v3014_v23  ;;  %v2760_v20 = vadd.f32 %v2759_v14, %v7428_v55  ;;  %v2628_v4 = vadd.f32 %v2627_v47, %v7429_v56  ;;  %v7435_v55 = vld [vmem:[#allocation38_spill] sm:$0xff]  ;;  %v7436_v56 = vld [vmem:[#allocation39_spill] sm:$0xff] }
 0x271   : > { %v3172_v33 = vadd.f32 %v3171_v40, %v3015_v54  ;;  %v3021_v23 = vmul.f32 %v7433_v7, %v7433_v7  ;;  %v3022_v54 = vmul.f32 %v7434_v28, %v7434_v28 }
 0x272   : > { %4256 = vst [vmem:[%s6047_s16 + $0x3f8] sm:$0xff] %v4656_v30  ;;  %v3305_v57 = vadd.f32 %v3304_v62, %v3016_v2  ;;  %v2761_v42 = vadd.f32 %v2760_v20, %v7430_v34  ;;  %v3018_v30 = vmul.f32 %v7430_v34, %v7430_v34  ;;  %v2629_v0 = vadd.f32 %v2628_v4, %v7431_v44  ;;  %v7437_v34 = vld [vmem:[#allocation40_spill] sm:$0xff]  ;;  %v7438_v44 = vld [vmem:[#allocation41_spill] sm:$0xff] }
 0x273   : > { %v3173_v52 = vadd.f32 %v3172_v33, %v3017_v60  ;;  %v3023_v2 = vmul.f32 %v7435_v55, %v7435_v55  ;;  %v3024_v60 = vmul.f32 %v7436_v56, %v7436_v56 }
 0x274   : > { %v3306_v25 = vadd.f32 %v3305_v57, %v3018_v30  ;;  %v2762_v11 = vadd.f32 %v2761_v42, %v7432_v46  ;;  %v2630_v14 = vadd.f32 %v2629_v0, %v7433_v7  ;;  %v3025_v30 = vmul.f32 %v7437_v34, %v7437_v34  ;;  %v7439_v46 = vld [vmem:[#allocation42_spill] sm:$0xff]  ;;  %v7440_v7 = vld [vmem:[#allocation43_spill] sm:$0xff] }
 0x275   : > { %v3174_v22 = vadd.f32 %v3173_v52, %v3019_v19  ;;  %v3026_v19 = vmul.f32 %v7438_v44, %v7438_v44 }
 0x276   : > { %v3307_v40 = vadd.f32 %v3306_v25, %v3020_v12  ;;  %v2763_v47 = vadd.f32 %v2762_v11, %v7434_v28  ;;  %v2631_v20 = vadd.f32 %v2630_v14, %v7435_v55  ;;  %v3027_v12 = vmul.f32 %v7439_v46, %v7439_v46  ;;  %v7441_v28 = vld [vmem:[#allocation44_spill] sm:$0xff]  ;;  %v7442_v55 = vld [vmem:[#allocation45_spill] sm:$0xff] }
 0x277   : > { %v3175_v62 = vadd.f32 %v3174_v22, %v3021_v23  ;;  %v3028_v23 = vmul.f32 %v7440_v7, %v7440_v7 }
 0x278   : > { %v3308_v33 = vadd.f32 %v3307_v40, %v3022_v54  ;;  %v2764_v4 = vadd.f32 %v2763_v47, %v7436_v56  ;;  %v2632_v42 = vadd.f32 %v2631_v20, %v7437_v34  ;;  %v3029_v54 = vmul.f32 %v7441_v28, %v7441_v28  ;;  %v7443_v56 = vld [vmem:[#allocation46_spill] sm:$0xff]  ;;  %v7444_v34 = vld [vmem:[#allocation47_spill] sm:$0xff] }
 0x279   : > { %v3176_v57 = vadd.f32 %v3175_v62, %v3023_v2  ;;  %v3030_v2 = vmul.f32 %v7442_v55, %v7442_v55 }
 0x27a   : > { %v3309_v52 = vadd.f32 %v3308_v33, %v3024_v60  ;;  %v2765_v0 = vadd.f32 %v2764_v4, %v7438_v44  ;;  %v2633_v11 = vadd.f32 %v2632_v42, %v7439_v46  ;;  %v3031_v60 = vmul.f32 %v7443_v56, %v7443_v56  ;;  %v7445_v44 = vld [vmem:[#allocation48_spill] sm:$0xff]  ;;  %v7446_v46 = vld [vmem:[#allocation49_spill] sm:$0xff] }
 0x27b   : > { %v3177_v25 = vadd.f32 %v3176_v57, %v3025_v30  ;;  %v3032_v30 = vmul.f32 %v7444_v34, %v7444_v34 }
 0x27c   : > { %v3310_v22 = vadd.f32 %v3309_v52, %v3026_v19  ;;  %v2766_v14 = vadd.f32 %v2765_v0, %v7440_v7  ;;  %v2634_v47 = vadd.f32 %v2633_v11, %v7441_v28  ;;  %v3033_v19 = vmul.f32 %v7445_v44, %v7445_v44  ;;  %v7447_v7 = vld [vmem:[#allocation50_spill] sm:$0xff]  ;;  %v7448_v28 = vld [vmem:[#allocation51_spill] sm:$0xff] }
 0x27d   : > { %v3178_v40 = vadd.f32 %v3177_v25, %v3027_v12  ;;  %v3034_v12 = vmul.f32 %v7446_v46, %v7446_v46 }
 0x27e   : > { %v3311_v62 = vadd.f32 %v3310_v22, %v3028_v23  ;;  %v2767_v20 = vadd.f32 %v2766_v14, %v7442_v55  ;;  %v2635_v4 = vadd.f32 %v2634_v47, %v7443_v56  ;;  %v3035_v23 = vmul.f32 %v7447_v7, %v7447_v7  ;;  %v7449_v55 = vld [vmem:[#allocation52_spill] sm:$0xff]  ;;  %v7450_v56 = vld [vmem:[#allocation53_spill] sm:$0xff] }
 0x27f   : > { %v3179_v33 = vadd.f32 %v3178_v40, %v3029_v54  ;;  %v3036_v54 = vmul.f32 %v7448_v28, %v7448_v28 }
 0x280   : > { %v3312_v57 = vadd.f32 %v3311_v62, %v3030_v2  ;;  %v2768_v42 = vadd.f32 %v2767_v20, %v7444_v34  ;;  %v2636_v0 = vadd.f32 %v2635_v4, %v7445_v44  ;;  %v3037_v2 = vmul.f32 %v7449_v55, %v7449_v55 }
 0x281   : > { %v3180_v52 = vadd.f32 %v3179_v33, %v3031_v60  ;;  %v3038_v60 = vmul.f32 %v7450_v56, %v7450_v56  ;;  %v3040_v44 = vmul.f32 %v6654_v9, %v6654_v9 }
 0x282   : > { %v3313_v25 = vadd.f32 %v3312_v57, %v3032_v30  ;;  %v2769_v11 = vadd.f32 %v2768_v42, %v7446_v46  ;;  %v2637_v14 = vadd.f32 %v2636_v0, %v7447_v7  ;;  %v3039_v42 = vmul.f32 %v6652_v29, %v6652_v29 }
 0x283   : > { %v3181_v22 = vadd.f32 %v3180_v52, %v3033_v19  ;;  %v3043_v7 = vmul.f32 %v6683_v15, %v6683_v15 }
 0x284   : > { %v3314_v40 = vadd.f32 %v3313_v25, %v3034_v12  ;;  %v2770_v47 = vadd.f32 %v2769_v11, %v7448_v28  ;;  %v2638_v20 = vadd.f32 %v2637_v14, %v7449_v55  ;;  %v3041_v25 = vmul.f32 %v6656_v45, %v6656_v45 }
 0x285   : > { %v3182_v62 = vadd.f32 %v3181_v22, %v3035_v23  ;;  %v3042_v12 = vmul.f32 %v6659_v6, %v6659_v6  ;;  %v3044_v23 = vmul.f32 %v6688_v39, %v6688_v39  ;;  %v3045_v28 = vmul.f32 %v6695_v51, %v6695_v51 }
 0x286   : > { %v3315_v33 = vadd.f32 %v3314_v40, %v3036_v54  ;;  %v2771_v4 = vadd.f32 %v2770_v47, %v7450_v56  ;;  %v2639_v34 = vadd.f32 %v2638_v20, %v6652_v29  ;;  %v3046_v54 = vmul.f32 %v6700_v26, %v6700_v26 }
 0x287   : > { %v3183_v57 = vadd.f32 %v3182_v62, %v3037_v2  ;;  %v3047_v55 = vmul.f32 %v6721_v24, %v6721_v24  ;;  %v3048_v2 = vmul.f32 %v6726_v13, %v6726_v13  ;;  %v3049_v56 = vmul.f32 %v6733_v27, %v6733_v27 }
 0x288   : > { %v3316_v30 = vadd.f32 %v3315_v33, %v3038_v60  ;;  %v2772_v52 = vadd.f32 %v2771_v4, %v6654_v9  ;;  %v2640_v19 = vadd.f32 %v2639_v34, %v6656_v45  ;;  %v3050_v60 = vmul.f32 %v6738_v5, %v6738_v5 }
 0x289   : > { %v3184_v0 = vadd.f32 %v3183_v57, %v3039_v42  ;;  %v3051_v34 = vmul.f32 %v6759_v37, %v6759_v37 }
 0x28a   : > { %v3317_v46 = vadd.f32 %v3316_v30, %v3040_v44  ;;  %v2773_v11 = vadd.f32 %v2772_v52, %v6659_v6  ;;  %v2641_v29 = vadd.f32 %v2640_v19, %v6683_v15  ;;  %v3052_v30 = vmul.f32 %v6764_v32, %v6764_v32 }
 0x28b   : > { %v3185_v22 = vadd.f32 %v3184_v0, %v3041_v25  ;;  %v3053_v44 = vmul.f32 %v6771_v36, %v6771_v36  ;;  %v3054_v19 = vmul.f32 %v6776_v53, %v6776_v53 }
 0x28c   : > { %v3318_v14 = vadd.f32 %v3317_v46, %v3042_v12  ;;  %v2774_v9 = vadd.f32 %v2773_v11, %v6688_v39  ;;  %v2642_v45 = vadd.f32 %v2641_v29, %v6695_v51  ;;  %v3055_v46 = vmul.f32 %v6797_v1, %v6797_v1 }
 0x28d   : > { %v3186_v40 = vadd.f32 %v3185_v22, %v3043_v7  ;;  %v3056_v12 = vmul.f32 %v6802_v63, %v6802_v63  ;;  %v3057_v29 = vmul.f32 %v6809_v61, %v6809_v61 }
 0x28e   : > { %v3319_v47 = vadd.f32 %v3318_v14, %v3044_v23  ;;  %v2775_v6 = vadd.f32 %v2774_v9, %v6700_v26  ;;  %v2643_v15 = vadd.f32 %v2642_v45, %v6721_v24  ;;  %v3058_v14 = vmul.f32 %v6814_v8, %v6814_v8 }
 0x28f   : > { %v3187_v62 = vadd.f32 %v3186_v40, %v3045_v28  ;;  %v3059_v23 = vmul.f32 %v6835_v10, %v6835_v10  ;;  %v3060_v45 = vmul.f32 %v6840_v38, %v6840_v38 }
 0x290   : > { %v3320_v20 = vadd.f32 %v3319_v47, %v3046_v54  ;;  %v2776_v39 = vadd.f32 %v2775_v6, %v6726_v13  ;;  %v2644_v51 = vadd.f32 %v2643_v15, %v6733_v27  ;;  %v3061_v47 = vmul.f32 %v6847_v41, %v6847_v41 }
 0x291   : > { %v3188_v33 = vadd.f32 %v3187_v62, %v3047_v55  ;;  %v3062_v54 = vmul.f32 %v6852_v48, %v6852_v48  ;;  %v3063_v15 = vmul.f32 %v6873_v43, %v6873_v43 }
 0x292   : > { %v3321_v4 = vadd.f32 %v3320_v20, %v3048_v2  ;;  %v2777_v26 = vadd.f32 %v2776_v39, %v6738_v5  ;;  %v2645_v24 = vadd.f32 %v2644_v51, %v6759_v37  ;;  %v3064_v20 = vmul.f32 %v6878_v31, %v6878_v31 }
 0x293   : > { %v3189_v57 = vadd.f32 %v3188_v33, %v3049_v56  ;;  %v3065_v2 = vmul.f32 %v6885_v49, %v6885_v49  ;;  %v3066_v51 = vmul.f32 %v6890_v3, %v6890_v3 }
 0x294   : > { %v3322_v42 = vadd.f32 %v3321_v4, %v3050_v60  ;;  %v2778_v13 = vadd.f32 %v2777_v26, %v6764_v32  ;;  %v2646_v27 = vadd.f32 %v2645_v24, %v6771_v36  ;;  %v3067_v4 = vmul.f32 %v6911_v21, %v6911_v21 }
 0x295   : > { %v3190_v52 = vadd.f32 %v3189_v57, %v3051_v34  ;;  %v3068_v60 = vmul.f32 %v6916_v17, %v6916_v17  ;;  %v3069_v24 = vmul.f32 %v6923_v59, %v6923_v59 }
 0x296   : > { %v3323_v0 = vadd.f32 %v3322_v42, %v3052_v30  ;;  %v2779_v5 = vadd.f32 %v2778_v13, %v6776_v53  ;;  %v2647_v37 = vadd.f32 %v2646_v27, %v6797_v1  ;;  %v3072_v13 = vmul.f32 %v6954_v16, %v6954_v16 }
 0x297   : > { %v3191_v25 = vadd.f32 %v3190_v52, %v3053_v44 }
 0x298   : > { %v3324_v11 = vadd.f32 %v3323_v0, %v3054_v19  ;;  %v2780_v32 = vadd.f32 %v2779_v5, %v6802_v63  ;;  %v2648_v36 = vadd.f32 %v2647_v37, %v6809_v61  ;;  %v3073_v0 = vmul.f32 %v6961_v58, %v6961_v58 }
 0x299   : > { %v3192_v22 = vadd.f32 %v3191_v25, %v3055_v46 }
 0x29a   : > { %v3325_v7 = vadd.f32 %v3324_v11, %v3056_v12  ;;  %v2781_v53 = vadd.f32 %v2780_v32, %v6814_v8  ;;  %v2649_v1 = vadd.f32 %v2648_v36, %v6835_v10 }
 0x29b   : > { %v3193_v9 = vadd.f32 %v3192_v22, %v3057_v29 }
 0x29c   : > { %v3326_v40 = vadd.f32 %v3325_v7, %v3058_v14  ;;  %v2782_v63 = vadd.f32 %v2781_v53, %v6840_v38  ;;  %v2650_v61 = vadd.f32 %v2649_v1, %v6847_v41 }
 0x29d   : > { %v3194_v28 = vadd.f32 %v3193_v9, %v3059_v23 }
 0x29e   : > { %v3327_v6 = vadd.f32 %v3326_v40, %v3060_v45  ;;  %v2783_v8 = vadd.f32 %v2782_v63, %v6852_v48  ;;  %v2651_v10 = vadd.f32 %v2650_v61, %v6873_v43 }
 0x29f   : > { %v3195_v62 = vadd.f32 %v3194_v28, %v3061_v47 }
 0x2a0   : > { %v3328_v55 = vadd.f32 %v3327_v6, %v3062_v54  ;;  %v2784_v38 = vadd.f32 %v2783_v8, %v6878_v31  ;;  %v2652_v41 = vadd.f32 %v2651_v10, %v6885_v49  ;;  %v7451_v54 = vld [vmem:[#allocation2_spill] sm:$0xff] }
 0x2a1   : > { %v3196_v39 = vadd.f32 %v3195_v62, %v3063_v15  ;;  %v7452_v15 = vlaneseq }
 0x2a2   : > { %v3329_v33 = vadd.f32 %v3328_v55, %v3064_v20  ;;  %v2785_v48 = vadd.f32 %v2784_v38, %v6890_v3  ;;  %v2653_v43 = vadd.f32 %v2652_v41, %v6911_v21  ;;  %v3071_v3 = vmul.f32 %v6949_v50, %v6949_v50 }
 0x2a3   : > { %v3197_v56 = vadd.f32 %v3196_v39, %v3065_v2  ;;  %v3070_v21 = vmul.f32 %v6928_v18, %v6928_v18  ;;  %vm2816_vm1 = vcmp.lt.s32.totalorder %v7452_v15, 256 }
 0x2a4   : > { %v3330_v26 = vadd.f32 %v3329_v33, %v3066_v51  ;;  %v2786_v31 = vadd.f32 %v2785_v48, %v6916_v17  ;;  %v2654_v49 = vadd.f32 %v2653_v43, %v6923_v59 }
 0x2a5   : > { %v3198_v57 = vadd.f32 %v3197_v56, %v3067_v4 }
 0x2a6   : > { %v3331_v34 = vadd.f32 %v3330_v26, %v3068_v60  ;;  %v2787_v42 = vadd.f32 %v2786_v31, %v6928_v18  ;;  %v2655_v17 = vadd.f32 %v2654_v49, %v6949_v50  ;;  %v3074_v18 = vmul.f32 %v6966_v35, %v6966_v35 }
 0x2a7   : > { %v3199_v30 = vadd.f32 %v3198_v57, %v3069_v24 }
 0x2a8   : > { %v3332_v52 = vadd.f32 %v3331_v34, %v3070_v21  ;;  %v2788_v27 = vadd.f32 %v2787_v42, %v6954_v16  ;;  %v2656_v59 = vadd.f32 %v2655_v17, %v6961_v58 }
 0x2a9   : > { %v3200_v44 = vadd.f32 %v3199_v30, %v3071_v3 }
 0x2aa   : > { %v3333_v5 = vadd.f32 %v3332_v52, %v3072_v13  ;;  %v2789_v19 = vadd.f32 %v2788_v27, %v6966_v35  ;;  %v2657_v25 = vrot.slane %v2656_v59, 4 }
 0x2ab   : > { %v3201_v37 = vadd.f32 %v3200_v44, %v3073_v0 }
 0x2ac   : > { %v2790_v46 = vrot.slane %v2789_v19, 4  ;;  %v3334_v50 = vadd.f32 %v3333_v5, %v3074_v18  ;;  %v2658_v11 = vadd.f32 %v2657_v25, %v2656_v59 }
 0x2ad   : > { %v3202_v16 = vrot.slane %v3201_v37, 4 }
 0x2ae   : > { %v2791_v32 = vadd.f32 %v2790_v46, %v2789_v19  ;;  %v3335_v12 = vrot.slane %v3334_v50, 4  ;;  %v2659_v22 = vrot.slane %v2658_v11, 2 }
 0x2af   : > { %v3203_v36 = vadd.f32 %v3202_v16, %v3201_v37 }
 0x2b0   : > { %v2792_v29 = vrot.slane %v2791_v32, 2  ;;  %v3336_v58 = vadd.f32 %v3335_v12, %v3334_v50  ;;  %v2660_v7 = vadd.f32 %v2659_v22, %v2658_v11 }
 0x2b1   : > { %v3204_v53 = vrot.slane %v3203_v36, 2 }
 0x2b2   : > { %v2793_v14 = vadd.f32 %v2792_v29, %v2791_v32  ;;  %v3337_v9 = vrot.slane %v3336_v58, 2  ;;  %v2661_v1 = vrot.slane %v2660_v7, 1 }
 0x2b3   : > { %v3205_v35 = vadd.f32 %v3204_v53, %v3203_v36 }
 0x2b4   : > { %v2794_v23 = vrot.slane %v2793_v14, 1  ;;  %v3338_v40 = vadd.f32 %v3337_v9, %v3336_v58  ;;  %v2662_v63 = vadd.f32 %v2661_v1, %v2660_v7 }
 0x2b5   : > { %v3206_v45 = vrot.slane %v3205_v35, 1 }
 0x2b6   : > { %v2795_v28 = vadd.f32 %v2794_v23, %v2793_v14  ;;  %v3339_v61 = vrot.slane %v3338_v40, 1 }
 0x2b7   : > { %v3207_v47 = vadd.f32 %v3206_v45, %v3205_v35 }
 0x2b8   : > { %v2798_v6 = vcombine.low %v2662_v63, %v2795_v28  ;;  %v3340_v8 = vadd.f32 %v3339_v61, %v3338_v40 }
 0x2ba   : > { %v2805_v62 = vrot.slane %v2798_v6, %v7451_v54  ;;  %v3343_v10 = vcombine.low %v3207_v47, %v3340_v8 }
 0x2bc   : > { %v2812_v55 = vrot.slane %v2805_v62, %v7451_v54  ;;  %v3350_v38 = vrot.slane %v3343_v10, %v7451_v54 }
 0x2be   : > { %2818 = vst.msk [vmem:[%s272_s17] ss:$2 sm:$0x3] %vm2816_vm1, %v2812_v55  ;;  %v3357_v20 = vrot.slane %v3350_v38, %v7451_v54 }
 0x2c0   : > { %4395 = vst.msk [vmem:[%s272_s17 + $0x1] ss:$2 sm:$0x3] %vm2816_vm1, %v3357_v20 }
 0x2c1 PF: > { %s17_s21 = sadd.s32 1, %s4756_s21  }
 0x2c2   : > { %p14_p5 = scmp.ge.s32.totalorder %s17_s21, 4  }
 0x2c4   :  { %16 = sbr.rel (!%p14_p5) target bundleno = 1 (0x1), region = 83 }

// kernel: residual_block.5
= control target key start
LH: loop header
LB: loop body
LE: loop exit
PB: predicated region body
PF: predicated region fallthrough
CT: control target
= control target key end

     0   :  { %12 = vsyncpa [#allocation3], 0  ;;  %s6071_s0 = inlined_call_operand.vmem [shape: bf16[2048,256], index: 0, kind: input, shape index: {}]   ;;  %s6072_s1 = inlined_call_operand.vmem [shape: bf16[2048,128], index: 1, kind: input, shape index: {}]   ;;  %s6073_s2 = inlined_call_operand.vmem [shape: bf16[128,256], index: 2, kind: input, shape index: {}]   ;;  %s6074_s3 = inlined_call_operand.vmem [shape: f32[1,256], index: 3, kind: input, shape index: {}]   ;;  %s6075_s4 = inlined_call_operand.vmem [shape: f32[2,2,256], index: 4, kind: input, shape index: {}]   ;;  %s6076_s5 = inlined_call_operand.vmem [shape: f32[1,256], index: 5, kind: input, shape index: {}]   ;;  %s6077_s6 = inlined_call_operand.vmem [shape: f32[1,256], index: 6, kind: input, shape index: {}]   ;;  %s6078_s7 = inlined_call_operand.hbm [shape: f32[2048,256], index: 7, kind: output, shape index: {}]  }
   0x1   :  { %14 = vsyncpa [#allocation3 + $0x1], 0  ;;  %s3825_s24 = smov 0   ;;  %s3827_s25 = smov 0  }
   0x2   :  { %s3829_s26 = smov 0   ;;  %s3831_s27 = smov 0  }
   0x3 LB: > { %s3846_s28 = sadd.s32 4294967295, %s3778_s27   ;;  %s3464_s29 = sadd.s32 4294967294, %s3778_s27   ;;  %s3778_s27 = sphi %s3831_s27, %s6307_s27   ;;  %s3774_s26 = sphi %s3829_s26, %s6306_s26   ;;  %s3770_s25 = sphi %s3827_s25, %s6305_s25   ;;  %s3766_s24 = sphi %s3825_s24, %s6304_s24  }
   0x4   : > { %s3850_s30 = sadd.s32 1, %s3778_s27   ;;  %s184_s8 = sadd.s32 1, %s3774_s26 }
   0x5   : > { %s181_s9 = ssub.s32 %s3778_s27, %s3850_s30  ;;  %p194_p0 = scmp.ne.s32.totalorder %s3774_s26, %s3770_s25 }
   0x6   : > { %p182_p1 = scmp.eq.s32.totalorder %s181_s9, 0  ;;  %p195_p2 = scmp.eq.s32.totalorder %s3846_s28, 1 }
   0x7   : > { %p200_p3 = scmp.ne.s32.totalorder %s3770_s25, %s3766_s24  ;;  %p201_p4 = scmp.eq.s32.totalorder %s3464_s29, 1 }
   0x8   : > { %s3861_s10 = scalar_select %p182_p1, %s3774_s26, %s184_s8  }
   0x9   : > { %p3863_p5 = por %p195_p2, %p194_p0  ;;  %p3867_p6 = por %p201_p4, %p200_p3 }
   0xa   : > { %p3467_p7 = scmp.ge.s32.totalorder %s3778_s27, 1  ;;  %p253_p8 = scmp.lt.s32.totalorder %s3778_s27, 3 }
   0xc   : > { %p254_p9 = pnand %p3467_p7, %p253_p8 }
   0xe   : > { %257 = sbr.rel (%p254_p9) target bundleno = 576 (0x240), region = 48 }
  0x15   : > { %v3624_v0 = vld [vmem:[%s6073_s2 + $0x4] ss:$8 sps:$4 sm:$0xff]   ;;  %s3469_s15 = sshll.u32 %s3846_s28, 7  ;;  %v3626_v1 = vld [vmem:[%s6073_s2] ss:$8 sps:$4 sm:$0xff]   ;;  %v6079_v2 = vmov 0   ;;  %v361_v57 = vlaneseq }
  0x16   : > { %1059 = vmatprep.mubr.bf16.mxu0 %v6079_v2  ;;  %1379 = vmatprep.mubr.bf16.mxu1 %v6079_v2  ;;  %p292_p10 = scmp.lt.s32.totalorder %s3469_s15, 255  ;;  %v3627_v3 = vld [vmem:[%s6073_s2 + $0x14] ss:$8 sps:$4 sm:$0xff]   ;;  %v3629_v4 = vld [vmem:[%s6073_s2 + $0x10] ss:$8 sps:$4 sm:$0xff]   ;;  %vm332_vm0 = vcmask 1041408  }
  0x17   : > { %1027 = vmatprep.subr.bf16.mxu0 %v3624_v0  ;;  %3565 = vmatprep.subr.bf16.mxu1 %v3624_v0  ;;  %v3630_v5 = vld [vmem:[%s6073_s2 + $0x24] ss:$8 sps:$4 sm:$0xff]   ;;  %v3632_v6 = vld [vmem:[%s6073_s2 + $0x20] ss:$8 sps:$4 sm:$0xff]   ;;  %v3633_v7 = vld [vmem:[%s6073_s2 + $0x34] ss:$8 sps:$4 sm:$0xff]  }
  0x18   : > { %1028 = vmatpush1.bf16.msra.mxu0 %v3626_v1  ;;  %3573 = vmatpush1.bf16.msra.mxu1 %v3626_v1  ;;  %s6309_s15 = smov (!%p292_p10, %s3469_s15), 255  ;;  %v3635_v8 = vld [vmem:[%s6073_s2 + $0x30] ss:$8 sps:$4 sm:$0xff]   ;;  %v3636_v9 = vld [vmem:[%s6073_s2 + $0x44] ss:$8 sps:$4 sm:$0xff]   ;;  %v362_v60 = vshrl.u32 %v361_v57, 7 }
  0x19   : > { %1029 = vmatprep.subr.bf16.mxu0 %v3627_v3  ;;  %3566 = vmatprep.subr.bf16.mxu1 %v3627_v3  ;;  %s3473_s29 = sshll.u32 %s6309_s15, 2  ;;  %v3638_v10 = vld [vmem:[%s6073_s2 + $0x40] ss:$8 sps:$4 sm:$0xff]   ;;  %v3639_v11 = vld [vmem:[%s6073_s2 + $0x54] ss:$8 sps:$4 sm:$0xff]   ;;  %s3562_s19 = sshll.u32 %s6309_s15, 3 }
  0x1a   : > { %s3903_s18 = scalar_lea.vmem %s6072_s1, %s3473_s29  ;;  %v3641_v12 = vld [vmem:[%s6073_s2 + $0x50] ss:$8 sps:$4 sm:$0xff]   ;;  %v3642_v13 = vld [vmem:[%s6073_s2 + $0x64] ss:$8 sps:$4 sm:$0xff]   ;;  %v3644_v14 = vld [vmem:[%s6073_s2 + $0x60] ss:$8 sps:$4 sm:$0xff]   ;;  %s4017_s22 = scalar_lea.vmem %s6071_s0, %s3562_s19 }
  0x1b   : > { %v3645_v15 = vld [vmem:[%s6073_s2 + $0x74] ss:$8 sps:$4 sm:$0xff]   ;;  %v3647_v16 = vld [vmem:[%s6073_s2 + $0x70] ss:$8 sps:$4 sm:$0xff]   ;;  %v3648_v17 = vld [vmem:[%s3903_s18] sm:$0xff]   ;;  %s288_s9 = sand.u32 1, %s3770_s25  }
  0x1c   : > { %1030 = vmatpush1.bf16.msra.mxu0 %v3629_v4  ;;  %3574 = vmatpush1.bf16.msra.mxu1 %v3629_v4  ;;  %v3649_v18 = vld [vmem:[%s3903_s18 + $0x100] sm:$0xff]   ;;  %v3650_v19 = vld [vmem:[%s3903_s18 + $0x8] sm:$0xff]   ;;  %v3652_v21 = vld [vmem:[%s3903_s18 + $0x10] sm:$0xff]   ;;  %v3781_v55 = vmov 1966171168   ;;  %s4682_s13 = sshll.u32 %s288_s9, 11 }
  0x1d   : > { %1031 = vmatprep.subr.bf16.mxu0 %v3630_v5  ;;  %3567 = vmatprep.subr.bf16.mxu1 %v3630_v5  ;;  %v3651_v20 = vld [vmem:[%s3903_s18 + $0x108] sm:$0xff]   ;;  %v3653_v22 = vld [vmem:[%s3903_s18 + $0x110] sm:$0xff]   ;;  %v3654_v23 = vld [vmem:[%s3903_s18 + $0x18] sm:$0xff]   ;;  %v359_v56 = vunpack.c.l.s4 %v3781_v55  ;;  %s4717_s14 = scalar_lea.vmem [#allocation2], %s4682_s13 }
  0x1e   : > { %v3655_v24 = vld [vmem:[%s3903_s18 + $0x118] sm:$0xff]   ;;  %v3656_v25 = vld [vmem:[%s3903_s18 + $0x20] sm:$0xff]   ;;  %v3658_v31 = vld [vmem:[%s3903_s18 + $0x28] sm:$0xff]   ;;  %s3390_s16 = sshll.u32 %s4717_s14, 4  ;;  %s6023_s16 = int_to_ptr.vmem [resolvable:$true] %s3390_s16 }
  0x1f   : > { %v3657_v26 = vld [vmem:[%s3903_s18 + $0x120] sm:$0xff]   ;;  %v3659_v32 = vld [vmem:[%s3903_s18 + $0x128] sm:$0xff]   ;;  %v3660_v44 = vld [vmem:[%s3903_s18 + $0x30] sm:$0xff]   ;;  %v360_v59 = vunpack.c.0.s8 %v359_v56  ;;  %s3716_s21 = scalar_lea.vmem %s6023_s16, 32768 }
  0x20   : > { %1032 = vmatpush1.bf16.msra.mxu0 %v3632_v6  ;;  %3575 = vmatpush1.bf16.msra.mxu1 %v3632_v6  ;;  %v3474_v27 = vld.sshfl [vmem:[%s6075_s4] sm:$0x33 pattern:$0x76325410]  ;;  %v3661_v45 = vld [vmem:[%s3903_s18 + $0x130] sm:$0xff]   ;;  %v3662_v51 = vld [vmem:[%s3903_s18 + $0x38] sm:$0xff]   ;;  %p3717_p11 = scmp.ne.s32.totalorder %s6023_s16, %s3716_s21 }
  0x21   : > { %1033 = vmatprep.subr.bf16.mxu0 %v3633_v7  ;;  %3568 = vmatprep.subr.bf16.mxu1 %v3633_v7  ;;  %v3475_v28 = vld.sshfl [vmem:[%s6075_s4 + $0x4] sm:$0x33 pattern:$0x76325410]  ;;  %v319_v29 = vcombine.high %v3474_v27, %v3474_v27  ;;  %v333_v33 = vsel %vm332_vm0, %v3474_v27, 0.0  ;;  %v3663_v52 = vld [vmem:[%s3903_s18 + $0x138] sm:$0xff]   ;;  %v363_v1 = vsub.s32 %v360_v59, %v362_v60 }
  0x22   : > { %v327_v30 = vcombine.high %v3475_v28, %v3475_v28  ;;  %v334_v34 = vsel %vm332_vm0, %v3475_v28, 0.0  ;;  %v3664_v53 = vld [vmem:[%s3903_s18 + $0x40] sm:$0xff]   ;;  %v3666_v62 = vld [vmem:[%s3903_s18 + $0x48] sm:$0xff]   ;;  %v3668_v4 = vld [vmem:[%s3903_s18 + $0x50] sm:$0xff]   ;;  %p3718_p12 = pnand %p3717_p11, %p3863_p5 }
  0x23   : > { %v336_v35 = vsel %vm332_vm0, %v319_v29, 0.0  ;;  %v335_v36 = vadd.f32 %v334_v34, %v333_v33  ;;  %v3665_v54 = vld [vmem:[%s3903_s18 + $0x140] sm:$0xff]   ;;  %v3667_v63 = vld [vmem:[%s3903_s18 + $0x148] sm:$0xff]   ;;  %v3669_v5 = vld [vmem:[%s3903_s18 + $0x150] sm:$0xff]  }
  0x24   : > { %1034 = vmatpush1.bf16.msra.mxu0 %v3635_v8  ;;  %3576 = vmatpush1.bf16.msra.mxu1 %v3635_v8  ;;  %v337_v37 = vsel %vm332_vm0, %v327_v30, 0.0  ;;  %v308_v8 = vld [vmem:[%s6076_s5] sm:$0x3]  ;;  %v3676_v28 = vld [vmem:[%s3903_s18 + $0x70] sm:$0xff]   ;;  %v1765_v33 = vld [vmem:[%s4017_s22 + $0x208] sm:$0xff]  ;;  %p3719_p13 = pneg %p3718_p12 }
  0x25   : > { %1035 = vmatprep.subr.bf16.mxu0 %v3636_v9  ;;  %3569 = vmatprep.subr.bf16.mxu1 %v3636_v9  ;;  %v338_v38 = vadd.f32 %v337_v37, %v336_v35  ;;  %v3960_v39 = vmul.f32 0.00048828125, %v335_v36  ;;  %v3670_v9 = vld [vmem:[%s3903_s18 + $0x58] sm:$0xff]   ;;  %v1764_v27 = vld [vmem:[%s4017_s22 + $0x200] sm:$0xff]  ;;  %v3677_v29 = vld [vmem:[%s3903_s18 + $0x170] sm:$0xff]  }
  0x26   : > { %v1956_v34 = vunpack.c.l.bf16 %v1764_v27  ;;  %v551_v36 = vld [vmem:[%s6074_s3] sm:$0x3]  ;;  %v1957_v37 = vunpack.c.h.bf16 %v1764_v27  ;;  %v1767_v55 = vld [vmem:[%s4017_s22 + $0x218] sm:$0xff] }
  0x27   : > { %v3962_v40 = vmul.f32 0.00048828125, %v338_v38  ;;  %v341_v41 = vmul.f32 %v3960_v39, %v3960_v39  ;;  %v3678_v56 = vld [vmem:[%s3903_s18 + $0x78] sm:$0xff]  }
  0x28   : > { %1036 = vmatpush1.bf16.msra.mxu0 %v3638_v10  ;;  %3577 = vmatpush1.bf16.msra.mxu1 %v3638_v10  ;;  %v3671_v10 = vld [vmem:[%s3903_s18 + $0x158] sm:$0xff]  }
  0x29   : > { %1037 = vmatprep.subr.bf16.mxu0 %v3639_v11  ;;  %3570 = vmatprep.subr.bf16.mxu1 %v3639_v11  ;;  %v342_v42 = vmul.f32 %v3962_v40, %v3962_v40  ;;  %v345_v43 = vrot.slane %v341_v41, 7  ;;  %v3679_v57 = vld [vmem:[%s3903_s18 + $0x178] sm:$0xff]  }
  0x2b   : > { %v346_v46 = vrot.slane %v342_v42, 7  ;;  %v349_v47 = vsub.f32 %v3960_v39, %v345_v43 }
  0x2c   : > { %1038 = vmatpush1.bf16.msra.mxu0 %v3641_v12  ;;  %3578 = vmatpush1.bf16.msra.mxu1 %v3641_v12  ;;  %v378_v12 = vsub.s32 0, %v362_v60 }
  0x2d   : > { %1039 = vmatprep.subr.bf16.mxu0 %v3642_v13  ;;  %3571 = vmatprep.subr.bf16.mxu1 %v3642_v13  ;;  %v350_v48 = vsub.f32 %v3962_v40, %v346_v46  ;;  %v351_v49 = vadd.f32 0.001, %v349_v47  ;;  %v382_v13 = vsub.s32 1, %v362_v60  ;;  %v1766_v46 = vld [vmem:[%s4017_s22 + $0x210] sm:$0xff] }
  0x2e   : > { %v4041_v47 = vrot.slane %v551_v36, %v378_v12 }
  0x2f   : > { %v352_v50 = vadd.f32 0.001, %v350_v48  ;;  %3712 = vrsqrt.f32 %v351_v49  ;;  %v4043_v48 = vrot.slane %v551_v36, %v382_v13 }
  0x30   : > { %1040 = vmatpush1.bf16.msra.mxu0 %v3644_v14  ;;  %3579 = vmatpush1.bf16.msra.mxu1 %v3644_v14 }
  0x31   : > { %1041 = vmatprep.subr.bf16.mxu0 %v3645_v15  ;;  %3572 = vmatprep.subr.bf16.mxu1 %v3645_v15  ;;  %3714 = vrsqrt.f32 %v352_v50 }
  0x34   : > { %1042 = vmatpush1.bf16.msra.mxu0 %v3647_v16  ;;  %3580 = vmatpush1.bf16.msra.mxu1 %v3647_v16  ;;  %v3672_v16 = vld [vmem:[%s3903_s18 + $0x60] sm:$0xff]  }
  0x37   : > { %1060 = vmatmul.mubr.bf16.vlgmr.msra.gmra.mrb[0].mxu0 %v3648_v17  ;;  %1380 = vmatmul.mubr.bf16.vlgmr.msra.gmra.mrb[0].mxu1 %v3649_v18  ;;  %v3673_v17 = vld [vmem:[%s3903_s18 + $0x160] sm:$0xff]  }
  0x38   : > { %1069 = vmatprep.mubr.bf16.mxu0 %v6079_v2  ;;  %1389 = vmatprep.mubr.bf16.mxu1 %v6079_v2 }
  0x39   : > { %v3713_v58 = vpop.eup %3712 }
  0x3b   : > { %v3715_v61 = vpop.eup %3714 }
  0x3c   : > { %v357_v0 = vcombine.low %v3713_v58, %v3715_v61  ;;  %v1960_v61 = vunpack.c.l.bf16 %v1766_v46 }
  0x3e   : > { %v364_v3 = vrot.slane %v357_v0, %v363_v1 }
  0x3f   : > { %1070 = vmatmul.mubr.bf16.gmra.mrb[4].mxu0 %v3650_v19  ;;  %1390 = vmatmul.mubr.bf16.gmra.mrb[4].mxu1 %v3651_v20 }
  0x40   : > { %1079 = vmatprep.mubr.bf16.mxu0 %v6079_v2  ;;  %1399 = vmatprep.mubr.bf16.mxu1 %v6079_v2  ;;  %v365_v6 = vcombine.high %v364_v3, %v364_v3  ;;  %v1704_v3 = vld [vmem:[%s4017_s22 + $0x20] sm:$0xff] }
  0x42   : > { %v372_v7 = vrot.slane %v365_v6, %v363_v1 }
  0x44   : > { %v374_v11 = vmul.f32 %v372_v7, %v308_v8  ;;  %v1963_v7 = vunpack.c.h.bf16 %v1767_v55  ;;  %v1768_v8 = vld [vmem:[%s4017_s22 + $0x220] sm:$0xff] }
  0x46   : > { %v3997_v14 = vrot.slane %v374_v11, %v378_v12  ;;  %v3999_v15 = vrot.slane %v374_v11, %v382_v13 }
  0x47   : > { %1080 = vmatmul.mubr.bf16.gmra.mrb[8].mxu0 %v3652_v21  ;;  %1400 = vmatmul.mubr.bf16.gmra.mrb[8].mxu1 %v3653_v22  ;;  %v3674_v21 = vld [vmem:[%s3903_s18 + $0x68] sm:$0xff]  }
  0x48   : > { %1089 = vmatprep.mubr.bf16.mxu0 %v6079_v2  ;;  %1409 = vmatprep.mubr.bf16.mxu1 %v6079_v2  ;;  %v386_v18 = vmul.f32 %v3997_v14, %v3960_v39  ;;  %v387_v19 = vmul.f32 %v3999_v15, %v3962_v40  ;;  %v3675_v22 = vld [vmem:[%s3903_s18 + $0x168] sm:$0xff]   ;;  %v1958_v39 = vunpack.c.l.bf16 %v1765_v33  ;;  %v2212_v43 = vmul.f32 %v1956_v34, %v3997_v14  ;;  %v3681_v34 = vld [vmem:[%s3903_s18 + $0x180] sm:$0xff]  }
  0x4a   : > { %v390_v20 = vcombine.low %v386_v18, %v387_v19  ;;  %v1836_v18 = vunpack.c.l.bf16 %v1704_v3  ;;  %v1705_v19 = vld [vmem:[%s4017_s22 + $0x28] sm:$0xff] }
  0x4f   : > { %1090 = vmatmul.mubr.bf16.gmra.mrb[12].mxu0 %v3654_v23  ;;  %1410 = vmatmul.mubr.bf16.gmra.mrb[12].mxu1 %v3655_v24  ;;  %v397_v23 = vrot.slane %v390_v20, %v363_v1  ;;  %v1769_v20 = vld [vmem:[%s4017_s22 + $0x228] sm:$0xff] }
  0x50   : > { %1099 = vmatprep.mubr.bf16.mxu0 %v6079_v2  ;;  %1419 = vmatprep.mubr.bf16.mxu1 %v6079_v2 }
  0x51   : > { %v404_v24 = vrot.slane %v397_v23, %v363_v1  ;;  %v1961_v1 = vunpack.c.h.bf16 %v1766_v46 }
  0x53   : > { %v2217_v23 = vmul.f32 %v1961_v1, %v3999_v15 }
  0x57   : > { %1100 = vmatmul.mubr.bf16.gmra.mrb[16].mxu0 %v3656_v25  ;;  %1420 = vmatmul.mubr.bf16.gmra.mrb[16].mxu1 %v3657_v26  ;;  %v309_v25 = vld [vmem:[%s6077_s6] sm:$0x3] }
  0x58   : > { %1109 = vmatprep.mubr.bf16.mxu0 %v6079_v2  ;;  %1429 = vmatprep.mubr.bf16.mxu1 %v6079_v2  ;;  %v1700_v26 = vld [vmem:[%s4017_s22] sm:$0xff]  ;;  %v406_v30 = vsub.f32 %v309_v25, %v404_v24  ;;  %v1964_v24 = vunpack.c.l.bf16 %v1768_v8 }
  0x59   : > { %v1829_v35 = vunpack.c.h.bf16 %v1700_v26 }
  0x5a   : > { %v4034_v41 = vrot.slane %v406_v30, %v378_v12  ;;  %v4046_v50 = vrot.slane %v406_v30, %v382_v13  ;;  %v1965_v30 = vunpack.c.h.bf16 %v1768_v8 }
  0x5b   : > { %v2085_v49 = vmul.f32 %v1829_v35, %v3999_v15 }
  0x5f   : > { %1110 = vmatmul.mubr.bf16.gmra.mrb[20].mxu0 %v3658_v31  ;;  %1430 = vmatmul.mubr.bf16.gmra.mrb[20].mxu1 %v3659_v32  ;;  %v1828_v31 = vunpack.c.l.bf16 %v1700_v26  ;;  %v1701_v32 = vld [vmem:[%s4017_s22 + $0x8] sm:$0xff] }
  0x60   : > { %1119 = vmatprep.mubr.bf16.mxu0 %v6079_v2  ;;  %1439 = vmatprep.mubr.bf16.mxu1 %v6079_v2  ;;  %v1830_v38 = vunpack.c.l.bf16 %v1701_v32  ;;  %v1831_v42 = vunpack.c.h.bf16 %v1701_v32  ;;  %v1966_v32 = vunpack.c.l.bf16 %v1769_v20 }
  0x61   : > { %v2084_v40 = vmul.f32 %v1828_v31, %v3997_v14  ;;  %v1838_v31 = vunpack.c.l.bf16 %v1705_v19 }
  0x62   : > { %v2087_v59 = vmul.f32 %v1831_v42, %v3999_v15  ;;  %v2220_v42 = vmul.f32 %v1964_v24, %v3997_v14 }
  0x63   : > { %v4056_v58 = vadd.f32 %v4034_v41, %v2084_v40  ;;  %v4108_v40 = vadd.f32 %v4046_v50, %v2217_v23 }
  0x64   : > { %v4078_v13 = vadd.f32 %v4046_v50, %v2087_v59  ;;  %v1771_v59 = vld [vmem:[%s4017_s22 + $0x238] sm:$0xff]  ;;  %v4138_v1 = vadd.f32 %v4034_v41, %v2220_v42 }
  0x65   : > { %v1970_v8 = vunpack.c.l.bf16 %v1771_v59 }
  0x67   : > { %1120 = vmatmul.mubr.bf16.gmra.mrb[24].mxu0 %v3660_v44  ;;  %1440 = vmatmul.mubr.bf16.gmra.mrb[24].mxu1 %v3661_v45  ;;  %v1959_v44 = vunpack.c.h.bf16 %v1765_v33  ;;  %v1702_v45 = vld [vmem:[%s4017_s22 + $0x10] sm:$0xff]  ;;  %v3680_v33 = vld [vmem:[%s3903_s18 + $0x80] sm:$0xff]   ;;  %v2226_v42 = vmul.f32 %v1970_v8, %v3997_v14 }
  0x68   : > { %1129 = vmatprep.mubr.bf16.mxu0 %v6079_v2  ;;  %1449 = vmatprep.mubr.bf16.mxu1 %v6079_v2  ;;  %v1832_v60 = vunpack.c.l.bf16 %v1702_v45  ;;  %v1833_v0 = vunpack.c.h.bf16 %v1702_v45  ;;  %v1770_v45 = vld [vmem:[%s4017_s22 + $0x230] sm:$0xff] }
  0x69   : > { %v4195_v8 = vadd.f32 %v4034_v41, %v2226_v42 }
  0x6f   : > { %1130 = vmatmul.mubr.bf16.gmra.mrb[28].mxu0 %v3662_v51  ;;  %1450 = vmatmul.mubr.bf16.gmra.mrb[28].mxu1 %v3663_v52  ;;  %v2213_v51 = vmul.f32 %v1957_v37, %v3999_v15  ;;  %v2086_v52 = vmul.f32 %v1830_v38, %v3997_v14  ;;  %v2092_v37 = vmul.f32 %v1836_v18, %v3997_v14  ;;  %v1839_v38 = vunpack.c.h.bf16 %v1705_v19  ;;  %v1772_v18 = vld [vmem:[%s4017_s22 + $0x240] sm:$0xff]  ;;  %v3682_v19 = vld [vmem:[%s3903_s18 + $0x88] sm:$0xff]  }
  0x70   : > { %1139 = vmatprep.mubr.bf16.mxu0 %v6079_v2  ;;  %1459 = vmatprep.mubr.bf16.mxu1 %v6079_v2 }
  0x71   : > { %v4072_v11 = vadd.f32 %v4034_v41, %v2086_v52 }
  0x77   : > { %1140 = vmatmul.mubr.bf16.gmra.mrb[32].mxu0 %v3664_v53  ;;  %1460 = vmatmul.mubr.bf16.gmra.mrb[32].mxu1 %v3665_v54  ;;  %v2214_v53 = vmul.f32 %v1958_v39, %v3997_v14  ;;  %v1703_v54 = vld [vmem:[%s4017_s22 + $0x18] sm:$0xff] }
  0x78   : > { %1149 = vmatprep.mubr.bf16.mxu0 %v6079_v2  ;;  %1469 = vmatprep.mubr.bf16.mxu1 %v6079_v2  ;;  %v1835_v6 = vunpack.c.h.bf16 %v1703_v54 }
  0x79   : > { %v4075_v12 = vadd.f32 %v4034_v41, %v2214_v53 }
  0x7a   : > { %v2091_v27 = vmul.f32 %v1835_v6, %v3999_v15  ;;  %v1708_v6 = vld [vmem:[%s4017_s22 + $0x40] sm:$0xff] }
  0x7f   : > { %1150 = vmatmul.mubr.bf16.gmra.mrb[36].mxu0 %v3666_v62  ;;  %1470 = vmatmul.mubr.bf16.gmra.mrb[36].mxu1 %v3667_v63  ;;  %v4060_v62 = vadd.f32 %v4034_v41, %v2212_v43  ;;  %v2215_v63 = vmul.f32 %v1959_v44, %v3999_v15  ;;  %v1967_v43 = vunpack.c.h.bf16 %v1769_v20  ;;  %v1706_v44 = vld [vmem:[%s4017_s22 + $0x30] sm:$0xff] }
  0x80   : > { %1159 = vmatprep.mubr.bf16.mxu0 %v6079_v2  ;;  %1479 = vmatprep.mubr.bf16.mxu1 %v6079_v2 }
  0x87   : > { %1160 = vmatmul.mubr.bf16.gmra.mrb[40].mxu0 %v3668_v4  ;;  %1480 = vmatmul.mubr.bf16.gmra.mrb[40].mxu1 %v3669_v5  ;;  %v1834_v4 = vunpack.c.l.bf16 %v1703_v54  ;;  %v1962_v5 = vunpack.c.l.bf16 %v1767_v55  ;;  %v2221_v54 = vmul.f32 %v1965_v30, %v3999_v15  ;;  %v2094_v55 = vmul.f32 %v1838_v31, %v3997_v14  ;;  %v1709_v30 = vld [vmem:[%s4017_s22 + $0x48] sm:$0xff] }
  0x88   : > { %1169 = vmatprep.mubr.bf16.mxu0 %v6079_v2  ;;  %1489 = vmatprep.mubr.bf16.mxu1 %v6079_v2  ;;  %v1773_v31 = vld [vmem:[%s4017_s22 + $0x248] sm:$0xff] }
  0x89   : > { %v2090_v25 = vmul.f32 %v1834_v4, %v3997_v14  ;;  %v2218_v26 = vmul.f32 %v1962_v5, %v3997_v14  ;;  %v1841_v4 = vunpack.c.h.bf16 %v1706_v44  ;;  %v1969_v5 = vunpack.c.h.bf16 %v1770_v45 }
  0x8a   : > { %v4151_v23 = vadd.f32 %v4034_v41, %v2094_v55  ;;  %v1974_v55 = vunpack.c.l.bf16 %v1773_v31 }
  0x8b   : > { %v4114_v46 = vadd.f32 %v4034_v41, %v2090_v25  ;;  %v3683_v25 = vld [vmem:[%s3903_s18 + $0x188] sm:$0xff]  }
  0x8f   : > { %1170 = vmatmul.mubr.bf16.gmra.mrb[44].mxu0 %v3670_v9  ;;  %1490 = vmatmul.mubr.bf16.gmra.mrb[44].mxu1 %v3671_v10  ;;  %v4066_v9 = vadd.f32 %v4046_v50, %v2085_v49  ;;  %v4069_v10 = vadd.f32 %v4046_v50, %v2213_v51  ;;  %v4117_v49 = vadd.f32 %v4034_v41, %v2218_v26 }
  0x90   : > { %1179 = vmatprep.mubr.bf16.mxu0 %v6079_v2  ;;  %1499 = vmatprep.mubr.bf16.mxu1 %v6079_v2  ;;  %v4120_v51 = vadd.f32 %v4046_v50, %v2091_v27 }
  0x97   : > { %1180 = vmatmul.mubr.bf16.gmra.mrb[48].mxu0 %v3672_v16  ;;  %1500 = vmatmul.mubr.bf16.gmra.mrb[48].mxu1 %v3673_v17  ;;  %v2088_v16 = vmul.f32 %v1832_v60, %v3997_v14  ;;  %v2216_v17 = vmul.f32 %v1960_v61, %v3997_v14  ;;  %v4132_v60 = vadd.f32 %v4034_v41, %v2092_v37  ;;  %v1972_v37 = vunpack.c.l.bf16 %v1772_v18 }
  0x98   : > { %1189 = vmatprep.mubr.bf16.mxu0 %v6079_v2  ;;  %1509 = vmatprep.mubr.bf16.mxu1 %v6079_v2  ;;  %v2095_v61 = vmul.f32 %v1839_v38, %v3999_v15 }
  0x99   : > { %v4098_v35 = vadd.f32 %v4034_v41, %v2088_v16  ;;  %v4101_v36 = vadd.f32 %v4034_v41, %v2216_v17  ;;  %v1971_v17 = vunpack.c.h.bf16 %v1771_v59 }
  0x9a   : > { %v4158_v26 = vadd.f32 %v4046_v50, %v2095_v61  ;;  %v1847_v61 = vunpack.c.h.bf16 %v1709_v30 }
  0x9f   : > { %1190 = vmatmul.mubr.bf16.gmra.mrb[52].mxu0 %v3674_v21  ;;  %1510 = vmatmul.mubr.bf16.gmra.mrb[52].mxu1 %v3675_v22  ;;  %v4087_v21 = vadd.f32 %v4046_v50, %v2215_v63  ;;  %v2089_v22 = vmul.f32 %v1833_v0, %v3999_v15  ;;  %v1840_v63 = vunpack.c.l.bf16 %v1706_v44  ;;  %v1968_v0 = vunpack.c.l.bf16 %v1770_v45 }
  0xa0   : > { %1199 = vmatprep.mubr.bf16.mxu0 %v6079_v2  ;;  %1519 = vmatprep.mubr.bf16.mxu1 %v6079_v2  ;;  %v2227_v44 = vmul.f32 %v1971_v17, %v3999_v15  ;;  %v1845_v45 = vunpack.c.h.bf16 %v1708_v6 }
  0xa1   : > { %v4105_v39 = vadd.f32 %v4046_v50, %v2089_v22  ;;  %v4148_v22 = vadd.f32 %v4046_v50, %v2221_v54  ;;  %v2096_v27 = vmul.f32 %v1840_v63, %v3997_v14  ;;  %v1846_v54 = vunpack.c.l.bf16 %v1709_v30  ;;  %v3684_v30 = vld [vmem:[%s3903_s18 + $0x90] sm:$0xff]  }
  0xa2   : > { %v4201_v17 = vadd.f32 %v4046_v50, %v2227_v44 }
  0xa4   : > { %6084 = vst [vmem:[#allocation6_spill] sm:$0xff] %v4201_v17 }
  0xa7   : > { %1200 = vmatmul.mubr.bf16.gmra.mrb[56].mxu0 %v3676_v28  ;;  %1520 = vmatmul.mubr.bf16.gmra.mrb[56].mxu1 %v3677_v29  ;;  %v2219_v28 = vmul.f32 %v1963_v7, %v3999_v15  ;;  %v1837_v29 = vunpack.c.h.bf16 %v1704_v3  ;;  %v2223_v3 = vmul.f32 %v1967_v43, %v3999_v15 }
  0xa8   : > { %1209 = vmatprep.mubr.bf16.mxu0 %v6079_v2  ;;  %1529 = vmatprep.mubr.bf16.mxu1 %v6079_v2 }
  0xa9   : > { %v4123_v52 = vadd.f32 %v4046_v50, %v2219_v28  ;;  %v2093_v53 = vmul.f32 %v1837_v29, %v3999_v15  ;;  %v2224_v28 = vmul.f32 %v1968_v0, %v3997_v14  ;;  %v1844_v29 = vunpack.c.l.bf16 %v1708_v6  ;;  %v1774_v6 = vld [vmem:[%s4017_s22 + $0x250] sm:$0xff] }
  0xab   : > { %v4145_v20 = vadd.f32 %v4046_v50, %v2093_v53  ;;  %v1973_v53 = vunpack.c.h.bf16 %v1772_v18  ;;  %v2100_v59 = vmul.f32 %v1844_v29, %v3997_v14  ;;  %v2101_v18 = vmul.f32 %v1845_v45, %v3999_v15  ;;  %v1775_v29 = vld [vmem:[%s4017_s22 + $0x258] sm:$0xff] }
  0xac   : > { %v1977_v45 = vunpack.c.h.bf16 %v1774_v6  ;;  %v1979_v17 = vunpack.c.h.bf16 %v1775_v29 }
  0xaf   : > { %1210 = vmatmul.mubr.bf16.gmra.mrb[60].mxu0 %v3678_v56  ;;  %1530 = vmatmul.mubr.bf16.gmra.mrb[60].mxu1 %v3679_v57  ;;  %v2222_v56 = vmul.f32 %v1966_v32, %v3997_v14  ;;  %v1707_v57 = vld [vmem:[%s4017_s22 + $0x38] sm:$0xff]  ;;  %v4165_v32 = vadd.f32 %v4046_v50, %v2223_v3  ;;  %v2228_v3 = vmul.f32 %v1972_v37, %v3997_v14 }
  0xb0   : > { %1219 = vmatprep.mubr.bf16.mxu0 %v6079_v2  ;;  %1539 = vmatprep.mubr.bf16.mxu1 %v6079_v2  ;;  %v1842_v7 = vunpack.c.l.bf16 %v1707_v57  ;;  %v1843_v16 = vunpack.c.h.bf16 %v1707_v57  ;;  %v4177_v57 = vadd.f32 %v4034_v41, %v2224_v28  ;;  %v1711_v28 = vld [vmem:[%s4017_s22 + $0x58] sm:$0xff] }
  0xb1   : > { %v4154_v24 = vadd.f32 %v4034_v41, %v2222_v56  ;;  %v4174_v56 = vadd.f32 %v4034_v41, %v2096_v27  ;;  %v2230_v27 = vmul.f32 %v1974_v55, %v3997_v14  ;;  %v4216_v42 = vadd.f32 %v4034_v41, %v2228_v3 }
  0xb2   : > { %v2098_v38 = vmul.f32 %v1842_v7, %v3997_v14  ;;  %v2099_v43 = vmul.f32 %v1843_v16, %v3999_v15  ;;  %v1978_v55 = vunpack.c.l.bf16 %v1775_v29  ;;  %v1713_v29 = vld [vmem:[%s4017_s22 + $0x68] sm:$0xff] }
  0xb3   : > { %6086 = vst [vmem:[#allocation8_spill] sm:$0xff] %v4216_v42  ;;  %v3687_v42 = vld [vmem:[%s3903_s18 + $0x198] sm:$0xff]  }
  0xb4   : > { %v4192_v7 = vadd.f32 %v4034_v41, %v2098_v38  ;;  %v4198_v16 = vadd.f32 %v4046_v50, %v2099_v43  ;;  %v1976_v38 = vunpack.c.l.bf16 %v1774_v6 }
  0xb6   : > { %6083 = vst [vmem:[#allocation5_spill] sm:$0xff] %v4198_v16  ;;  %v1714_v16 = vld [vmem:[%s4017_s22 + $0x70] sm:$0xff] }
  0xb7   : > { %1220 = vmatmul.mubr.bf16.gmra.mrb[64].mxu0 %v3680_v33  ;;  %1540 = vmatmul.mubr.bf16.gmra.mrb[64].mxu1 %v3681_v34  ;;  %v2097_v33 = vmul.f32 %v1841_v4, %v3999_v15  ;;  %v2225_v34 = vmul.f32 %v1969_v5, %v3999_v15  ;;  %v1975_v4 = vunpack.c.h.bf16 %v1773_v31  ;;  %v1710_v5 = vld [vmem:[%s4017_s22 + $0x50] sm:$0xff] }
  0xb8   : > { %1229 = vmatprep.mubr.bf16.mxu0 %v6079_v2  ;;  %1549 = vmatprep.mubr.bf16.mxu1 %v6079_v2  ;;  %v3685_v31 = vld [vmem:[%s3903_s18 + $0x190] sm:$0xff]   ;;  %v1848_v37 = vunpack.c.l.bf16 %v1710_v5  ;;  %v1849_v44 = vunpack.c.h.bf16 %v1710_v5 }
  0xb9   : > { %v4183_v63 = vadd.f32 %v4046_v50, %v2097_v33  ;;  %v4186_v0 = vadd.f32 %v4046_v50, %v2225_v34  ;;  %v4212_v33 = vadd.f32 %v4034_v41, %v2100_v59  ;;  %v2103_v34 = vmul.f32 %v1847_v61, %v3999_v15  ;;  %v1776_v59 = vld [vmem:[%s4017_s22 + $0x260] sm:$0xff] }
  0xba   : > { %v2231_v43 = vmul.f32 %v1975_v4, %v3999_v15  ;;  %v4231_v4 = vadd.f32 %v4034_v41, %v2230_v27  ;;  %v2104_v6 = vmul.f32 %v1848_v37, %v3997_v14  ;;  %v2105_v27 = vmul.f32 %v1849_v44, %v3999_v15 }
  0xbb   : > { %6085 = vst [vmem:[#allocation7_spill] sm:$0xff] %v4212_v33  ;;  %v4222_v33 = vadd.f32 %v4046_v50, %v2101_v18  ;;  %v4234_v5 = vadd.f32 %v4046_v50, %v2103_v34  ;;  %v2234_v37 = vmul.f32 %v1978_v55, %v3997_v14 }
  0xbc   : > { %6090 = vst [vmem:[#allocation12_spill] sm:$0xff] %v4231_v4  ;;  %v4254_v44 = vadd.f32 %v4034_v41, %v2104_v6  ;;  %v1778_v6 = vld [vmem:[%s4017_s22 + $0x270] sm:$0xff] }
  0xbd   : > { %6087 = vst [vmem:[#allocation9_spill] sm:$0xff] %v4222_v33  ;;  %6091 = vst [vmem:[#allocation13_spill] sm:$0xff] %v4234_v5  ;;  %v2235_v5 = vmul.f32 %v1979_v17, %v3999_v15  ;;  %v1854_v33 = vunpack.c.l.bf16 %v1713_v29  ;;  %v4261_v17 = vadd.f32 %v4046_v50, %v2105_v27 }
  0xbe   : > { %6094 = vst [vmem:[#allocation15_spill] sm:$0xff] %v4254_v44 }
  0xbf   : > { %1230 = vmatmul.mubr.bf16.gmra.mrb[68].mxu0 %v3682_v19  ;;  %1550 = vmatmul.mubr.bf16.gmra.mrb[68].mxu1 %v3683_v25  ;;  %v2229_v19 = vmul.f32 %v1973_v53, %v3999_v15  ;;  %v2102_v25 = vmul.f32 %v1846_v54, %v3997_v14  ;;  %v1712_v53 = vld [vmem:[%s4017_s22 + $0x60] sm:$0xff]  ;;  %v1850_v54 = vunpack.c.l.bf16 %v1711_v28  ;;  %6096 = vst [vmem:[#allocation17_spill] sm:$0xff] %v4261_v17 }
  0xc0   : > { %1239 = vmatprep.mubr.bf16.mxu0 %v6079_v2  ;;  %1559 = vmatprep.mubr.bf16.mxu1 %v6079_v2  ;;  %v1851_v2 = vunpack.c.h.bf16 %v1711_v28  ;;  %v2232_v28 = vmul.f32 %v1976_v38, %v3997_v14  ;;  %v1852_v18 = vunpack.c.l.bf16 %v1712_v53  ;;  %v1853_v4 = vunpack.c.h.bf16 %v1712_v53 }
  0xc1   : > { %v4225_v61 = vadd.f32 %v4046_v50, %v2229_v19  ;;  %v4228_v3 = vadd.f32 %v4034_v41, %v2102_v25  ;;  %v1777_v19 = vld [vmem:[%s4017_s22 + $0x268] sm:$0xff]  ;;  %v4243_v25 = vadd.f32 %v4046_v50, %v2231_v43  ;;  %v2106_v34 = vmul.f32 %v1850_v54, %v3997_v14 }
  0xc2   : > { %v2107_v38 = vmul.f32 %v1851_v2, %v3999_v15  ;;  %v1982_v43 = vunpack.c.l.bf16 %v1777_v19  ;;  %v2108_v54 = vmul.f32 %v1852_v18, %v3997_v14  ;;  %v1855_v2 = vunpack.c.h.bf16 %v1713_v29 }
  0xc3   : > { %6088 = vst [vmem:[#allocation10_spill] sm:$0xff] %v4225_v61  ;;  %6089 = vst [vmem:[#allocation11_spill] sm:$0xff] %v4228_v3  ;;  %v6092_v61 = vmov 0   ;;  %v1981_v3 = vunpack.c.h.bf16 %v1776_v59  ;;  %v4270_v44 = vadd.f32 %v4034_v41, %v2106_v34  ;;  %v4279_v29 = vadd.f32 %v4046_v50, %v2235_v5  ;;  %v1715_v34 = vld [vmem:[%s4017_s22 + $0x78] sm:$0xff] }
  0xc4   : > { %6093 = vst [vmem:[#allocation14_spill] sm:$0xff] %v4243_v25  ;;  %v3686_v25 = vld [vmem:[%s3903_s18 + $0x98] sm:$0xff]   ;;  %v4276_v18 = vadd.f32 %v4046_v50, %v2107_v38  ;;  %v2109_v27 = vmul.f32 %v1853_v4, %v3999_v15  ;;  %v2111_v5 = vmul.f32 %v1855_v2, %v3999_v15  ;;  %v1856_v38 = vunpack.c.l.bf16 %v1714_v16 }
  0xc5   : > { %6098 = vst [vmem:[#allocation19_spill] sm:$0xff] %v4270_v44  ;;  %6101 = vst [vmem:[#allocation22_spill] sm:$0xff] %v4279_v29  ;;  %v1779_v44 = vld [vmem:[%s4017_s22 + $0x278] sm:$0xff]  ;;  %v1984_v4 = vunpack.c.l.bf16 %v1778_v6  ;;  %v1859_v2 = vunpack.c.h.bf16 %v1715_v34 }
  0xc6   : > { %6100 = vst [vmem:[#allocation21_spill] sm:$0xff] %v4276_v18  ;;  %v1987_v29 = vunpack.c.h.bf16 %v1779_v44  ;;  %v1780_v18 = vld [vmem:[%s4017_s22 + $0x280] sm:$0xff] }
  0xc7   : > { %1240 = vmatmul.mubr.bf16.gmra.mrb[72].mxu0 %v3684_v30  ;;  %1560 = vmatmul.mubr.bf16.gmra.mrb[72].mxu1 %v3685_v31  ;;  %v2233_v30 = vmul.f32 %v1977_v45, %v3999_v15  ;;  %v1980_v31 = vunpack.c.l.bf16 %v1776_v59  ;;  %v4257_v45 = vadd.f32 %v4034_v41, %v2232_v28  ;;  %v1983_v59 = vunpack.c.h.bf16 %v1777_v19 }
  0xc8   : > { %1249 = vmatprep.mubr.bf16.mxu0 %v6092_v61  ;;  %1569 = vmatprep.mubr.bf16.mxu1 %v6092_v61  ;;  %v4273_v28 = vadd.f32 %v4034_v41, %v2234_v37  ;;  %v2110_v19 = vmul.f32 %v1854_v33, %v3997_v14  ;;  %v4288_v37 = vadd.f32 %v4034_v41, %v2108_v54  ;;  %v1858_v54 = vunpack.c.l.bf16 %v1715_v34 }
  0xc9   : > { %6095 = vst [vmem:[#allocation16_spill] sm:$0xff] %v4257_v45  ;;  %v4264_v53 = vadd.f32 %v4046_v50, %v2233_v30  ;;  %v2236_v55 = vmul.f32 %v1980_v31, %v3997_v14  ;;  %v2237_v30 = vmul.f32 %v1981_v3, %v3999_v15  ;;  %v2238_v31 = vmul.f32 %v1982_v43, %v3997_v14  ;;  %v1716_v43 = vld [vmem:[%s4017_s22 + $0x80] sm:$0xff] }
  0xca   : > { %6099 = vst [vmem:[#allocation20_spill] sm:$0xff] %v4273_v28  ;;  %6102 = vst [vmem:[#allocation23_spill] sm:$0xff] %v4288_v37  ;;  %v2239_v3 = vmul.f32 %v1983_v59, %v3999_v15  ;;  %v1986_v37 = vunpack.c.l.bf16 %v1779_v44  ;;  %v3688_v28 = vld [vmem:[%s3903_s18 + $0xa0] sm:$0xff]   ;;  %v2112_v44 = vmul.f32 %v1856_v38, %v3997_v14  ;;  %v2240_v34 = vmul.f32 %v1984_v4, %v3997_v14 }
  0xcb   : > { %6097 = vst [vmem:[#allocation18_spill] sm:$0xff] %v4264_v53  ;;  %v4294_v33 = vadd.f32 %v4034_v41, %v2236_v55  ;;  %v4301_v53 = vadd.f32 %v4046_v50, %v2109_v27  ;;  %v4304_v17 = vadd.f32 %v4046_v50, %v2237_v30  ;;  %v4307_v55 = vadd.f32 %v4034_v41, %v2110_v19  ;;  %v3689_v59 = vld [vmem:[%s3903_s18 + $0x1a0] sm:$0xff]   ;;  %v1717_v27 = vld [vmem:[%s4017_s22 + $0x88] sm:$0xff] }
  0xcc   : > { %v4321_v30 = vadd.f32 %v4046_v50, %v2239_v3  ;;  %v2243_v38 = vmul.f32 %v1987_v29, %v3999_v15  ;;  %v1861_v4 = vunpack.c.h.bf16 %v1716_v43  ;;  %v1862_v45 = vunpack.c.l.bf16 %v1717_v27 }
  0xcd   : > { %6103 = vst [vmem:[#allocation24_spill] sm:$0xff] %v4294_v33  ;;  %6104 = vst [vmem:[#allocation25_spill] sm:$0xff] %v4301_v53  ;;  %v1860_v33 = vunpack.c.l.bf16 %v1716_v43  ;;  %v1781_v53 = vld [vmem:[%s4017_s22 + $0x288] sm:$0xff] }
  0xce   : > { %6105 = vst [vmem:[#allocation26_spill] sm:$0xff] %v4304_v17  ;;  %6106 = vst [vmem:[#allocation27_spill] sm:$0xff] %v4307_v55  ;;  %v1989_v17 = vunpack.c.h.bf16 %v1780_v18  ;;  %v1990_v3 = vunpack.c.l.bf16 %v1781_v53  ;;  %v1991_v43 = vunpack.c.h.bf16 %v1781_v53  ;;  %v2118_v53 = vmul.f32 %v1862_v45, %v3997_v14 }
  0xcf   : > { %1250 = vmatmul.mubr.bf16.gmra.mrb[76].mxu0 %v3686_v25  ;;  %1570 = vmatmul.mubr.bf16.gmra.mrb[76].mxu1 %v3687_v42  ;;  %v1857_v42 = vunpack.c.h.bf16 %v1714_v16  ;;  %v1985_v25 = vunpack.c.h.bf16 %v1778_v6  ;;  %v4310_v16 = vadd.f32 %v4034_v41, %v2238_v31  ;;  %v4314_v6 = vadd.f32 %v4046_v50, %v2111_v5  ;;  %6109 = vst [vmem:[#allocation30_spill] sm:$0xff] %v4321_v30 }
  0xd0   : > { %1259 = vmatprep.mubr.bf16.mxu0 %v6092_v61  ;;  %1579 = vmatprep.mubr.bf16.mxu1 %v6092_v61  ;;  %v1988_v31 = vunpack.c.l.bf16 %v1780_v18  ;;  %v2242_v5 = vmul.f32 %v1986_v37, %v3997_v14  ;;  %v2116_v37 = vmul.f32 %v1860_v33, %v3997_v14  ;;  %v1782_v33 = vld [vmem:[%s4017_s22 + $0x290] sm:$0xff] }
  0xd1   : > { %6107 = vst [vmem:[#allocation28_spill] sm:$0xff] %v4310_v16  ;;  %6108 = vst [vmem:[#allocation29_spill] sm:$0xff] %v4314_v6  ;;  %v2113_v19 = vmul.f32 %v1857_v42, %v3999_v15  ;;  %v2241_v55 = vmul.f32 %v1985_v25, %v3999_v15  ;;  %v2114_v16 = vmul.f32 %v1858_v54, %v3997_v14  ;;  %v1863_v54 = vunpack.c.h.bf16 %v1717_v27 }
  0xd2   : > { %v2115_v6 = vmul.f32 %v1859_v2, %v3999_v15  ;;  %v4330_v42 = vadd.f32 %v4034_v41, %v2112_v44  ;;  %v4333_v25 = vadd.f32 %v4034_v41, %v2240_v34  ;;  %v2244_v29 = vmul.f32 %v1988_v31, %v3997_v14  ;;  %v1718_v2 = vld [vmem:[%s4017_s22 + $0x90] sm:$0xff] }
  0xd3   : > { %v4339_v18 = vadd.f32 %v4046_v50, %v2113_v19  ;;  %v4351_v44 = vadd.f32 %v4034_v41, %v2242_v5  ;;  %v4357_v27 = vadd.f32 %v4046_v50, %v2243_v38  ;;  %v2245_v19 = vmul.f32 %v1989_v17, %v3999_v15  ;;  %v3690_v5 = vld [vmem:[%s3903_s18 + $0xa8] sm:$0xff]  }
  0xd4   : > { %6110 = vst [vmem:[#allocation31_spill] sm:$0xff] %v4330_v42  ;;  %6111 = vst [vmem:[#allocation32_spill] sm:$0xff] %v4333_v25  ;;  %v4354_v34 = vadd.f32 %v4046_v50, %v2115_v6  ;;  %v2246_v31 = vmul.f32 %v1990_v3, %v3997_v14  ;;  %v4368_v6 = vadd.f32 %v4034_v41, %v2116_v37  ;;  %v1865_v45 = vunpack.c.h.bf16 %v1718_v2  ;;  %v1720_v3 = vld [vmem:[%s4017_s22 + $0xa0] sm:$0xff] }
  0xd5   : > { %6112 = vst [vmem:[#allocation33_spill] sm:$0xff] %v4339_v18  ;;  %6115 = vst [vmem:[#allocation36_spill] sm:$0xff] %v4351_v44  ;;  %v3691_v44 = vld [vmem:[%s3903_s18 + $0x1a8] sm:$0xff]   ;;  %v2119_v38 = vmul.f32 %v1863_v54, %v3999_v15  ;;  %v2247_v17 = vmul.f32 %v1991_v43, %v3999_v15  ;;  %v1784_v37 = vld [vmem:[%s4017_s22 + $0x2a0] sm:$0xff]  ;;  %v4381_v54 = vadd.f32 %v4046_v50, %v2245_v19 }
  0xd6   : > { %6116 = vst [vmem:[#allocation37_spill] sm:$0xff] %v4354_v34  ;;  %6117 = vst [vmem:[#allocation38_spill] sm:$0xff] %v4357_v27  ;;  %v1864_v27 = vunpack.c.l.bf16 %v1718_v2  ;;  %v1992_v34 = vunpack.c.l.bf16 %v1782_v33  ;;  %v4387_v43 = vadd.f32 %v4034_v41, %v2246_v31  ;;  %v1785_v19 = vld [vmem:[%s4017_s22 + $0x2a8] sm:$0xff] }
  0xd7   : > { %1260 = vmatmul.mubr.bf16.gmra.mrb[80].mxu0 %v3688_v28  ;;  %1580 = vmatmul.mubr.bf16.gmra.mrb[80].mxu1 %v3689_v59  ;;  %v4342_v28 = vadd.f32 %v4046_v50, %v2241_v55  ;;  %v4348_v59 = vadd.f32 %v4034_v41, %v2114_v16  ;;  %v2117_v55 = vmul.f32 %v1861_v4, %v3999_v15  ;;  %v1719_v16 = vld [vmem:[%s4017_s22 + $0x98] sm:$0xff] }
  0xd8   : > { %1269 = vmatprep.mubr.bf16.mxu0 %v6092_v61  ;;  %1589 = vmatprep.mubr.bf16.mxu1 %v6092_v61  ;;  %6118 = vst [vmem:[#allocation39_spill] sm:$0xff] %v4368_v6  ;;  %v4372_v4 = vadd.f32 %v4034_v41, %v2244_v29  ;;  %v1866_v18 = vunpack.c.l.bf16 %v1719_v16  ;;  %v1867_v42 = vunpack.c.h.bf16 %v1719_v16  ;;  %6121 = vst [vmem:[#allocation42_spill] sm:$0xff] %v4381_v54  ;;  %v1721_v16 = vld [vmem:[%s4017_s22 + $0xa8] sm:$0xff] }
  0xd9   : > { %6113 = vst [vmem:[#allocation34_spill] sm:$0xff] %v4342_v28  ;;  %6114 = vst [vmem:[#allocation35_spill] sm:$0xff] %v4348_v59  ;;  %v1783_v59 = vld [vmem:[%s4017_s22 + $0x298] sm:$0xff]  ;;  %v1993_v28 = vunpack.c.h.bf16 %v1782_v33  ;;  %v4378_v6 = vadd.f32 %v4046_v50, %v2117_v55  ;;  %v4384_v29 = vadd.f32 %v4034_v41, %v2118_v53  ;;  %v4390_v2 = vadd.f32 %v4046_v50, %v2119_v38 }
  0xda   : > { %6119 = vst [vmem:[#allocation40_spill] sm:$0xff] %v4372_v4  ;;  %v1994_v25 = vunpack.c.l.bf16 %v1783_v59  ;;  %v1995_v30 = vunpack.c.h.bf16 %v1783_v59  ;;  %6123 = vst [vmem:[#allocation44_spill] sm:$0xff] %v4387_v43  ;;  %v2120_v33 = vmul.f32 %v1864_v27, %v3997_v14  ;;  %v2248_v59 = vmul.f32 %v1992_v34, %v3997_v14  ;;  %v1722_v4 = vld [vmem:[%s4017_s22 + $0xb0] sm:$0xff] }
  0xdb   : > { %6120 = vst [vmem:[#allocation41_spill] sm:$0xff] %v4378_v6  ;;  %6122 = vst [vmem:[#allocation43_spill] sm:$0xff] %v4384_v29  ;;  %v1868_v55 = vunpack.c.l.bf16 %v1720_v3  ;;  %v4399_v53 = vadd.f32 %v4046_v50, %v2247_v17  ;;  %v2249_v31 = vmul.f32 %v1993_v28, %v3999_v15  ;;  %v2122_v27 = vmul.f32 %v1866_v18, %v3997_v14  ;;  %v3693_v6 = vld [vmem:[%s3903_s18 + $0x1b0] sm:$0xff]  }
  0xdc   : > { %6124 = vst [vmem:[#allocation45_spill] sm:$0xff] %v4390_v2  ;;  %v2250_v34 = vmul.f32 %v1994_v25, %v3997_v14  ;;  %v2123_v38 = vmul.f32 %v1867_v42, %v3999_v15  ;;  %v2251_v2 = vmul.f32 %v1995_v30, %v3999_v15  ;;  %v1869_v43 = vunpack.c.h.bf16 %v1720_v3 }
  0xdd   : > { %6125 = vst [vmem:[#allocation46_spill] sm:$0xff] %v4399_v53  ;;  %v1997_v29 = vunpack.c.h.bf16 %v1784_v37  ;;  %v1870_v54 = vunpack.c.l.bf16 %v1721_v16  ;;  %v1998_v17 = vunpack.c.l.bf16 %v1785_v19  ;;  %v3692_v53 = vld [vmem:[%s3903_s18 + $0xb0] sm:$0xff]   ;;  %v4413_v28 = vadd.f32 %v4034_v41, %v2248_v59 }
  0xde   : > { %v2124_v25 = vmul.f32 %v1868_v55, %v3997_v14  ;;  %v1871_v42 = vunpack.c.h.bf16 %v1721_v16  ;;  %v4420_v18 = vadd.f32 %v4046_v50, %v2249_v31  ;;  %v4429_v59 = vadd.f32 %v4034_v41, %v2250_v34 }
  0xdf   : > { %1270 = vmatmul.mubr.bf16.gmra.mrb[84].mxu0 %v3690_v5  ;;  %1590 = vmatmul.mubr.bf16.gmra.mrb[84].mxu1 %v3691_v44  ;;  %v2121_v44 = vmul.f32 %v1865_v45, %v3999_v15  ;;  %v1996_v5 = vunpack.c.l.bf16 %v1784_v37  ;;  %v4410_v45 = vadd.f32 %v4034_v41, %v2120_v33  ;;  %6127 = vst [vmem:[#allocation48_spill] sm:$0xff] %v4413_v28  ;;  %v1999_v37 = vunpack.c.h.bf16 %v1785_v19  ;;  %v1786_v33 = vld [vmem:[%s4017_s22 + $0x2b0] sm:$0xff] }
  0xe0   : > { %1279 = vmatprep.mubr.bf16.mxu0 %v6092_v61  ;;  %1599 = vmatprep.mubr.bf16.mxu1 %v6092_v61  ;;  %6129 = vst [vmem:[#allocation50_spill] sm:$0xff] %v4420_v18  ;;  %6131 = vst [vmem:[#allocation52_spill] sm:$0xff] %v4429_v59  ;;  %v4432_v55 = vadd.f32 %v4046_v50, %v2123_v38  ;;  %v4435_v16 = vadd.f32 %v4046_v50, %v2251_v2  ;;  %v1872_v38 = vunpack.c.l.bf16 %v1722_v4  ;;  %v3694_v59 = vld [vmem:[%s3903_s18 + $0xb8] sm:$0xff]  }
  0xe1   : > { %6126 = vst [vmem:[#allocation47_spill] sm:$0xff] %v4410_v45  ;;  %v4417_v30 = vadd.f32 %v4046_v50, %v2121_v44  ;;  %v2252_v3 = vmul.f32 %v1996_v5, %v3997_v14  ;;  %v4426_v45 = vadd.f32 %v4034_v41, %v2122_v27  ;;  %v2125_v44 = vmul.f32 %v1869_v43, %v3999_v15  ;;  %v1723_v27 = vld [vmem:[%s4017_s22 + $0xb8] sm:$0xff] }
  0xe2   : > { %6132 = vst [vmem:[#allocation53_spill] sm:$0xff] %v4432_v55  ;;  %6133 = vst [vmem:[#allocation54_spill] sm:$0xff] %v4435_v16  ;;  %v2253_v31 = vmul.f32 %v1997_v29, %v3999_v15  ;;  %v2126_v19 = vmul.f32 %v1870_v54, %v3997_v14  ;;  %v2254_v5 = vmul.f32 %v1998_v17, %v3997_v14  ;;  %v2000_v43 = vunpack.c.l.bf16 %v1786_v33  ;;  %v1724_v17 = vld [vmem:[%s4017_s22 + $0xc0] sm:$0xff] }
  0xe3   : > { %6128 = vst [vmem:[#allocation49_spill] sm:$0xff] %v4417_v30  ;;  %6130 = vst [vmem:[#allocation51_spill] sm:$0xff] %v4426_v45  ;;  %v1787_v45 = vld [vmem:[%s4017_s22 + $0x2b8] sm:$0xff]  ;;  %v4444_v34 = vadd.f32 %v4034_v41, %v2124_v25  ;;  %v2127_v2 = vmul.f32 %v1871_v42, %v3999_v15  ;;  %v4450_v54 = vadd.f32 %v4034_v41, %v2252_v3  ;;  %v1874_v25 = vunpack.c.l.bf16 %v1723_v27  ;;  %v1788_v55 = vld [vmem:[%s4017_s22 + $0x2c0] sm:$0xff] }
  0xe4   : > { %v2255_v29 = vmul.f32 %v1999_v37, %v3999_v15  ;;  %v1875_v42 = vunpack.c.h.bf16 %v1723_v27  ;;  %v2003_v16 = vunpack.c.h.bf16 %v1787_v45  ;;  %v4457_v18 = vadd.f32 %v4046_v50, %v2125_v44  ;;  %v3695_v37 = vld [vmem:[%s3903_s18 + $0x1b8] sm:$0xff]   ;;  %v1725_v44 = vld [vmem:[%s4017_s22 + $0xc8] sm:$0xff] }
  0xe5   : > { %6134 = vst [vmem:[#allocation55_spill] sm:$0xff] %v4444_v34  ;;  %6135 = vst [vmem:[#allocation56_spill] sm:$0xff] %v4450_v54  ;;  %v2002_v34 = vunpack.c.l.bf16 %v1787_v45  ;;  %v4460_v30 = vadd.f32 %v4046_v50, %v2253_v31  ;;  %v4463_v3 = vadd.f32 %v4034_v41, %v2126_v19  ;;  %v2128_v45 = vmul.f32 %v1872_v38, %v3997_v14 }
  0xe6   : > { %6136 = vst [vmem:[#allocation57_spill] sm:$0xff] %v4457_v18  ;;  %v2256_v27 = vmul.f32 %v2000_v43, %v3997_v14  ;;  %v1876_v54 = vunpack.c.l.bf16 %v1724_v17  ;;  %v1789_v18 = vld [vmem:[%s4017_s22 + $0x2c8] sm:$0xff]  ;;  %v4477_v31 = vadd.f32 %v4046_v50, %v2255_v29  ;;  %v2259_v38 = vmul.f32 %v2003_v16, %v3999_v15 }
  0xe7   : > { %1280 = vmatmul.mubr.bf16.gmra.mrb[88].mxu0 %v3692_v53  ;;  %1600 = vmatmul.mubr.bf16.gmra.mrb[88].mxu1 %v3693_v6  ;;  %v1873_v6 = vunpack.c.h.bf16 %v1722_v4  ;;  %v2001_v53 = vunpack.c.h.bf16 %v1786_v33  ;;  %6137 = vst [vmem:[#allocation58_spill] sm:$0xff] %v4460_v30  ;;  %6138 = vst [vmem:[#allocation59_spill] sm:$0xff] %v4463_v3  ;;  %v4466_v4 = vadd.f32 %v4034_v41, %v2254_v5  ;;  %v2004_v5 = vunpack.c.l.bf16 %v1788_v55 }
  0xe8   : > { %1289 = vmatprep.mubr.bf16.mxu0 %v6092_v61  ;;  %1609 = vmatprep.mubr.bf16.mxu1 %v6092_v61  ;;  %v4470_v33 = vadd.f32 %v4046_v50, %v2127_v2  ;;  %6141 = vst [vmem:[#allocation62_spill] sm:$0xff] %v4477_v31  ;;  %v2258_v2 = vmul.f32 %v2002_v34, %v3997_v14  ;;  %v1877_v43 = vunpack.c.h.bf16 %v1724_v17  ;;  %v2005_v30 = vunpack.c.h.bf16 %v1788_v55  ;;  %v3700_v31 = vld [vmem:[%s3903_s18 + $0xd0] sm:$0xff]  }
  0xe9   : > { %6139 = vst [vmem:[#allocation60_spill] sm:$0xff] %v4466_v4  ;;  %v2129_v19 = vmul.f32 %v1873_v6, %v3999_v15  ;;  %v2257_v3 = vmul.f32 %v2001_v53, %v3999_v15  ;;  %v2130_v4 = vmul.f32 %v1874_v25, %v3997_v14  ;;  %v1878_v28 = vunpack.c.l.bf16 %v1725_v44 }
  0xea   : > { %6140 = vst [vmem:[#allocation61_spill] sm:$0xff] %v4470_v33  ;;  %v2131_v33 = vmul.f32 %v1875_v42, %v3999_v15  ;;  %v2006_v29 = vunpack.c.l.bf16 %v1789_v18  ;;  %v4486_v6 = vadd.f32 %v4034_v41, %v2128_v45  ;;  %v4489_v53 = vadd.f32 %v4034_v41, %v2256_v27  ;;  %v1726_v42 = vld [vmem:[%s4017_s22 + $0xd0] sm:$0xff] }
  0xeb   : > { %v2132_v34 = vmul.f32 %v1876_v54, %v3997_v14  ;;  %v1879_v25 = vunpack.c.h.bf16 %v1725_v44  ;;  %v4495_v55 = vadd.f32 %v4046_v50, %v2129_v19  ;;  %v2260_v16 = vmul.f32 %v2004_v5, %v3997_v14  ;;  %v1790_v54 = vld [vmem:[%s4017_s22 + $0x2d0] sm:$0xff] }
  0xec   : > { %6142 = vst [vmem:[#allocation63_spill] sm:$0xff] %v4486_v6  ;;  %6143 = vst [vmem:[#allocation64_spill] sm:$0xff] %v4489_v53  ;;  %v2007_v17 = vunpack.c.h.bf16 %v1789_v18  ;;  %v4507_v45 = vadd.f32 %v4034_v41, %v2258_v2  ;;  %v4510_v27 = vadd.f32 %v4046_v50, %v2131_v33  ;;  %v4513_v44 = vadd.f32 %v4046_v50, %v2259_v38 }
  0xed   : > { %6144 = vst [vmem:[#allocation65_spill] sm:$0xff] %v4495_v55  ;;  %v2261_v19 = vmul.f32 %v2005_v30, %v3999_v15  ;;  %v2134_v18 = vmul.f32 %v1878_v28, %v3997_v14  ;;  %v2262_v5 = vmul.f32 %v2006_v29, %v3997_v14  ;;  %v3697_v55 = vld [vmem:[%s3903_s18 + $0x1c0] sm:$0xff]   ;;  %v4524_v2 = vadd.f32 %v4034_v41, %v2132_v34 }
  0xee   : > { %6147 = vst [vmem:[#allocation68_spill] sm:$0xff] %v4507_v45  ;;  %6148 = vst [vmem:[#allocation69_spill] sm:$0xff] %v4510_v27  ;;  %v2135_v33 = vmul.f32 %v1879_v25, %v3999_v15  ;;  %v1880_v27 = vunpack.c.l.bf16 %v1726_v42  ;;  %v2008_v38 = vunpack.c.l.bf16 %v1790_v54  ;;  %v2263_v30 = vmul.f32 %v2007_v17, %v3999_v15 }
  0xef   : > { %1290 = vmatmul.mubr.bf16.gmra.mrb[92].mxu0 %v3694_v59  ;;  %1610 = vmatmul.mubr.bf16.gmra.mrb[92].mxu1 %v3695_v37  ;;  %v4498_v59 = vadd.f32 %v4046_v50, %v2257_v3  ;;  %v4504_v37 = vadd.f32 %v4034_v41, %v2130_v4  ;;  %6149 = vst [vmem:[#allocation70_spill] sm:$0xff] %v4513_v44  ;;  %v1791_v4 = vld [vmem:[%s4017_s22 + $0x2d8] sm:$0xff]  ;;  %6150 = vst [vmem:[#allocation71_spill] sm:$0xff] %v4524_v2  ;;  %v1881_v28 = vunpack.c.h.bf16 %v1726_v42 }
  0xf0   : > { %1299 = vmatprep.mubr.bf16.mxu0 %v6092_v61  ;;  %1619 = vmatprep.mubr.bf16.mxu1 %v6092_v61  ;;  %v2133_v3 = vmul.f32 %v1877_v43, %v3999_v15  ;;  %v4528_v44 = vadd.f32 %v4034_v41, %v2260_v16  ;;  %v2009_v43 = vunpack.c.h.bf16 %v1790_v54  ;;  %v2010_v45 = vunpack.c.l.bf16 %v1791_v4 }
  0xf1   : > { %6145 = vst [vmem:[#allocation66_spill] sm:$0xff] %v4498_v59  ;;  %6146 = vst [vmem:[#allocation67_spill] sm:$0xff] %v4504_v37  ;;  %v1727_v59 = vld [vmem:[%s4017_s22 + $0xd8] sm:$0xff]  ;;  %v3696_v37 = vld [vmem:[%s3903_s18 + $0xc0] sm:$0xff]   ;;  %v2011_v6 = vunpack.c.h.bf16 %v1791_v4  ;;  %v4535_v25 = vadd.f32 %v4046_v50, %v2261_v19  ;;  %v4538_v16 = vadd.f32 %v4034_v41, %v2134_v18  ;;  %v4541_v17 = vadd.f32 %v4034_v41, %v2262_v5 }
  0xf2   : > { %6151 = vst [vmem:[#allocation72_spill] sm:$0xff] %v4528_v44  ;;  %v1882_v29 = vunpack.c.l.bf16 %v1727_v59  ;;  %v1883_v53 = vunpack.c.h.bf16 %v1727_v59  ;;  %v4532_v34 = vadd.f32 %v4046_v50, %v2133_v3  ;;  %v4544_v42 = vadd.f32 %v4046_v50, %v2135_v33  ;;  %v1728_v3 = vld [vmem:[%s4017_s22 + $0xe0] sm:$0xff]  ;;  %v1729_v18 = vld [vmem:[%s4017_s22 + $0xe8] sm:$0xff] }
  0xf3   : > { %6153 = vst [vmem:[#allocation74_spill] sm:$0xff] %v4535_v25  ;;  %6154 = vst [vmem:[#allocation75_spill] sm:$0xff] %v4538_v16  ;;  %v2136_v59 = vmul.f32 %v1880_v27, %v3997_v14  ;;  %v2264_v54 = vmul.f32 %v2008_v38, %v3997_v14  ;;  %v1792_v4 = vld [vmem:[%s4017_s22 + $0x2e0] sm:$0xff]  ;;  %v4553_v19 = vadd.f32 %v4046_v50, %v2263_v30  ;;  %v1793_v5 = vld [vmem:[%s4017_s22 + $0x2e8] sm:$0xff]  ;;  %v1885_v25 = vunpack.c.h.bf16 %v1728_v3 }
  0xf4   : > { %6152 = vst [vmem:[#allocation73_spill] sm:$0xff] %v4532_v34  ;;  %6155 = vst [vmem:[#allocation76_spill] sm:$0xff] %v4541_v17  ;;  %v2138_v27 = vmul.f32 %v1882_v29, %v3997_v14  ;;  %v2266_v33 = vmul.f32 %v2010_v45, %v3997_v14  ;;  %v2139_v38 = vmul.f32 %v1883_v53, %v3999_v15  ;;  %v1884_v17 = vunpack.c.l.bf16 %v1728_v3  ;;  %v3698_v30 = vld [vmem:[%s3903_s18 + $0xc8] sm:$0xff]  }
  0xf5   : > { %6156 = vst [vmem:[#allocation77_spill] sm:$0xff] %v4544_v42  ;;  %6157 = vst [vmem:[#allocation78_spill] sm:$0xff] %v4553_v19  ;;  %v2267_v42 = vmul.f32 %v2011_v6, %v3999_v15  ;;  %v2012_v16 = vunpack.c.l.bf16 %v1792_v4  ;;  %v2013_v34 = vunpack.c.h.bf16 %v1792_v4  ;;  %v3699_v19 = vld [vmem:[%s3903_s18 + $0x1c8] sm:$0xff]   ;;  %v1886_v29 = vunpack.c.l.bf16 %v1729_v18 }
  0xf6   : > { %v2014_v45 = vunpack.c.l.bf16 %v1793_v5  ;;  %v1887_v3 = vunpack.c.h.bf16 %v1729_v18  ;;  %v2015_v4 = vunpack.c.h.bf16 %v1793_v5  ;;  %v4578_v44 = vadd.f32 %v4034_v41, %v2138_v27  ;;  %v1730_v5 = vld [vmem:[%s4017_s22 + $0xf0] sm:$0xff] }
  0xf7   : > { %1300 = vmatmul.mubr.bf16.gmra.mrb[96].mxu0 %v3696_v37  ;;  %1620 = vmatmul.mubr.bf16.gmra.mrb[96].mxu1 %v3697_v55  ;;  %v2137_v55 = vmul.f32 %v1881_v28, %v3999_v15  ;;  %v2265_v37 = vmul.f32 %v2009_v43, %v3999_v15  ;;  %v4566_v28 = vadd.f32 %v4034_v41, %v2136_v59  ;;  %v1794_v27 = vld [vmem:[%s4017_s22 + $0x2f0] sm:$0xff] }
  0xf8   : > { %1309 = vmatprep.mubr.bf16.mxu0 %v6092_v61  ;;  %1629 = vmatprep.mubr.bf16.mxu1 %v6092_v61  ;;  %v4569_v43 = vadd.f32 %v4034_v41, %v2264_v54  ;;  %6162 = vst [vmem:[#allocation83_spill] sm:$0xff] %v4578_v44  ;;  %v4581_v59 = vadd.f32 %v4034_v41, %v2266_v33 }
  0xf9   : > { %6158 = vst [vmem:[#allocation79_spill] sm:$0xff] %v4566_v28  ;;  %v4572_v53 = vadd.f32 %v4046_v50, %v2137_v55  ;;  %v4575_v6 = vadd.f32 %v4046_v50, %v2265_v37  ;;  %v4584_v54 = vadd.f32 %v4046_v50, %v2139_v38  ;;  %v2140_v55 = vmul.f32 %v1884_v17, %v3997_v14 }
  0xfa   : > { %6159 = vst [vmem:[#allocation80_spill] sm:$0xff] %v4569_v43  ;;  %6163 = vst [vmem:[#allocation84_spill] sm:$0xff] %v4581_v59  ;;  %v4587_v43 = vadd.f32 %v4046_v50, %v2267_v42  ;;  %v2141_v37 = vmul.f32 %v1885_v25, %v3999_v15  ;;  %v2269_v18 = vmul.f32 %v2013_v34, %v3999_v15  ;;  %v1888_v42 = vunpack.c.l.bf16 %v1730_v5 }
  0xfb   : > { %6160 = vst [vmem:[#allocation81_spill] sm:$0xff] %v4572_v53  ;;  %6161 = vst [vmem:[#allocation82_spill] sm:$0xff] %v4575_v6  ;;  %v2268_v53 = vmul.f32 %v2012_v16, %v3997_v14  ;;  %v2142_v33 = vmul.f32 %v1886_v29, %v3997_v14  ;;  %v2270_v38 = vmul.f32 %v2014_v45, %v3997_v14  ;;  %v1889_v16 = vunpack.c.h.bf16 %v1730_v5 }
  0xfc   : > { %6164 = vst [vmem:[#allocation85_spill] sm:$0xff] %v4584_v54  ;;  %6165 = vst [vmem:[#allocation86_spill] sm:$0xff] %v4587_v43  ;;  %v2016_v43 = vunpack.c.l.bf16 %v1794_v27  ;;  %v2143_v25 = vmul.f32 %v1887_v3, %v3999_v15  ;;  %v2271_v34 = vmul.f32 %v2015_v4, %v3999_v15  ;;  %v2017_v17 = vunpack.c.h.bf16 %v1794_v27  ;;  %v3701_v3 = vld [vmem:[%s3903_s18 + $0x1d0] sm:$0xff]  }
  0xfd   : > { %v2144_v29 = vmul.f32 %v1888_v42, %v3997_v14  ;;  %v2145_v44 = vmul.f32 %v1889_v16, %v3999_v15  ;;  %v4610_v4 = vadd.f32 %v4034_v41, %v2140_v55  ;;  %v4613_v5 = vadd.f32 %v4034_v41, %v2268_v53 }
  0xfe   : > { %v2272_v45 = vmul.f32 %v2016_v43, %v3997_v14  ;;  %v2273_v6 = vmul.f32 %v2017_v17, %v3999_v15  ;;  %v4618_v42 = vadd.f32 %v4046_v50, %v2141_v37  ;;  %v4621_v16 = vadd.f32 %v4046_v50, %v2269_v18 }
  0xff   : > { %1310 = vmatmul.mubr.bf16.gmra.mrb[100].mxu0 %v3698_v30  ;;  %1630 = vmatmul.mubr.bf16.gmra.mrb[100].mxu1 %v3699_v19  ;;  %v1731_v30 = vld [vmem:[%s4017_s22 + $0xf8] sm:$0xff]  ;;  %v4629_v53 = vadd.f32 %v4034_v41, %v2270_v38  ;;  %v4638_v37 = vadd.f32 %v4034_v41, %v2144_v29  ;;  %v1796_v38 = vld [vmem:[%s4017_s22 + $0x300] sm:$0xff] }
 0x100   : > { %1319 = vmatprep.mubr.bf16.mxu0 %v6092_v61  ;;  %1639 = vmatprep.mubr.bf16.mxu1 %v6092_v61  ;;  %v1795_v19 = vld [vmem:[%s4017_s22 + $0x2f8] sm:$0xff]  ;;  %v1890_v54 = vunpack.c.l.bf16 %v1731_v30  ;;  %v1891_v28 = vunpack.c.h.bf16 %v1731_v30  ;;  %6166 = vst [vmem:[#allocation87_spill] sm:$0xff] %v4621_v16  ;;  %v4626_v30 = vadd.f32 %v4034_v41, %v2142_v33  ;;  %v4647_v18 = vadd.f32 %v4046_v50, %v2273_v6  ;;  %v1732_v33 = vld [vmem:[%s4017_s22 + $0x100] sm:$0xff] }
 0x101   : > { %v2018_v59 = vunpack.c.l.bf16 %v1795_v19  ;;  %v2019_v2 = vunpack.c.h.bf16 %v1795_v19  ;;  %6168 = vst [vmem:[#allocation89_spill] sm:$0xff] %v4629_v53  ;;  %6171 = vst [vmem:[#allocation92_spill] sm:$0xff] %v4638_v37  ;;  %v1892_v19 = vunpack.c.l.bf16 %v1732_v33  ;;  %v2020_v29 = vunpack.c.l.bf16 %v1796_v38  ;;  %v3702_v37 = vld [vmem:[%s3903_s18 + $0xd8] sm:$0xff]  }
 0x102   : > { %v2146_v43 = vmul.f32 %v1890_v54, %v3997_v14  ;;  %v2147_v17 = vmul.f32 %v1891_v28, %v3999_v15  ;;  %6167 = vst [vmem:[#allocation88_spill] sm:$0xff] %v4626_v30  ;;  %v4632_v54 = vadd.f32 %v4046_v50, %v2143_v25  ;;  %v4641_v28 = vadd.f32 %v4034_v41, %v2272_v45 }
 0x103   : > { %v2274_v27 = vmul.f32 %v2018_v59, %v3997_v14  ;;  %v2275_v55 = vmul.f32 %v2019_v2, %v3999_v15  ;;  %v4635_v59 = vadd.f32 %v4046_v50, %v2271_v34  ;;  %v4644_v2 = vadd.f32 %v4046_v50, %v2145_v44  ;;  %6174 = vst [vmem:[#allocation95_spill] sm:$0xff] %v4647_v18 }
 0x104   : > { %6169 = vst [vmem:[#allocation90_spill] sm:$0xff] %v4632_v54  ;;  %6172 = vst [vmem:[#allocation93_spill] sm:$0xff] %v4641_v28  ;;  %v4652_v25 = vadd.f32 %v4034_v41, %v2146_v43  ;;  %v4661_v44 = vadd.f32 %v4046_v50, %v2147_v17  ;;  %v1893_v6 = vunpack.c.h.bf16 %v1732_v33  ;;  %v2021_v45 = vunpack.c.h.bf16 %v1796_v38  ;;  %v4670_v43 = vld [vmem:[%s4017_s22 + $0x308] sm:$0xff] }
 0x105   : > { %6170 = vst [vmem:[#allocation91_spill] sm:$0xff] %v4635_v59  ;;  %6173 = vst [vmem:[#allocation94_spill] sm:$0xff] %v4644_v2  ;;  %v4655_v34 = vadd.f32 %v4034_v41, %v2274_v27  ;;  %v2148_v27 = vmul.f32 %v1892_v19, %v3997_v14  ;;  %v2022_v17 = vunpack.c.l.bf16 %v4670_v43  ;;  %v3703_v59 = vld [vmem:[%s3903_s18 + $0x1d8] sm:$0xff]  }
 0x106   : > { %6175 = vst [vmem:[#allocation96_spill] sm:$0xff] %v4652_v25  ;;  %6177 = vst [vmem:[#allocation98_spill] sm:$0xff] %v4661_v44  ;;  %v2277_v33 = vmul.f32 %v2021_v45, %v3999_v15 }
 0x107   : > { %1320 = vmatmul.mubr.bf16.gmra.mrb[104].mxu0 %v3700_v31  ;;  %1640 = vmatmul.mubr.bf16.gmra.mrb[104].mxu1 %v3701_v3  ;;  %6176 = vst [vmem:[#allocation97_spill] sm:$0xff] %v4655_v34  ;;  %v4664_v31 = vadd.f32 %v4046_v50, %v2275_v55  ;;  %v4667_v3 = vld [vmem:[%s4017_s22 + $0x108] sm:$0xff]  ;;  %v2276_v34 = vmul.f32 %v2020_v29, %v3997_v14 }
 0x108   : > { %1329 = vmatprep.mubr.bf16.mxu0 %v6092_v61  ;;  %1649 = vmatprep.mubr.bf16.mxu1 %v6092_v61  ;;  %v1894_v25 = vunpack.c.l.bf16 %v4667_v3  ;;  %v2149_v55 = vmul.f32 %v1893_v6, %v3999_v15  ;;  %v1895_v38 = vunpack.c.h.bf16 %v4667_v3  ;;  %v4689_v54 = vadd.f32 %v4034_v41, %v2148_v27 }
 0x109   : > { %6178 = vst [vmem:[#allocation99_spill] sm:$0xff] %v4664_v31  ;;  %v2023_v31 = vunpack.c.h.bf16 %v4670_v43  ;;  %v4692_v6 = vadd.f32 %v4034_v41, %v2276_v34 }
 0x10a   : > { %v1061_v44 = vpop.f32.mrb[0].mxu0  ;;  %v1381_v18 = vpop.f32.mrb[0].mxu1  ;;  %6179 = vst [vmem:[#allocation100_spill] sm:$0xff] %v4689_v54 }
 0x10b   : > { %v1062_v19 = vadd.f32 %v1061_v44, %v4041_v47  ;;  %v1382_v29 = vadd.f32 %v1381_v18, %v4041_v47  ;;  %v1063_v2 = vpop.f32.mrb[1].mxu0  ;;  %v1383_v28 = vpop.f32.mrb[1].mxu1  ;;  %6180 = vst [vmem:[#allocation101_spill] sm:$0xff] %v4692_v6  ;;  %v4697_v44 = vadd.f32 %v4046_v50, %v2149_v55  ;;  %v4700_v18 = vadd.f32 %v4046_v50, %v2277_v33 }
 0x10c   : > { %v1064_v45 = vadd.f32 %v1063_v2, %v4043_v48  ;;  %v1384_v3 = vadd.f32 %v1383_v28, %v4043_v48  ;;  %v1065_v43 = vpop.f32.mrb[2].mxu0  ;;  %v1385_v53 = vpop.f32.mrb[2].mxu1 }
 0x10d   : > { %6181 = vst [vmem:[#allocation102_spill] sm:$0xff] %v4697_v44  ;;  %6182 = vst [vmem:[#allocation103_spill] sm:$0xff] %v4700_v18  ;;  %v2607_v30 = vadd.f32 %v4056_v58, %v1062_v19  ;;  %v2735_v27 = vadd.f32 %v4060_v62, %v1382_v29  ;;  %v1066_v54 = vadd.f32 %v1065_v43, %v4041_v47  ;;  %v1067_v6 = vpop.f32.mrb[3].mxu0  ;;  %v1387_v2 = vpop.f32.mrb[3].mxu1  ;;  %v3705_v43 = vld [vmem:[%s3903_s18 + $0x1e0] sm:$0xff]  }
 0x10e   : > { %v1386_v34 = vadd.f32 %v1385_v53, %v4041_v47  ;;  %v2608_v28 = vadd.f32 %v4066_v9, %v1064_v45  ;;  %v2736_v16 = vadd.f32 %v4069_v10, %v1384_v3  ;;  %v1068_v55 = vadd.f32 %v1067_v6, %v4043_v48  ;;  %v3704_v3 = vld [vmem:[%s3903_s18 + $0xe0] sm:$0xff]  }
 0x10f   : > { %v1388_v33 = vadd.f32 %v1387_v2, %v4043_v48  ;;  %v2863_v18 = vmax.f32 %v2607_v30, 0.0  ;;  %v2991_v44 = vmax.f32 %v2735_v27, 0.0  ;;  %v2609_v58 = vadd.f32 %v4072_v11, %v1066_v54  ;;  %1330 = vmatmul.mubr.bf16.gmra.mrb[108].mxu0 %v3702_v37  ;;  %1650 = vmatmul.mubr.bf16.gmra.mrb[108].mxu1 %v3703_v59 }
 0x110   : > { %v2737_v62 = vadd.f32 %v4075_v12, %v1386_v34  ;;  %v2864_v53 = vmax.f32 %v2608_v28, 0.0  ;;  %v2992_v19 = vmax.f32 %v2736_v16, 0.0  ;;  %v2610_v29 = vadd.f32 %v4078_v13, %v1068_v55  ;;  %1339 = vmatprep.mubr.bf16.mxu0 %v6092_v61  ;;  %1659 = vmatprep.mubr.bf16.mxu1 %v6092_v61 }
 0x111   : > { %v2738_v9 = vadd.f32 %v4087_v21, %v1388_v33  ;;  %3119 = vst [vmem:[%s4717_s14] sm:$0xff] %v2863_v18  ;;  %3247 = vst [vmem:[%s4717_s14 + $0x400] sm:$0xff] %v2991_v44  ;;  %v2865_v10 = vmax.f32 %v2609_v58, 0.0  ;;  %v2150_v12 = vmul.f32 %v1894_v25, %v3997_v14  ;;  %v2278_v13 = vmul.f32 %v2022_v17, %v3997_v14 }
 0x112   : > { %v2993_v11 = vmax.f32 %v2737_v62, 0.0  ;;  %3120 = vst [vmem:[%s4717_s14 + $0x8] sm:$0xff] %v2864_v53  ;;  %3248 = vst [vmem:[%s4717_s14 + $0x408] sm:$0xff] %v2992_v19  ;;  %v2866_v21 = vmax.f32 %v2610_v29, 0.0  ;;  %v1071_v30 = vpop.f32.mrb[4].mxu0  ;;  %v1391_v54 = vpop.f32.mrb[4].mxu1  ;;  %v2151_v59 = vmul.f32 %v1895_v38, %v3999_v15  ;;  %v2279_v37 = vmul.f32 %v2023_v31, %v3999_v15 }
 0x113   : > { %v2994_v16 = vmax.f32 %v2738_v9, 0.0  ;;  %3121 = vst [vmem:[%s4717_s14 + $0x10] sm:$0xff] %v2865_v10  ;;  %v1072_v25 = vadd.f32 %v1071_v30, %v4041_v47  ;;  %v1392_v6 = vadd.f32 %v1391_v54, %v4041_v47  ;;  %v1073_v17 = vpop.f32.mrb[5].mxu0  ;;  %v1393_v45 = vpop.f32.mrb[5].mxu1  ;;  %v4734_v44 = vadd.f32 %v4034_v41, %v2150_v12  ;;  %v1734_v12 = vld [vmem:[%s4017_s22 + $0x110] sm:$0xff] }
 0x114   : > { %3249 = vst [vmem:[%s4717_s14 + $0x410] sm:$0xff] %v2993_v11  ;;  %v4737_v18 = vadd.f32 %v4034_v41, %v2278_v13  ;;  %3122 = vst [vmem:[%s4717_s14 + $0x18] sm:$0xff] %v2866_v21  ;;  %v1074_v31 = vadd.f32 %v1073_v17, %v4043_v48  ;;  %v1394_v38 = vadd.f32 %v1393_v45, %v4043_v48  ;;  %v1075_v27 = vpop.f32.mrb[6].mxu0  ;;  %v1395_v34 = vpop.f32.mrb[6].mxu1  ;;  %v1897_v17 = vunpack.c.h.bf16 %v1734_v12 }
 0x115   : > { %3250 = vst [vmem:[%s4717_s14 + $0x418] sm:$0xff] %v2994_v16  ;;  %v4744_v2 = vadd.f32 %v4046_v50, %v2151_v59  ;;  %v4747_v28 = vadd.f32 %v4046_v50, %v2279_v37  ;;  %v2611_v55 = vadd.f32 %v4098_v35, %v1072_v25  ;;  %v2739_v33 = vadd.f32 %v4101_v36, %v1392_v6  ;;  %v1077_v53 = vpop.f32.mrb[7].mxu0  ;;  %v1397_v19 = vpop.f32.mrb[7].mxu1  ;;  %v1798_v35 = vld [vmem:[%s4017_s22 + $0x310] sm:$0xff] }
 0x116   : > { %v1076_v58 = vadd.f32 %v1075_v27, %v4041_v47  ;;  %v1396_v62 = vadd.f32 %v1395_v34, %v4041_v47  ;;  %v2612_v29 = vadd.f32 %v4105_v39, %v1074_v31  ;;  %v2740_v9 = vadd.f32 %v4108_v40, %v1394_v38  ;;  %v3706_v27 = vld [vmem:[%s3903_s18 + $0xe8] sm:$0xff]  }
 0x117   : > { %v1078_v10 = vadd.f32 %v1077_v53, %v4043_v48  ;;  %v1398_v11 = vadd.f32 %v1397_v19, %v4043_v48  ;;  %v2867_v13 = vmax.f32 %v2611_v55, 0.0  ;;  %v2995_v36 = vmax.f32 %v2739_v33, 0.0  ;;  %1340 = vmatmul.mubr.bf16.gmra.mrb[112].mxu0 %v3704_v3  ;;  %1660 = vmatmul.mubr.bf16.gmra.mrb[112].mxu1 %v3705_v43  ;;  %v3707_v34 = vld [vmem:[%s3903_s18 + $0x1e8] sm:$0xff]  }
 0x118   : > { %v2613_v21 = vadd.f32 %v4114_v46, %v1076_v58  ;;  %v2741_v16 = vadd.f32 %v4117_v49, %v1396_v62  ;;  %v2868_v39 = vmax.f32 %v2612_v29, 0.0  ;;  %v2996_v40 = vmax.f32 %v2740_v9, 0.0  ;;  %1349 = vmatprep.mubr.bf16.mxu0 %v6092_v61  ;;  %1669 = vmatprep.mubr.bf16.mxu1 %v6092_v61 }
 0x119   : > { %v2614_v30 = vadd.f32 %v4120_v51, %v1078_v10  ;;  %v2742_v54 = vadd.f32 %v4123_v52, %v1398_v11  ;;  %3123 = vst [vmem:[%s4717_s14 + $0x20] sm:$0xff] %v2867_v13  ;;  %3251 = vst [vmem:[%s4717_s14 + $0x420] sm:$0xff] %v2995_v36  ;;  %v1896_v49 = vunpack.c.l.bf16 %v1734_v12  ;;  %v2024_v37 = vunpack.c.l.bf16 %v1798_v35 }
 0x11a   : > { %v2869_v46 = vmax.f32 %v2613_v21, 0.0  ;;  %v2997_v59 = vmax.f32 %v2741_v16, 0.0  ;;  %3124 = vst [vmem:[%s4717_s14 + $0x28] sm:$0xff] %v2868_v39  ;;  %3252 = vst [vmem:[%s4717_s14 + $0x428] sm:$0xff] %v2996_v40  ;;  %v1081_v52 = vpop.f32.mrb[8].mxu0  ;;  %v1401_v6 = vpop.f32.mrb[8].mxu1  ;;  %v2025_v45 = vunpack.c.h.bf16 %v1798_v35  ;;  %v2153_v29 = vmul.f32 %v1897_v17, %v3999_v15 }
 0x11b   : > { %v2870_v25 = vmax.f32 %v2614_v30, 0.0  ;;  %v2998_v51 = vmax.f32 %v2742_v54, 0.0  ;;  %v1082_v3 = vadd.f32 %v1081_v52, %v4041_v47  ;;  %v1402_v43 = vadd.f32 %v1401_v6, %v4041_v47  ;;  %v1083_v31 = vpop.f32.mrb[9].mxu0  ;;  %v1403_v38 = vpop.f32.mrb[9].mxu1 }
 0x11c   : > { %3125 = vst [vmem:[%s4717_s14 + $0x30] sm:$0xff] %v2869_v46  ;;  %3253 = vst [vmem:[%s4717_s14 + $0x430] sm:$0xff] %v2997_v59  ;;  %v2152_v55 = vmul.f32 %v1896_v49, %v3997_v14  ;;  %v2280_v33 = vmul.f32 %v2024_v37, %v3997_v14  ;;  %v1084_v58 = vadd.f32 %v1083_v31, %v4043_v48  ;;  %v1085_v53 = vpop.f32.mrb[10].mxu0  ;;  %v1405_v19 = vpop.f32.mrb[10].mxu1  ;;  %v4798_v49 = vld [vmem:[%s4017_s22 + $0x118] sm:$0xff] }
 0x11d   : > { %3126 = vst [vmem:[%s4717_s14 + $0x38] sm:$0xff] %v2870_v25  ;;  %3254 = vst [vmem:[%s4717_s14 + $0x438] sm:$0xff] %v2998_v51  ;;  %v1404_v62 = vadd.f32 %v1403_v38, %v4043_v48  ;;  %v2281_v9 = vmul.f32 %v2025_v45, %v3999_v15  ;;  %v2615_v10 = vadd.f32 %v4132_v60, %v1082_v3  ;;  %v1087_v13 = vpop.f32.mrb[11].mxu0  ;;  %v1407_v36 = vpop.f32.mrb[11].mxu1 }
 0x11e   : > { %v2743_v11 = vadd.f32 %v4138_v1, %v1402_v43  ;;  %v1086_v12 = vadd.f32 %v1085_v53, %v4041_v47  ;;  %v1406_v35 = vadd.f32 %v1405_v19, %v4041_v47  ;;  %v2616_v21 = vadd.f32 %v4145_v20, %v1084_v58 }
 0x11f   : > { %v2744_v16 = vadd.f32 %v4148_v22, %v1404_v62  ;;  %v1088_v39 = vadd.f32 %v1087_v13, %v4043_v48  ;;  %v1408_v40 = vadd.f32 %v1407_v36, %v4043_v48  ;;  %v2871_v60 = vmax.f32 %v2615_v10, 0.0  ;;  %1350 = vmatmul.mubr.bf16.gmra.mrb[116].mxu0 %v3706_v27  ;;  %1670 = vmatmul.mubr.bf16.gmra.mrb[116].mxu1 %v3707_v34  ;;  %v3708_v27 = vld [vmem:[%s3903_s18 + $0xf0] sm:$0xff]  }
 0x120   : > { %v2999_v1 = vmax.f32 %v2743_v11, 0.0  ;;  %v2617_v30 = vadd.f32 %v4151_v23, %v1086_v12  ;;  %v2745_v54 = vadd.f32 %v4154_v24, %v1406_v35  ;;  %v2872_v20 = vmax.f32 %v2616_v21, 0.0  ;;  %1359 = vmatprep.mubr.bf16.mxu0 %v6092_v61  ;;  %1679 = vmatprep.mubr.bf16.mxu1 %v6092_v61  ;;  %v4801_v23 = vld [vmem:[%s4017_s22 + $0x318] sm:$0xff]  ;;  %v3709_v34 = vld [vmem:[%s3903_s18 + $0x1f0] sm:$0xff]  }
 0x121   : > { %v3000_v46 = vmax.f32 %v2744_v16, 0.0  ;;  %v2618_v22 = vadd.f32 %v4158_v26, %v1088_v39  ;;  %v2746_v59 = vadd.f32 %v4165_v32, %v1408_v40  ;;  %3127 = vst [vmem:[%s4717_s14 + $0x40] sm:$0xff] %v2871_v60  ;;  %v4806_v25 = vadd.f32 %v4034_v41, %v2152_v55 }
 0x122   : > { %3255 = vst [vmem:[%s4717_s14 + $0x440] sm:$0xff] %v2999_v1  ;;  %v2873_v24 = vmax.f32 %v2617_v30, 0.0  ;;  %v3001_v37 = vmax.f32 %v2745_v54, 0.0  ;;  %v4809_v26 = vadd.f32 %v4034_v41, %v2280_v33  ;;  %3128 = vst [vmem:[%s4717_s14 + $0x48] sm:$0xff] %v2872_v20  ;;  %v1091_v52 = vpop.f32.mrb[12].mxu0  ;;  %v1411_v6 = vpop.f32.mrb[12].mxu1  ;;  %v4814_v17 = vadd.f32 %v4046_v50, %v2153_v29 }
 0x123   : > { %3256 = vst [vmem:[%s4717_s14 + $0x448] sm:$0xff] %v3000_v46  ;;  %v2874_v32 = vmax.f32 %v2618_v22, 0.0  ;;  %v3002_v51 = vmax.f32 %v2746_v59, 0.0  ;;  %v4817_v45 = vadd.f32 %v4046_v50, %v2281_v9  ;;  %v1092_v3 = vadd.f32 %v1091_v52, %v4041_v47  ;;  %v1093_v31 = vpop.f32.mrb[13].mxu0  ;;  %v1413_v38 = vpop.f32.mrb[13].mxu1  ;;  %v6183_v54 = vld [vmem:[#allocation5_spill] sm:$0xff] }
 0x124   : > { %3129 = vst [vmem:[%s4717_s14 + $0x50] sm:$0xff] %v2873_v24  ;;  %3257 = vst [vmem:[%s4717_s14 + $0x450] sm:$0xff] %v3001_v37  ;;  %v1412_v43 = vadd.f32 %v1411_v6, %v4041_v47  ;;  %v1898_v55 = vunpack.c.l.bf16 %v4798_v49  ;;  %v2026_v33 = vunpack.c.l.bf16 %v4801_v23  ;;  %v1094_v58 = vadd.f32 %v1093_v31, %v4043_v48  ;;  %v1095_v53 = vpop.f32.mrb[14].mxu0  ;;  %v1415_v19 = vpop.f32.mrb[14].mxu1  ;;  %v3711_v31 = vld [vmem:[%s3903_s18 + $0x1f8] sm:$0xff]  }
 0x125   : > { %3130 = vst [vmem:[%s4717_s14 + $0x58] sm:$0xff] %v2874_v32  ;;  %3258 = vst [vmem:[%s4717_s14 + $0x458] sm:$0xff] %v3002_v51  ;;  %v1414_v62 = vadd.f32 %v1413_v38, %v4043_v48  ;;  %v1899_v29 = vunpack.c.h.bf16 %v4798_v49  ;;  %v2027_v9 = vunpack.c.h.bf16 %v4801_v23  ;;  %v2619_v10 = vadd.f32 %v4174_v56, %v1092_v3  ;;  %v1097_v13 = vpop.f32.mrb[15].mxu0  ;;  %v1417_v36 = vpop.f32.mrb[15].mxu1 }
 0x126   : > { %v2747_v11 = vadd.f32 %v4177_v57, %v1412_v43  ;;  %v1096_v12 = vadd.f32 %v1095_v53, %v4041_v47  ;;  %v1416_v35 = vadd.f32 %v1415_v19, %v4041_v47  ;;  %v2620_v21 = vadd.f32 %v4183_v63, %v1094_v58  ;;  %v3710_v43 = vld [vmem:[%s3903_s18 + $0xf8] sm:$0xff]   ;;  %v6185_v19 = vld [vmem:[#allocation7_spill] sm:$0xff]  ;;  %s3564_s18 = sshll.u32 %s3846_s28, 15  ;;  %s6030_s28 = scalar_lea.sflag [#allocation3], %s288_s9 }
 0x127   : > { %v2748_v16 = vadd.f32 %v4186_v0, %v1414_v62  ;;  %v1098_v39 = vadd.f32 %v1097_v13, %v4043_v48  ;;  %v1418_v40 = vadd.f32 %v1417_v36, %v4043_v48  ;;  %v2875_v60 = vmax.f32 %v2619_v10, 0.0  ;;  %1360 = vmatmul.mubr.bf16.gmra.mrb[120].mxu0 %v3708_v27  ;;  %1680 = vmatmul.mubr.bf16.gmra.mrb[120].mxu1 %v3709_v34  ;;  %v6184_v0 = vld [vmem:[#allocation6_spill] sm:$0xff]  ;;  %v6187_v36 = vld [vmem:[#allocation9_spill] sm:$0xff]  ;;  %s6021_s20 = scalar_lea.hbm %s6078_s7, %s3564_s18 }
 0x128   : > { %v3003_v56 = vmax.f32 %v2747_v11, 0.0  ;;  %v2621_v57 = vadd.f32 %v4192_v7, %v1096_v12  ;;  %v2749_v1 = vadd.f32 %v4195_v8, %v1416_v35  ;;  %v2876_v30 = vmax.f32 %v2620_v21, 0.0  ;;  %1369 = vmatprep.mubr.bf16.mxu0 %v6092_v61  ;;  %1689 = vmatprep.mubr.bf16.mxu1 %v6092_v61 }
 0x129   : > { %v3004_v63 = vmax.f32 %v2748_v16, 0.0  ;;  %v2622_v20 = vadd.f32 %v6183_v54, %v1098_v39  ;;  %v2750_v46 = vadd.f32 %v6184_v0, %v1418_v40  ;;  %3131 = vst [vmem:[%s4717_s14 + $0x60] sm:$0xff] %v2875_v60  ;;  %v2154_v8 = vmul.f32 %v1898_v55, %v3997_v14  ;;  %v6188_v16 = vld [vmem:[#allocation10_spill] sm:$0xff] }
 0x12a   : > { %3259 = vst [vmem:[%s4717_s14 + $0x460] sm:$0xff] %v3003_v56  ;;  %v2877_v7 = vmax.f32 %v2621_v57, 0.0  ;;  %v3005_v22 = vmax.f32 %v2749_v1, 0.0  ;;  %v2282_v59 = vmul.f32 %v2026_v33, %v3997_v14  ;;  %3132 = vst [vmem:[%s4717_s14 + $0x68] sm:$0xff] %v2876_v30  ;;  %v1101_v24 = vpop.f32.mrb[16].mxu0  ;;  %v1421_v37 = vpop.f32.mrb[16].mxu1  ;;  %v2155_v61 = vmul.f32 %v1899_v29, %v3999_v15 }
 0x12b   : > { %3260 = vst [vmem:[%s4717_s14 + $0x468] sm:$0xff] %v3004_v63  ;;  %v2878_v49 = vmax.f32 %v2622_v20, 0.0  ;;  %v3006_v23 = vmax.f32 %v2750_v46, 0.0  ;;  %v2283_v32 = vmul.f32 %v2027_v9, %v3999_v15  ;;  %v1102_v51 = vadd.f32 %v1101_v24, %v4041_v47  ;;  %v1103_v6 = vpop.f32.mrb[17].mxu0  ;;  %v1423_v3 = vpop.f32.mrb[17].mxu1  ;;  %v6186_v9 = vld [vmem:[#allocation8_spill] sm:$0xff] }
 0x12c   : > { %3133 = vst [vmem:[%s4717_s14 + $0x70] sm:$0xff] %v2877_v7  ;;  %3261 = vst [vmem:[%s4717_s14 + $0x470] sm:$0xff] %v3005_v22  ;;  %v1422_v52 = vadd.f32 %v1421_v37, %v4041_v47  ;;  %v4862_v38 = vadd.f32 %v4034_v41, %v2154_v8  ;;  %v4865_v27 = vadd.f32 %v4034_v41, %v2282_v59  ;;  %v1105_v33 = vpop.f32.mrb[18].mxu0  ;;  %v1425_v58 = vpop.f32.mrb[18].mxu1  ;;  %v1736_v56 = vld [vmem:[%s4017_s22 + $0x120] sm:$0xff]  ;;  %v6189_v63 = vld [vmem:[#allocation11_spill] sm:$0xff] }
 0x12d   : > { %3134 = vst [vmem:[%s4717_s14 + $0x78] sm:$0xff] %v2878_v49  ;;  %3262 = vst [vmem:[%s4717_s14 + $0x478] sm:$0xff] %v3006_v23  ;;  %v1104_v34 = vadd.f32 %v1103_v6, %v4043_v48  ;;  %v1424_v55 = vadd.f32 %v1423_v3, %v4043_v48  ;;  %v4872_v62 = vadd.f32 %v4046_v50, %v2155_v61  ;;  %v1107_v35 = vpop.f32.mrb[19].mxu0  ;;  %v1427_v13 = vpop.f32.mrb[19].mxu1  ;;  %v1800_v57 = vld [vmem:[%s4017_s22 + $0x320] sm:$0xff]  ;;  %v6190_v20 = vld [vmem:[#allocation12_spill] sm:$0xff]  ;;  %v1900_v37 = vunpack.c.l.bf16 %v1736_v56 }
 0x12e   : > { %v4875_v53 = vadd.f32 %v4046_v50, %v2283_v32  ;;  %v2623_v29 = vadd.f32 %v6185_v19, %v1102_v51  ;;  %v2751_v10 = vadd.f32 %v6186_v9, %v1422_v52  ;;  %v1106_v11 = vadd.f32 %v1105_v33, %v4041_v47  ;;  %v6191_v22 = vld [vmem:[#allocation13_spill] sm:$0xff]  ;;  %v6192_v59 = vld [vmem:[#allocation14_spill] sm:$0xff] }
 0x12f   : > { %v1426_v12 = vadd.f32 %v1425_v58, %v4041_v47  ;;  %v2624_v21 = vadd.f32 %v6187_v36, %v1104_v34  ;;  %v2752_v39 = vadd.f32 %v6188_v16, %v1424_v55  ;;  %v1108_v40 = vadd.f32 %v1107_v35, %v4043_v48  ;;  %1370 = vmatmul.mubr.bf16.gmra.mrb[124].mxu0 %v3710_v43 }
 0x130   : > { %v1428_v60 = vadd.f32 %v1427_v13, %v4043_v48  ;;  %v2879_v1 = vmax.f32 %v2623_v29, 0.0  ;;  %v3007_v30 = vmax.f32 %v2751_v10, 0.0  ;;  %v2625_v54 = vadd.f32 %v6189_v63, %v1106_v11  ;;  %1690 = vmatmul.mubr.bf16.gmra.mrb[124].mxu1 %v3711_v31  ;;  %v6193_v13 = vld [vmem:[#allocation15_spill] sm:$0xff] }
 0x131   : > { %v2753_v0 = vadd.f32 %v6190_v20, %v1426_v12  ;;  %v2880_v46 = vmax.f32 %v2624_v21, 0.0  ;;  %v3008_v7 = vmax.f32 %v2752_v39, 0.0  ;;  %v2626_v8 = vadd.f32 %v6191_v22, %v1108_v40  ;;  %v6194_v21 = vld [vmem:[#allocation16_spill] sm:$0xff] }
 0x132   : > { %v2754_v49 = vadd.f32 %v6192_v59, %v1428_v60  ;;  %3135 = vst [vmem:[%s4717_s14 + $0x80] sm:$0xff] %v2879_v1  ;;  %3263 = vst [vmem:[%s4717_s14 + $0x480] sm:$0xff] %v3007_v30  ;;  %v2881_v23 = vmax.f32 %v2625_v54, 0.0  ;;  %v2028_v61 = vunpack.c.l.bf16 %v1800_v57  ;;  %v1111_v52 = vpop.f32.mrb[20].mxu0  ;;  %v1431_v6 = vpop.f32.mrb[20].mxu1  ;;  %v1901_v3 = vunpack.c.h.bf16 %v1736_v56  ;;  %v6196_v30 = vld [vmem:[#allocation18_spill] sm:$0xff] }
 0x133   : > { %v3009_v24 = vmax.f32 %v2753_v0, 0.0  ;;  %3136 = vst [vmem:[%s4717_s14 + $0x88] sm:$0xff] %v2880_v46  ;;  %3264 = vst [vmem:[%s4717_s14 + $0x488] sm:$0xff] %v3008_v7  ;;  %v2882_v32 = vmax.f32 %v2626_v8, 0.0  ;;  %v2029_v43 = vunpack.c.h.bf16 %v1800_v57  ;;  %v1112_v31 = vadd.f32 %v1111_v52, %v4041_v47  ;;  %v1113_v55 = vpop.f32.mrb[21].mxu0  ;;  %v1433_v33 = vpop.f32.mrb[21].mxu1 }
 0x134   : > { %v3010_v51 = vmax.f32 %v2754_v49, 0.0  ;;  %3137 = vst [vmem:[%s4717_s14 + $0x90] sm:$0xff] %v2881_v23  ;;  %v1432_v34 = vadd.f32 %v1431_v6, %v4041_v47  ;;  %v2156_v58 = vmul.f32 %v1900_v37, %v3997_v14  ;;  %v2284_v19 = vmul.f32 %v2028_v61, %v3997_v14  ;;  %v1115_v10 = vpop.f32.mrb[22].mxu0  ;;  %v1435_v11 = vpop.f32.mrb[22].mxu1  ;;  %v6195_v57 = vld [vmem:[#allocation17_spill] sm:$0xff]  ;;  %v6197_v7 = vld [vmem:[#allocation19_spill] sm:$0xff] }
 0x135   : > { %3265 = vst [vmem:[%s4717_s14 + $0x490] sm:$0xff] %v3009_v24  ;;  %3138 = vst [vmem:[%s4717_s14 + $0x98] sm:$0xff] %v2882_v32  ;;  %v1114_v29 = vadd.f32 %v1113_v55, %v4043_v48  ;;  %v1434_v9 = vadd.f32 %v1433_v33, %v4043_v48  ;;  %v2157_v12 = vmul.f32 %v1901_v3, %v3999_v15  ;;  %v1117_v60 = vpop.f32.mrb[23].mxu0  ;;  %v1437_v56 = vpop.f32.mrb[23].mxu1  ;;  %v6198_v8 = vld [vmem:[#allocation20_spill] sm:$0xff]  ;;  %v6199_v24 = vld [vmem:[#allocation21_spill] sm:$0xff] }
 0x136   : > { %3266 = vst [vmem:[%s4717_s14 + $0x498] sm:$0xff] %v3010_v51  ;;  %v2285_v35 = vmul.f32 %v2029_v43, %v3999_v15  ;;  %v2627_v36 = vadd.f32 %v6193_v13, %v1112_v31  ;;  %v2755_v16 = vadd.f32 %v6194_v21, %v1432_v34  ;;  %v1116_v39 = vadd.f32 %v1115_v10, %v4041_v47  ;;  %v6200_v61 = vld [vmem:[#allocation22_spill] sm:$0xff] }
 0x137   : > { %v1436_v40 = vadd.f32 %v1435_v11, %v4041_v47  ;;  %v2628_v1 = vadd.f32 %v6195_v57, %v1114_v29  ;;  %v2756_v63 = vadd.f32 %v6196_v30, %v1434_v9  ;;  %v1118_v54 = vadd.f32 %v1117_v60, %v4043_v48  ;;  %v4920_v51 = vld [vmem:[%s4017_s22 + $0x128] sm:$0xff] }
 0x138   : > { %v1438_v20 = vadd.f32 %v1437_v56, %v4043_v48  ;;  %v2883_v0 = vmax.f32 %v2627_v36, 0.0  ;;  %v3011_v46 = vmax.f32 %v2755_v16, 0.0  ;;  %v2629_v22 = vadd.f32 %v6197_v7, %v1116_v39  ;;  %v4923_v52 = vld [vmem:[%s4017_s22 + $0x328] sm:$0xff]  ;;  %v6201_v56 = vld [vmem:[#allocation23_spill] sm:$0xff] }
 0x139   : > { %v2757_v59 = vadd.f32 %v6198_v8, %v1436_v40  ;;  %v2884_v49 = vmax.f32 %v2628_v1, 0.0  ;;  %v3012_v23 = vmax.f32 %v2756_v63, 0.0  ;;  %v2630_v37 = vadd.f32 %v6199_v24, %v1118_v54  ;;  %v6202_v1 = vld [vmem:[#allocation24_spill] sm:$0xff] }
 0x13a   : > { %v2758_v32 = vadd.f32 %v6200_v61, %v1438_v20  ;;  %3139 = vst [vmem:[%s4717_s14 + $0xa0] sm:$0xff] %v2883_v0  ;;  %3267 = vst [vmem:[%s4717_s14 + $0x4a0] sm:$0xff] %v3011_v46  ;;  %v2885_v6 = vmax.f32 %v2629_v22, 0.0  ;;  %v4928_v43 = vadd.f32 %v4034_v41, %v2156_v58  ;;  %v4931_v31 = vadd.f32 %v4034_v41, %v2284_v19  ;;  %v1121_v33 = vpop.f32.mrb[24].mxu0  ;;  %v1441_v29 = vpop.f32.mrb[24].mxu1  ;;  %v6203_v46 = vld [vmem:[#allocation25_spill] sm:$0xff] }
 0x13b   : > { %v3013_v3 = vmax.f32 %v2757_v59, 0.0  ;;  %3140 = vst [vmem:[%s4717_s14 + $0xa8] sm:$0xff] %v2884_v49  ;;  %3268 = vst [vmem:[%s4717_s14 + $0x4a8] sm:$0xff] %v3012_v23  ;;  %v2886_v34 = vmax.f32 %v2630_v37, 0.0  ;;  %v4936_v9 = vadd.f32 %v4046_v50, %v2157_v12  ;;  %v4939_v10 = vadd.f32 %v4046_v50, %v2285_v35  ;;  %v1123_v11 = vpop.f32.mrb[25].mxu0  ;;  %v1443_v13 = vpop.f32.mrb[25].mxu1 }
 0x13c   : > { %v3014_v55 = vmax.f32 %v2758_v32, 0.0  ;;  %3141 = vst [vmem:[%s4717_s14 + $0xb0] sm:$0xff] %v2885_v6  ;;  %v1122_v58 = vadd.f32 %v1121_v33, %v4041_v47  ;;  %v1442_v19 = vadd.f32 %v1441_v29, %v4041_v47  ;;  %v1902_v36 = vunpack.c.l.bf16 %v4920_v51  ;;  %v1125_v35 = vpop.f32.mrb[26].mxu0  ;;  %v1445_v39 = vpop.f32.mrb[26].mxu1  ;;  %v6204_v22 = vld [vmem:[#allocation26_spill] sm:$0xff]  ;;  %v6205_v37 = vld [vmem:[#allocation27_spill] sm:$0xff] }
 0x13d   : > { %3269 = vst [vmem:[%s4717_s14 + $0x4b0] sm:$0xff] %v3013_v3  ;;  %v2030_v21 = vunpack.c.l.bf16 %v4923_v52  ;;  %3142 = vst [vmem:[%s4717_s14 + $0xb8] sm:$0xff] %v2886_v34  ;;  %v1124_v12 = vadd.f32 %v1123_v11, %v4043_v48  ;;  %v1444_v16 = vadd.f32 %v1443_v13, %v4043_v48  ;;  %v1903_v40 = vunpack.c.h.bf16 %v4920_v51  ;;  %v1127_v20 = vpop.f32.mrb[27].mxu0  ;;  %v1447_v0 = vpop.f32.mrb[27].mxu1  ;;  %v6206_v32 = vld [vmem:[#allocation28_spill] sm:$0xff]  ;;  %v6207_v3 = vld [vmem:[#allocation29_spill] sm:$0xff] }
 0x13e   : > { %3270 = vst [vmem:[%s4717_s14 + $0x4b8] sm:$0xff] %v3014_v55  ;;  %v2031_v60 = vunpack.c.h.bf16 %v4923_v52  ;;  %v2631_v57 = vadd.f32 %v6201_v56, %v1122_v58  ;;  %v2759_v30 = vadd.f32 %v6202_v1, %v1442_v19  ;;  %v1126_v63 = vadd.f32 %v1125_v35, %v4041_v47  ;;  %v6208_v55 = vld [vmem:[#allocation30_spill] sm:$0xff] }
 0x13f   : > { %v1446_v54 = vadd.f32 %v1445_v39, %v4041_v47  ;;  %v2632_v7 = vadd.f32 %v6203_v46, %v1124_v12  ;;  %v2760_v8 = vadd.f32 %v6204_v22, %v1444_v16  ;;  %v1128_v59 = vadd.f32 %v1127_v20, %v4043_v48 }
 0x140   : > { %v1448_v49 = vadd.f32 %v1447_v0, %v4043_v48  ;;  %v2887_v23 = vmax.f32 %v2631_v57, 0.0  ;;  %v3015_v24 = vmax.f32 %v2759_v30, 0.0  ;;  %v2633_v61 = vadd.f32 %v6205_v37, %v1126_v63 }
 0x141   : > { %v2761_v51 = vadd.f32 %v6206_v32, %v1446_v54  ;;  %v2888_v52 = vmax.f32 %v2632_v7, 0.0  ;;  %v3016_v6 = vmax.f32 %v2760_v8, 0.0  ;;  %v2634_v34 = vadd.f32 %v6207_v3, %v1128_v59  ;;  %v6209_v7 = vld [vmem:[#allocation31_spill] sm:$0xff]  ;;  %v6210_v8 = vld [vmem:[#allocation32_spill] sm:$0xff] }
 0x142   : > { %v2762_v33 = vadd.f32 %v6208_v55, %v1448_v49  ;;  %3143 = vst [vmem:[%s4717_s14 + $0xc0] sm:$0xff] %v2887_v23  ;;  %3271 = vst [vmem:[%s4717_s14 + $0x4c0] sm:$0xff] %v3015_v24  ;;  %v2889_v29 = vmax.f32 %v2633_v61, 0.0  ;;  %v2158_v19 = vmul.f32 %v1902_v36, %v3997_v14  ;;  %v2286_v11 = vmul.f32 %v2030_v21, %v3997_v14  ;;  %v1131_v16 = vpop.f32.mrb[28].mxu0  ;;  %v1451_v35 = vpop.f32.mrb[28].mxu1  ;;  %v6211_v61 = vld [vmem:[#allocation33_spill] sm:$0xff] }
 0x143   : > { %v3017_v58 = vmax.f32 %v2761_v51, 0.0  ;;  %3144 = vst [vmem:[%s4717_s14 + $0xc8] sm:$0xff] %v2888_v52  ;;  %3272 = vst [vmem:[%s4717_s14 + $0x4c8] sm:$0xff] %v3016_v6  ;;  %v2890_v13 = vmax.f32 %v2634_v34, 0.0  ;;  %v2159_v39 = vmul.f32 %v1903_v40, %v3999_v15  ;;  %v2287_v56 = vmul.f32 %v2031_v60, %v3999_v15  ;;  %v1133_v1 = vpop.f32.mrb[29].mxu0  ;;  %v1453_v21 = vpop.f32.mrb[29].mxu1 }
 0x144   : > { %v3018_v12 = vmax.f32 %v2762_v33, 0.0  ;;  %3145 = vst [vmem:[%s4717_s14 + $0xd0] sm:$0xff] %v2889_v29  ;;  %v1132_v57 = vadd.f32 %v1131_v16, %v4041_v47  ;;  %v1452_v36 = vadd.f32 %v1451_v35, %v4041_v47  ;;  %v4978_v30 = vadd.f32 %v4034_v41, %v2158_v19  ;;  %v1135_v54 = vpop.f32.mrb[30].mxu0  ;;  %v1455_v20 = vpop.f32.mrb[30].mxu1  ;;  %v6212_v51 = vld [vmem:[#allocation34_spill] sm:$0xff]  ;;  %v1738_v34 = vld [vmem:[%s4017_s22 + $0x130] sm:$0xff] }
 0x145   : > { %3273 = vst [vmem:[%s4717_s14 + $0x4d0] sm:$0xff] %v3017_v58  ;;  %v4981_v63 = vadd.f32 %v4034_v41, %v2286_v11  ;;  %3146 = vst [vmem:[%s4717_s14 + $0xd8] sm:$0xff] %v2890_v13  ;;  %v1134_v40 = vadd.f32 %v1133_v1, %v4043_v48  ;;  %v1454_v60 = vadd.f32 %v1453_v21, %v4043_v48  ;;  %v1137_v24 = vpop.f32.mrb[31].mxu0  ;;  %v1457_v37 = vpop.f32.mrb[31].mxu1  ;;  %v1802_v55 = vld [vmem:[%s4017_s22 + $0x330] sm:$0xff]  ;;  %v6214_v11 = vld [vmem:[#allocation36_spill] sm:$0xff]  ;;  %v1904_v21 = vunpack.c.l.bf16 %v1738_v34 }
 0x146   : > { %3274 = vst [vmem:[%s4717_s14 + $0x4d8] sm:$0xff] %v3018_v12  ;;  %v4988_v0 = vadd.f32 %v4046_v50, %v2159_v39  ;;  %v4991_v46 = vadd.f32 %v4046_v50, %v2287_v56  ;;  %v2635_v22 = vadd.f32 %v6209_v7, %v1132_v57  ;;  %v2763_v59 = vadd.f32 %v6210_v8, %v1452_v36  ;;  %v6213_v58 = vld [vmem:[#allocation35_spill] sm:$0xff]  ;;  %v6215_v35 = vld [vmem:[#allocation37_spill] sm:$0xff]  ;;  %v6216_v56 = vld [vmem:[#allocation38_spill] sm:$0xff] }
 0x147   : > { %v1136_v49 = vadd.f32 %v1135_v54, %v4041_v47  ;;  %v1456_v23 = vadd.f32 %v1455_v20, %v4041_v47  ;;  %v2636_v32 = vadd.f32 %v6211_v61, %v1134_v40  ;;  %v2764_v52 = vadd.f32 %v6212_v51, %v1454_v60 }
 0x148   : > { %v1138_v6 = vadd.f32 %v1137_v24, %v4043_v48  ;;  %v1458_v3 = vadd.f32 %v1457_v37, %v4043_v48  ;;  %v2891_v33 = vmax.f32 %v2635_v22, 0.0  ;;  %v3019_v29 = vmax.f32 %v2763_v59, 0.0 }
 0x149   : > { %v2637_v19 = vadd.f32 %v6213_v58, %v1136_v49  ;;  %v2765_v13 = vadd.f32 %v6214_v11, %v1456_v23  ;;  %v2892_v12 = vmax.f32 %v2636_v32, 0.0  ;;  %v3020_v16 = vmax.f32 %v2764_v52, 0.0 }
 0x14a   : > { %v2638_v39 = vadd.f32 %v6215_v35, %v1138_v6  ;;  %v2766_v57 = vadd.f32 %v6216_v56, %v1458_v3  ;;  %3147 = vst [vmem:[%s4717_s14 + $0xe0] sm:$0xff] %v2891_v33  ;;  %3275 = vst [vmem:[%s4717_s14 + $0x4e0] sm:$0xff] %v3019_v29  ;;  %v2032_v40 = vunpack.c.l.bf16 %v1802_v55  ;;  %v1141_v20 = vpop.f32.mrb[32].mxu0  ;;  %v1461_v7 = vpop.f32.mrb[32].mxu1  ;;  %v1905_v22 = vunpack.c.h.bf16 %v1738_v34  ;;  %v6218_v29 = vld [vmem:[#allocation40_spill] sm:$0xff] }
 0x14b   : > { %v2893_v36 = vmax.f32 %v2637_v19, 0.0  ;;  %v3021_v1 = vmax.f32 %v2765_v13, 0.0  ;;  %3148 = vst [vmem:[%s4717_s14 + $0xe8] sm:$0xff] %v2892_v12  ;;  %3276 = vst [vmem:[%s4717_s14 + $0x4e8] sm:$0xff] %v3020_v16  ;;  %v2033_v8 = vunpack.c.h.bf16 %v1802_v55  ;;  %v1142_v59 = vadd.f32 %v1141_v20, %v4041_v47  ;;  %v1143_v23 = vpop.f32.mrb[33].mxu0  ;;  %v1463_v24 = vpop.f32.mrb[33].mxu1 }
 0x14c   : > { %v2894_v60 = vmax.f32 %v2638_v39, 0.0  ;;  %v3022_v54 = vmax.f32 %v2766_v57, 0.0  ;;  %v1462_v49 = vadd.f32 %v1461_v7, %v4041_v47  ;;  %v2160_v37 = vmul.f32 %v1904_v21, %v3997_v14  ;;  %v1145_v52 = vpop.f32.mrb[34].mxu0  ;;  %v1465_v6 = vpop.f32.mrb[34].mxu1  ;;  %v6217_v55 = vld [vmem:[#allocation39_spill] sm:$0xff]  ;;  %v6219_v16 = vld [vmem:[#allocation41_spill] sm:$0xff] }
 0x14d   : > { %3149 = vst [vmem:[%s4717_s14 + $0xf0] sm:$0xff] %v2893_v36  ;;  %3277 = vst [vmem:[%s4717_s14 + $0x4f0] sm:$0xff] %v3021_v1  ;;  %v2288_v61 = vmul.f32 %v2032_v40, %v3997_v14  ;;  %v1144_v32 = vadd.f32 %v1143_v23, %v4043_v48  ;;  %v1464_v51 = vadd.f32 %v1463_v24, %v4043_v48  ;;  %v1147_v13 = vpop.f32.mrb[35].mxu0  ;;  %v1467_v12 = vpop.f32.mrb[35].mxu1  ;;  %v6220_v39 = vld [vmem:[#allocation42_spill] sm:$0xff]  ;;  %v6221_v40 = vld [vmem:[#allocation43_spill] sm:$0xff] }
 0x14e   : > { %3150 = vst [vmem:[%s4717_s14 + $0xf8] sm:$0xff] %v2894_v60  ;;  %3278 = vst [vmem:[%s4717_s14 + $0x4f8] sm:$0xff] %v3022_v54  ;;  %v2161_v3 = vmul.f32 %v1905_v22, %v3999_v15  ;;  %v2289_v34 = vmul.f32 %v2033_v8, %v3999_v15  ;;  %v2639_v33 = vadd.f32 %v6217_v55, %v1142_v59  ;;  %v6222_v54 = vld [vmem:[#allocation44_spill] sm:$0xff]  ;;  %v6223_v8 = vld [vmem:[#allocation45_spill] sm:$0xff] }
 0x14f   : > { %v2767_v58 = vadd.f32 %v6218_v29, %v1462_v49  ;;  %v1146_v19 = vadd.f32 %v1145_v52, %v4041_v47  ;;  %v1466_v11 = vadd.f32 %v1465_v6, %v4041_v47  ;;  %v2640_v35 = vadd.f32 %v6219_v16, %v1144_v32  ;;  %v6224_v49 = vld [vmem:[#allocation46_spill] sm:$0xff]  ;;  %v5036_v24 = vld [vmem:[%s4017_s22 + $0x138] sm:$0xff] }
 0x150   : > { %v2768_v56 = vadd.f32 %v6220_v39, %v1464_v51  ;;  %v1148_v57 = vadd.f32 %v1147_v13, %v4043_v48  ;;  %v1468_v36 = vadd.f32 %v1467_v12, %v4043_v48  ;;  %v2895_v1 = vmax.f32 %v2639_v33, 0.0  ;;  %v5039_v32 = vld [vmem:[%s4017_s22 + $0x338] sm:$0xff] }
 0x151   : > { %v3023_v21 = vmax.f32 %v2767_v58, 0.0  ;;  %v2641_v60 = vadd.f32 %v6221_v40, %v1146_v19  ;;  %v2769_v20 = vadd.f32 %v6222_v54, %v1466_v11  ;;  %v2896_v7 = vmax.f32 %v2640_v35, 0.0 }
 0x152   : > { %v3024_v22 = vmax.f32 %v2768_v56, 0.0  ;;  %v2642_v59 = vadd.f32 %v6223_v8, %v1148_v57  ;;  %v2770_v23 = vadd.f32 %v6224_v49, %v1468_v36  ;;  %3151 = vst [vmem:[%s4717_s14 + $0x100] sm:$0xff] %v2895_v1  ;;  %v5044_v6 = vadd.f32 %v4034_v41, %v2160_v37  ;;  %v1151_v58 = vpop.f32.mrb[36].mxu0  ;;  %v1471_v19 = vpop.f32.mrb[36].mxu1 }
 0x153   : > { %3279 = vst [vmem:[%s4717_s14 + $0x500] sm:$0xff] %v3023_v21  ;;  %v2897_v51 = vmax.f32 %v2641_v60, 0.0  ;;  %v3025_v52 = vmax.f32 %v2769_v20, 0.0  ;;  %v5047_v55 = vadd.f32 %v4034_v41, %v2288_v61  ;;  %3152 = vst [vmem:[%s4717_s14 + $0x108] sm:$0xff] %v2896_v7  ;;  %v5052_v11 = vadd.f32 %v4046_v50, %v2161_v3  ;;  %v1153_v12 = vpop.f32.mrb[37].mxu0  ;;  %v1473_v16 = vpop.f32.mrb[37].mxu1 }
 0x154   : > { %3280 = vst [vmem:[%s4717_s14 + $0x508] sm:$0xff] %v3024_v22  ;;  %v2898_v33 = vmax.f32 %v2642_v59, 0.0  ;;  %v3026_v29 = vmax.f32 %v2770_v23, 0.0  ;;  %v5055_v13 = vadd.f32 %v4046_v50, %v2289_v34  ;;  %v1152_v37 = vadd.f32 %v1151_v58, %v4041_v47  ;;  %v1155_v34 = vpop.f32.mrb[38].mxu0  ;;  %v1475_v57 = vpop.f32.mrb[38].mxu1  ;;  %v6225_v21 = vld [vmem:[#allocation47_spill] sm:$0xff] }
 0x155   : > { %3153 = vst [vmem:[%s4717_s14 + $0x110] sm:$0xff] %v2897_v51  ;;  %3281 = vst [vmem:[%s4717_s14 + $0x510] sm:$0xff] %v3025_v52  ;;  %v1472_v61 = vadd.f32 %v1471_v19, %v4041_v47  ;;  %v1906_v35 = vunpack.c.l.bf16 %v5036_v24  ;;  %v2034_v39 = vunpack.c.l.bf16 %v5039_v32  ;;  %v1154_v3 = vadd.f32 %v1153_v12, %v4043_v48  ;;  %v6226_v60 = vld [vmem:[#allocation48_spill] sm:$0xff]  ;;  %v1157_v22 = vpop.f32.mrb[39].mxu0  ;;  %v1477_v8 = vpop.f32.mrb[39].mxu1  ;;  %v6227_v59 = vld [vmem:[#allocation49_spill] sm:$0xff] }
 0x156   : > { %3154 = vst [vmem:[%s4717_s14 + $0x118] sm:$0xff] %v2898_v33  ;;  %3282 = vst [vmem:[%s4717_s14 + $0x518] sm:$0xff] %v3026_v29  ;;  %v1474_v56 = vadd.f32 %v1473_v16, %v4043_v48  ;;  %v1907_v36 = vunpack.c.h.bf16 %v5036_v24  ;;  %v2035_v1 = vunpack.c.h.bf16 %v5039_v32  ;;  %v2643_v40 = vadd.f32 %v6225_v21, %v1152_v37  ;;  %v6228_v23 = vld [vmem:[#allocation50_spill] sm:$0xff]  ;;  %v6229_v29 = vld [vmem:[#allocation51_spill] sm:$0xff] }
 0x157   : > { %v2771_v54 = vadd.f32 %v6226_v60, %v1472_v61  ;;  %v1156_v20 = vadd.f32 %v1155_v34, %v4041_v47  ;;  %v1476_v7 = vadd.f32 %v1475_v57, %v4041_v47  ;;  %v2644_v49 = vadd.f32 %v6227_v59, %v1154_v3  ;;  %v6230_v19 = vld [vmem:[#allocation52_spill] sm:$0xff]  ;;  %v6231_v16 = vld [vmem:[#allocation53_spill] sm:$0xff]  ;;  %v6232_v57 = vld [vmem:[#allocation54_spill] sm:$0xff] }
 0x158   : > { %v2772_v51 = vadd.f32 %v6228_v23, %v1474_v56  ;;  %v1158_v24 = vadd.f32 %v1157_v22, %v4043_v48  ;;  %v1478_v32 = vadd.f32 %v1477_v8, %v4043_v48  ;;  %v2899_v52 = vmax.f32 %v2643_v40, 0.0 }
 0x159   : > { %v3027_v33 = vmax.f32 %v2771_v54, 0.0  ;;  %v2645_v58 = vadd.f32 %v6229_v29, %v1156_v20  ;;  %v2773_v37 = vadd.f32 %v6230_v19, %v1476_v7  ;;  %v2900_v61 = vmax.f32 %v2644_v49, 0.0 }
 0x15a   : > { %v3028_v12 = vmax.f32 %v2772_v51, 0.0  ;;  %v2646_v34 = vadd.f32 %v6231_v16, %v1158_v24  ;;  %v2774_v3 = vadd.f32 %v6232_v57, %v1478_v32  ;;  %3155 = vst [vmem:[%s4717_s14 + $0x120] sm:$0xff] %v2899_v52  ;;  %v2162_v60 = vmul.f32 %v1906_v35, %v3997_v14  ;;  %v1161_v7 = vpop.f32.mrb[40].mxu0  ;;  %v1481_v22 = vpop.f32.mrb[40].mxu1 }
 0x15b   : > { %3283 = vst [vmem:[%s4717_s14 + $0x520] sm:$0xff] %v3027_v33  ;;  %v2901_v56 = vmax.f32 %v2645_v58, 0.0  ;;  %v3029_v21 = vmax.f32 %v2773_v37, 0.0  ;;  %v2290_v40 = vmul.f32 %v2034_v39, %v3997_v14  ;;  %3156 = vst [vmem:[%s4717_s14 + $0x128] sm:$0xff] %v2900_v61  ;;  %v2163_v8 = vmul.f32 %v1907_v36, %v3999_v15  ;;  %v1163_v23 = vpop.f32.mrb[41].mxu0  ;;  %v1483_v39 = vpop.f32.mrb[41].mxu1 }
 0x15c   : > { %3284 = vst [vmem:[%s4717_s14 + $0x528] sm:$0xff] %v3028_v12  ;;  %v2902_v54 = vmax.f32 %v2646_v34, 0.0  ;;  %v3030_v20 = vmax.f32 %v2774_v3, 0.0  ;;  %v2291_v59 = vmul.f32 %v2035_v1, %v3999_v15  ;;  %v1162_v49 = vadd.f32 %v1161_v7, %v4041_v47  ;;  %v1165_v32 = vpop.f32.mrb[42].mxu0  ;;  %v1485_v52 = vpop.f32.mrb[42].mxu1  ;;  %v6235_v58 = vld [vmem:[#allocation55_spill] sm:$0xff] }
 0x15d   : > { %3157 = vst [vmem:[%s4717_s14 + $0x130] sm:$0xff] %v2901_v56  ;;  %3285 = vst [vmem:[%s4717_s14 + $0x530] sm:$0xff] %v3029_v21  ;;  %v1482_v35 = vadd.f32 %v1481_v22, %v4041_v47  ;;  %v5094_v51 = vadd.f32 %v4034_v41, %v2162_v60  ;;  %v5097_v24 = vadd.f32 %v4034_v41, %v2290_v40  ;;  %v6236_v37 = vld [vmem:[#allocation56_spill] sm:$0xff]  ;;  %v1167_v34 = vpop.f32.mrb[43].mxu0  ;;  %v1487_v57 = vpop.f32.mrb[43].mxu1  ;;  %v6237_v3 = vld [vmem:[#allocation57_spill] sm:$0xff] }
 0x15e   : > { %3158 = vst [vmem:[%s4717_s14 + $0x138] sm:$0xff] %v2902_v54  ;;  %3286 = vst [vmem:[%s4717_s14 + $0x538] sm:$0xff] %v3030_v20  ;;  %v1164_v36 = vadd.f32 %v1163_v23, %v4043_v48  ;;  %v1484_v1 = vadd.f32 %v1483_v39, %v4043_v48  ;;  %v5104_v33 = vadd.f32 %v4046_v50, %v2163_v8  ;;  %v6238_v21 = vld [vmem:[#allocation58_spill] sm:$0xff]  ;;  %v1740_v20 = vld [vmem:[%s4017_s22 + $0x140] sm:$0xff] }
 0x15f   : > { %v5107_v29 = vadd.f32 %v4046_v50, %v2291_v59  ;;  %v2647_v19 = vadd.f32 %v6235_v58, %v1162_v49  ;;  %v2775_v61 = vadd.f32 %v6236_v37, %v1482_v35  ;;  %v1166_v12 = vadd.f32 %v1165_v32, %v4041_v47  ;;  %v1804_v7 = vld [vmem:[%s4017_s22 + $0x340] sm:$0xff]  ;;  %v6239_v59 = vld [vmem:[#allocation59_spill] sm:$0xff]  ;;  %v6240_v35 = vld [vmem:[#allocation60_spill] sm:$0xff] }
 0x160   : > { %6233 = vst [vmem:[#allocation5_spill] sm:$0xff] %v5104_v33  ;;  %v1486_v16 = vadd.f32 %v1485_v52, %v4041_v47  ;;  %v2648_v56 = vadd.f32 %v6237_v3, %v1164_v36  ;;  %v2776_v60 = vadd.f32 %v6238_v21, %v1484_v1  ;;  %v1168_v40 = vadd.f32 %v1167_v34, %v4043_v48  ;;  %v6241_v52 = vld [vmem:[#allocation61_spill] sm:$0xff]  ;;  %v6242_v58 = vld [vmem:[#allocation62_spill] sm:$0xff] }
 0x161   : > { %6234 = vst [vmem:[#allocation6_spill] sm:$0xff] %v5107_v29  ;;  %v1488_v54 = vadd.f32 %v1487_v57, %v4043_v48  ;;  %v2903_v22 = vmax.f32 %v2647_v19, 0.0  ;;  %v3031_v8 = vmax.f32 %v2775_v61, 0.0  ;;  %v2649_v49 = vadd.f32 %v6239_v59, %v1166_v12  ;;  %v6250_v33 = vld [vmem:[#allocation70_spill] sm:$0xff] }
 0x162   : > { %v2777_v23 = vadd.f32 %v6240_v35, %v1486_v16  ;;  %v2904_v39 = vmax.f32 %v2648_v56, 0.0  ;;  %v3032_v32 = vmax.f32 %v2776_v60, 0.0  ;;  %v2650_v36 = vadd.f32 %v6241_v52, %v1168_v40  ;;  %v1171_v12 = vpop.f32.mrb[44].mxu0  ;;  %v1491_v16 = vpop.f32.mrb[44].mxu1 }
 0x163   : > { %v2778_v1 = vadd.f32 %v6242_v58, %v1488_v54  ;;  %3159 = vst [vmem:[%s4717_s14 + $0x140] sm:$0xff] %v2903_v22  ;;  %3287 = vst [vmem:[%s4717_s14 + $0x540] sm:$0xff] %v3031_v8  ;;  %v2905_v37 = vmax.f32 %v2649_v49, 0.0  ;;  %v1908_v57 = vunpack.c.l.bf16 %v1740_v20  ;;  %v2036_v3 = vunpack.c.l.bf16 %v1804_v7  ;;  %v1173_v54 = vpop.f32.mrb[45].mxu0  ;;  %v1493_v22 = vpop.f32.mrb[45].mxu1 }
 0x164   : > { %v3033_v34 = vmax.f32 %v2777_v23, 0.0  ;;  %3160 = vst [vmem:[%s4717_s14 + $0x148] sm:$0xff] %v2904_v39  ;;  %3288 = vst [vmem:[%s4717_s14 + $0x548] sm:$0xff] %v3032_v32  ;;  %v2906_v19 = vmax.f32 %v2650_v36, 0.0  ;;  %v1909_v56 = vunpack.c.h.bf16 %v1740_v20  ;;  %v2037_v21 = vunpack.c.h.bf16 %v1804_v7  ;;  %v1175_v20 = vpop.f32.mrb[46].mxu0  ;;  %v1495_v7 = vpop.f32.mrb[46].mxu1 }
 0x165   : > { %v3034_v61 = vmax.f32 %v2778_v1, 0.0  ;;  %3161 = vst [vmem:[%s4717_s14 + $0x150] sm:$0xff] %v2905_v37  ;;  %v1172_v60 = vadd.f32 %v1171_v12, %v4041_v47  ;;  %v1492_v40 = vadd.f32 %v1491_v16, %v4041_v47  ;;  %v2164_v8 = vmul.f32 %v1908_v57, %v3997_v14  ;;  %v6243_v32 = vld [vmem:[#allocation63_spill] sm:$0xff]  ;;  %v6244_v36 = vld [vmem:[#allocation64_spill] sm:$0xff]  ;;  %v1497_v57 = vpop.f32.mrb[47].mxu1 }
 0x166   : > { %3289 = vst [vmem:[%s4717_s14 + $0x550] sm:$0xff] %v3033_v34  ;;  %v2292_v59 = vmul.f32 %v2036_v3, %v3997_v14  ;;  %3162 = vst [vmem:[%s4717_s14 + $0x158] sm:$0xff] %v2906_v19  ;;  %v1174_v49 = vadd.f32 %v1173_v54, %v4043_v48  ;;  %v1494_v35 = vadd.f32 %v1493_v22, %v4043_v48  ;;  %v1177_v34 = vpop.f32.mrb[47].mxu0  ;;  %v6245_v3 = vld [vmem:[#allocation65_spill] sm:$0xff]  ;;  %v6248_v22 = vld [vmem:[#allocation68_spill] sm:$0xff] }
 0x167   : > { %3290 = vst [vmem:[%s4717_s14 + $0x558] sm:$0xff] %v3034_v61  ;;  %v2165_v23 = vmul.f32 %v1909_v56, %v3999_v15  ;;  %v2293_v39 = vmul.f32 %v2037_v21, %v3999_v15  ;;  %v2651_v52 = vadd.f32 %v6243_v32, %v1172_v60  ;;  %v2779_v58 = vadd.f32 %v6244_v36, %v1492_v40  ;;  %v6246_v61 = vld [vmem:[#allocation66_spill] sm:$0xff]  ;;  %v6247_v40 = vld [vmem:[#allocation67_spill] sm:$0xff]  ;;  %v6249_v36 = vld [vmem:[#allocation69_spill] sm:$0xff] }
 0x168   : > { %v1176_v1 = vadd.f32 %v1175_v20, %v4041_v47  ;;  %v1496_v37 = vadd.f32 %v1495_v7, %v4041_v47  ;;  %v2652_v19 = vadd.f32 %v6245_v3, %v1174_v49  ;;  %v2780_v12 = vadd.f32 %v6246_v61, %v1494_v35  ;;  %v5152_v3 = vld [vmem:[%s4017_s22 + $0x148] sm:$0xff] }
 0x169   : > { %v1178_v16 = vadd.f32 %v1177_v34, %v4043_v48  ;;  %v1498_v56 = vadd.f32 %v1497_v57, %v4043_v48  ;;  %v2907_v21 = vmax.f32 %v2651_v52, 0.0  ;;  %v3035_v60 = vmax.f32 %v2779_v58, 0.0  ;;  %v5155_v35 = vld [vmem:[%s4017_s22 + $0x348] sm:$0xff] }
 0x16a   : > { %v2653_v54 = vadd.f32 %v6247_v40, %v1176_v1  ;;  %v2781_v20 = vadd.f32 %v6248_v22, %v1496_v37  ;;  %v2908_v7 = vmax.f32 %v2652_v19, 0.0  ;;  %v3036_v32 = vmax.f32 %v2780_v12, 0.0  ;;  %v1181_v57 = vpop.f32.mrb[48].mxu0  ;;  %v1501_v19 = vpop.f32.mrb[48].mxu1 }
 0x16b   : > { %v2654_v29 = vadd.f32 %v6249_v36, %v1178_v16  ;;  %v2782_v49 = vadd.f32 %v6250_v33, %v1498_v56  ;;  %3163 = vst [vmem:[%s4717_s14 + $0x160] sm:$0xff] %v2907_v21  ;;  %3291 = vst [vmem:[%s4717_s14 + $0x560] sm:$0xff] %v3035_v60  ;;  %v5160_v1 = vadd.f32 %v4034_v41, %v2164_v8  ;;  %v1183_v16 = vpop.f32.mrb[49].mxu0  ;;  %v1503_v56 = vpop.f32.mrb[49].mxu1  ;;  %v1910_v21 = vunpack.c.l.bf16 %v5152_v3 }
 0x16c   : > { %v2909_v52 = vmax.f32 %v2653_v54, 0.0  ;;  %v3037_v58 = vmax.f32 %v2781_v20, 0.0  ;;  %v5163_v37 = vadd.f32 %v4034_v41, %v2292_v59  ;;  %3164 = vst [vmem:[%s4717_s14 + $0x168] sm:$0xff] %v2908_v7  ;;  %3292 = vst [vmem:[%s4717_s14 + $0x568] sm:$0xff] %v3036_v32  ;;  %v5168_v61 = vadd.f32 %v4046_v50, %v2165_v23  ;;  %v1505_v40 = vpop.f32.mrb[50].mxu1  ;;  %v6255_v20 = vld [vmem:[#allocation71_spill] sm:$0xff] }
 0x16d   : > { %6251 = vst [vmem:[#allocation7_spill] sm:$0xff] %v5160_v1  ;;  %v2910_v33 = vmax.f32 %v2654_v29, 0.0  ;;  %v3038_v34 = vmax.f32 %v2782_v49, 0.0  ;;  %v5171_v12 = vadd.f32 %v4046_v50, %v2293_v39  ;;  %v1182_v8 = vadd.f32 %v1181_v57, %v4041_v47  ;;  %v1185_v39 = vpop.f32.mrb[50].mxu0  ;;  %v6256_v32 = vld [vmem:[#allocation72_spill] sm:$0xff]  ;;  %v6262_v1 = vld [vmem:[#allocation78_spill] sm:$0xff] }
 0x16e   : > { %6252 = vst [vmem:[#allocation8_spill] sm:$0xff] %v5163_v37  ;;  %6253 = vst [vmem:[#allocation9_spill] sm:$0xff] %v5168_v61  ;;  %v1502_v59 = vadd.f32 %v1501_v19, %v4041_v47  ;;  %v2038_v29 = vunpack.c.l.bf16 %v5155_v35  ;;  %v1184_v23 = vadd.f32 %v1183_v16, %v4043_v48  ;;  %v1504_v60 = vadd.f32 %v1503_v56, %v4043_v48  ;;  %v6258_v19 = vld [vmem:[#allocation74_spill] sm:$0xff]  ;;  %v6259_v56 = vld [vmem:[#allocation75_spill] sm:$0xff] }
 0x16f   : > { %6254 = vst [vmem:[#allocation10_spill] sm:$0xff] %v5171_v12  ;;  %3165 = vst [vmem:[%s4717_s14 + $0x170] sm:$0xff] %v2909_v52  ;;  %v1911_v54 = vunpack.c.h.bf16 %v5152_v3  ;;  %v2039_v22 = vunpack.c.h.bf16 %v5155_v35  ;;  %v2655_v7 = vadd.f32 %v6255_v20, %v1182_v8  ;;  %v1186_v49 = vadd.f32 %v1185_v39, %v4041_v47  ;;  %v6260_v20 = vld [vmem:[#allocation76_spill] sm:$0xff]  ;;  %v6261_v61 = vld [vmem:[#allocation77_spill] sm:$0xff] }
 0x170   : > { %3293 = vst [vmem:[%s4717_s14 + $0x570] sm:$0xff] %v3037_v58  ;;  %3166 = vst [vmem:[%s4717_s14 + $0x178] sm:$0xff] %v2910_v33  ;;  %v2783_v36 = vadd.f32 %v6256_v32, %v1502_v59  ;;  %v1506_v52 = vadd.f32 %v1505_v40, %v4041_v47  ;;  %v1187_v58 = vpop.f32.mrb[51].mxu0  ;;  %v1507_v33 = vpop.f32.mrb[51].mxu1  ;;  %v2784_v16 = vadd.f32 %v6258_v19, %v1504_v60 }
 0x171   : > { %3294 = vst [vmem:[%s4717_s14 + $0x578] sm:$0xff] %v3038_v34  ;;  %v6257_v34 = vld [vmem:[#allocation73_spill] sm:$0xff]  ;;  %v1188_v3 = vadd.f32 %v1187_v58, %v4043_v48  ;;  %v1508_v35 = vadd.f32 %v1507_v33, %v4043_v48  ;;  %v2911_v8 = vmax.f32 %v2655_v7, 0.0  ;;  %v2657_v39 = vadd.f32 %v6259_v56, %v1186_v49 }
 0x172   : > { %v2656_v57 = vadd.f32 %v6257_v34, %v1184_v23  ;;  %v3039_v59 = vmax.f32 %v2783_v36, 0.0  ;;  %v2785_v32 = vadd.f32 %v6260_v20, %v1506_v52  ;;  %v3040_v12 = vmax.f32 %v2784_v16, 0.0  ;;  %v1191_v52 = vpop.f32.mrb[52].mxu0 }
 0x173   : > { %v2658_v37 = vadd.f32 %v6261_v61, %v1188_v3  ;;  %v2786_v23 = vadd.f32 %v6262_v1, %v1508_v35  ;;  %3167 = vst [vmem:[%s4717_s14 + $0x180] sm:$0xff] %v2911_v8  ;;  %v2913_v60 = vmax.f32 %v2657_v39, 0.0  ;;  %v2166_v33 = vmul.f32 %v1910_v21, %v3997_v14  ;;  %v1511_v61 = vpop.f32.mrb[52].mxu1  ;;  %v1193_v19 = vpop.f32.mrb[53].mxu0  ;;  %v6265_v39 = vld [vmem:[#allocation80_spill] sm:$0xff] }
 0x174   : > { %v2912_v40 = vmax.f32 %v2656_v57, 0.0  ;;  %3295 = vst [vmem:[%s4717_s14 + $0x580] sm:$0xff] %v3039_v59  ;;  %v3041_v58 = vmax.f32 %v2785_v32, 0.0  ;;  %v2294_v7 = vmul.f32 %v2038_v29, %v3997_v14  ;;  %3296 = vst [vmem:[%s4717_s14 + $0x588] sm:$0xff] %v3040_v12  ;;  %v2167_v34 = vmul.f32 %v1911_v54, %v3999_v15  ;;  %v1513_v29 = vpop.f32.mrb[53].mxu1  ;;  %v6264_v59 = vld [vmem:[#allocation79_spill] sm:$0xff] }
 0x175   : > { %v2914_v36 = vmax.f32 %v2658_v37, 0.0  ;;  %v3042_v49 = vmax.f32 %v2786_v23, 0.0  ;;  %v2295_v1 = vmul.f32 %v2039_v22, %v3999_v15  ;;  %3169 = vst [vmem:[%s4717_s14 + $0x190] sm:$0xff] %v2913_v60  ;;  %v1192_v57 = vadd.f32 %v1191_v52, %v4041_v47  ;;  %v1195_v22 = vpop.f32.mrb[54].mxu0  ;;  %v1515_v3 = vpop.f32.mrb[54].mxu1 }
 0x176   : > { %3168 = vst [vmem:[%s4717_s14 + $0x188] sm:$0xff] %v2912_v40  ;;  %3297 = vst [vmem:[%s4717_s14 + $0x590] sm:$0xff] %v3041_v58  ;;  %v1512_v21 = vadd.f32 %v1511_v61, %v4041_v47  ;;  %v5210_v16 = vadd.f32 %v4034_v41, %v2166_v33  ;;  %v5213_v37 = vadd.f32 %v4034_v41, %v2294_v7  ;;  %v1197_v23 = vpop.f32.mrb[55].mxu0  ;;  %v1517_v60 = vpop.f32.mrb[55].mxu1  ;;  %v6266_v58 = vld [vmem:[#allocation81_spill] sm:$0xff]  ;;  %v6267_v7 = vld [vmem:[#allocation82_spill] sm:$0xff] }
 0x177   : > { %3170 = vst [vmem:[%s4717_s14 + $0x198] sm:$0xff] %v2914_v36  ;;  %3298 = vst [vmem:[%s4717_s14 + $0x598] sm:$0xff] %v3042_v49  ;;  %v1194_v12 = vadd.f32 %v1193_v19, %v4043_v48  ;;  %v1514_v54 = vadd.f32 %v1513_v29, %v4043_v48  ;;  %v5220_v35 = vadd.f32 %v4046_v50, %v2167_v34  ;;  %v1742_v61 = vld [vmem:[%s4017_s22 + $0x150] sm:$0xff]  ;;  %v6269_v29 = vld [vmem:[#allocation84_spill] sm:$0xff] }
 0x178   : > { %v5223_v8 = vadd.f32 %v4046_v50, %v2295_v1  ;;  %v2659_v56 = vadd.f32 %v6264_v59, %v1192_v57  ;;  %v2787_v20 = vadd.f32 %v6265_v39, %v1512_v21  ;;  %v1196_v32 = vadd.f32 %v1195_v22, %v4041_v47  ;;  %v1806_v34 = vld [vmem:[%s4017_s22 + $0x350] sm:$0xff]  ;;  %v6270_v39 = vld [vmem:[#allocation85_spill] sm:$0xff] }
 0x179   : > { %v1516_v40 = vadd.f32 %v1515_v3, %v4041_v47  ;;  %v2660_v33 = vadd.f32 %v6266_v58, %v1194_v12  ;;  %v2788_v36 = vadd.f32 %v6267_v7, %v1514_v54  ;;  %v1198_v49 = vadd.f32 %v1197_v23, %v4043_v48  ;;  %v6268_v21 = vld [vmem:[#allocation83_spill] sm:$0xff]  ;;  %v6271_v58 = vld [vmem:[#allocation86_spill] sm:$0xff] }
 0x17a   : > { %6263 = vst [vmem:[#allocation11_spill] sm:$0xff] %v5223_v8  ;;  %v1518_v52 = vadd.f32 %v1517_v60, %v4043_v48  ;;  %v2915_v1 = vmax.f32 %v2659_v56, 0.0  ;;  %v3043_v57 = vmax.f32 %v2787_v20, 0.0  ;;  %v2661_v19 = vadd.f32 %v6268_v21, %v1196_v32  ;;  %v1201_v32 = vpop.f32.mrb[56].mxu0 }
 0x17b   : > { %v2789_v22 = vadd.f32 %v6269_v29, %v1516_v40  ;;  %v2916_v3 = vmax.f32 %v2660_v33, 0.0  ;;  %v3044_v59 = vmax.f32 %v2788_v36, 0.0  ;;  %v2662_v12 = vadd.f32 %v6270_v39, %v1198_v49  ;;  %v1521_v40 = vpop.f32.mrb[56].mxu1 }
 0x17c   : > { %v2790_v54 = vadd.f32 %v6271_v58, %v1518_v52  ;;  %3171 = vst [vmem:[%s4717_s14 + $0x1a0] sm:$0xff] %v2915_v1  ;;  %3299 = vst [vmem:[%s4717_s14 + $0x5a0] sm:$0xff] %v3043_v57  ;;  %v2917_v23 = vmax.f32 %v2661_v19, 0.0  ;;  %v1912_v7 = vunpack.c.l.bf16 %v1742_v61  ;;  %v2040_v8 = vunpack.c.l.bf16 %v1806_v34  ;;  %v1203_v1 = vpop.f32.mrb[57].mxu0  ;;  %v1523_v57 = vpop.f32.mrb[57].mxu1 }
 0x17d   : > { %v3045_v60 = vmax.f32 %v2789_v22, 0.0  ;;  %3172 = vst [vmem:[%s4717_s14 + $0x1a8] sm:$0xff] %v2916_v3  ;;  %3300 = vst [vmem:[%s4717_s14 + $0x5a8] sm:$0xff] %v3044_v59  ;;  %v2918_v56 = vmax.f32 %v2662_v12, 0.0  ;;  %v1913_v33 = vunpack.c.h.bf16 %v1742_v61  ;;  %v2041_v36 = vunpack.c.h.bf16 %v1806_v34  ;;  %v1205_v61 = vpop.f32.mrb[58].mxu0  ;;  %v1525_v34 = vpop.f32.mrb[58].mxu1 }
 0x17e   : > { %v3046_v20 = vmax.f32 %v2790_v54, 0.0  ;;  %3173 = vst [vmem:[%s4717_s14 + $0x1b0] sm:$0xff] %v2917_v23  ;;  %v1202_v49 = vadd.f32 %v1201_v32, %v4041_v47  ;;  %v1522_v52 = vadd.f32 %v1521_v40, %v4041_v47  ;;  %v2168_v21 = vmul.f32 %v1912_v7, %v3997_v14  ;;  %v1207_v54 = vpop.f32.mrb[59].mxu0  ;;  %v1527_v23 = vpop.f32.mrb[59].mxu1  ;;  %v6272_v7 = vld [vmem:[#allocation87_spill] sm:$0xff]  ;;  %v6273_v40 = vld [vmem:[#allocation88_spill] sm:$0xff] }
 0x17f   : > { %3301 = vst [vmem:[%s4717_s14 + $0x5b0] sm:$0xff] %v3045_v60  ;;  %v2296_v19 = vmul.f32 %v2040_v8, %v3997_v14  ;;  %3174 = vst [vmem:[%s4717_s14 + $0x1b8] sm:$0xff] %v2918_v56  ;;  %v1204_v29 = vadd.f32 %v1203_v1, %v4043_v48  ;;  %v1524_v22 = vadd.f32 %v1523_v57, %v4043_v48  ;;  %v6275_v57 = vld [vmem:[#allocation90_spill] sm:$0xff] }
 0x180   : > { %3302 = vst [vmem:[%s4717_s14 + $0x5b8] sm:$0xff] %v3046_v20  ;;  %v2169_v3 = vmul.f32 %v1913_v33, %v3999_v15  ;;  %v2297_v59 = vmul.f32 %v2041_v36, %v3999_v15  ;;  %v2663_v39 = vadd.f32 %v4610_v4, %v1202_v49  ;;  %v2791_v12 = vadd.f32 %v4613_v5, %v1522_v52  ;;  %v6274_v36 = vld [vmem:[#allocation89_spill] sm:$0xff] }
 0x181   : > { %v1206_v58 = vadd.f32 %v1205_v61, %v4041_v47  ;;  %v1526_v8 = vadd.f32 %v1525_v34, %v4041_v47  ;;  %v2664_v60 = vadd.f32 %v4618_v42, %v1204_v29  ;;  %v2792_v56 = vadd.f32 %v6272_v7, %v1524_v22  ;;  %v6276_v34 = vld [vmem:[#allocation91_spill] sm:$0xff]  ;;  %v5268_v29 = vld [vmem:[%s4017_s22 + $0x158] sm:$0xff] }
 0x182   : > { %v1208_v20 = vadd.f32 %v1207_v54, %v4043_v48  ;;  %v1528_v4 = vadd.f32 %v1527_v23, %v4043_v48  ;;  %v2919_v32 = vmax.f32 %v2663_v39, 0.0  ;;  %v3047_v5 = vmax.f32 %v2791_v12, 0.0  ;;  %v5271_v22 = vld [vmem:[%s4017_s22 + $0x358] sm:$0xff]  ;;  %v1531_v7 = vpop.f32.mrb[60].mxu1 }
 0x183   : > { %v2665_v33 = vadd.f32 %v6273_v40, %v1206_v58  ;;  %v2793_v49 = vadd.f32 %v6274_v36, %v1526_v8  ;;  %v2920_v52 = vmax.f32 %v2664_v60, 0.0  ;;  %v3048_v1 = vmax.f32 %v2792_v56, 0.0  ;;  %v1211_v60 = vpop.f32.mrb[60].mxu0 }
 0x184   : > { %v2666_v61 = vadd.f32 %v6275_v57, %v1208_v20  ;;  %v2794_v42 = vadd.f32 %v6276_v34, %v1528_v4  ;;  %3175 = vst [vmem:[%s4717_s14 + $0x1c0] sm:$0xff] %v2919_v32  ;;  %3303 = vst [vmem:[%s4717_s14 + $0x5c0] sm:$0xff] %v3047_v5  ;;  %v5276_v58 = vadd.f32 %v4034_v41, %v2168_v21  ;;  %v1213_v4 = vpop.f32.mrb[61].mxu0  ;;  %v1533_v32 = vpop.f32.mrb[61].mxu1  ;;  %v1914_v5 = vunpack.c.l.bf16 %v5268_v29 }
 0x185   : > { %v2921_v39 = vmax.f32 %v2665_v33, 0.0  ;;  %v3049_v12 = vmax.f32 %v2793_v49, 0.0  ;;  %v5279_v8 = vadd.f32 %v4034_v41, %v2296_v19  ;;  %3176 = vst [vmem:[%s4717_s14 + $0x1c8] sm:$0xff] %v2920_v52  ;;  %3304 = vst [vmem:[%s4717_s14 + $0x5c8] sm:$0xff] %v3048_v1  ;;  %v5284_v56 = vadd.f32 %v4046_v50, %v2169_v3  ;;  %v1535_v36 = vpop.f32.mrb[62].mxu1  ;;  %v6281_v1 = vld [vmem:[#allocation92_spill] sm:$0xff] }
 0x186   : > { %6277 = vst [vmem:[#allocation12_spill] sm:$0xff] %v5276_v58  ;;  %v2922_v54 = vmax.f32 %v2666_v61, 0.0  ;;  %v3050_v23 = vmax.f32 %v2794_v42, 0.0  ;;  %v5287_v20 = vadd.f32 %v4046_v50, %v2297_v59  ;;  %v1212_v21 = vadd.f32 %v1211_v60, %v4041_v47  ;;  %v1215_v59 = vpop.f32.mrb[62].mxu0  ;;  %v6282_v61 = vld [vmem:[#allocation93_spill] sm:$0xff]  ;;  %v6288_v58 = vld [vmem:[#allocation99_spill] sm:$0xff] }
 0x187   : > { %6278 = vst [vmem:[#allocation13_spill] sm:$0xff] %v5279_v8  ;;  %6279 = vst [vmem:[#allocation14_spill] sm:$0xff] %v5284_v56  ;;  %v1532_v19 = vadd.f32 %v1531_v7, %v4041_v47  ;;  %v2042_v40 = vunpack.c.l.bf16 %v5271_v22  ;;  %v1214_v3 = vadd.f32 %v1213_v4, %v4043_v48  ;;  %v1534_v33 = vadd.f32 %v1533_v32, %v4043_v48  ;;  %v6284_v7 = vld [vmem:[#allocation95_spill] sm:$0xff]  ;;  %v6285_v32 = vld [vmem:[#allocation96_spill] sm:$0xff] }
 0x188   : > { %6280 = vst [vmem:[#allocation15_spill] sm:$0xff] %v5287_v20  ;;  %3177 = vst [vmem:[%s4717_s14 + $0x1d0] sm:$0xff] %v2921_v39  ;;  %v1915_v49 = vunpack.c.h.bf16 %v5268_v29  ;;  %v2043_v52 = vunpack.c.h.bf16 %v5271_v22  ;;  %v2667_v57 = vadd.f32 %v6281_v1, %v1212_v21  ;;  %v1216_v42 = vadd.f32 %v1215_v59, %v4041_v47  ;;  %v6286_v1 = vld [vmem:[#allocation97_spill] sm:$0xff]  ;;  %v6287_v56 = vld [vmem:[#allocation98_spill] sm:$0xff] }
 0x189   : > { %3305 = vst [vmem:[%s4717_s14 + $0x5d0] sm:$0xff] %v3049_v12  ;;  %3178 = vst [vmem:[%s4717_s14 + $0x1d8] sm:$0xff] %v2922_v54  ;;  %v2795_v34 = vadd.f32 %v6282_v61, %v1532_v19  ;;  %v1536_v39 = vadd.f32 %v1535_v36, %v4041_v47  ;;  %v1217_v12 = vpop.f32.mrb[63].mxu0  ;;  %v1537_v54 = vpop.f32.mrb[63].mxu1  ;;  %v2796_v4 = vadd.f32 %v6284_v7, %v1534_v33 }
 0x18a   : > { %3306 = vst [vmem:[%s4717_s14 + $0x5d8] sm:$0xff] %v3050_v23  ;;  %v6283_v23 = vld [vmem:[#allocation94_spill] sm:$0xff]  ;;  %v1218_v29 = vadd.f32 %v1217_v12, %v4043_v48  ;;  %v1538_v22 = vadd.f32 %v1537_v54, %v4043_v48  ;;  %v2923_v21 = vmax.f32 %v2667_v57, 0.0  ;;  %v2669_v59 = vadd.f32 %v6285_v32, %v1216_v42 }
 0x18b   : > { %v2668_v60 = vadd.f32 %v6283_v23, %v1214_v3  ;;  %v3051_v19 = vmax.f32 %v2795_v34, 0.0  ;;  %v2797_v61 = vadd.f32 %v6286_v1, %v1536_v39  ;;  %v3052_v20 = vmax.f32 %v2796_v4, 0.0  ;;  %v1221_v39 = vpop.f32.mrb[64].mxu0 }
 0x18c   : > { %v2670_v8 = vadd.f32 %v6287_v56, %v1218_v29  ;;  %v2798_v3 = vadd.f32 %v6288_v58, %v1538_v22  ;;  %3179 = vst [vmem:[%s4717_s14 + $0x1e0] sm:$0xff] %v2923_v21  ;;  %v2925_v33 = vmax.f32 %v2669_v59, 0.0  ;;  %v2170_v54 = vmul.f32 %v1914_v5, %v3997_v14  ;;  %v1541_v56 = vpop.f32.mrb[64].mxu1  ;;  %v1223_v7 = vpop.f32.mrb[65].mxu0  ;;  %v6290_v59 = vld [vmem:[#allocation101_spill] sm:$0xff] }
 0x18d   : > { %v2924_v36 = vmax.f32 %v2668_v60, 0.0  ;;  %3307 = vst [vmem:[%s4717_s14 + $0x5e0] sm:$0xff] %v3051_v19  ;;  %v3053_v12 = vmax.f32 %v2797_v61, 0.0  ;;  %v2298_v57 = vmul.f32 %v2042_v40, %v3997_v14  ;;  %3308 = vst [vmem:[%s4717_s14 + $0x5e8] sm:$0xff] %v3052_v20  ;;  %v2171_v23 = vmul.f32 %v1915_v49, %v3999_v15  ;;  %v1543_v40 = vpop.f32.mrb[65].mxu1  ;;  %v6289_v19 = vld [vmem:[#allocation100_spill] sm:$0xff] }
 0x18e   : > { %v2926_v34 = vmax.f32 %v2670_v8, 0.0  ;;  %v3054_v42 = vmax.f32 %v2798_v3, 0.0  ;;  %v2299_v58 = vmul.f32 %v2043_v52, %v3999_v15  ;;  %3181 = vst [vmem:[%s4717_s14 + $0x1f0] sm:$0xff] %v2925_v33  ;;  %v1222_v60 = vadd.f32 %v1221_v39, %v4041_v47  ;;  %v1225_v52 = vpop.f32.mrb[66].mxu0  ;;  %v1545_v29 = vpop.f32.mrb[66].mxu1 }
 0x18f   : > { %3180 = vst [vmem:[%s4717_s14 + $0x1e8] sm:$0xff] %v2924_v36  ;;  %3309 = vst [vmem:[%s4717_s14 + $0x5f0] sm:$0xff] %v3053_v12  ;;  %v1542_v5 = vadd.f32 %v1541_v56, %v4041_v47  ;;  %v5326_v4 = vadd.f32 %v4034_v41, %v2170_v54  ;;  %v5329_v8 = vadd.f32 %v4034_v41, %v2298_v57  ;;  %v1227_v3 = vpop.f32.mrb[67].mxu0  ;;  %v1547_v33 = vpop.f32.mrb[67].mxu1  ;;  %v6291_v12 = vld [vmem:[#allocation102_spill] sm:$0xff]  ;;  %v6292_v57 = vld [vmem:[#allocation103_spill] sm:$0xff] }
 0x190   : > { %3182 = vst [vmem:[%s4717_s14 + $0x1f8] sm:$0xff] %v2926_v34  ;;  %3310 = vst [vmem:[%s4717_s14 + $0x5f8] sm:$0xff] %v3054_v42  ;;  %v1224_v20 = vadd.f32 %v1223_v7, %v4043_v48  ;;  %v1544_v49 = vadd.f32 %v1543_v40, %v4043_v48  ;;  %v5336_v22 = vadd.f32 %v4046_v50, %v2171_v23  ;;  %v1744_v56 = vld [vmem:[%s4017_s22 + $0x160] sm:$0xff] }
 0x191   : > { %v5339_v21 = vadd.f32 %v4046_v50, %v2299_v58  ;;  %v2671_v32 = vadd.f32 %v6289_v19, %v1222_v60  ;;  %v2799_v1 = vadd.f32 %v6290_v59, %v1542_v5  ;;  %v1226_v61 = vadd.f32 %v1225_v52, %v4041_v47  ;;  %v1808_v23 = vld [vmem:[%s4017_s22 + $0x360] sm:$0xff] }
 0x192   : > { %v1546_v36 = vadd.f32 %v1545_v29, %v4041_v47  ;;  %v2672_v54 = vadd.f32 %v6291_v12, %v1224_v20  ;;  %v2800_v34 = vadd.f32 %v6292_v57, %v1544_v49  ;;  %v1228_v42 = vadd.f32 %v1227_v3, %v4043_v48 }
 0x193   : > { %v1548_v39 = vadd.f32 %v1547_v33, %v4043_v48  ;;  %v2927_v58 = vmax.f32 %v2671_v32, 0.0  ;;  %v3055_v60 = vmax.f32 %v2799_v1, 0.0  ;;  %v2673_v5 = vadd.f32 %v4734_v44, %v1226_v61  ;;  %v1231_v32 = vpop.f32.mrb[68].mxu0  ;;  %v1551_v1 = vpop.f32.mrb[68].mxu1 }
 0x194   : > { %v2801_v7 = vadd.f32 %v4737_v18, %v1546_v36  ;;  %v2928_v40 = vmax.f32 %v2672_v54, 0.0  ;;  %v3056_v52 = vmax.f32 %v2800_v34, 0.0  ;;  %v2674_v20 = vadd.f32 %v4744_v2, %v1228_v42  ;;  %v1233_v33 = vpop.f32.mrb[69].mxu0  ;;  %v1553_v12 = vpop.f32.mrb[69].mxu1 }
 0x195   : > { %v2802_v49 = vadd.f32 %v4747_v28, %v1548_v39  ;;  %3183 = vst [vmem:[%s4717_s14 + $0x200] sm:$0xff] %v2927_v58  ;;  %3311 = vst [vmem:[%s4717_s14 + $0x600] sm:$0xff] %v3055_v60  ;;  %v2929_v29 = vmax.f32 %v2673_v5, 0.0  ;;  %v1916_v59 = vunpack.c.l.bf16 %v1744_v56  ;;  %v2044_v3 = vunpack.c.l.bf16 %v1808_v23  ;;  %v1235_v39 = vpop.f32.mrb[70].mxu0 }
 0x196   : > { %v3057_v19 = vmax.f32 %v2801_v7, 0.0  ;;  %3184 = vst [vmem:[%s4717_s14 + $0x208] sm:$0xff] %v2928_v40  ;;  %3312 = vst [vmem:[%s4717_s14 + $0x608] sm:$0xff] %v3056_v52  ;;  %v2930_v44 = vmax.f32 %v2674_v20, 0.0  ;;  %v1917_v61 = vunpack.c.h.bf16 %v1744_v56  ;;  %v2045_v2 = vunpack.c.h.bf16 %v1808_v23  ;;  %v1555_v56 = vpop.f32.mrb[70].mxu1  ;;  %v1237_v52 = vpop.f32.mrb[71].mxu0 }
 0x197   : > { %v3058_v18 = vmax.f32 %v2802_v49, 0.0  ;;  %3185 = vst [vmem:[%s4717_s14 + $0x210] sm:$0xff] %v2929_v29  ;;  %v1232_v28 = vadd.f32 %v1231_v32, %v4041_v47  ;;  %v1552_v36 = vadd.f32 %v1551_v1, %v4041_v47  ;;  %v2172_v54 = vmul.f32 %v1916_v59, %v3997_v14  ;;  %v1557_v20 = vpop.f32.mrb[71].mxu1 }
 0x198   : > { %3313 = vst [vmem:[%s4717_s14 + $0x610] sm:$0xff] %v3057_v19  ;;  %v2300_v57 = vmul.f32 %v2044_v3, %v3997_v14  ;;  %3186 = vst [vmem:[%s4717_s14 + $0x218] sm:$0xff] %v2930_v44  ;;  %v1234_v34 = vadd.f32 %v1233_v33, %v4043_v48  ;;  %v1554_v42 = vadd.f32 %v1553_v12, %v4043_v48 }
 0x199   : > { %3314 = vst [vmem:[%s4717_s14 + $0x618] sm:$0xff] %v3058_v18  ;;  %v2173_v23 = vmul.f32 %v1917_v61, %v3999_v15  ;;  %v2301_v58 = vmul.f32 %v2045_v2, %v3999_v15  ;;  %v2675_v60 = vadd.f32 %v4806_v25, %v1232_v28  ;;  %v2803_v5 = vadd.f32 %v4809_v26, %v1552_v36  ;;  %v5384_v61 = vld [vmem:[%s4017_s22 + $0x168] sm:$0xff] }
 0x19a   : > { %v1236_v7 = vadd.f32 %v1235_v39, %v4041_v47  ;;  %v1556_v40 = vadd.f32 %v1555_v56, %v4041_v47  ;;  %v2676_v49 = vadd.f32 %v4814_v17, %v1234_v34  ;;  %v2804_v29 = vadd.f32 %v4817_v45, %v1554_v42  ;;  %v5387_v45 = vld [vmem:[%s4017_s22 + $0x368] sm:$0xff]  ;;  %v1241_v36 = vpop.f32.mrb[72].mxu0  ;;  %v1561_v33 = vpop.f32.mrb[72].mxu1 }
 0x19b   : > { %v1238_v19 = vadd.f32 %v1237_v52, %v4043_v48  ;;  %v1558_v25 = vadd.f32 %v1557_v20, %v4043_v48  ;;  %v2931_v59 = vmax.f32 %v2675_v60, 0.0  ;;  %v3059_v26 = vmax.f32 %v2803_v5, 0.0  ;;  %v1243_v42 = vpop.f32.mrb[73].mxu0  ;;  %v1563_v39 = vpop.f32.mrb[73].mxu1 }
 0x19c   : > { %v2677_v3 = vadd.f32 %v4862_v38, %v1236_v7  ;;  %v2805_v44 = vadd.f32 %v4865_v27, %v1556_v40  ;;  %v2932_v18 = vmax.f32 %v2676_v49, 0.0  ;;  %v3060_v32 = vmax.f32 %v2804_v29, 0.0  ;;  %v1565_v7 = vpop.f32.mrb[74].mxu1 }
 0x19d   : > { %v2678_v1 = vadd.f32 %v4872_v62, %v1238_v19  ;;  %v2806_v17 = vadd.f32 %v4875_v53, %v1558_v25  ;;  %3187 = vst [vmem:[%s4717_s14 + $0x220] sm:$0xff] %v2931_v59  ;;  %3315 = vst [vmem:[%s4717_s14 + $0x620] sm:$0xff] %v3059_v26  ;;  %v5392_v38 = vadd.f32 %v4034_v41, %v2172_v54  ;;  %v1918_v56 = vunpack.c.l.bf16 %v5384_v61  ;;  %v1567_v59 = vpop.f32.mrb[75].mxu1 }
 0x19e   : > { %v2933_v2 = vmax.f32 %v2677_v3, 0.0  ;;  %v3061_v28 = vmax.f32 %v2805_v44, 0.0  ;;  %v5395_v27 = vadd.f32 %v4034_v41, %v2300_v57  ;;  %3188 = vst [vmem:[%s4717_s14 + $0x228] sm:$0xff] %v2932_v18  ;;  %3316 = vst [vmem:[%s4717_s14 + $0x628] sm:$0xff] %v3060_v32  ;;  %v5400_v12 = vadd.f32 %v4046_v50, %v2173_v23 }
 0x19f   : > { %v2934_v62 = vmax.f32 %v2678_v1, 0.0  ;;  %v3062_v53 = vmax.f32 %v2806_v17, 0.0  ;;  %v5403_v34 = vadd.f32 %v4046_v50, %v2301_v58  ;;  %v1242_v54 = vadd.f32 %v1241_v36, %v4041_v47  ;;  %v1245_v58 = vpop.f32.mrb[74].mxu0 }
 0x1a0   : > { %3189 = vst [vmem:[%s4717_s14 + $0x230] sm:$0xff] %v2933_v2  ;;  %3317 = vst [vmem:[%s4717_s14 + $0x630] sm:$0xff] %v3061_v28  ;;  %v1562_v57 = vadd.f32 %v1561_v33, %v4041_v47  ;;  %v2046_v60 = vunpack.c.l.bf16 %v5387_v45  ;;  %v1244_v23 = vadd.f32 %v1243_v42, %v4043_v48  ;;  %v1564_v5 = vadd.f32 %v1563_v39, %v4043_v48  ;;  %v1247_v25 = vpop.f32.mrb[75].mxu0 }
 0x1a1   : > { %3190 = vst [vmem:[%s4717_s14 + $0x238] sm:$0xff] %v2934_v62  ;;  %3318 = vst [vmem:[%s4717_s14 + $0x638] sm:$0xff] %v3062_v53  ;;  %v1919_v40 = vunpack.c.h.bf16 %v5384_v61  ;;  %v2047_v52 = vunpack.c.h.bf16 %v5387_v45  ;;  %v2679_v20 = vadd.f32 %v4928_v43, %v1242_v54  ;;  %v1246_v29 = vadd.f32 %v1245_v58, %v4041_v47 }
 0x1a2   : > { %v2807_v49 = vadd.f32 %v4931_v31, %v1562_v57  ;;  %v1566_v19 = vadd.f32 %v1565_v7, %v4041_v47  ;;  %v2680_v26 = vadd.f32 %v4936_v9, %v1244_v23  ;;  %v2808_v3 = vadd.f32 %v4939_v10, %v1564_v5  ;;  %v1251_v53 = vpop.f32.mrb[76].mxu0 }
 0x1a3   : > { %v1248_v44 = vadd.f32 %v1247_v25, %v4043_v48  ;;  %v1568_v18 = vadd.f32 %v1567_v59, %v4043_v48  ;;  %v2935_v43 = vmax.f32 %v2679_v20, 0.0  ;;  %v2681_v32 = vadd.f32 %v4978_v30, %v1246_v29  ;;  %v1253_v57 = vpop.f32.mrb[77].mxu0 }
 0x1a4   : > { %v3063_v31 = vmax.f32 %v2807_v49, 0.0  ;;  %v2809_v1 = vadd.f32 %v4981_v63, %v1566_v19  ;;  %v2936_v17 = vmax.f32 %v2680_v26, 0.0  ;;  %v3064_v61 = vmax.f32 %v2808_v3, 0.0  ;;  %v1255_v5 = vpop.f32.mrb[78].mxu0 }
 0x1a5   : > { %v2682_v45 = vadd.f32 %v4988_v0, %v1248_v44  ;;  %v2810_v9 = vadd.f32 %v4991_v46, %v1568_v18  ;;  %3191 = vst [vmem:[%s4717_s14 + $0x240] sm:$0xff] %v2935_v43  ;;  %v2937_v10 = vmax.f32 %v2681_v32, 0.0  ;;  %v2174_v28 = vmul.f32 %v1918_v56, %v3997_v14  ;;  %v1571_v0 = vpop.f32.mrb[76].mxu1  ;;  %v1257_v19 = vpop.f32.mrb[79].mxu0  ;;  %v1746_v18 = vld [vmem:[%s4017_s22 + $0x170] sm:$0xff] }
 0x1a6   : > { %3319 = vst [vmem:[%s4717_s14 + $0x640] sm:$0xff] %v3063_v31  ;;  %v3065_v2 = vmax.f32 %v2809_v1, 0.0  ;;  %v2302_v62 = vmul.f32 %v2046_v60, %v3997_v14  ;;  %3192 = vst [vmem:[%s4717_s14 + $0x248] sm:$0xff] %v2936_v17  ;;  %v2175_v36 = vmul.f32 %v1919_v40, %v3999_v15  ;;  %v2303_v46 = vmul.f32 %v2047_v52, %v3999_v15  ;;  %v1573_v42 = vpop.f32.mrb[77].mxu1 }
 0x1a7   : > { %3320 = vst [vmem:[%s4717_s14 + $0x648] sm:$0xff] %v3064_v61  ;;  %v2938_v30 = vmax.f32 %v2682_v45, 0.0  ;;  %v3066_v63 = vmax.f32 %v2810_v9, 0.0  ;;  %3193 = vst [vmem:[%s4717_s14 + $0x250] sm:$0xff] %v2937_v10  ;;  %v1252_v33 = vadd.f32 %v1251_v53, %v4041_v47  ;;  %v1572_v54 = vadd.f32 %v1571_v0, %v4041_v47  ;;  %v1575_v58 = vpop.f32.mrb[78].mxu1  ;;  %v6293_v61 = vld [vmem:[#allocation5_spill] sm:$0xff] }
 0x1a8   : > { %3321 = vst [vmem:[%s4717_s14 + $0x650] sm:$0xff] %v3065_v2  ;;  %v5442_v39 = vadd.f32 %v4034_v41, %v2174_v28  ;;  %v5445_v56 = vadd.f32 %v4034_v41, %v2302_v62  ;;  %v1254_v60 = vadd.f32 %v1253_v57, %v4043_v48  ;;  %v1574_v23 = vadd.f32 %v1573_v42, %v4043_v48  ;;  %v1577_v25 = vpop.f32.mrb[79].mxu1  ;;  %v6294_v45 = vld [vmem:[#allocation6_spill] sm:$0xff] }
 0x1a9   : > { %3194 = vst [vmem:[%s4717_s14 + $0x258] sm:$0xff] %v2938_v30  ;;  %3322 = vst [vmem:[%s4717_s14 + $0x658] sm:$0xff] %v3066_v63  ;;  %v5452_v7 = vadd.f32 %v4046_v50, %v2175_v36  ;;  %v5455_v40 = vadd.f32 %v4046_v50, %v2303_v46  ;;  %v2683_v52 = vadd.f32 %v5044_v6, %v1252_v33  ;;  %v1810_v6 = vld [vmem:[%s4017_s22 + $0x370] sm:$0xff]  ;;  %v1920_v2 = vunpack.c.l.bf16 %v1746_v18 }
 0x1aa   : > { %v2811_v20 = vadd.f32 %v5047_v55, %v1572_v54  ;;  %v1256_v49 = vadd.f32 %v1255_v5, %v4041_v47  ;;  %v1576_v29 = vadd.f32 %v1575_v58, %v4041_v47  ;;  %v2684_v59 = vadd.f32 %v5052_v11, %v1254_v60  ;;  %v1261_v62 = vpop.f32.mrb[80].mxu0  ;;  %v1581_v30 = vpop.f32.mrb[80].mxu1 }
 0x1ab   : > { %v2812_v26 = vadd.f32 %v5055_v13, %v1574_v23  ;;  %v1258_v3 = vadd.f32 %v1257_v19, %v4043_v48  ;;  %v1578_v44 = vadd.f32 %v1577_v25, %v4043_v48  ;;  %v2939_v55 = vmax.f32 %v2683_v52, 0.0  ;;  %v1263_v46 = vpop.f32.mrb[81].mxu0  ;;  %v1583_v33 = vpop.f32.mrb[81].mxu1 }
 0x1ac   : > { %v3067_v43 = vmax.f32 %v2811_v20, 0.0  ;;  %v2685_v31 = vadd.f32 %v5094_v51, %v1256_v49  ;;  %v2813_v32 = vadd.f32 %v5097_v24, %v1576_v29  ;;  %v2940_v1 = vmax.f32 %v2684_v59, 0.0  ;;  %v1265_v23 = vpop.f32.mrb[82].mxu0  ;;  %v1585_v5 = vpop.f32.mrb[82].mxu1  ;;  %v6295_v20 = vld [vmem:[#allocation7_spill] sm:$0xff]  ;;  %v6296_v29 = vld [vmem:[#allocation8_spill] sm:$0xff] }
 0x1ad   : > { %v3068_v17 = vmax.f32 %v2812_v26, 0.0  ;;  %v2686_v11 = vadd.f32 %v6293_v61, %v1258_v3  ;;  %v2814_v13 = vadd.f32 %v6294_v45, %v1578_v44  ;;  %3195 = vst [vmem:[%s4717_s14 + $0x260] sm:$0xff] %v2939_v55  ;;  %v2048_v28 = vunpack.c.l.bf16 %v1810_v6  ;;  %v1267_v26 = vpop.f32.mrb[83].mxu0  ;;  %v1587_v3 = vpop.f32.mrb[83].mxu1  ;;  %v6297_v44 = vld [vmem:[#allocation9_spill] sm:$0xff] }
 0x1ae   : > { %3323 = vst [vmem:[%s4717_s14 + $0x660] sm:$0xff] %v3067_v43  ;;  %v2941_v9 = vmax.f32 %v2685_v31, 0.0  ;;  %v3069_v10 = vmax.f32 %v2813_v32, 0.0  ;;  %3196 = vst [vmem:[%s4717_s14 + $0x268] sm:$0xff] %v2940_v1  ;;  %v1921_v63 = vunpack.c.h.bf16 %v1746_v18  ;;  %v2049_v53 = vunpack.c.h.bf16 %v1810_v6  ;;  %v6298_v6 = vld [vmem:[#allocation10_spill] sm:$0xff] }
 0x1af   : > { %3324 = vst [vmem:[%s4717_s14 + $0x668] sm:$0xff] %v3068_v17  ;;  %v2942_v51 = vmax.f32 %v2686_v11, 0.0  ;;  %v3070_v24 = vmax.f32 %v2814_v13, 0.0  ;;  %v1262_v0 = vadd.f32 %v1261_v62, %v4041_v47  ;;  %v1582_v36 = vadd.f32 %v1581_v30, %v4041_v47 }
 0x1b0   : > { %3197 = vst [vmem:[%s4717_s14 + $0x270] sm:$0xff] %v2941_v9  ;;  %3325 = vst [vmem:[%s4717_s14 + $0x670] sm:$0xff] %v3069_v10  ;;  %v2176_v54 = vmul.f32 %v1920_v2, %v3997_v14  ;;  %v2304_v57 = vmul.f32 %v2048_v28, %v3997_v14  ;;  %v1264_v42 = vadd.f32 %v1263_v46, %v4043_v48  ;;  %v6299_v9 = vld [vmem:[#allocation11_spill] sm:$0xff]  ;;  %v5500_v2 = vld [vmem:[%s4017_s22 + $0x178] sm:$0xff] }
 0x1b1   : > { %3198 = vst [vmem:[%s4717_s14 + $0x278] sm:$0xff] %v2942_v51  ;;  %3326 = vst [vmem:[%s4717_s14 + $0x678] sm:$0xff] %v3070_v24  ;;  %v1584_v60 = vadd.f32 %v1583_v33, %v4043_v48  ;;  %v2177_v58 = vmul.f32 %v1921_v63, %v3999_v15  ;;  %v2305_v52 = vmul.f32 %v2049_v53, %v3999_v15  ;;  %v5503_v28 = vld [vmem:[%s4017_s22 + $0x378] sm:$0xff] }
 0x1b2   : > { %v2687_v49 = vadd.f32 %v6295_v20, %v1262_v0  ;;  %v2815_v19 = vadd.f32 %v6296_v29, %v1582_v36  ;;  %v1266_v25 = vadd.f32 %v1265_v23, %v4041_v47  ;;  %v1586_v59 = vadd.f32 %v1585_v5, %v4041_v47  ;;  %v1271_v30 = vpop.f32.mrb[84].mxu0  ;;  %v1591_v63 = vpop.f32.mrb[84].mxu1 }
 0x1b3   : > { %v2688_v18 = vadd.f32 %v6297_v44, %v1264_v42  ;;  %v2816_v55 = vadd.f32 %v6298_v6, %v1584_v60  ;;  %v1268_v43 = vadd.f32 %v1267_v26, %v4043_v48  ;;  %v1588_v31 = vadd.f32 %v1587_v3, %v4043_v48  ;;  %v1273_v33 = vpop.f32.mrb[85].mxu0 }
 0x1b4   : > { %v2943_v32 = vmax.f32 %v2687_v49, 0.0  ;;  %v3071_v1 = vmax.f32 %v2815_v19, 0.0  ;;  %v2689_v17 = vadd.f32 %v5210_v16, %v1266_v25  ;;  %v2817_v61 = vadd.f32 %v5213_v37, %v1586_v59  ;;  %v1275_v5 = vpop.f32.mrb[86].mxu0  ;;  %v6300_v49 = vld [vmem:[#allocation12_spill] sm:$0xff]  ;;  %v6301_v19 = vld [vmem:[#allocation13_spill] sm:$0xff] }
 0x1b5   : > { %v2944_v11 = vmax.f32 %v2688_v18, 0.0  ;;  %v3072_v45 = vmax.f32 %v2816_v55, 0.0  ;;  %v2690_v13 = vadd.f32 %v5220_v35, %v1268_v43  ;;  %v2818_v10 = vadd.f32 %v6299_v9, %v1588_v31  ;;  %v1277_v3 = vpop.f32.mrb[87].mxu0  ;;  %v6302_v18 = vld [vmem:[#allocation14_spill] sm:$0xff]  ;;  %v6303_v55 = vld [vmem:[#allocation15_spill] sm:$0xff] }
 0x1b6   : > { %3199 = vst [vmem:[%s4717_s14 + $0x280] sm:$0xff] %v2943_v32  ;;  %3327 = vst [vmem:[%s4717_s14 + $0x680] sm:$0xff] %v3071_v1  ;;  %v2945_v51 = vmax.f32 %v2689_v17, 0.0  ;;  %v3073_v24 = vmax.f32 %v2817_v61, 0.0  ;;  %v5508_v16 = vadd.f32 %v4034_v41, %v2176_v54  ;;  %v5511_v37 = vadd.f32 %v4034_v41, %v2304_v57  ;;  %v1593_v54 = vpop.f32.mrb[85].mxu1 }
 0x1b7   : > { %3200 = vst [vmem:[%s4717_s14 + $0x288] sm:$0xff] %v2944_v11  ;;  %3328 = vst [vmem:[%s4717_s14 + $0x688] sm:$0xff] %v3072_v45  ;;  %v2946_v35 = vmax.f32 %v2690_v13, 0.0  ;;  %v3074_v62 = vmax.f32 %v2818_v10, 0.0  ;;  %v5516_v53 = vadd.f32 %v4046_v50, %v2177_v58  ;;  %v5519_v0 = vadd.f32 %v4046_v50, %v2305_v52  ;;  %v1595_v58 = vpop.f32.mrb[86].mxu1 }
 0x1b8   : > { %3201 = vst [vmem:[%s4717_s14 + $0x290] sm:$0xff] %v2945_v51  ;;  %3329 = vst [vmem:[%s4717_s14 + $0x690] sm:$0xff] %v3073_v24  ;;  %v1272_v36 = vadd.f32 %v1271_v30, %v4041_v47  ;;  %v1592_v46 = vadd.f32 %v1591_v63, %v4041_v47  ;;  %v1922_v57 = vunpack.c.l.bf16 %v5500_v2  ;;  %v2050_v42 = vunpack.c.l.bf16 %v5503_v28  ;;  %v1597_v44 = vpop.f32.mrb[87].mxu1 }
 0x1b9   : > { %3202 = vst [vmem:[%s4717_s14 + $0x298] sm:$0xff] %v2946_v35  ;;  %3330 = vst [vmem:[%s4717_s14 + $0x698] sm:$0xff] %v3074_v62  ;;  %v1274_v60 = vadd.f32 %v1273_v33, %v4043_v48  ;;  %v1594_v23 = vadd.f32 %v1593_v54, %v4043_v48  ;;  %v1923_v52 = vunpack.c.h.bf16 %v5500_v2  ;;  %v2051_v20 = vunpack.c.h.bf16 %v5503_v28 }
 0x1ba   : > { %v2691_v29 = vadd.f32 %v6300_v49, %v1272_v36  ;;  %v2819_v25 = vadd.f32 %v6301_v19, %v1592_v46  ;;  %v1276_v59 = vadd.f32 %v1275_v5, %v4041_v47  ;;  %v1596_v26 = vadd.f32 %v1595_v58, %v4041_v47  ;;  %v1281_v35 = vpop.f32.mrb[88].mxu0 }
 0x1bb   : > { %v2692_v6 = vadd.f32 %v6302_v18, %v1274_v60  ;;  %v2820_v43 = vadd.f32 %v6303_v55, %v1594_v23  ;;  %v1278_v31 = vadd.f32 %v1277_v3, %v4043_v48  ;;  %v1598_v32 = vadd.f32 %v1597_v44, %v4043_v48  ;;  %v1283_v36 = vpop.f32.mrb[89].mxu0  ;;  %v1748_v18 = vld [vmem:[%s4017_s22 + $0x180] sm:$0xff] }
 0x1bc   : > { %v2947_v1 = vmax.f32 %v2691_v29, 0.0  ;;  %v3075_v17 = vmax.f32 %v2819_v25, 0.0  ;;  %v2693_v61 = vadd.f32 %v5326_v4, %v1276_v59  ;;  %v2821_v11 = vadd.f32 %v5329_v8, %v1596_v26  ;;  %v1285_v60 = vpop.f32.mrb[90].mxu0 }
 0x1bd   : > { %v2948_v45 = vmax.f32 %v2692_v6, 0.0  ;;  %v3076_v13 = vmax.f32 %v2820_v43, 0.0  ;;  %v2694_v9 = vadd.f32 %v5336_v22, %v1278_v31  ;;  %v2822_v10 = vadd.f32 %v5339_v21, %v1598_v32  ;;  %v1601_v22 = vpop.f32.mrb[88].mxu1  ;;  %v1287_v19 = vpop.f32.mrb[91].mxu0 }
 0x1be   : > { %3203 = vst [vmem:[%s4717_s14 + $0x2a0] sm:$0xff] %v2947_v1  ;;  %3331 = vst [vmem:[%s4717_s14 + $0x6a0] sm:$0xff] %v3075_v17  ;;  %v2949_v2 = vmax.f32 %v2693_v61, 0.0  ;;  %v3077_v28 = vmax.f32 %v2821_v11, 0.0  ;;  %v2178_v51 = vmul.f32 %v1922_v57, %v3997_v14  ;;  %v2306_v24 = vmul.f32 %v2050_v42, %v3997_v14  ;;  %v1603_v46 = vpop.f32.mrb[89].mxu1 }
 0x1bf   : > { %3204 = vst [vmem:[%s4717_s14 + $0x2a8] sm:$0xff] %v2948_v45  ;;  %3332 = vst [vmem:[%s4717_s14 + $0x6a8] sm:$0xff] %v3076_v13  ;;  %v2950_v4 = vmax.f32 %v2694_v9, 0.0  ;;  %v3078_v8 = vmax.f32 %v2822_v10, 0.0  ;;  %v2179_v62 = vmul.f32 %v1923_v52, %v3999_v15  ;;  %v2307_v21 = vmul.f32 %v2051_v20, %v3999_v15  ;;  %v1605_v23 = vpop.f32.mrb[90].mxu1 }
 0x1c0   : > { %3205 = vst [vmem:[%s4717_s14 + $0x2b0] sm:$0xff] %v2949_v2  ;;  %3333 = vst [vmem:[%s4717_s14 + $0x6b0] sm:$0xff] %v3077_v28  ;;  %v1282_v30 = vadd.f32 %v1281_v35, %v4041_v47  ;;  %v1602_v63 = vadd.f32 %v1601_v22, %v4041_v47  ;;  %v5558_v33 = vadd.f32 %v4034_v41, %v2178_v51  ;;  %v1607_v25 = vpop.f32.mrb[91].mxu1  ;;  %v1924_v61 = vunpack.c.l.bf16 %v1748_v18 }
 0x1c1   : > { %v5561_v54 = vadd.f32 %v4034_v41, %v2306_v24  ;;  %3206 = vst [vmem:[%s4717_s14 + $0x2b8] sm:$0xff] %v2950_v4  ;;  %3334 = vst [vmem:[%s4717_s14 + $0x6b8] sm:$0xff] %v3078_v8  ;;  %v1284_v57 = vadd.f32 %v1283_v36, %v4043_v48  ;;  %v1604_v42 = vadd.f32 %v1603_v46, %v4043_v48  ;;  %v1925_v9 = vunpack.c.h.bf16 %v1748_v18 }
 0x1c2   : > { %v5568_v5 = vadd.f32 %v4046_v50, %v2179_v62  ;;  %v5571_v58 = vadd.f32 %v4046_v50, %v2307_v21  ;;  %v2695_v52 = vadd.f32 %v5392_v38, %v1282_v30  ;;  %v2823_v20 = vadd.f32 %v5395_v27, %v1602_v63  ;;  %v1812_v38 = vld [vmem:[%s4017_s22 + $0x380] sm:$0xff]  ;;  %v1291_v45 = vpop.f32.mrb[92].mxu0  ;;  %v1611_v13 = vpop.f32.mrb[92].mxu1 }
 0x1c3   : > { %v1286_v49 = vadd.f32 %v1285_v60, %v4041_v47  ;;  %v1606_v29 = vadd.f32 %v1605_v23, %v4041_v47  ;;  %v2696_v59 = vadd.f32 %v5400_v12, %v1284_v57  ;;  %v2824_v26 = vadd.f32 %v5403_v34, %v1604_v42  ;;  %v1293_v2 = vpop.f32.mrb[93].mxu0  ;;  %v1613_v28 = vpop.f32.mrb[93].mxu1 }
 0x1c4   : > { %v1288_v3 = vadd.f32 %v1287_v19, %v4043_v48  ;;  %v1608_v44 = vadd.f32 %v1607_v25, %v4043_v48  ;;  %v2951_v27 = vmax.f32 %v2695_v52, 0.0  ;;  %v3079_v6 = vmax.f32 %v2823_v20, 0.0  ;;  %v1295_v35 = vpop.f32.mrb[94].mxu0  ;;  %v1615_v22 = vpop.f32.mrb[94].mxu1 }
 0x1c5   : > { %v2697_v55 = vadd.f32 %v5442_v39, %v1286_v49  ;;  %v2825_v43 = vadd.f32 %v5445_v56, %v1606_v29  ;;  %v2952_v31 = vmax.f32 %v2696_v59, 0.0  ;;  %v3080_v32 = vmax.f32 %v2824_v26, 0.0  ;;  %v1297_v57 = vpop.f32.mrb[95].mxu0  ;;  %v1617_v42 = vpop.f32.mrb[95].mxu1  ;;  %v1749_v26 = vld [vmem:[%s4017_s22 + $0x188] sm:$0xff] }
 0x1c6   : > { %v2698_v12 = vadd.f32 %v5452_v7, %v1288_v3  ;;  %v2826_v34 = vadd.f32 %v5455_v40, %v1608_v44  ;;  %3207 = vst [vmem:[%s4717_s14 + $0x2c0] sm:$0xff] %v2951_v27  ;;  %3335 = vst [vmem:[%s4717_s14 + $0x6c0] sm:$0xff] %v3079_v6  ;;  %v2052_v11 = vunpack.c.l.bf16 %v1812_v38  ;;  %v2053_v7 = vunpack.c.h.bf16 %v1812_v38 }
 0x1c7   : > { %v2953_v1 = vmax.f32 %v2697_v55, 0.0  ;;  %v3081_v17 = vmax.f32 %v2825_v43, 0.0  ;;  %3208 = vst [vmem:[%s4717_s14 + $0x2c8] sm:$0xff] %v2952_v31  ;;  %3336 = vst [vmem:[%s4717_s14 + $0x6c8] sm:$0xff] %v3080_v32  ;;  %v1292_v40 = vadd.f32 %v1291_v45, %v4041_v47  ;;  %v1612_v10 = vadd.f32 %v1611_v13, %v4041_v47 }
 0x1c8   : > { %v2954_v39 = vmax.f32 %v2698_v12, 0.0  ;;  %v3082_v56 = vmax.f32 %v2826_v34, 0.0  ;;  %v2180_v51 = vmul.f32 %v1924_v61, %v3997_v14  ;;  %v2308_v24 = vmul.f32 %v2052_v11, %v3997_v14 }
 0x1c9   : > { %3209 = vst [vmem:[%s4717_s14 + $0x2d0] sm:$0xff] %v2953_v1  ;;  %3337 = vst [vmem:[%s4717_s14 + $0x6d0] sm:$0xff] %v3081_v17  ;;  %v1294_v4 = vadd.f32 %v1293_v2, %v4043_v48  ;;  %v1614_v8 = vadd.f32 %v1613_v28, %v4043_v48  ;;  %v2181_v62 = vmul.f32 %v1925_v9, %v3999_v15  ;;  %v1926_v12 = vunpack.c.l.bf16 %v1749_v26 }
 0x1ca   : > { %3210 = vst [vmem:[%s4717_s14 + $0x2d8] sm:$0xff] %v2954_v39  ;;  %3338 = vst [vmem:[%s4717_s14 + $0x6d8] sm:$0xff] %v3082_v56  ;;  %v2309_v21 = vmul.f32 %v2053_v7, %v3999_v15  ;;  %v2699_v30 = vadd.f32 %v5508_v16, %v1292_v40  ;;  %v2827_v63 = vadd.f32 %v5511_v37, %v1612_v10  ;;  %v1301_v38 = vpop.f32.mrb[96].mxu0  ;;  %v1927_v39 = vunpack.c.h.bf16 %v1749_v26 }
 0x1cb   : > { %v1296_v36 = vadd.f32 %v1295_v35, %v4041_v47  ;;  %v1616_v46 = vadd.f32 %v1615_v22, %v4041_v47  ;;  %v2700_v60 = vadd.f32 %v5516_v53, %v1294_v4  ;;  %v2828_v23 = vadd.f32 %v5519_v0, %v1614_v8  ;;  %v1813_v0 = vld [vmem:[%s4017_s22 + $0x388] sm:$0xff]  ;;  %v1303_v31 = vpop.f32.mrb[97].mxu0  ;;  %v1750_v4 = vld [vmem:[%s4017_s22 + $0x190] sm:$0xff] }
 0x1cc   : > { %v1298_v52 = vadd.f32 %v1297_v57, %v4043_v48  ;;  %v1618_v16 = vadd.f32 %v1617_v42, %v4043_v48  ;;  %v2955_v20 = vmax.f32 %v2699_v30, 0.0  ;;  %v3083_v37 = vmax.f32 %v2827_v63, 0.0  ;;  %v1305_v61 = vpop.f32.mrb[98].mxu0 }
 0x1cd   : > { %v2701_v49 = vadd.f32 %v5558_v33, %v1296_v36  ;;  %v2829_v29 = vadd.f32 %v5561_v54, %v1616_v46  ;;  %v2956_v19 = vmax.f32 %v2700_v60, 0.0  ;;  %v3084_v25 = vmax.f32 %v2828_v23, 0.0  ;;  %v1307_v40 = vpop.f32.mrb[99].mxu0 }
 0x1ce   : > { %v2702_v59 = vadd.f32 %v5568_v5, %v1298_v52  ;;  %v2830_v53 = vadd.f32 %v5571_v58, %v1618_v16  ;;  %3211 = vst [vmem:[%s4717_s14 + $0x2e0] sm:$0xff] %v2955_v20  ;;  %3339 = vst [vmem:[%s4717_s14 + $0x6e0] sm:$0xff] %v3083_v37  ;;  %v2447_v18 = vadd.f32 %v4034_v41, %v2180_v51  ;;  %v1621_v58 = vpop.f32.mrb[96].mxu1  ;;  %v2054_v34 = vunpack.c.l.bf16 %v1813_v0 }
 0x1cf   : > { %v2957_v3 = vmax.f32 %v2701_v49, 0.0  ;;  %v3085_v44 = vmax.f32 %v2829_v29, 0.0  ;;  %v2575_v33 = vadd.f32 %v4034_v41, %v2308_v24  ;;  %3212 = vst [vmem:[%s4717_s14 + $0x2e8] sm:$0xff] %v2956_v19  ;;  %3340 = vst [vmem:[%s4717_s14 + $0x6e8] sm:$0xff] %v3084_v25  ;;  %v2448_v27 = vadd.f32 %v4046_v50, %v2181_v62  ;;  %v1623_v32 = vpop.f32.mrb[97].mxu1 }
 0x1d0   : > { %v2958_v54 = vmax.f32 %v2702_v59, 0.0  ;;  %v3086_v5 = vmax.f32 %v2830_v53, 0.0  ;;  %v2576_v6 = vadd.f32 %v4046_v50, %v2309_v21  ;;  %v1302_v55 = vadd.f32 %v1301_v38, %v4041_v47  ;;  %v1625_v11 = vpop.f32.mrb[98].mxu1  ;;  %v1814_v21 = vld [vmem:[%s4017_s22 + $0x390] sm:$0xff] }
 0x1d1   : > { %3213 = vst [vmem:[%s4717_s14 + $0x2f0] sm:$0xff] %v2957_v3  ;;  %3341 = vst [vmem:[%s4717_s14 + $0x6f0] sm:$0xff] %v3085_v44  ;;  %v1622_v43 = vadd.f32 %v1621_v58, %v4041_v47  ;;  %v1304_v1 = vadd.f32 %v1303_v31, %v4043_v48  ;;  %v1624_v17 = vadd.f32 %v1623_v32, %v4043_v48  ;;  %v2055_v56 = vunpack.c.h.bf16 %v1813_v0  ;;  %v1627_v10 = vpop.f32.mrb[99].mxu1 }
 0x1d2   : > { %3214 = vst [vmem:[%s4717_s14 + $0x2f8] sm:$0xff] %v2958_v54  ;;  %3342 = vst [vmem:[%s4717_s14 + $0x6f8] sm:$0xff] %v3086_v5  ;;  %v2703_v45 = vadd.f32 %v2447_v18, %v1302_v55  ;;  %v1306_v9 = vadd.f32 %v1305_v61, %v4041_v47  ;;  %v2182_v7 = vmul.f32 %v1926_v12, %v3997_v14  ;;  %v1928_v23 = vunpack.c.l.bf16 %v1750_v4  ;;  %v1311_v20 = vpop.f32.mrb[100].mxu0  ;;  %v1631_v37 = vpop.f32.mrb[100].mxu1  ;;  %v1751_v55 = vld [vmem:[%s4017_s22 + $0x198] sm:$0xff] }
 0x1d3   : > { %v2831_v13 = vadd.f32 %v2575_v33, %v1622_v43  ;;  %v2704_v2 = vadd.f32 %v2448_v27, %v1304_v1  ;;  %v2832_v28 = vadd.f32 %v2576_v6, %v1624_v17  ;;  %v1626_v51 = vadd.f32 %v1625_v11, %v4041_v47  ;;  %v1313_v26 = vpop.f32.mrb[101].mxu0  ;;  %v1633_v0 = vpop.f32.mrb[101].mxu1  ;;  %v1815_v1 = vld [vmem:[%s4017_s22 + $0x398] sm:$0xff] }
 0x1d4   : > { %v2310_v24 = vmul.f32 %v2054_v34, %v3997_v14  ;;  %v2959_v8 = vmax.f32 %v2703_v45, 0.0  ;;  %v2449_v22 = vadd.f32 %v4034_v41, %v2182_v7  ;;  %v1308_v62 = vadd.f32 %v1307_v40, %v4043_v48  ;;  %v1315_v54 = vpop.f32.mrb[102].mxu0  ;;  %v1635_v5 = vpop.f32.mrb[102].mxu1 }
 0x1d5   : > { %v3087_v35 = vmax.f32 %v2831_v13, 0.0  ;;  %v2960_v30 = vmax.f32 %v2704_v2, 0.0  ;;  %v3088_v63 = vmax.f32 %v2832_v28, 0.0  ;;  %v2183_v46 = vmul.f32 %v1927_v39, %v3999_v15  ;;  %v1317_v43 = vpop.f32.mrb[103].mxu0  ;;  %v1637_v31 = vpop.f32.mrb[103].mxu1 }
 0x1d6   : > { %v2577_v36 = vadd.f32 %v4034_v41, %v2310_v24  ;;  %3215 = vst [vmem:[%s4717_s14 + $0x300] sm:$0xff] %v2959_v8  ;;  %v2705_v57 = vadd.f32 %v2449_v22, %v1306_v9  ;;  %v1628_v42 = vadd.f32 %v1627_v10, %v4043_v48  ;;  %v2311_v60 = vmul.f32 %v2055_v56, %v3999_v15 }
 0x1d7   : > { %3343 = vst [vmem:[%s4717_s14 + $0x700] sm:$0xff] %v3087_v35  ;;  %3216 = vst [vmem:[%s4717_s14 + $0x308] sm:$0xff] %v2960_v30  ;;  %v2450_v16 = vadd.f32 %v4046_v50, %v2183_v46  ;;  %v2056_v49 = vunpack.c.l.bf16 %v1814_v21  ;;  %v1929_v29 = vunpack.c.h.bf16 %v1750_v4  ;;  %v1312_v59 = vadd.f32 %v1311_v20, %v4041_v47  ;;  %v1752_v35 = vld [vmem:[%s4017_s22 + $0x1a0] sm:$0xff] }
 0x1d8   : > { %3344 = vst [vmem:[%s4717_s14 + $0x708] sm:$0xff] %v3088_v63  ;;  %v2833_v52 = vadd.f32 %v2577_v36, %v1626_v51  ;;  %v2961_v19 = vmax.f32 %v2705_v57, 0.0  ;;  %v2578_v25 = vadd.f32 %v4046_v50, %v2311_v60  ;;  %v2184_v53 = vmul.f32 %v1928_v23, %v3997_v14  ;;  %v1816_v36 = vld [vmem:[%s4017_s22 + $0x3a0] sm:$0xff] }
 0x1d9   : > { %v2706_v44 = vadd.f32 %v2450_v16, %v1308_v62  ;;  %v1632_v18 = vadd.f32 %v1631_v37, %v4041_v47  ;;  %v2312_v33 = vmul.f32 %v2056_v49, %v3997_v14  ;;  %v1314_v27 = vadd.f32 %v1313_v26, %v4043_v48 }
 0x1da   : > { %v3089_v3 = vmax.f32 %v2833_v52, 0.0  ;;  %3217 = vst [vmem:[%s4717_s14 + $0x310] sm:$0xff] %v2961_v19  ;;  %v2834_v38 = vadd.f32 %v2578_v25, %v1628_v42  ;;  %v2451_v58 = vadd.f32 %v4034_v41, %v2184_v53  ;;  %v2185_v6 = vmul.f32 %v1929_v29, %v3999_v15  ;;  %v1321_v8 = vpop.f32.mrb[104].mxu0  ;;  %v1641_v22 = vpop.f32.mrb[104].mxu1 }
 0x1db   : > { %v2962_v32 = vmax.f32 %v2706_v44, 0.0  ;;  %v2579_v12 = vadd.f32 %v4034_v41, %v2312_v33  ;;  %v2057_v34 = vunpack.c.h.bf16 %v1814_v21  ;;  %v1634_v39 = vadd.f32 %v1633_v0, %v4043_v48  ;;  %v1323_v46 = vpop.f32.mrb[105].mxu0  ;;  %v1643_v57 = vpop.f32.mrb[105].mxu1 }
 0x1dc   : > { %3345 = vst [vmem:[%s4717_s14 + $0x710] sm:$0xff] %v3089_v3  ;;  %v3090_v17 = vmax.f32 %v2834_v38, 0.0  ;;  %v2707_v61 = vadd.f32 %v2451_v58, %v1312_v59  ;;  %v2452_v11 = vadd.f32 %v4046_v50, %v2185_v6  ;;  %v1316_v13 = vadd.f32 %v1315_v54, %v4041_v47  ;;  %v1325_v16 = vpop.f32.mrb[106].mxu0  ;;  %v1645_v20 = vpop.f32.mrb[106].mxu1  ;;  %v1753_v6 = vld [vmem:[%s4017_s22 + $0x1a8] sm:$0xff] }
 0x1dd   : > { %3218 = vst [vmem:[%s4717_s14 + $0x318] sm:$0xff] %v2962_v32  ;;  %v2835_v56 = vadd.f32 %v2579_v12, %v1632_v18  ;;  %v2313_v45 = vmul.f32 %v2057_v34, %v3999_v15  ;;  %v1930_v9 = vunpack.c.l.bf16 %v1751_v55  ;;  %v1636_v10 = vadd.f32 %v1635_v5, %v4041_v47  ;;  %v1327_v25 = vpop.f32.mrb[107].mxu0  ;;  %v5685_v59 = vpop.f32.mrb[107].mxu1 }
 0x1de   : > { %3346 = vst [vmem:[%s4717_s14 + $0x718] sm:$0xff] %v3090_v17  ;;  %v2963_v7 = vmax.f32 %v2707_v61, 0.0  ;;  %v2708_v40 = vadd.f32 %v2452_v11, %v1314_v27  ;;  %v2058_v2 = vunpack.c.l.bf16 %v1815_v1  ;;  %v1931_v4 = vunpack.c.h.bf16 %v1751_v55  ;;  %v1817_v61 = vld [vmem:[%s4017_s22 + $0x3a8] sm:$0xff] }
 0x1df   : > { %v3091_v28 = vmax.f32 %v2835_v56, 0.0  ;;  %v2580_v51 = vadd.f32 %v4046_v50, %v2313_v45  ;;  %v2186_v24 = vmul.f32 %v1930_v9, %v3997_v14  ;;  %v1318_v30 = vadd.f32 %v1317_v43, %v4043_v48 }
 0x1e0   : > { %3219 = vst [vmem:[%s4717_s14 + $0x320] sm:$0xff] %v2963_v7  ;;  %v2964_v62 = vmax.f32 %v2708_v40, 0.0  ;;  %v2314_v21 = vmul.f32 %v2058_v2, %v3997_v14  ;;  %v2059_v63 = vunpack.c.h.bf16 %v1815_v1  ;;  %v2187_v23 = vmul.f32 %v1931_v4, %v3999_v15 }
 0x1e1   : > { %3347 = vst [vmem:[%s4717_s14 + $0x720] sm:$0xff] %v3091_v28  ;;  %v2836_v42 = vadd.f32 %v2580_v51, %v1634_v39  ;;  %v2453_v60 = vadd.f32 %v4034_v41, %v2186_v24  ;;  %v1638_v52 = vadd.f32 %v1637_v31, %v4043_v48  ;;  %v1322_v29 = vadd.f32 %v1321_v8, %v4041_v47 }
 0x1e2   : > { %3220 = vst [vmem:[%s4717_s14 + $0x328] sm:$0xff] %v2964_v62  ;;  %v2581_v37 = vadd.f32 %v4034_v41, %v2314_v21  ;;  %v2315_v49 = vmul.f32 %v2059_v63, %v3999_v15  ;;  %v1932_v19 = vunpack.c.l.bf16 %v1752_v35  ;;  %v2454_v0 = vadd.f32 %v4046_v50, %v2187_v23  ;;  %v1331_v11 = vpop.f32.mrb[108].mxu0  ;;  %v1651_v39 = vpop.f32.mrb[108].mxu1 }
 0x1e3   : > { %v3092_v53 = vmax.f32 %v2836_v42, 0.0  ;;  %v2709_v26 = vadd.f32 %v2453_v60, %v1316_v13  ;;  %v2060_v3 = vunpack.c.l.bf16 %v1816_v36  ;;  %v1642_v54 = vadd.f32 %v1641_v22, %v4041_v47  ;;  %v1333_v7 = vpop.f32.mrb[109].mxu0  ;;  %v5702_v40 = vpop.f32.mrb[109].mxu1  ;;  %v1754_v42 = vld [vmem:[%s4017_s22 + $0x1b0] sm:$0xff] }
 0x1e4   : > { %v2837_v44 = vadd.f32 %v2581_v37, %v1636_v10  ;;  %v2582_v18 = vadd.f32 %v4046_v50, %v2315_v49  ;;  %v2188_v33 = vmul.f32 %v1932_v19, %v3997_v14  ;;  %v2710_v38 = vadd.f32 %v2454_v0, %v1318_v30  ;;  %v5708_v24 = vpop.f32.mrb[110].mxu0  ;;  %v5710_v4 = vpop.f32.mrb[110].mxu1 }
 0x1e5   : > { %3348 = vst [vmem:[%s4717_s14 + $0x728] sm:$0xff] %v3092_v53  ;;  %v2965_v5 = vmax.f32 %v2709_v26, 0.0  ;;  %v2316_v58 = vmul.f32 %v2060_v3, %v3997_v14  ;;  %v1933_v27 = vunpack.c.h.bf16 %v1752_v35  ;;  %v1324_v32 = vadd.f32 %v1323_v46, %v4043_v48  ;;  %v5715_v21 = vpop.f32.mrb[111].mxu0  ;;  %v5717_v30 = vpop.f32.mrb[111].mxu1 }
 0x1e6   : > { %v3093_v55 = vmax.f32 %v2837_v44, 0.0  ;;  %v2838_v43 = vadd.f32 %v2582_v18, %v1638_v52  ;;  %v2455_v31 = vadd.f32 %v4034_v41, %v2188_v33  ;;  %v2966_v12 = vmax.f32 %v2710_v38, 0.0 }
 0x1e7   : > { %3221 = vst [vmem:[%s4717_s14 + $0x330] sm:$0xff] %v2965_v5  ;;  %v2583_v34 = vadd.f32 %v4034_v41, %v2316_v58  ;;  %v2189_v1 = vmul.f32 %v1933_v27, %v3999_v15  ;;  %v2061_v17 = vunpack.c.h.bf16 %v1816_v36  ;;  %v1644_v13 = vadd.f32 %v1643_v57, %v4043_v48 }
 0x1e8   : > { %3349 = vst [vmem:[%s4717_s14 + $0x730] sm:$0xff] %v3093_v55  ;;  %v3094_v56 = vmax.f32 %v2838_v43, 0.0  ;;  %v2711_v45 = vadd.f32 %v2455_v31, %v1322_v29  ;;  %v1934_v9 = vunpack.c.l.bf16 %v1753_v6  ;;  %3222 = vst [vmem:[%s4717_s14 + $0x338] sm:$0xff] %v2966_v12  ;;  %v1326_v51 = vadd.f32 %v1325_v16, %v4041_v47 }
 0x1e9   : > { %v2839_v10 = vadd.f32 %v2583_v34, %v1642_v54  ;;  %v2456_v2 = vadd.f32 %v4046_v50, %v2189_v1  ;;  %v2317_v28 = vmul.f32 %v2061_v17, %v3999_v15  ;;  %v1646_v22 = vadd.f32 %v1645_v20, %v4041_v47  ;;  %v1818_v20 = vld [vmem:[%s4017_s22 + $0x3b0] sm:$0xff]  ;;  %v1755_v34 = vld [vmem:[%s4017_s22 + $0x1b8] sm:$0xff] }
 0x1ea   : > { %3350 = vst [vmem:[%s4717_s14 + $0x738] sm:$0xff] %v3094_v56  ;;  %v2967_v8 = vmax.f32 %v2711_v45, 0.0  ;;  %v2190_v35 = vmul.f32 %v1934_v9, %v3997_v14  ;;  %v2062_v62 = vunpack.c.l.bf16 %v1817_v61  ;;  %v1935_v57 = vunpack.c.h.bf16 %v1753_v6  ;;  %v5735_v54 = vpop.f32.mrb[112].mxu0  ;;  %v5737_v5 = vpop.f32.mrb[112].mxu1 }
 0x1eb   : > { %v3095_v63 = vmax.f32 %v2839_v10, 0.0  ;;  %v2712_v36 = vadd.f32 %v2456_v2, %v1324_v32  ;;  %v2584_v46 = vadd.f32 %v4046_v50, %v2317_v28  ;;  %v1328_v52 = vadd.f32 %v1327_v25, %v4043_v48  ;;  %v5741_v6 = vpop.f32.mrb[113].mxu0  ;;  %v5743_v55 = vpop.f32.mrb[113].mxu1 }
 0x1ec   : > { %3223 = vst [vmem:[%s4717_s14 + $0x340] sm:$0xff] %v2967_v8  ;;  %v2457_v60 = vadd.f32 %v4034_v41, %v2190_v35  ;;  %v2318_v23 = vmul.f32 %v2062_v62, %v3997_v14  ;;  %v2063_v16 = vunpack.c.h.bf16 %v1817_v61  ;;  %v2191_v29 = vmul.f32 %v1935_v57, %v3999_v15  ;;  %v5749_v1 = vpop.f32.mrb[114].mxu0  ;;  %v5751_v17 = vpop.f32.mrb[114].mxu1 }
 0x1ed   : > { %3351 = vst [vmem:[%s4717_s14 + $0x740] sm:$0xff] %v3095_v63  ;;  %v2968_v37 = vmax.f32 %v2712_v36, 0.0  ;;  %v2840_v49 = vadd.f32 %v2584_v46, %v1644_v13  ;;  %v1648_v19 = vadd.f32 %v5685_v59, %v4043_v48  ;;  %v1936_v3 = vunpack.c.l.bf16 %v1754_v42  ;;  %v5756_v13 = vpop.f32.mrb[115].mxu0 }
 0x1ee   : > { %v2713_v53 = vadd.f32 %v2457_v60, %v1326_v51  ;;  %v2585_v26 = vadd.f32 %v4034_v41, %v2318_v23  ;;  %v2319_v0 = vmul.f32 %v2063_v16, %v3999_v15  ;;  %v2458_v25 = vadd.f32 %v4046_v50, %v2191_v29  ;;  %v1819_v51 = vld [vmem:[%s4017_s22 + $0x3b8] sm:$0xff] }
 0x1ef   : > { %3224 = vst [vmem:[%s4717_s14 + $0x348] sm:$0xff] %v2968_v37  ;;  %v3096_v44 = vmax.f32 %v2840_v49, 0.0  ;;  %v1332_v18 = vadd.f32 %v1331_v11, %v4041_v47  ;;  %v2064_v33 = vunpack.c.l.bf16 %v1818_v20  ;;  %v2192_v27 = vmul.f32 %v1936_v3, %v3997_v14  ;;  %v1756_v37 = vld [vmem:[%s4017_s22 + $0x1c0] sm:$0xff] }
 0x1f0   : > { %v2969_v59 = vmax.f32 %v2713_v53, 0.0  ;;  %v2841_v38 = vadd.f32 %v2585_v26, %v1646_v22  ;;  %v2586_v58 = vadd.f32 %v4046_v50, %v2319_v0  ;;  %v2714_v43 = vadd.f32 %v2458_v25, %v1328_v52  ;;  %v1820_v26 = vld [vmem:[%s4017_s22 + $0x3c0] sm:$0xff] }
 0x1f1   : > { %3352 = vst [vmem:[%s4717_s14 + $0x748] sm:$0xff] %v3096_v44  ;;  %v1652_v31 = vadd.f32 %v1651_v39, %v4041_v47  ;;  %v2320_v32 = vmul.f32 %v2064_v33, %v3997_v14  ;;  %v1937_v12 = vunpack.c.h.bf16 %v1754_v42  ;;  %v2459_v56 = vadd.f32 %v4034_v41, %v2192_v27  ;;  %v5758_v39 = vpop.f32.mrb[115].mxu1 }
 0x1f2   : > { %3225 = vst [vmem:[%s4717_s14 + $0x350] sm:$0xff] %v2969_v59  ;;  %v3097_v61 = vmax.f32 %v2841_v38, 0.0  ;;  %v2842_v11 = vadd.f32 %v2586_v58, %v1648_v19  ;;  %v1334_v45 = vadd.f32 %v1333_v7, %v4043_v48  ;;  %v2970_v9 = vmax.f32 %v2714_v43, 0.0  ;;  %v5777_v49 = vpop.f32.mrb[116].mxu0  ;;  %v5779_v29 = vpop.f32.mrb[116].mxu1 }
 0x1f3   : > { %v2587_v10 = vadd.f32 %v4034_v41, %v2320_v32  ;;  %v2193_v2 = vmul.f32 %v1937_v12, %v3999_v15  ;;  %v2065_v28 = vunpack.c.h.bf16 %v1818_v20  ;;  %v2715_v35 = vadd.f32 %v2459_v56, %v1332_v18  ;;  %v5787_v0 = vpop.f32.mrb[117].mxu0  ;;  %v5789_v3 = vpop.f32.mrb[117].mxu1 }
 0x1f4   : > { %3353 = vst [vmem:[%s4717_s14 + $0x750] sm:$0xff] %v3097_v61  ;;  %v3098_v8 = vmax.f32 %v2842_v11, 0.0  ;;  %v1654_v22 = vadd.f32 %v5702_v40, %v4043_v48  ;;  %v1938_v7 = vunpack.c.l.bf16 %v1755_v34  ;;  %3226 = vst [vmem:[%s4717_s14 + $0x358] sm:$0xff] %v2970_v9  ;;  %v1336_v46 = vadd.f32 %v5708_v24, %v4041_v47  ;;  %v5795_v59 = vpop.f32.mrb[118].mxu0  ;;  %v5797_v38 = vpop.f32.mrb[118].mxu1 }
 0x1f5   : > { %v2843_v62 = vadd.f32 %v2587_v10, %v1652_v31  ;;  %v2460_v63 = vadd.f32 %v4046_v50, %v2193_v2  ;;  %v2321_v36 = vmul.f32 %v2065_v28, %v3999_v15  ;;  %v2971_v57 = vmax.f32 %v2715_v35, 0.0  ;;  %v5801_v31 = vpop.f32.mrb[119].mxu0  ;;  %v5803_v32 = vpop.f32.mrb[119].mxu1 }
 0x1f6   : > { %3354 = vst [vmem:[%s4717_s14 + $0x758] sm:$0xff] %v3098_v8  ;;  %v2194_v42 = vmul.f32 %v1938_v7, %v3997_v14  ;;  %v1656_v40 = vadd.f32 %v5710_v4, %v4041_v47  ;;  %v2066_v60 = vunpack.c.l.bf16 %v1819_v51  ;;  %v1939_v20 = vunpack.c.h.bf16 %v1755_v34  ;;  %v1757_v8 = vld [vmem:[%s4017_s22 + $0x1c8] sm:$0xff] }
 0x1f7   : > { %v3099_v23 = vmax.f32 %v2843_v62, 0.0  ;;  %v2716_v52 = vadd.f32 %v2460_v63, %v1334_v45  ;;  %v2588_v16 = vadd.f32 %v4046_v50, %v2321_v36  ;;  %3227 = vst [vmem:[%s4717_s14 + $0x360] sm:$0xff] %v2971_v57  ;;  %v1338_v4 = vadd.f32 %v5715_v21, %v4043_v48 }
 0x1f8   : > { %v2461_v24 = vadd.f32 %v4034_v41, %v2194_v42  ;;  %v2322_v19 = vmul.f32 %v2066_v60, %v3997_v14  ;;  %v2067_v53 = vunpack.c.h.bf16 %v1819_v51  ;;  %v2195_v18 = vmul.f32 %v1939_v20, %v3999_v15 }
 0x1f9   : > { %3355 = vst [vmem:[%s4717_s14 + $0x760] sm:$0xff] %v3099_v23  ;;  %v2972_v44 = vmax.f32 %v2716_v52, 0.0  ;;  %v2844_v25 = vadd.f32 %v2588_v16, %v1654_v22  ;;  %v1658_v33 = vadd.f32 %v5717_v30, %v4043_v48  ;;  %v1940_v43 = vunpack.c.l.bf16 %v1756_v37 }
 0x1fa   : > { %v2717_v21 = vadd.f32 %v2461_v24, %v1336_v46  ;;  %v2589_v58 = vadd.f32 %v4034_v41, %v2322_v19  ;;  %v2323_v27 = vmul.f32 %v2067_v53, %v3999_v15  ;;  %v2462_v30 = vadd.f32 %v4046_v50, %v2195_v18  ;;  %v1821_v46 = vld [vmem:[%s4017_s22 + $0x3c8] sm:$0xff]  ;;  %v5823_v57 = vpop.f32.mrb[120].mxu0  ;;  %v5825_v42 = vpop.f32.mrb[120].mxu1 }
 0x1fb   : > { %3228 = vst [vmem:[%s4717_s14 + $0x368] sm:$0xff] %v2972_v44  ;;  %v3100_v12 = vmax.f32 %v2844_v25, 0.0  ;;  %v1342_v34 = vadd.f32 %v5735_v54, %v4041_v47  ;;  %v2068_v61 = vunpack.c.l.bf16 %v1820_v26  ;;  %v2196_v9 = vmul.f32 %v1940_v43, %v3997_v14  ;;  %v5832_v16 = vpop.f32.mrb[121].mxu1  ;;  %v1758_v43 = vld [vmem:[%s4017_s22 + $0x1d0] sm:$0xff] }
 0x1fc   : > { %v2973_v11 = vmax.f32 %v2717_v21, 0.0  ;;  %v2845_v56 = vadd.f32 %v2589_v58, %v1656_v40  ;;  %v2590_v45 = vadd.f32 %v4046_v50, %v2323_v27  ;;  %v2718_v10 = vadd.f32 %v2462_v30, %v1338_v4  ;;  %v5841_v53 = vpop.f32.mrb[122].mxu1 }
 0x1fd   : > { %3356 = vst [vmem:[%s4717_s14 + $0x768] sm:$0xff] %v3100_v12  ;;  %v1662_v2 = vadd.f32 %v5737_v5, %v4041_v47  ;;  %v2324_v28 = vmul.f32 %v2068_v61, %v3997_v14  ;;  %v1941_v51 = vunpack.c.h.bf16 %v1756_v37  ;;  %v2463_v22 = vadd.f32 %v4034_v41, %v2196_v9  ;;  %v1822_v61 = vld [vmem:[%s4017_s22 + $0x3d0] sm:$0xff] }
 0x1fe   : > { %3229 = vst [vmem:[%s4717_s14 + $0x370] sm:$0xff] %v2973_v11  ;;  %v3101_v54 = vmax.f32 %v2845_v56, 0.0  ;;  %v2846_v35 = vadd.f32 %v2590_v45, %v1658_v33  ;;  %v1344_v7 = vadd.f32 %v5741_v6, %v4043_v48  ;;  %v2974_v62 = vmax.f32 %v2718_v10, 0.0  ;;  %v5830_v6 = vpop.f32.mrb[121].mxu0  ;;  %v5849_v33 = vpop.f32.mrb[123].mxu1 }
 0x1ff   : > { %v2591_v63 = vadd.f32 %v4034_v41, %v2324_v28  ;;  %v2197_v36 = vmul.f32 %v1941_v51, %v3999_v15  ;;  %v2069_v5 = vunpack.c.h.bf16 %v1820_v26  ;;  %v2719_v60 = vadd.f32 %v2463_v22, %v1342_v34  ;;  %v5839_v4 = vpop.f32.mrb[122].mxu0 }
 0x200   : > { %3357 = vst [vmem:[%s4717_s14 + $0x770] sm:$0xff] %v3101_v54  ;;  %v3102_v40 = vmax.f32 %v2846_v35, 0.0  ;;  %v1664_v23 = vadd.f32 %v5743_v55, %v4043_v48  ;;  %v1942_v52 = vunpack.c.l.bf16 %v1757_v8  ;;  %3230 = vst [vmem:[%s4717_s14 + $0x378] sm:$0xff] %v2974_v62  ;;  %v1346_v19 = vadd.f32 %v5749_v1, %v4041_v47  ;;  %v5847_v18 = vpop.f32.mrb[123].mxu0 }
 0x201   : > { %v2847_v20 = vadd.f32 %v2591_v63, %v1662_v2  ;;  %v2464_v37 = vadd.f32 %v4046_v50, %v2197_v36  ;;  %v2325_v24 = vmul.f32 %v2069_v5, %v3999_v15  ;;  %v2975_v55 = vmax.f32 %v2719_v60, 0.0 }
 0x202   : > { %3358 = vst [vmem:[%s4717_s14 + $0x778] sm:$0xff] %v3102_v40  ;;  %v2198_v26 = vmul.f32 %v1942_v52, %v3997_v14  ;;  %v1666_v44 = vadd.f32 %v5751_v17, %v4041_v47  ;;  %v2070_v25 = vunpack.c.l.bf16 %v1821_v46  ;;  %v1943_v27 = vunpack.c.h.bf16 %v1757_v8  ;;  %v5869_v22 = vpop.f32.mrb[124].mxu0  ;;  %v1759_v52 = vld [vmem:[%s4017_s22 + $0x1d8] sm:$0xff] }
 0x203   : > { %v3103_v21 = vmax.f32 %v2847_v20, 0.0  ;;  %v2720_v1 = vadd.f32 %v2464_v37, %v1344_v7  ;;  %v2592_v58 = vadd.f32 %v4046_v50, %v2325_v24  ;;  %3231 = vst [vmem:[%s4717_s14 + $0x380] sm:$0xff] %v2975_v55  ;;  %v1348_v17 = vadd.f32 %v5756_v13, %v4043_v48  ;;  %v5875_v5 = vpop.f32.mrb[125].mxu0 }
 0x204   : > { %v2465_v12 = vadd.f32 %v4034_v41, %v2198_v26  ;;  %v2326_v30 = vmul.f32 %v2070_v25, %v3997_v14  ;;  %v2071_v34 = vunpack.c.h.bf16 %v1821_v46  ;;  %v2199_v45 = vmul.f32 %v1943_v27, %v3999_v15  ;;  %v5884_v20 = vpop.f32.mrb[126].mxu0  ;;  %v1823_v27 = vld [vmem:[%s4017_s22 + $0x3d8] sm:$0xff] }
 0x205   : > { %3359 = vst [vmem:[%s4717_s14 + $0x780] sm:$0xff] %v3103_v21  ;;  %v2976_v11 = vmax.f32 %v2720_v1, 0.0  ;;  %v2848_v56 = vadd.f32 %v2592_v58, %v1664_v23  ;;  %v1668_v9 = vadd.f32 %v5758_v39, %v4043_v48  ;;  %v1944_v51 = vunpack.c.l.bf16 %v1758_v43  ;;  %v5871_v39 = vpop.f32.mrb[124].mxu1 }
 0x206   : > { %v2721_v10 = vadd.f32 %v2465_v12, %v1346_v19  ;;  %v2593_v2 = vadd.f32 %v4034_v41, %v2326_v30  ;;  %v2327_v28 = vmul.f32 %v2071_v34, %v3999_v15  ;;  %v2466_v13 = vadd.f32 %v4046_v50, %v2199_v45  ;;  %v5877_v46 = vpop.f32.mrb[125].mxu1 }
 0x207   : > { %3232 = vst [vmem:[%s4717_s14 + $0x388] sm:$0xff] %v2976_v11  ;;  %v3104_v8 = vmax.f32 %v2848_v56, 0.0  ;;  %v1352_v54 = vadd.f32 %v5777_v49, %v4041_v47  ;;  %v2072_v35 = vunpack.c.l.bf16 %v1822_v61  ;;  %v2200_v36 = vmul.f32 %v1944_v51, %v3997_v14  ;;  %v5886_v37 = vpop.f32.mrb[126].mxu1 }
 0x208   : > { %v2977_v7 = vmax.f32 %v2721_v10, 0.0  ;;  %v2849_v62 = vadd.f32 %v2593_v2, %v1666_v44  ;;  %v2594_v63 = vadd.f32 %v4046_v50, %v2327_v28  ;;  %v2722_v40 = vadd.f32 %v2466_v13, %v1348_v17  ;;  %v5894_v44 = vpop.f32.mrb[127].mxu1 }
 0x209   : > { %3360 = vst [vmem:[%s4717_s14 + $0x788] sm:$0xff] %v3104_v8  ;;  %v1672_v49 = vadd.f32 %v5779_v29, %v4041_v47  ;;  %v2328_v60 = vmul.f32 %v2072_v35, %v3997_v14  ;;  %v1945_v23 = vunpack.c.h.bf16 %v1758_v43  ;;  %v2467_v55 = vadd.f32 %v4034_v41, %v2200_v36  ;;  %v5892_v29 = vpop.f32.mrb[127].mxu0  ;;  %v1760_v8 = vld [vmem:[%s4017_s22 + $0x1e0] sm:$0xff] }
 0x20a   : > { %3233 = vst [vmem:[%s4717_s14 + $0x390] sm:$0xff] %v2977_v7  ;;  %v3105_v24 = vmax.f32 %v2849_v62, 0.0  ;;  %v2850_v19 = vadd.f32 %v2594_v63, %v1668_v9  ;;  %v1354_v26 = vadd.f32 %v5787_v0, %v4043_v48  ;;  %v2978_v25 = vmax.f32 %v2722_v40, 0.0  ;;  %v1824_v7 = vld [vmem:[%s4017_s22 + $0x3e0] sm:$0xff] }
 0x20b   : > { %v2595_v21 = vadd.f32 %v4034_v41, %v2328_v60  ;;  %v2201_v1 = vmul.f32 %v1945_v23, %v3999_v15  ;;  %v2073_v58 = vunpack.c.h.bf16 %v1822_v61  ;;  %v2723_v12 = vadd.f32 %v2467_v55, %v1352_v54 }
 0x20c   : > { %3361 = vst [vmem:[%s4717_s14 + $0x790] sm:$0xff] %v3105_v24  ;;  %v3106_v43 = vmax.f32 %v2850_v19, 0.0  ;;  %v1674_v30 = vadd.f32 %v5789_v3, %v4043_v48  ;;  %v1946_v0 = vunpack.c.l.bf16 %v1759_v52  ;;  %3234 = vst [vmem:[%s4717_s14 + $0x398] sm:$0xff] %v2978_v25  ;;  %v1356_v56 = vadd.f32 %v5795_v59, %v4041_v47 }
 0x20d   : > { %v2851_v17 = vadd.f32 %v2595_v21, %v1672_v49  ;;  %v2468_v34 = vadd.f32 %v4046_v50, %v2201_v1  ;;  %v2329_v11 = vmul.f32 %v2073_v58, %v3999_v15  ;;  %v2979_v61 = vmax.f32 %v2723_v12, 0.0 }
 0x20e   : > { %3362 = vst [vmem:[%s4717_s14 + $0x798] sm:$0xff] %v3106_v43  ;;  %v2202_v45 = vmul.f32 %v1946_v0, %v3997_v14  ;;  %v1676_v3 = vadd.f32 %v5797_v38, %v4041_v47  ;;  %v2074_v9 = vunpack.c.l.bf16 %v1823_v27  ;;  %v1947_v51 = vunpack.c.h.bf16 %v1759_v52  ;;  %v1761_v43 = vld [vmem:[%s4017_s22 + $0x1e8] sm:$0xff] }
 0x20f   : > { %v3107_v10 = vmax.f32 %v2851_v17, 0.0  ;;  %v2724_v2 = vadd.f32 %v2468_v34, %v1354_v26  ;;  %v2596_v28 = vadd.f32 %v4046_v50, %v2329_v11  ;;  %3235 = vst [vmem:[%s4717_s14 + $0x3a0] sm:$0xff] %v2979_v61  ;;  %v1358_v54 = vadd.f32 %v5801_v31, %v4043_v48 }
 0x210   : > { %v2469_v59 = vadd.f32 %v4034_v41, %v2202_v45  ;;  %v2330_v13 = vmul.f32 %v2074_v9, %v3997_v14  ;;  %v2075_v35 = vunpack.c.h.bf16 %v1823_v27  ;;  %v2203_v63 = vmul.f32 %v1947_v51, %v3999_v15 }
 0x211   : > { %3363 = vst [vmem:[%s4717_s14 + $0x7a0] sm:$0xff] %v3107_v10  ;;  %v2980_v38 = vmax.f32 %v2724_v2, 0.0  ;;  %v2852_v62 = vadd.f32 %v2596_v28, %v1674_v30  ;;  %v1678_v36 = vadd.f32 %v5803_v32, %v4043_v48  ;;  %v1948_v23 = vunpack.c.l.bf16 %v1760_v8 }
 0x212   : > { %v2725_v40 = vadd.f32 %v2469_v59, %v1356_v56  ;;  %v2597_v49 = vadd.f32 %v4034_v41, %v2330_v13  ;;  %v2331_v60 = vmul.f32 %v2075_v35, %v3999_v15  ;;  %v2470_v52 = vadd.f32 %v4046_v50, %v2203_v63  ;;  %v1825_v56 = vld [vmem:[%s4017_s22 + $0x3e8] sm:$0xff] }
 0x213   : > { %3236 = vst [vmem:[%s4717_s14 + $0x3a8] sm:$0xff] %v2980_v38  ;;  %v3108_v31 = vmax.f32 %v2852_v62, 0.0  ;;  %v1362_v24 = vadd.f32 %v5823_v57, %v4041_v47  ;;  %v2076_v19 = vunpack.c.l.bf16 %v1824_v7  ;;  %v2204_v25 = vmul.f32 %v1948_v23, %v3997_v14  ;;  %v1762_v38 = vld [vmem:[%s4017_s22 + $0x1f0] sm:$0xff] }
 0x214   : > { %v2981_v55 = vmax.f32 %v2725_v40, 0.0  ;;  %v2853_v26 = vadd.f32 %v2597_v49, %v1676_v3  ;;  %v2598_v32 = vadd.f32 %v4046_v50, %v2331_v60  ;;  %v2726_v21 = vadd.f32 %v2470_v52, %v1358_v54  ;;  %v1826_v40 = vld [vmem:[%s4017_s22 + $0x3f0] sm:$0xff] }
 0x215   : > { %3364 = vst [vmem:[%s4717_s14 + $0x7a8] sm:$0xff] %v3108_v31  ;;  %v1682_v1 = vadd.f32 %v5825_v42, %v4041_v47  ;;  %v2332_v58 = vmul.f32 %v2076_v19, %v3997_v14  ;;  %v1949_v27 = vunpack.c.h.bf16 %v1760_v8  ;;  %v2471_v30 = vadd.f32 %v4034_v41, %v2204_v25 }
 0x216   : > { %3237 = vst [vmem:[%s4717_s14 + $0x3b0] sm:$0xff] %v2981_v55  ;;  %v3109_v57 = vmax.f32 %v2853_v26, 0.0  ;;  %v2854_v12 = vadd.f32 %v2598_v32, %v1678_v36  ;;  %v1364_v0 = vadd.f32 %v5830_v6, %v4043_v48  ;;  %v2982_v17 = vmax.f32 %v2726_v21, 0.0 }
 0x217   : > { %v2599_v34 = vadd.f32 %v4034_v41, %v2332_v58  ;;  %v2205_v11 = vmul.f32 %v1949_v27, %v3999_v15  ;;  %v2077_v42 = vunpack.c.h.bf16 %v1824_v7  ;;  %v2727_v45 = vadd.f32 %v2471_v30, %v1362_v24 }
 0x218   : > { %3365 = vst [vmem:[%s4717_s14 + $0x7b0] sm:$0xff] %v3109_v57  ;;  %v3110_v61 = vmax.f32 %v2854_v12, 0.0  ;;  %v1684_v3 = vadd.f32 %v5832_v16, %v4043_v48  ;;  %v1950_v9 = vunpack.c.l.bf16 %v1761_v43  ;;  %3238 = vst [vmem:[%s4717_s14 + $0x3b8] sm:$0xff] %v2982_v17  ;;  %v1366_v28 = vadd.f32 %v5839_v4, %v4041_v47  ;;  %v1763_v12 = vld [vmem:[%s4017_s22 + $0x1f8] sm:$0xff] }
 0x219   : > { %v2855_v10 = vadd.f32 %v2599_v34, %v1682_v1  ;;  %v2472_v6 = vadd.f32 %v4046_v50, %v2205_v11  ;;  %v2333_v2 = vmul.f32 %v2077_v42, %v3999_v15  ;;  %v2983_v51 = vmax.f32 %v2727_v45, 0.0 }
 0x21a   : > { %3366 = vst [vmem:[%s4717_s14 + $0x7b8] sm:$0xff] %v3110_v61  ;;  %v2206_v8 = vmul.f32 %v1950_v9, %v3997_v14  ;;  %v1686_v16 = vadd.f32 %v5841_v53, %v4041_v47  ;;  %v2078_v59 = vunpack.c.l.bf16 %v1825_v56  ;;  %v1951_v7 = vunpack.c.h.bf16 %v1761_v43 }
 0x21b   : > { %v3111_v13 = vmax.f32 %v2855_v10, 0.0  ;;  %v2728_v54 = vadd.f32 %v2472_v6, %v1364_v0  ;;  %v2600_v35 = vadd.f32 %v4046_v50, %v2333_v2  ;;  %3239 = vst [vmem:[%s4717_s14 + $0x3c0] sm:$0xff] %v2983_v51  ;;  %v1368_v63 = vadd.f32 %v5847_v18, %v4043_v48 }
 0x21c   : > { %v2473_v4 = vadd.f32 %v4034_v41, %v2206_v8  ;;  %v2334_v62 = vmul.f32 %v2078_v59, %v3997_v14  ;;  %v2079_v36 = vunpack.c.h.bf16 %v1825_v56  ;;  %v2207_v60 = vmul.f32 %v1951_v7, %v3999_v15  ;;  %v1827_v56 = vld [vmem:[%s4017_s22 + $0x3f8] sm:$0xff]  ;;  %s3782_s22 = smov [#allocation2]  }
 0x21d   : > { %3367 = vst [vmem:[%s4717_s14 + $0x7c0] sm:$0xff] %v3111_v13  ;;  %v2984_v53 = vmax.f32 %v2728_v54, 0.0  ;;  %v2856_v49 = vadd.f32 %v2600_v35, %v1684_v3  ;;  %v1688_v23 = vadd.f32 %v5849_v33, %v4043_v48  ;;  %v1952_v19 = vunpack.c.l.bf16 %v1762_v38  ;;  %s3720_s15 = sshll.u32 %s3782_s22, 4  ;;  %s3721_s15 = int_to_ptr.vmem [resolvable:$false] %s3720_s15 }
 0x21e   : > { %v2729_v31 = vadd.f32 %v2473_v4, %v1366_v28  ;;  %v2601_v52 = vadd.f32 %v4034_v41, %v2334_v62  ;;  %v2335_v24 = vmul.f32 %v2079_v36, %v3999_v15  ;;  %v2474_v55 = vadd.f32 %v4046_v50, %v2207_v60  ;;  %s3722_s23 = scalar_lea.vmem %s3721_s15, 65536  ;;  %p3723_p0 = scmp.lt.s32.totalorder %s6023_s16, %s3721_s15 }
 0x21f   : > { %3240 = vst [vmem:[%s4717_s14 + $0x3c8] sm:$0xff] %v2984_v53  ;;  %v3112_v18 = vmax.f32 %v2856_v49, 0.0  ;;  %v1372_v26 = vadd.f32 %v5869_v22, %v4041_v47  ;;  %v2080_v32 = vunpack.c.l.bf16 %v1826_v40  ;;  %v2208_v1 = vmul.f32 %v1952_v19, %v3997_v14  ;;  %p3724_p1 = scmp.lt.s32.totalorder %s3722_s23, %s3716_s21 }
 0x220   : > { %v2985_v25 = vmax.f32 %v2729_v31, 0.0  ;;  %v2857_v21 = vadd.f32 %v2601_v52, %v1686_v16  ;;  %v2602_v33 = vadd.f32 %v4046_v50, %v2335_v24  ;;  %v2730_v58 = vadd.f32 %v2474_v55, %v1368_v63 }
 0x221   : > { %3368 = vst [vmem:[%s4717_s14 + $0x7c8] sm:$0xff] %v3112_v18  ;;  %v1692_v27 = vadd.f32 %v5871_v39, %v4041_v47  ;;  %v2336_v43 = vmul.f32 %v2080_v32, %v3997_v14  ;;  %v1953_v57 = vunpack.c.h.bf16 %v1762_v38  ;;  %v2475_v0 = vadd.f32 %v4034_v41, %v2208_v1  ;;  %p3725_p2 = por %p3724_p1, %p3723_p0 }
 0x222   : > { %3241 = vst [vmem:[%s4717_s14 + $0x3d0] sm:$0xff] %v2985_v25  ;;  %v3113_v22 = vmax.f32 %v2857_v21, 0.0  ;;  %v2858_v30 = vadd.f32 %v2602_v33, %v1688_v23  ;;  %v1374_v17 = vadd.f32 %v5875_v5, %v4043_v48  ;;  %v2986_v34 = vmax.f32 %v2730_v58, 0.0 }
 0x223   : > { %v2603_v11 = vadd.f32 %v4034_v41, %v2336_v43  ;;  %v2209_v42 = vmul.f32 %v1953_v57, %v3999_v15  ;;  %v2081_v39 = vunpack.c.h.bf16 %v1826_v40  ;;  %v2731_v45 = vadd.f32 %v2475_v0, %v1372_v26  ;;  %p3726_p3 = pnand %p3725_p2, %p3719_p13 }
 0x224   : > { %3369 = vst [vmem:[%s4717_s14 + $0x7d0] sm:$0xff] %v3113_v22  ;;  %v3114_v61 = vmax.f32 %v2858_v30, 0.0  ;;  %v1954_v3 = vunpack.c.l.bf16 %v1763_v12  ;;  %3242 = vst [vmem:[%s4717_s14 + $0x3d8] sm:$0xff] %v2986_v34  ;;  %v1694_v6 = vadd.f32 %v5877_v46, %v4043_v48  ;;  %v1376_v28 = vadd.f32 %v5884_v20, %v4041_v47 }
 0x225   : > { %v2859_v9 = vadd.f32 %v2603_v11, %v1692_v27  ;;  %v2476_v10 = vadd.f32 %v4046_v50, %v2209_v42  ;;  %v2337_v5 = vmul.f32 %v2081_v39, %v3999_v15  ;;  %v2987_v2 = vmax.f32 %v2731_v45, 0.0 }
 0x226   : > { %3370 = vst [vmem:[%s4717_s14 + $0x7d8] sm:$0xff] %v3114_v61  ;;  %v2210_v51 = vmul.f32 %v1954_v3, %v3997_v14  ;;  %v2082_v8 = vunpack.c.l.bf16 %v1827_v56  ;;  %v1955_v54 = vunpack.c.h.bf16 %v1763_v12  ;;  %v1696_v35 = vadd.f32 %v5886_v37, %v4041_v47 }
 0x227   : > { %v3115_v16 = vmax.f32 %v2859_v9, 0.0  ;;  %v2732_v59 = vadd.f32 %v2476_v10, %v1374_v17  ;;  %v2604_v13 = vadd.f32 %v4046_v50, %v2337_v5  ;;  %3243 = vst [vmem:[%s4717_s14 + $0x3e0] sm:$0xff] %v2987_v2  ;;  %v2083_v38 = vunpack.c.h.bf16 %v1827_v56 }
 0x228   : > { %v2477_v46 = vadd.f32 %v4034_v41, %v2210_v51  ;;  %v2338_v7 = vmul.f32 %v2082_v8, %v3997_v14  ;;  %v1378_v62 = vadd.f32 %v5892_v29, %v4043_v48  ;;  %v2211_v63 = vmul.f32 %v1955_v54, %v3999_v15 }
 0x229   : > { %3371 = vst [vmem:[%s4717_s14 + $0x7e0] sm:$0xff] %v3115_v16  ;;  %v2988_v20 = vmax.f32 %v2732_v59, 0.0  ;;  %v2860_v4 = vadd.f32 %v2604_v13, %v1694_v6  ;;  %v1698_v47 = vadd.f32 %v5894_v44, %v4043_v48  ;;  %v2339_v14 = vmul.f32 %v2083_v38, %v3999_v15 }
 0x22a   : > { %v2733_v36 = vadd.f32 %v2477_v46, %v1376_v28  ;;  %v2605_v40 = vadd.f32 %v4034_v41, %v2338_v7  ;;  %v2478_v53 = vadd.f32 %v4046_v50, %v2211_v63 }
 0x22b   : > { %3244 = vst [vmem:[%s4717_s14 + $0x3e8] sm:$0xff] %v2988_v20  ;;  %v3116_v37 = vmax.f32 %v2860_v4, 0.0  ;;  %v2606_v60 = vadd.f32 %v4046_v50, %v2339_v14 }
 0x22c   : > { %v2989_v49 = vmax.f32 %v2733_v36, 0.0  ;;  %v2861_v29 = vadd.f32 %v2605_v40, %v1696_v35  ;;  %v2734_v41 = vadd.f32 %v2478_v53, %v1378_v62 }
 0x22d   : > { %3372 = vst [vmem:[%s4717_s14 + $0x7e8] sm:$0xff] %v3116_v37  ;;  %v2862_v15 = vadd.f32 %v2606_v60, %v1698_v47 }
 0x22e   : > { %3245 = vst [vmem:[%s4717_s14 + $0x3f0] sm:$0xff] %v2989_v49  ;;  %v3117_v48 = vmax.f32 %v2861_v29, 0.0  ;;  %v2990_v44 = vmax.f32 %v2734_v41, 0.0 }
 0x22f   : > { %v3118_v50 = vmax.f32 %v2862_v15, 0.0 }
 0x230   : > { %3373 = vst [vmem:[%s4717_s14 + $0x7f0] sm:$0xff] %v3117_v48  ;;  %3246 = vst [vmem:[%s4717_s14 + $0x3f8] sm:$0xff] %v2990_v44 }
 0x231   : > { %3374 = vst [vmem:[%s4717_s14 + $0x7f8] sm:$0xff] %v3118_v50 }
 0x232   : > { %3729 = shalt.err (!%p3726_p3)
}
 0x233   : > { %s3730_s8 = scalar_lea.hbm %s6021_s20, 32768  ;;  %s3734_s13 = scalar_lea.hbm %s6078_s7, 65536 }
 0x234   : > { %p3731_p4 = scmp.ne.s32.totalorder %s6021_s20, %s3730_s8  ;;  %p3735_p9 = scmp.lt.u32.totalorder %s6021_s20, %s6078_s7 }
 0x235   : > { %p3736_p10 = scmp.lt.u32.totalorder %s3734_s13, %s3730_s8  ;;  %p3738_p12 = scmp.lt.u32.totalorder %s3730_s8, %s6021_s20 }
 0x236   : > { %p3732_p7 = pnand %p3731_p4, %p3863_p5 }
 0x237   : > { %p3737_p11 = por %p3736_p10, %p3735_p9 }
 0x238   : > { %p3733_p8 = pneg %p3732_p7 }
 0x239   : > { %p3739_p13 = por %p3738_p12, %p3737_p11 }
 0x23b   : > { %p3740_p0 = pnand %p3739_p13, %p3733_p8 }
 0x23d   : > { %3743 = shalt.err (!%p3740_p0)
}
 0x23e   : > { %s3783_s17 = smov 256   ;;  %s3784_s19 = smov 16  }
 0x23f   : > { %3581 = dma.vmem_to_hbm [thread:$0]  (%p3863_p5), %s6023_s16, 32768, %s6021_s20, %s6030_s28, %s3783_s17, %s3783_s17, %s3784_s19  }
 0x240 PF: > { %p3587_p1 = scmp.ge.s32.totalorder %s3778_s27, 2  ;;  %s3405_s21 = sand.u32 1, %s3766_s24  }
 0x241   : > { %s3406_s22 = scalar_lea.sflag [#allocation3], %s3405_s21 }
 0x242   : > { %p3584_p2 = pnand %p3587_p1, %p3867_p6 }
 0x244   : > { %3761 = dma.done.wait (!%p3584_p2), %s3406_s22, 32768  }
 0x245   : > { %3763 = vsyncadd (!%p3584_p2), %s3406_s22, 4294934528  ;;  %p17_p3 = scmp.ge.s32.totalorder %s3850_s30, 4   ;;  %s6304_s24 = smov %s3770_s25 }
 0x246   : > { %s6305_s25 = smov %s3774_s26  ;;  %s6306_s26 = smov %s3861_s10 }
 0x247   : > { %s6307_s27 = smov %s3850_s30  ;;  %19 = sbr.rel (!%p17_p3) target bundleno = 3 (0x3), region = 86 }
 0x24e   :  { %3411 = vsyncpa [#allocation3], 1 }
 0x24f   :  { %3413 = vsyncpa [#allocation3 + $0x1], 1 }

</bundles_post_ra>
